<compile_context>
chip_gen: v7x
topology: tpu7x:2x2x1
jax: 0.10.0
libtpu: 0.0.40
codegen_flags: <defaults>
</compile_context>

<pallas_src>
import math
import functools

import jax
import jax.numpy as jnp
import numpy as np
from jax.experimental import pallas as pl
from jax.experimental.pallas import tpu as pltpu

_BN_EPS = 1e-5


# ---------------------------------------------------------------------------
# Host-side weight transforms (done ONCE at param-prep time, outside the jit).
# ---------------------------------------------------------------------------
def _expand_conv3x3(w, W):
    """(3, 3, Cin, Cout) conv weight -> (3*W*Cin, W*Cout) band matrix.

    With activations laid out lane-dense as rows of length W*Cin
    (lane index = w*Cin + ci), a pad=1 3x3 conv of one output row is
        out[h] = patch[h] @ band,   patch[h] = concat_dh x_hpad[h+dh]
    where x_hpad is zero-padded only along H; W-padding is encoded by the
    band structure (taps with |w_in - w_out| > 1 are zero).
    """
    Kh, Kw, Cin, Cout = w.shape
    w_in = jnp.arange(W)[None, :, None]
    w_out = jnp.arange(W)[None, None, :]
    dw = jnp.arange(Kw)[:, None, None]
    sel = (w_in == w_out + dw - (Kw // 2)).astype(w.dtype)     # (Kw, W, W)
    band = jnp.einsum('dkio,kwv->dwivo', w, sel)               # (Kh, W, Cin, W, Cout)
    return band.reshape(Kh * W * Cin, W * Cout)


def _expand_conv1x1(w, W):
    """(Cin, Cout) 1x1 conv weight -> (W*Cin, W*Cout) block-diagonal matrix."""
    Cin, Cout = w.shape
    eye = jnp.eye(W, dtype=w.dtype)
    return jnp.einsum('io,wv->wivo', w, eye).reshape(W * Cin, W * Cout)


def _lane_tile(v, W):
    """Per-channel (C,) vector -> lane-dense (W*C,) vector (lane = w*C + c)."""
    return jnp.tile(v, W).astype(jnp.float32)


# ---------------------------------------------------------------------------
# The fused whole-network kernel.  One grid step runs NB images through the
# ENTIRE MemNet forward; every intermediate stays on-chip.
# ---------------------------------------------------------------------------
def _memnet_kernel(NB, H, WC, R, M, seg_counts,
                   x_ref, conv_s_ref, conv_b_ref, conv_w_ref,
                   gate_s_ref, gate_b_ref, gate_w_ref,
                   o_ref, pad_ref, patch_ref):
    HP = H + 2

    # Zero only the per-image 1-row halos of the h-padded bf16 scratch; the
    # interior rows are fully overwritten before every conv reads them.  Not
    # guarded by program_id, so it stays correct under a "parallel" batch split.
    zero_row = jnp.zeros((1, WC), jnp.bfloat16)
    for n in range(NB):
        pad_ref[n * HP:n * HP + 1, :] = zero_row
        pad_ref[n * HP + H + 1:n * HP + H + 2, :] = zero_row

    def bn_relu_conv3x3(a_f32, ci):
        # Folded eval-mode BN + ReLU in f32, ONE cast to bf16 on the store.
        s = conv_s_ref[ci:ci + 1, :]
        b = conv_b_ref[ci:ci + 1, :]
        a = jnp.maximum(a_f32 * s + b, 0.0).astype(jnp.bfloat16)
        for n in range(NB):
            pad_ref[n * HP + 1:n * HP + 1 + H, :] = a[n * H:(n + 1) * H, :]
        # im2col patch: 3 lane-dense row-shifted copies -> one big-K MXU matmul.
        for n in range(NB):
            for dh in range(3):
                patch_ref[n * H:(n + 1) * H, dh * WC:(dh + 1) * WC] = \
                    pad_ref[n * HP + dh:n * HP + dh + H, :]
        return jnp.dot(patch_ref[...], conv_w_ref[ci],
                       preferred_element_type=jnp.float32)

    x_in = x_ref[...]                                  # (NB*H, WC) f32, residual

    ci = 0
    out = bn_relu_conv3x3(x_in, ci); ci += 1           # feature_extractor
    ys = [out]

    gseg = 0                                           # running gate-segment offset
    for m in range(M):
        S = seg_counts[m]
        h = out
        xs = []
        for _ in range(R):                             # recursive unit (resblocks)
            t = bn_relu_conv3x3(h, ci); ci += 1
            h = bn_relu_conv3x3(t, ci) + h; ci += 1    # residual skip (f32)
            xs.append(h)
        # gate unit: per-segment BN+ReLU -> lane concat -> ONE big-K 1x1 matmul.
        segs = xs + ys                                 # order matches torch.cat(xs + ys)
        acts = []
        for s in range(S):
            gs = gate_s_ref[gseg + s:gseg + s + 1, :]
            gb = gate_b_ref[gseg + s:gseg + s + 1, :]
            acts.append(jnp.maximum(segs[s] * gs + gb, 0.0).astype(jnp.bfloat16))
        gate_in = jnp.concatenate(acts, axis=-1)                     # (NB*H, S*WC)
        gw = gate_w_ref[gseg * WC:(gseg + S) * WC, :]                # (S*WC, WC)
        out = jnp.dot(gate_in, gw, preferred_element_type=jnp.float32)
        ys.append(out)
        gseg += S

    rec = bn_relu_conv3x3(out, ci); ci += 1            # reconstructor
    o_ref[...] = (rec + x_in).astype(o_ref.dtype)      # global residual add


def _images_per_grid_step(N):
    """v7x has 2 TensorCores/chip: keep batch as a 'parallel' grid axis so both
    cores get work.  Single-TC chips (v5e/v6e): fold the whole batch into the
    matmul M dimension and collapse the grid to a single step."""
    try:
        kind = jax.devices()[0].device_kind.lower()
    except Exception:
        return N
    return 1 if "7" in kind else N


def memnet_forward(cfg, kp, x_nchw, nb=None):
    """cfg: static python ints; kp: prepared weight arrays; x_nchw: (N,Cin,H,W) f32."""
    C = cfg["channels"]
    Cin = cfg["in_channels"]
    R = cfg["num_resblock"]
    M = cfg["num_memblock"]
    N, cin_x, H, W = x_nchw.shape
    assert cin_x == Cin
    WC = W * C
    seg_counts = tuple(R + m + 1 for m in range(M))

    if nb is None:
        nb = _images_per_grid_step(N)
    G = N // nb
    assert nb * G == N

    # NCHW -> NHWC, zero-pad channels Cin -> C (lane-dense 128-wide everywhere),
    # flatten to (N*H, W*C).  Kept f32 so the global residual add is exact.
    x_nhwc = jnp.transpose(x_nchw, (0, 2, 3, 1))
    x_nhwc = jnp.pad(x_nhwc, ((0, 0), (0, 0), (0, 0), (0, C - Cin)))
    x_ld = x_nhwc.reshape(N * H, WC).astype(jnp.float32)

    n_convs = kp["conv_w"].shape[0]
    sum_s = kp["gate_s"].shape[0]
    assert n_convs == 2 + 2 * R * M and sum_s == sum(seg_counts)

    kernel = functools.partial(_memnet_kernel, nb, H, WC, R, M, seg_counts)

    out_ld = pl.pallas_call(
        kernel,
        out_shape=jax.ShapeDtypeStruct((N * H, WC), jnp.float32),
        grid=(G,),
        in_specs=[
            pl.BlockSpec((nb * H, WC), lambda g: (g, 0)),            # x (lane-dense)
            pl.BlockSpec((n_convs, WC), lambda g: (0, 0)),           # conv scales
            pl.BlockSpec((n_convs, WC), lambda g: (0, 0)),           # conv biases
            pl.BlockSpec((n_convs, 3 * WC, WC), lambda g: (0, 0, 0)),  # conv band mats
            pl.BlockSpec((sum_s, WC), lambda g: (0, 0)),             # gate scales
            pl.BlockSpec((sum_s, WC), lambda g: (0, 0)),             # gate biases
            pl.BlockSpec((sum_s * WC, WC), lambda g: (0, 0)),        # gate big-K mats
        ],
        out_specs=pl.BlockSpec((nb * H, WC), lambda g: (g, 0)),
        scratch_shapes=[
            pltpu.VMEM((nb * (H + 2), WC), jnp.bfloat16),            # h-padded act
            pltpu.VMEM((nb * H, 3 * WC), jnp.bfloat16),              # im2col patch
        ],
        compiler_params=pltpu.CompilerParams(
            dimension_semantics=("parallel",),
            vmem_limit_bytes=32 * 1024 * 1024),
    )(x_ld, kp["conv_s"], kp["conv_b"], kp["conv_w"],
      kp["gate_s"], kp["gate_b"], kp["gate_w"])

    out = out_ld.reshape(N, H, W, C)[..., :Cin]          # drop padded channels
    return jnp.transpose(out, (0, 3, 1, 2))              # back to NCHW


# ---------------------------------------------------------------------------
# Deterministic synthetic parameters (mirror the module's shapes) + prep.
# ---------------------------------------------------------------------------
def init_bnreluconv(key, cin, cout, k):
    kg, kb, km, kv, kw = jax.random.split(key, 5)
    gamma = jax.random.uniform(kg, (cin,), jnp.float32, 0.5, 1.5)
    beta = 0.1 * jax.random.normal(kb, (cin,), jnp.float32)
    running_mean = 0.1 * jax.random.normal(km, (cin,), jnp.float32)
    running_var = jax.random.uniform(kv, (cin,), jnp.float32, 0.5, 1.5)
    fan_in = k * k * cin
    if k == 1:
        w = jax.random.normal(kw, (cin, cout), jnp.float32) / math.sqrt(fan_in)
    else:
        w = jax.random.normal(kw, (k, k, cin, cout), jnp.float32) / math.sqrt(fan_in)
    # Fold eval-mode BatchNorm into per-channel scale/bias.
    scale = gamma / jnp.sqrt(running_var + _BN_EPS)
    bias = beta - running_mean * scale
    return {"scale": scale, "bias": bias, "w": w}


def init_memnet_params(key, in_channels, channels, num_memblock=6, num_resblock=6):
    n_keys = 2 + num_memblock * (2 * num_resblock + 1)
    keys = iter(jax.random.split(key, n_keys))
    params = {
        "feature_extractor": init_bnreluconv(next(keys), in_channels, channels, 3),
        "reconstructor": init_bnreluconv(next(keys), channels, in_channels, 3),
        "memory_blocks": [],
    }
    for i in range(num_memblock):
        resblocks = []
        for _ in range(num_resblock):
            resblocks.append({
                "relu_conv1": init_bnreluconv(next(keys), channels, channels, 3),
                "relu_conv2": init_bnreluconv(next(keys), channels, channels, 3),
            })
        gate_cin = (num_resblock + i + 1) * channels   # xs (num_resblock) + ys (i+1)
        gate = init_bnreluconv(next(keys), gate_cin, channels, 1)
        params["memory_blocks"].append({"recursive_unit": resblocks,
                                        "gate_unit": gate})
    return params


def prepare_memnet_params(params, W, channels, in_channels):
    """Fold BN, pad channels to lane density, expand convs to band/block-diag
    form, and consolidate everything into a handful of stacked arrays."""
    C = channels
    M = len(params["memory_blocks"])
    R = len(params["memory_blocks"][0]["recursive_unit"])

    fe = params["feature_extractor"]
    fe_s = jnp.pad(fe["scale"], (0, C - in_channels))
    fe_b = jnp.pad(fe["bias"], (0, C - in_channels))
    fe_w = jnp.pad(fe["w"], ((0, 0), (0, 0), (0, C - in_channels), (0, 0)))

    rc = params["reconstructor"]
    rc_w = jnp.pad(rc["w"], ((0, 0), (0, 0), (0, 0), (0, C - in_channels)))

    conv_s = [_lane_tile(fe_s, W)]
    conv_b = [_lane_tile(fe_b, W)]
    conv_w = [_expand_conv3x3(fe_w, W)]
    for mb in params["memory_blocks"]:
        for rb in mb["recursive_unit"]:
            for name in ("relu_conv1", "relu_conv2"):
                p = rb[name]
                conv_s.append(_lane_tile(p["scale"], W))
                conv_b.append(_lane_tile(p["bias"], W))
                conv_w.append(_expand_conv3x3(p["w"], W))
    conv_s.append(_lane_tile(rc["scale"], W))
    conv_b.append(_lane_tile(rc["bias"], W))
    conv_w.append(_expand_conv3x3(rc_w, W))

    gate_s, gate_b, gate_w = [], [], []
    for mb in params["memory_blocks"]:
        g = mb["gate_unit"]
        S = g["scale"].shape[0] // C
        gate_s.append(jnp.tile(g["scale"].reshape(S, C), (1, W)).astype(jnp.float32))
        gate_b.append(jnp.tile(g["bias"].reshape(S, C), (1, W)).astype(jnp.float32))
        gate_w.append(jnp.concatenate(
            [_expand_conv1x1(g["w"][s * C:(s + 1) * C, :], W) for s in range(S)],
            axis=0))

    cfg = {"channels": C, "in_channels": in_channels,
           "num_resblock": R, "num_memblock": M}
    arrays = {
        "conv_s": jnp.stack(conv_s).astype(jnp.float32),
        "conv_b": jnp.stack(conv_b).astype(jnp.float32),
        "conv_w": jnp.stack(conv_w).astype(jnp.bfloat16),
        "gate_s": jnp.concatenate(gate_s, axis=0),
        "gate_b": jnp.concatenate(gate_b, axis=0),
        "gate_w": jnp.concatenate(gate_w, axis=0).astype(jnp.bfloat16),
    }
    return cfg, arrays


# ---------------------------------------------------------------------------
# Pure-JAX reference (float32) for end-to-end validation.
# ---------------------------------------------------------------------------
def _ref_bnreluconv(x, p, k):
    a = jnp.maximum(x * p["scale"][None, :, None, None]
                    + p["bias"][None, :, None, None], 0.0)
    if k == 1:
        return jnp.einsum('nchw,cd->ndhw', a, p["w"])
    return jax.lax.conv_general_dilated(
        a, p["w"], window_strides=(1, 1), padding=((1, 1), (1, 1)),
        dimension_numbers=('NCHW', 'HWIO', 'NCHW'))


def memnet_reference(params, x):
    out = _ref_bnreluconv(x, params["feature_extractor"], 3)
    ys = [out]
    for mb in params["memory_blocks"]:
        h = out
        xs = []
        for rb in mb["recursive_unit"]:
            t = _ref_bnreluconv(h, rb["relu_conv1"], 3)
            h = _ref_bnreluconv(t, rb["relu_conv2"], 3) + h
            xs.append(h)
        out = _ref_bnreluconv(jnp.concatenate(xs + ys, axis=1), mb["gate_unit"], 1)
        ys.append(out)
    out = _ref_bnreluconv(out, params["reconstructor"], 3)
    return out + x


if __name__ == "__main__":
    key = jax.random.PRNGKey(0)
    kx, kprm = jax.random.split(key)

    # args.n_colors = 3, args.n_feats = 8; small MemNet: 3 memory blocks x 3
    # resblocks.  W * n_feats = 16 * 8 = 128 -> lane-dense activations.
    N, Cin, H, W = 2, 3, 16, 16
    n_feats = 8
    x = jax.random.normal(kx, (N, Cin, H, W), jnp.float32)

    raw_params = init_memnet_params(kprm, in_channels=Cin, channels=n_feats,
                                    num_memblock=3, num_resblock=3)
    cfg, arrays = prepare_memnet_params(raw_params, W=W, channels=n_feats,
                                        in_channels=Cin)

    fwd = jax.jit(functools.partial(memnet_forward, cfg))
    out = jax.block_until_ready(fwd(arrays, x))
    assert out.shape == (N, Cin, H, W) and out.dtype == jnp.float32

    ref = jax.block_until_ready(jax.jit(memnet_reference)(raw_params, x))
    np.testing.assert_allclose(np.asarray(out), np.asarray(ref),
                               rtol=0.1, atol=0.1)
    print("KERNEL_OK")
</pallas_src>

<mosaic_0001>
module attributes {stable_mosaic.version = 11 : i64} {
  func.func @_memnet_kernel(%arg0: i32, %arg1: memref<32x128xf32, #tpu.memory_space<vmem>>, %arg2: memref<20x128xf32, #tpu.memory_space<vmem>>, %arg3: memref<20x128xf32, #tpu.memory_space<vmem>>, %arg4: memref<20x384x128xbf16, #tpu.memory_space<vmem>>, %arg5: memref<15x128xf32, #tpu.memory_space<vmem>>, %arg6: memref<15x128xf32, #tpu.memory_space<vmem>>, %arg7: memref<1920x128xbf16, #tpu.memory_space<vmem>>, %arg8: memref<32x128xf32, #tpu.memory_space<vmem>>, %arg9: memref<36x128xbf16, #tpu.memory_space<vmem>>, %arg10: memref<32x384xbf16, #tpu.memory_space<vmem>>) attributes {dimension_semantics = [#tpu.dimension_semantics<parallel>], iteration_bounds = array<i64: 1>, scalar_prefetch = 0 : i64, scratch_operands = 2 : i64, tpu.core_type = #tpu.core_type<tc>, window_params = [{transform_indices = @transform_0, window_bounds = array<i64: 32, 128>}, {pipeline_mode = #tpu.pipeline_mode<synchronous>, transform_indices = @transform_1, window_bounds = array<i64: 20, 128>}, {pipeline_mode = #tpu.pipeline_mode<synchronous>, transform_indices = @transform_2, window_bounds = array<i64: 20, 128>}, {pipeline_mode = #tpu.pipeline_mode<synchronous>, transform_indices = @transform_3, window_bounds = array<i64: 20, 384, 128>}, {pipeline_mode = #tpu.pipeline_mode<synchronous>, transform_indices = @transform_4, window_bounds = array<i64: 15, 128>}, {pipeline_mode = #tpu.pipeline_mode<synchronous>, transform_indices = @transform_5, window_bounds = array<i64: 15, 128>}, {pipeline_mode = #tpu.pipeline_mode<synchronous>, transform_indices = @transform_6, window_bounds = array<i64: 1920, 128>}, {transform_indices = @transform_7, window_bounds = array<i64: 32, 128>}]} {
    %cst = arith.constant 0.000000e+00 : bf16
    %0 = vector.broadcast %cst : bf16 to vector<1x128xbf16>
    %c0 = arith.constant 0 : index
    %c0_0 = arith.constant 0 : index
    %1 = vector.load %arg9[%c0, %c0_0] : memref<36x128xbf16, #tpu.memory_space<vmem>>, vector<1x128xbf16>
    tpu.vector_store %arg9[%c0, %c0_0], %0 {strides = array<i32>} : memref<36x128xbf16, #tpu.memory_space<vmem>>, vector<1x128xbf16>,
    %c17 = arith.constant 17 : index
    %c0_1 = arith.constant 0 : index
    %2 = vector.load %arg9[%c17, %c0_1] : memref<36x128xbf16, #tpu.memory_space<vmem>>, vector<1x128xbf16>
    tpu.vector_store %arg9[%c17, %c0_1], %0 {strides = array<i32>} : memref<36x128xbf16, #tpu.memory_space<vmem>>, vector<1x128xbf16>,
    %c18 = arith.constant 18 : index
    %c0_2 = arith.constant 0 : index
    %3 = vector.load %arg9[%c18, %c0_2] : memref<36x128xbf16, #tpu.memory_space<vmem>>, vector<1x128xbf16>
    tpu.vector_store %arg9[%c18, %c0_2], %0 {strides = array<i32>} : memref<36x128xbf16, #tpu.memory_space<vmem>>, vector<1x128xbf16>,
    %c35 = arith.constant 35 : index
    %c0_3 = arith.constant 0 : index
    %4 = vector.load %arg9[%c35, %c0_3] : memref<36x128xbf16, #tpu.memory_space<vmem>>, vector<1x128xbf16>
    tpu.vector_store %arg9[%c35, %c0_3], %0 {strides = array<i32>} : memref<36x128xbf16, #tpu.memory_space<vmem>>, vector<1x128xbf16>,
    %c0_4 = arith.constant 0 : index
    %c0_5 = arith.constant 0 : index
    %5 = vector.load %arg1[%c0_4, %c0_5] : memref<32x128xf32, #tpu.memory_space<vmem>>, vector<32x128xf32>
    %c0_6 = arith.constant 0 : index
    %c0_7 = arith.constant 0 : index
    %6 = vector.load %arg2[%c0_6, %c0_7] : memref<20x128xf32, #tpu.memory_space<vmem>>, vector<1x128xf32>
    %c0_8 = arith.constant 0 : index
    %c0_9 = arith.constant 0 : index
    %7 = vector.load %arg3[%c0_8, %c0_9] : memref<20x128xf32, #tpu.memory_space<vmem>>, vector<1x128xf32>
    %8 = vector.broadcast %6 : vector<1x128xf32> to vector<32x128xf32>
    %9 = arith.mulf %5, %8 : vector<32x128xf32>
    %10 = vector.broadcast %7 : vector<1x128xf32> to vector<32x128xf32>
    %11 = arith.addf %9, %10 : vector<32x128xf32>
    %cst_10 = arith.constant 0.000000e+00 : f32
    %12 = vector.broadcast %cst_10 : f32 to vector<32x128xf32>
    %13 = arith.maximumf %11, %12 : vector<32x128xf32>
    %14 = arith.truncf %13 : vector<32x128xf32> to vector<32x128xbf16>
    %15 = vector.extract_strided_slice %14 {offsets = [0, 0], sizes = [16, 128], strides = [1, 1]} : vector<32x128xbf16> to vector<16x128xbf16>
    %c1 = arith.constant 1 : index
    %c0_11 = arith.constant 0 : index
    %16 = vector.load %arg9[%c1, %c0_11] : memref<36x128xbf16, #tpu.memory_space<vmem>>, vector<16x128xbf16>
    tpu.vector_store %arg9[%c1, %c0_11], %15 {strides = array<i32>} : memref<36x128xbf16, #tpu.memory_space<vmem>>, vector<16x128xbf16>,
    %17 = vector.extract_strided_slice %14 {offsets = [16, 0], sizes = [16, 128], strides = [1, 1]} : vector<32x128xbf16> to vector<16x128xbf16>
    %c19 = arith.constant 19 : index
    %c0_12 = arith.constant 0 : index
    %18 = vector.load %arg9[%c19, %c0_12] : memref<36x128xbf16, #tpu.memory_space<vmem>>, vector<16x128xbf16>
    tpu.vector_store %arg9[%c19, %c0_12], %17 {strides = array<i32>} : memref<36x128xbf16, #tpu.memory_space<vmem>>, vector<16x128xbf16>,
    %c0_13 = arith.constant 0 : index
    %c0_14 = arith.constant 0 : index
    %19 = vector.load %arg9[%c0_13, %c0_14] : memref<36x128xbf16, #tpu.memory_space<vmem>>, vector<16x128xbf16>
    %c0_15 = arith.constant 0 : index
    %c0_16 = arith.constant 0 : index
    %20 = vector.load %arg10[%c0_15, %c0_16] : memref<32x384xbf16, #tpu.memory_space<vmem>>, vector<16x128xbf16>
    tpu.vector_store %arg10[%c0_15, %c0_16], %19 {strides = array<i32>} : memref<32x384xbf16, #tpu.memory_space<vmem>>, vector<16x128xbf16>,
    %c1_17 = arith.constant 1 : index
    %c0_18 = arith.constant 0 : index
    %21 = vector.load %arg9[%c1_17, %c0_18] : memref<36x128xbf16, #tpu.memory_space<vmem>>, vector<16x128xbf16>
    %c0_19 = arith.constant 0 : index
    %c128 = arith.constant 128 : index
    %22 = vector.load %arg10[%c0_19, %c128] : memref<32x384xbf16, #tpu.memory_space<vmem>>, vector<16x128xbf16>
    tpu.vector_store %arg10[%c0_19, %c128], %21 {strides = array<i32>} : memref<32x384xbf16, #tpu.memory_space<vmem>>, vector<16x128xbf16>,
    %c2 = arith.constant 2 : index
    %c0_20 = arith.constant 0 : index
    %23 = vector.load %arg9[%c2, %c0_20] : memref<36x128xbf16, #tpu.memory_space<vmem>>, vector<16x128xbf16>
    %c0_21 = arith.constant 0 : index
    %c256 = arith.constant 256 : index
    %24 = vector.load %arg10[%c0_21, %c256] : memref<32x384xbf16, #tpu.memory_space<vmem>>, vector<16x128xbf16>
    tpu.vector_store %arg10[%c0_21, %c256], %23 {strides = array<i32>} : memref<32x384xbf16, #tpu.memory_space<vmem>>, vector<16x128xbf16>,
    %c18_22 = arith.constant 18 : index
    %c0_23 = arith.constant 0 : index
    %25 = vector.load %arg9[%c18_22, %c0_23] : memref<36x128xbf16, #tpu.memory_space<vmem>>, vector<16x128xbf16>
    %c16 = arith.constant 16 : index
    %c0_24 = arith.constant 0 : index
    %26 = vector.load %arg10[%c16, %c0_24] : memref<32x384xbf16, #tpu.memory_space<vmem>>, vector<16x128xbf16>
    tpu.vector_store %arg10[%c16, %c0_24], %25 {strides = array<i32>} : memref<32x384xbf16, #tpu.memory_space<vmem>>, vector<16x128xbf16>,
    %c19_25 = arith.constant 19 : index
    %c0_26 = arith.constant 0 : index
    %27 = vector.load %arg9[%c19_25, %c0_26] : memref<36x128xbf16, #tpu.memory_space<vmem>>, vector<16x128xbf16>
    %c16_27 = arith.constant 16 : index
    %c128_28 = arith.constant 128 : index
    %28 = vector.load %arg10[%c16_27, %c128_28] : memref<32x384xbf16, #tpu.memory_space<vmem>>, vector<16x128xbf16>
    tpu.vector_store %arg10[%c16_27, %c128_28], %27 {strides = array<i32>} : memref<32x384xbf16, #tpu.memory_space<vmem>>, vector<16x128xbf16>,
    %c20 = arith.constant 20 : index
    %c0_29 = arith.constant 0 : index
    %29 = vector.load %arg9[%c20, %c0_29] : memref<36x128xbf16, #tpu.memory_space<vmem>>, vector<16x128xbf16>
    %c16_30 = arith.constant 16 : index
    %c256_31 = arith.constant 256 : index
    %30 = vector.load %arg10[%c16_30, %c256_31] : memref<32x384xbf16, #tpu.memory_space<vmem>>, vector<16x128xbf16>
    tpu.vector_store %arg10[%c16_30, %c256_31], %29 {strides = array<i32>} : memref<32x384xbf16, #tpu.memory_space<vmem>>, vector<16x128xbf16>,
    %c0_32 = arith.constant 0 : index
    %c0_33 = arith.constant 0 : index
    %31 = vector.load %arg10[%c0_32, %c0_33] : memref<32x384xbf16, #tpu.memory_space<vmem>>, vector<32x384xbf16>
    %c0_34 = arith.constant 0 : index
    %c0_35 = arith.constant 0 : index
    %c0_36 = arith.constant 0 : index
    %32 = vector.load %arg4[%c0_34, %c0_35, %c0_36] : memref<20x384x128xbf16, #tpu.memory_space<vmem>>, vector<1x384x128xbf16>
    %33 = vector.shape_cast %32 : vector<1x384x128xbf16> to vector<384x128xbf16>
    %cst_37 = arith.constant dense<0.000000e+00> : vector<32x128xf32>
    %34 = tpu.matmul %31, %33, %cst_37 {dimension_numbers = #tpu.dot_dimension_numbers<[1], [0], [0], [1], [0, 0, 1, 1], [], []>} : vector<32x384xbf16>, vector<384x128xbf16>, vector<32x128xf32> -> vector<32x128xf32>
    %c1_38 = arith.constant 1 : index
    %c0_39 = arith.constant 0 : index
    %35 = vector.load %arg2[%c1_38, %c0_39] : memref<20x128xf32, #tpu.memory_space<vmem>>, vector<1x128xf32>
    %c1_40 = arith.constant 1 : index
    %c0_41 = arith.constant 0 : index
    %36 = vector.load %arg3[%c1_40, %c0_41] : memref<20x128xf32, #tpu.memory_space<vmem>>, vector<1x128xf32>
    %37 = vector.broadcast %35 : vector<1x128xf32> to vector<32x128xf32>
    %38 = arith.mulf %34, %37 : vector<32x128xf32>
    %39 = vector.broadcast %36 : vector<1x128xf32> to vector<32x128xf32>
    %40 = arith.addf %38, %39 : vector<32x128xf32>
    %cst_42 = arith.constant 0.000000e+00 : f32
    %41 = vector.broadcast %cst_42 : f32 to vector<32x128xf32>
    %42 = arith.maximumf %40, %41 : vector<32x128xf32>
    %43 = arith.truncf %42 : vector<32x128xf32> to vector<32x128xbf16>
    %44 = vector.extract_strided_slice %43 {offsets = [0, 0], sizes = [16, 128], strides = [1, 1]} : vector<32x128xbf16> to vector<16x128xbf16>
    %c1_43 = arith.constant 1 : index
    %c0_44 = arith.constant 0 : index
    %45 = vector.load %arg9[%c1_43, %c0_44] : memref<36x128xbf16, #tpu.memory_space<vmem>>, vector<16x128xbf16>
    tpu.vector_store %arg9[%c1_43, %c0_44], %44 {strides = array<i32>} : memref<36x128xbf16, #tpu.memory_space<vmem>>, vector<16x128xbf16>,
    %46 = vector.extract_strided_slice %43 {offsets = [16, 0], sizes = [16, 128], strides = [1, 1]} : vector<32x128xbf16> to vector<16x128xbf16>
    %c19_45 = arith.constant 19 : index
    %c0_46 = arith.constant 0 : index
    %47 = vector.load %arg9[%c19_45, %c0_46] : memref<36x128xbf16, #tpu.memory_space<vmem>>, vector<16x128xbf16>
    tpu.vector_store %arg9[%c19_45, %c0_46], %46 {strides = array<i32>} : memref<36x128xbf16, #tpu.memory_space<vmem>>, vector<16x128xbf16>,
    %c0_47 = arith.constant 0 : index
    %c0_48 = arith.constant 0 : index
    %48 = vector.load %arg9[%c0_47, %c0_48] : memref<36x128xbf16, #tpu.memory_space<vmem>>, vector<16x128xbf16>
    %c0_49 = arith.constant 0 : index
    %c0_50 = arith.constant 0 : index
    %49 = vector.load %arg10[%c0_49, %c0_50] : memref<32x384xbf16, #tpu.memory_space<vmem>>, vector<16x128xbf16>
    tpu.vector_store %arg10[%c0_49, %c0_50], %48 {strides = array<i32>} : memref<32x384xbf16, #tpu.memory_space<vmem>>, vector<16x128xbf16>,
    %c1_51 = arith.constant 1 : index
    %c0_52 = arith.constant 0 : index
    %50 = vector.load %arg9[%c1_51, %c0_52] : memref<36x128xbf16, #tpu.memory_space<vmem>>, vector<16x128xbf16>
    %c0_53 = arith.constant 0 : index
    %c128_54 = arith.constant 128 : index
    %51 = vector.load %arg10[%c0_53, %c128_54] : memref<32x384xbf16, #tpu.memory_space<vmem>>, vector<16x128xbf16>
    tpu.vector_store %arg10[%c0_53, %c128_54], %50 {strides = array<i32>} : memref<32x384xbf16, #tpu.memory_space<vmem>>, vector<16x128xbf16>,
    %c2_55 = arith.constant 2 : index
    %c0_56 = arith.constant 0 : index
    %52 = vector.load %arg9[%c2_55, %c0_56] : memref<36x128xbf16, #tpu.memory_space<vmem>>, vector<16x128xbf16>
    %c0_57 = arith.constant 0 : index
    %c256_58 = arith.constant 256 : index
    %53 = vector.load %arg10[%c0_57, %c256_58] : memref<32x384xbf16, #tpu.memory_space<vmem>>, vector<16x128xbf16>
    tpu.vector_store %arg10[%c0_57, %c256_58], %52 {strides = array<i32>} : memref<32x384xbf16, #tpu.memory_space<vmem>>, vector<16x128xbf16>,
    %c18_59 = arith.constant 18 : index
    %c0_60 = arith.constant 0 : index
    %54 = vector.load %arg9[%c18_59, %c0_60] : memref<36x128xbf16, #tpu.memory_space<vmem>>, vector<16x128xbf16>
    %c16_61 = arith.constant 16 : index
    %c0_62 = arith.constant 0 : index
    %55 = vector.load %arg10[%c16_61, %c0_62] : memref<32x384xbf16, #tpu.memory_space<vmem>>, vector<16x128xbf16>
    tpu.vector_store %arg10[%c16_61, %c0_62], %54 {strides = array<i32>} : memref<32x384xbf16, #tpu.memory_space<vmem>>, vector<16x128xbf16>,
    %c19_63 = arith.constant 19 : index
    %c0_64 = arith.constant 0 : index
    %56 = vector.load %arg9[%c19_63, %c0_64] : memref<36x128xbf16, #tpu.memory_space<vmem>>, vector<16x128xbf16>
    %c16_65 = arith.constant 16 : index
    %c128_66 = arith.constant 128 : index
    %57 = vector.load %arg10[%c16_65, %c128_66] : memref<32x384xbf16, #tpu.memory_space<vmem>>, vector<16x128xbf16>
    tpu.vector_store %arg10[%c16_65, %c128_66], %56 {strides = array<i32>} : memref<32x384xbf16, #tpu.memory_space<vmem>>, vector<16x128xbf16>,
    %c20_67 = arith.constant 20 : index
    %c0_68 = arith.constant 0 : index
    %58 = vector.load %arg9[%c20_67, %c0_68] : memref<36x128xbf16, #tpu.memory_space<vmem>>, vector<16x128xbf16>
    %c16_69 = arith.constant 16 : index
    %c256_70 = arith.constant 256 : index
    %59 = vector.load %arg10[%c16_69, %c256_70] : memref<32x384xbf16, #tpu.memory_space<vmem>>, vector<16x128xbf16>
    tpu.vector_store %arg10[%c16_69, %c256_70], %58 {strides = array<i32>} : memref<32x384xbf16, #tpu.memory_space<vmem>>, vector<16x128xbf16>,
    %c0_71 = arith.constant 0 : index
    %c0_72 = arith.constant 0 : index
    %60 = vector.load %arg10[%c0_71, %c0_72] : memref<32x384xbf16, #tpu.memory_space<vmem>>, vector<32x384xbf16>
    %c1_73 = arith.constant 1 : index
    %c0_74 = arith.constant 0 : index
    %c0_75 = arith.constant 0 : index
    %61 = vector.load %arg4[%c1_73, %c0_74, %c0_75] : memref<20x384x128xbf16, #tpu.memory_space<vmem>>, vector<1x384x128xbf16>
    %62 = vector.shape_cast %61 : vector<1x384x128xbf16> to vector<384x128xbf16>
    %cst_76 = arith.constant dense<0.000000e+00> : vector<32x128xf32>
    %63 = tpu.matmul %60, %62, %cst_76 {dimension_numbers = #tpu.dot_dimension_numbers<[1], [0], [0], [1], [0, 0, 1, 1], [], []>} : vector<32x384xbf16>, vector<384x128xbf16>, vector<32x128xf32> -> vector<32x128xf32>
    %c2_77 = arith.constant 2 : index
    %c0_78 = arith.constant 0 : index
    %64 = vector.load %arg2[%c2_77, %c0_78] : memref<20x128xf32, #tpu.memory_space<vmem>>, vector<1x128xf32>
    %c2_79 = arith.constant 2 : index
    %c0_80 = arith.constant 0 : index
    %65 = vector.load %arg3[%c2_79, %c0_80] : memref<20x128xf32, #tpu.memory_space<vmem>>, vector<1x128xf32>
    %66 = vector.broadcast %64 : vector<1x128xf32> to vector<32x128xf32>
    %67 = arith.mulf %63, %66 : vector<32x128xf32>
    %68 = vector.broadcast %65 : vector<1x128xf32> to vector<32x128xf32>
    %69 = arith.addf %67, %68 : vector<32x128xf32>
    %cst_81 = arith.constant 0.000000e+00 : f32
    %70 = vector.broadcast %cst_81 : f32 to vector<32x128xf32>
    %71 = arith.maximumf %69, %70 : vector<32x128xf32>
    %72 = arith.truncf %71 : vector<32x128xf32> to vector<32x128xbf16>
    %73 = vector.extract_strided_slice %72 {offsets = [0, 0], sizes = [16, 128], strides = [1, 1]} : vector<32x128xbf16> to vector<16x128xbf16>
    %c1_82 = arith.constant 1 : index
    %c0_83 = arith.constant 0 : index
    %74 = vector.load %arg9[%c1_82, %c0_83] : memref<36x128xbf16, #tpu.memory_space<vmem>>, vector<16x128xbf16>
    tpu.vector_store %arg9[%c1_82, %c0_83], %73 {strides = array<i32>} : memref<36x128xbf16, #tpu.memory_space<vmem>>, vector<16x128xbf16>,
    %75 = vector.extract_strided_slice %72 {offsets = [16, 0], sizes = [16, 128], strides = [1, 1]} : vector<32x128xbf16> to vector<16x128xbf16>
    %c19_84 = arith.constant 19 : index
    %c0_85 = arith.constant 0 : index
    %76 = vector.load %arg9[%c19_84, %c0_85] : memref<36x128xbf16, #tpu.memory_space<vmem>>, vector<16x128xbf16>
    tpu.vector_store %arg9[%c19_84, %c0_85], %75 {strides = array<i32>} : memref<36x128xbf16, #tpu.memory_space<vmem>>, vector<16x128xbf16>,
    %c0_86 = arith.constant 0 : index
    %c0_87 = arith.constant 0 : index
    %77 = vector.load %arg9[%c0_86, %c0_87] : memref<36x128xbf16, #tpu.memory_space<vmem>>, vector<16x128xbf16>
    %c0_88 = arith.constant 0 : index
    %c0_89 = arith.constant 0 : index
    %78 = vector.load %arg10[%c0_88, %c0_89] : memref<32x384xbf16, #tpu.memory_space<vmem>>, vector<16x128xbf16>
    tpu.vector_store %arg10[%c0_88, %c0_89], %77 {strides = array<i32>} : memref<32x384xbf16, #tpu.memory_space<vmem>>, vector<16x128xbf16>,
    %c1_90 = arith.constant 1 : index
    %c0_91 = arith.constant 0 : index
    %79 = vector.load %arg9[%c1_90, %c0_91] : memref<36x128xbf16, #tpu.memory_space<vmem>>, vector<16x128xbf16>
    %c0_92 = arith.constant 0 : index
    %c128_93 = arith.constant 128 : index
    %80 = vector.load %arg10[%c0_92, %c128_93] : memref<32x384xbf16, #tpu.memory_space<vmem>>, vector<16x128xbf16>
    tpu.vector_store %arg10[%c0_92, %c128_93], %79 {strides = array<i32>} : memref<32x384xbf16, #tpu.memory_space<vmem>>, vector<16x128xbf16>,
    %c2_94 = arith.constant 2 : index
    %c0_95 = arith.constant 0 : index
    %81 = vector.load %arg9[%c2_94, %c0_95] : memref<36x128xbf16, #tpu.memory_space<vmem>>, vector<16x128xbf16>
    %c0_96 = arith.constant 0 : index
    %c256_97 = arith.constant 256 : index
    %82 = vector.load %arg10[%c0_96, %c256_97] : memref<32x384xbf16, #tpu.memory_space<vmem>>, vector<16x128xbf16>
    tpu.vector_store %arg10[%c0_96, %c256_97], %81 {strides = array<i32>} : memref<32x384xbf16, #tpu.memory_space<vmem>>, vector<16x128xbf16>,
    %c18_98 = arith.constant 18 : index
    %c0_99 = arith.constant 0 : index
    %83 = vector.load %arg9[%c18_98, %c0_99] : memref<36x128xbf16, #tpu.memory_space<vmem>>, vector<16x128xbf16>
    %c16_100 = arith.constant 16 : index
    %c0_101 = arith.constant 0 : index
    %84 = vector.load %arg10[%c16_100, %c0_101] : memref<32x384xbf16, #tpu.memory_space<vmem>>, vector<16x128xbf16>
    tpu.vector_store %arg10[%c16_100, %c0_101], %83 {strides = array<i32>} : memref<32x384xbf16, #tpu.memory_space<vmem>>, vector<16x128xbf16>,
    %c19_102 = arith.constant 19 : index
    %c0_103 = arith.constant 0 : index
    %85 = vector.load %arg9[%c19_102, %c0_103] : memref<36x128xbf16, #tpu.memory_space<vmem>>, vector<16x128xbf16>
    %c16_104 = arith.constant 16 : index
    %c128_105 = arith.constant 128 : index
    %86 = vector.load %arg10[%c16_104, %c128_105] : memref<32x384xbf16, #tpu.memory_space<vmem>>, vector<16x128xbf16>
    tpu.vector_store %arg10[%c16_104, %c128_105], %85 {strides = array<i32>} : memref<32x384xbf16, #tpu.memory_space<vmem>>, vector<16x128xbf16>,
    %c20_106 = arith.constant 20 : index
    %c0_107 = arith.constant 0 : index
    %87 = vector.load %arg9[%c20_106, %c0_107] : memref<36x128xbf16, #tpu.memory_space<vmem>>, vector<16x128xbf16>
    %c16_108 = arith.constant 16 : index
    %c256_109 = arith.constant 256 : index
    %88 = vector.load %arg10[%c16_108, %c256_109] : memref<32x384xbf16, #tpu.memory_space<vmem>>, vector<16x128xbf16>
    tpu.vector_store %arg10[%c16_108, %c256_109], %87 {strides = array<i32>} : memref<32x384xbf16, #tpu.memory_space<vmem>>, vector<16x128xbf16>,
    %c0_110 = arith.constant 0 : index
    %c0_111 = arith.constant 0 : index
    %89 = vector.load %arg10[%c0_110, %c0_111] : memref<32x384xbf16, #tpu.memory_space<vmem>>, vector<32x384xbf16>
    %c2_112 = arith.constant 2 : index
    %c0_113 = arith.constant 0 : index
    %c0_114 = arith.constant 0 : index
    %90 = vector.load %arg4[%c2_112, %c0_113, %c0_114] : memref<20x384x128xbf16, #tpu.memory_space<vmem>>, vector<1x384x128xbf16>
    %91 = vector.shape_cast %90 : vector<1x384x128xbf16> to vector<384x128xbf16>
    %cst_115 = arith.constant dense<0.000000e+00> : vector<32x128xf32>
    %92 = tpu.matmul %89, %91, %cst_115 {dimension_numbers = #tpu.dot_dimension_numbers<[1], [0], [0], [1], [0, 0, 1, 1], [], []>} : vector<32x384xbf16>, vector<384x128xbf16>, vector<32x128xf32> -> vector<32x128xf32>
    %93 = arith.addf %92, %34 : vector<32x128xf32>
    %c3 = arith.constant 3 : index
    %c0_116 = arith.constant 0 : index
    %94 = vector.load %arg2[%c3, %c0_116] : memref<20x128xf32, #tpu.memory_space<vmem>>, vector<1x128xf32>
    %c3_117 = arith.constant 3 : index
    %c0_118 = arith.constant 0 : index
    %95 = vector.load %arg3[%c3_117, %c0_118] : memref<20x128xf32, #tpu.memory_space<vmem>>, vector<1x128xf32>
    %96 = vector.broadcast %94 : vector<1x128xf32> to vector<32x128xf32>
    %97 = arith.mulf %93, %96 : vector<32x128xf32>
    %98 = vector.broadcast %95 : vector<1x128xf32> to vector<32x128xf32>
    %99 = arith.addf %97, %98 : vector<32x128xf32>
    %cst_119 = arith.constant 0.000000e+00 : f32
    %100 = vector.broadcast %cst_119 : f32 to vector<32x128xf32>
    %101 = arith.maximumf %99, %100 : vector<32x128xf32>
    %102 = arith.truncf %101 : vector<32x128xf32> to vector<32x128xbf16>
    %103 = vector.extract_strided_slice %102 {offsets = [0, 0], sizes = [16, 128], strides = [1, 1]} : vector<32x128xbf16> to vector<16x128xbf16>
    %c1_120 = arith.constant 1 : index
    %c0_121 = arith.constant 0 : index
    %104 = vector.load %arg9[%c1_120, %c0_121] : memref<36x128xbf16, #tpu.memory_space<vmem>>, vector<16x128xbf16>
    tpu.vector_store %arg9[%c1_120, %c0_121], %103 {strides = array<i32>} : memref<36x128xbf16, #tpu.memory_space<vmem>>, vector<16x128xbf16>,
    %105 = vector.extract_strided_slice %102 {offsets = [16, 0], sizes = [16, 128], strides = [1, 1]} : vector<32x128xbf16> to vector<16x128xbf16>
    %c19_122 = arith.constant 19 : index
    %c0_123 = arith.constant 0 : index
    %106 = vector.load %arg9[%c19_122, %c0_123] : memref<36x128xbf16, #tpu.memory_space<vmem>>, vector<16x128xbf16>
    tpu.vector_store %arg9[%c19_122, %c0_123], %105 {strides = array<i32>} : memref<36x128xbf16, #tpu.memory_space<vmem>>, vector<16x128xbf16>,
    %c0_124 = arith.constant 0 : index
    %c0_125 = arith.constant 0 : index
    %107 = vector.load %arg9[%c0_124, %c0_125] : memref<36x128xbf16, #tpu.memory_space<vmem>>, vector<16x128xbf16>
    %c0_126 = arith.constant 0 : index
    %c0_127 = arith.constant 0 : index
    %108 = vector.load %arg10[%c0_126, %c0_127] : memref<32x384xbf16, #tpu.memory_space<vmem>>, vector<16x128xbf16>
    tpu.vector_store %arg10[%c0_126, %c0_127], %107 {strides = array<i32>} : memref<32x384xbf16, #tpu.memory_space<vmem>>, vector<16x128xbf16>,
    %c1_128 = arith.constant 1 : index
    %c0_129 = arith.constant 0 : index
    %109 = vector.load %arg9[%c1_128, %c0_129] : memref<36x128xbf16, #tpu.memory_space<vmem>>, vector<16x128xbf16>
    %c0_130 = arith.constant 0 : index
    %c128_131 = arith.constant 128 : index
    %110 = vector.load %arg10[%c0_130, %c128_131] : memref<32x384xbf16, #tpu.memory_space<vmem>>, vector<16x128xbf16>
    tpu.vector_store %arg10[%c0_130, %c128_131], %109 {strides = array<i32>} : memref<32x384xbf16, #tpu.memory_space<vmem>>, vector<16x128xbf16>,
    %c2_132 = arith.constant 2 : index
    %c0_133 = arith.constant 0 : index
    %111 = vector.load %arg9[%c2_132, %c0_133] : memref<36x128xbf16, #tpu.memory_space<vmem>>, vector<16x128xbf16>
    %c0_134 = arith.constant 0 : index
    %c256_135 = arith.constant 256 : index
    %112 = vector.load %arg10[%c0_134, %c256_135] : memref<32x384xbf16, #tpu.memory_space<vmem>>, vector<16x128xbf16>
    tpu.vector_store %arg10[%c0_134, %c256_135], %111 {strides = array<i32>} : memref<32x384xbf16, #tpu.memory_space<vmem>>, vector<16x128xbf16>,
    %c18_136 = arith.constant 18 : index
    %c0_137 = arith.constant 0 : index
    %113 = vector.load %arg9[%c18_136, %c0_137] : memref<36x128xbf16, #tpu.memory_space<vmem>>, vector<16x128xbf16>
    %c16_138 = arith.constant 16 : index
    %c0_139 = arith.constant 0 : index
    %114 = vector.load %arg10[%c16_138, %c0_139] : memref<32x384xbf16, #tpu.memory_space<vmem>>, vector<16x128xbf16>
    tpu.vector_store %arg10[%c16_138, %c0_139], %113 {strides = array<i32>} : memref<32x384xbf16, #tpu.memory_space<vmem>>, vector<16x128xbf16>,
    %c19_140 = arith.constant 19 : index
    %c0_141 = arith.constant 0 : index
    %115 = vector.load %arg9[%c19_140, %c0_141] : memref<36x128xbf16, #tpu.memory_space<vmem>>, vector<16x128xbf16>
    %c16_142 = arith.constant 16 : index
    %c128_143 = arith.constant 128 : index
    %116 = vector.load %arg10[%c16_142, %c128_143] : memref<32x384xbf16, #tpu.memory_space<vmem>>, vector<16x128xbf16>
    tpu.vector_store %arg10[%c16_142, %c128_143], %115 {strides = array<i32>} : memref<32x384xbf16, #tpu.memory_space<vmem>>, vector<16x128xbf16>,
    %c20_144 = arith.constant 20 : index
    %c0_145 = arith.constant 0 : index
    %117 = vector.load %arg9[%c20_144, %c0_145] : memref<36x128xbf16, #tpu.memory_space<vmem>>, vector<16x128xbf16>
    %c16_146 = arith.constant 16 : index
    %c256_147 = arith.constant 256 : index
    %118 = vector.load %arg10[%c16_146, %c256_147] : memref<32x384xbf16, #tpu.memory_space<vmem>>, vector<16x128xbf16>
    tpu.vector_store %arg10[%c16_146, %c256_147], %117 {strides = array<i32>} : memref<32x384xbf16, #tpu.memory_space<vmem>>, vector<16x128xbf16>,
    %c0_148 = arith.constant 0 : index
    %c0_149 = arith.constant 0 : index
    %119 = vector.load %arg10[%c0_148, %c0_149] : memref<32x384xbf16, #tpu.memory_space<vmem>>, vector<32x384xbf16>
    %c3_150 = arith.constant 3 : index
    %c0_151 = arith.constant 0 : index
    %c0_152 = arith.constant 0 : index
    %120 = vector.load %arg4[%c3_150, %c0_151, %c0_152] : memref<20x384x128xbf16, #tpu.memory_space<vmem>>, vector<1x384x128xbf16>
    %121 = vector.shape_cast %120 : vector<1x384x128xbf16> to vector<384x128xbf16>
    %cst_153 = arith.constant dense<0.000000e+00> : vector<32x128xf32>
    %122 = tpu.matmul %119, %121, %cst_153 {dimension_numbers = #tpu.dot_dimension_numbers<[1], [0], [0], [1], [0, 0, 1, 1], [], []>} : vector<32x384xbf16>, vector<384x128xbf16>, vector<32x128xf32> -> vector<32x128xf32>
    %c4 = arith.constant 4 : index
    %c0_154 = arith.constant 0 : index
    %123 = vector.load %arg2[%c4, %c0_154] : memref<20x128xf32, #tpu.memory_space<vmem>>, vector<1x128xf32>
    %c4_155 = arith.constant 4 : index
    %c0_156 = arith.constant 0 : index
    %124 = vector.load %arg3[%c4_155, %c0_156] : memref<20x128xf32, #tpu.memory_space<vmem>>, vector<1x128xf32>
    %125 = vector.broadcast %123 : vector<1x128xf32> to vector<32x128xf32>
    %126 = arith.mulf %122, %125 : vector<32x128xf32>
    %127 = vector.broadcast %124 : vector<1x128xf32> to vector<32x128xf32>
    %128 = arith.addf %126, %127 : vector<32x128xf32>
    %cst_157 = arith.constant 0.000000e+00 : f32
    %129 = vector.broadcast %cst_157 : f32 to vector<32x128xf32>
    %130 = arith.maximumf %128, %129 : vector<32x128xf32>
    %131 = arith.truncf %130 : vector<32x128xf32> to vector<32x128xbf16>
    %132 = vector.extract_strided_slice %131 {offsets = [0, 0], sizes = [16, 128], strides = [1, 1]} : vector<32x128xbf16> to vector<16x128xbf16>
    %c1_158 = arith.constant 1 : index
    %c0_159 = arith.constant 0 : index
    %133 = vector.load %arg9[%c1_158, %c0_159] : memref<36x128xbf16, #tpu.memory_space<vmem>>, vector<16x128xbf16>
    tpu.vector_store %arg9[%c1_158, %c0_159], %132 {strides = array<i32>} : memref<36x128xbf16, #tpu.memory_space<vmem>>, vector<16x128xbf16>,
    %134 = vector.extract_strided_slice %131 {offsets = [16, 0], sizes = [16, 128], strides = [1, 1]} : vector<32x128xbf16> to vector<16x128xbf16>
    %c19_160 = arith.constant 19 : index
    %c0_161 = arith.constant 0 : index
    %135 = vector.load %arg9[%c19_160, %c0_161] : memref<36x128xbf16, #tpu.memory_space<vmem>>, vector<16x128xbf16>
    tpu.vector_store %arg9[%c19_160, %c0_161], %134 {strides = array<i32>} : memref<36x128xbf16, #tpu.memory_space<vmem>>, vector<16x128xbf16>,
    %c0_162 = arith.constant 0 : index
    %c0_163 = arith.constant 0 : index
    %136 = vector.load %arg9[%c0_162, %c0_163] : memref<36x128xbf16, #tpu.memory_space<vmem>>, vector<16x128xbf16>
    %c0_164 = arith.constant 0 : index
    %c0_165 = arith.constant 0 : index
    %137 = vector.load %arg10[%c0_164, %c0_165] : memref<32x384xbf16, #tpu.memory_space<vmem>>, vector<16x128xbf16>
    tpu.vector_store %arg10[%c0_164, %c0_165], %136 {strides = array<i32>} : memref<32x384xbf16, #tpu.memory_space<vmem>>, vector<16x128xbf16>,
    %c1_166 = arith.constant 1 : index
    %c0_167 = arith.constant 0 : index
    %138 = vector.load %arg9[%c1_166, %c0_167] : memref<36x128xbf16, #tpu.memory_space<vmem>>, vector<16x128xbf16>
    %c0_168 = arith.constant 0 : index
    %c128_169 = arith.constant 128 : index
    %139 = vector.load %arg10[%c0_168, %c128_169] : memref<32x384xbf16, #tpu.memory_space<vmem>>, vector<16x128xbf16>
    tpu.vector_store %arg10[%c0_168, %c128_169], %138 {strides = array<i32>} : memref<32x384xbf16, #tpu.memory_space<vmem>>, vector<16x128xbf16>,
    %c2_170 = arith.constant 2 : index
    %c0_171 = arith.constant 0 : index
    %140 = vector.load %arg9[%c2_170, %c0_171] : memref<36x128xbf16, #tpu.memory_space<vmem>>, vector<16x128xbf16>
    %c0_172 = arith.constant 0 : index
    %c256_173 = arith.constant 256 : index
    %141 = vector.load %arg10[%c0_172, %c256_173] : memref<32x384xbf16, #tpu.memory_space<vmem>>, vector<16x128xbf16>
    tpu.vector_store %arg10[%c0_172, %c256_173], %140 {strides = array<i32>} : memref<32x384xbf16, #tpu.memory_space<vmem>>, vector<16x128xbf16>,
    %c18_174 = arith.constant 18 : index
    %c0_175 = arith.constant 0 : index
    %142 = vector.load %arg9[%c18_174, %c0_175] : memref<36x128xbf16, #tpu.memory_space<vmem>>, vector<16x128xbf16>
    %c16_176 = arith.constant 16 : index
    %c0_177 = arith.constant 0 : index
    %143 = vector.load %arg10[%c16_176, %c0_177] : memref<32x384xbf16, #tpu.memory_space<vmem>>, vector<16x128xbf16>
    tpu.vector_store %arg10[%c16_176, %c0_177], %142 {strides = array<i32>} : memref<32x384xbf16, #tpu.memory_space<vmem>>, vector<16x128xbf16>,
    %c19_178 = arith.constant 19 : index
    %c0_179 = arith.constant 0 : index
    %144 = vector.load %arg9[%c19_178, %c0_179] : memref<36x128xbf16, #tpu.memory_space<vmem>>, vector<16x128xbf16>
    %c16_180 = arith.constant 16 : index
    %c128_181 = arith.constant 128 : index
    %145 = vector.load %arg10[%c16_180, %c128_181] : memref<32x384xbf16, #tpu.memory_space<vmem>>, vector<16x128xbf16>
    tpu.vector_store %arg10[%c16_180, %c128_181], %144 {strides = array<i32>} : memref<32x384xbf16, #tpu.memory_space<vmem>>, vector<16x128xbf16>,
    %c20_182 = arith.constant 20 : index
    %c0_183 = arith.constant 0 : index
    %146 = vector.load %arg9[%c20_182, %c0_183] : memref<36x128xbf16, #tpu.memory_space<vmem>>, vector<16x128xbf16>
    %c16_184 = arith.constant 16 : index
    %c256_185 = arith.constant 256 : index
    %147 = vector.load %arg10[%c16_184, %c256_185] : memref<32x384xbf16, #tpu.memory_space<vmem>>, vector<16x128xbf16>
    tpu.vector_store %arg10[%c16_184, %c256_185], %146 {strides = array<i32>} : memref<32x384xbf16, #tpu.memory_space<vmem>>, vector<16x128xbf16>,
    %c0_186 = arith.constant 0 : index
    %c0_187 = arith.constant 0 : index
    %148 = vector.load %arg10[%c0_186, %c0_187] : memref<32x384xbf16, #tpu.memory_space<vmem>>, vector<32x384xbf16>
    %c4_188 = arith.constant 4 : index
    %c0_189 = arith.constant 0 : index
    %c0_190 = arith.constant 0 : index
    %149 = vector.load %arg4[%c4_188, %c0_189, %c0_190] : memref<20x384x128xbf16, #tpu.memory_space<vmem>>, vector<1x384x128xbf16>
    %150 = vector.shape_cast %149 : vector<1x384x128xbf16> to vector<384x128xbf16>
    %cst_191 = arith.constant dense<0.000000e+00> : vector<32x128xf32>
    %151 = tpu.matmul %148, %150, %cst_191 {dimension_numbers = #tpu.dot_dimension_numbers<[1], [0], [0], [1], [0, 0, 1, 1], [], []>} : vector<32x384xbf16>, vector<384x128xbf16>, vector<32x128xf32> -> vector<32x128xf32>
    %152 = arith.addf %151, %93 : vector<32x128xf32>
    %c5 = arith.constant 5 : index
    %c0_192 = arith.constant 0 : index
    %153 = vector.load %arg2[%c5, %c0_192] : memref<20x128xf32, #tpu.memory_space<vmem>>, vector<1x128xf32>
    %c5_193 = arith.constant 5 : index
    %c0_194 = arith.constant 0 : index
    %154 = vector.load %arg3[%c5_193, %c0_194] : memref<20x128xf32, #tpu.memory_space<vmem>>, vector<1x128xf32>
    %155 = vector.broadcast %153 : vector<1x128xf32> to vector<32x128xf32>
    %156 = arith.mulf %152, %155 : vector<32x128xf32>
    %157 = vector.broadcast %154 : vector<1x128xf32> to vector<32x128xf32>
    %158 = arith.addf %156, %157 : vector<32x128xf32>
    %cst_195 = arith.constant 0.000000e+00 : f32
    %159 = vector.broadcast %cst_195 : f32 to vector<32x128xf32>
    %160 = arith.maximumf %158, %159 : vector<32x128xf32>
    %161 = arith.truncf %160 : vector<32x128xf32> to vector<32x128xbf16>
    %162 = vector.extract_strided_slice %161 {offsets = [0, 0], sizes = [16, 128], strides = [1, 1]} : vector<32x128xbf16> to vector<16x128xbf16>
    %c1_196 = arith.constant 1 : index
    %c0_197 = arith.constant 0 : index
    %163 = vector.load %arg9[%c1_196, %c0_197] : memref<36x128xbf16, #tpu.memory_space<vmem>>, vector<16x128xbf16>
    tpu.vector_store %arg9[%c1_196, %c0_197], %162 {strides = array<i32>} : memref<36x128xbf16, #tpu.memory_space<vmem>>, vector<16x128xbf16>,
    %164 = vector.extract_strided_slice %161 {offsets = [16, 0], sizes = [16, 128], strides = [1, 1]} : vector<32x128xbf16> to vector<16x128xbf16>
    %c19_198 = arith.constant 19 : index
    %c0_199 = arith.constant 0 : index
    %165 = vector.load %arg9[%c19_198, %c0_199] : memref<36x128xbf16, #tpu.memory_space<vmem>>, vector<16x128xbf16>
    tpu.vector_store %arg9[%c19_198, %c0_199], %164 {strides = array<i32>} : memref<36x128xbf16, #tpu.memory_space<vmem>>, vector<16x128xbf16>,
    %c0_200 = arith.constant 0 : index
    %c0_201 = arith.constant 0 : index
    %166 = vector.load %arg9[%c0_200, %c0_201] : memref<36x128xbf16, #tpu.memory_space<vmem>>, vector<16x128xbf16>
    %c0_202 = arith.constant 0 : index
    %c0_203 = arith.constant 0 : index
    %167 = vector.load %arg10[%c0_202, %c0_203] : memref<32x384xbf16, #tpu.memory_space<vmem>>, vector<16x128xbf16>
    tpu.vector_store %arg10[%c0_202, %c0_203], %166 {strides = array<i32>} : memref<32x384xbf16, #tpu.memory_space<vmem>>, vector<16x128xbf16>,
    %c1_204 = arith.constant 1 : index
    %c0_205 = arith.constant 0 : index
    %168 = vector.load %arg9[%c1_204, %c0_205] : memref<36x128xbf16, #tpu.memory_space<vmem>>, vector<16x128xbf16>
    %c0_206 = arith.constant 0 : index
    %c128_207 = arith.constant 128 : index
    %169 = vector.load %arg10[%c0_206, %c128_207] : memref<32x384xbf16, #tpu.memory_space<vmem>>, vector<16x128xbf16>
    tpu.vector_store %arg10[%c0_206, %c128_207], %168 {strides = array<i32>} : memref<32x384xbf16, #tpu.memory_space<vmem>>, vector<16x128xbf16>,
    %c2_208 = arith.constant 2 : index
    %c0_209 = arith.constant 0 : index
    %170 = vector.load %arg9[%c2_208, %c0_209] : memref<36x128xbf16, #tpu.memory_space<vmem>>, vector<16x128xbf16>
    %c0_210 = arith.constant 0 : index
    %c256_211 = arith.constant 256 : index
    %171 = vector.load %arg10[%c0_210, %c256_211] : memref<32x384xbf16, #tpu.memory_space<vmem>>, vector<16x128xbf16>
    tpu.vector_store %arg10[%c0_210, %c256_211], %170 {strides = array<i32>} : memref<32x384xbf16, #tpu.memory_space<vmem>>, vector<16x128xbf16>,
    %c18_212 = arith.constant 18 : index
    %c0_213 = arith.constant 0 : index
    %172 = vector.load %arg9[%c18_212, %c0_213] : memref<36x128xbf16, #tpu.memory_space<vmem>>, vector<16x128xbf16>
    %c16_214 = arith.constant 16 : index
    %c0_215 = arith.constant 0 : index
    %173 = vector.load %arg10[%c16_214, %c0_215] : memref<32x384xbf16, #tpu.memory_space<vmem>>, vector<16x128xbf16>
    tpu.vector_store %arg10[%c16_214, %c0_215], %172 {strides = array<i32>} : memref<32x384xbf16, #tpu.memory_space<vmem>>, vector<16x128xbf16>,
    %c19_216 = arith.constant 19 : index
    %c0_217 = arith.constant 0 : index
    %174 = vector.load %arg9[%c19_216, %c0_217] : memref<36x128xbf16, #tpu.memory_space<vmem>>, vector<16x128xbf16>
    %c16_218 = arith.constant 16 : index
    %c128_219 = arith.constant 128 : index
    %175 = vector.load %arg10[%c16_218, %c128_219] : memref<32x384xbf16, #tpu.memory_space<vmem>>, vector<16x128xbf16>
    tpu.vector_store %arg10[%c16_218, %c128_219], %174 {strides = array<i32>} : memref<32x384xbf16, #tpu.memory_space<vmem>>, vector<16x128xbf16>,
    %c20_220 = arith.constant 20 : index
    %c0_221 = arith.constant 0 : index
    %176 = vector.load %arg9[%c20_220, %c0_221] : memref<36x128xbf16, #tpu.memory_space<vmem>>, vector<16x128xbf16>
    %c16_222 = arith.constant 16 : index
    %c256_223 = arith.constant 256 : index
    %177 = vector.load %arg10[%c16_222, %c256_223] : memref<32x384xbf16, #tpu.memory_space<vmem>>, vector<16x128xbf16>
    tpu.vector_store %arg10[%c16_222, %c256_223], %176 {strides = array<i32>} : memref<32x384xbf16, #tpu.memory_space<vmem>>, vector<16x128xbf16>,
    %c0_224 = arith.constant 0 : index
    %c0_225 = arith.constant 0 : index
    %178 = vector.load %arg10[%c0_224, %c0_225] : memref<32x384xbf16, #tpu.memory_space<vmem>>, vector<32x384xbf16>
    %c5_226 = arith.constant 5 : index
    %c0_227 = arith.constant 0 : index
    %c0_228 = arith.constant 0 : index
    %179 = vector.load %arg4[%c5_226, %c0_227, %c0_228] : memref<20x384x128xbf16, #tpu.memory_space<vmem>>, vector<1x384x128xbf16>
    %180 = vector.shape_cast %179 : vector<1x384x128xbf16> to vector<384x128xbf16>
    %cst_229 = arith.constant dense<0.000000e+00> : vector<32x128xf32>
    %181 = tpu.matmul %178, %180, %cst_229 {dimension_numbers = #tpu.dot_dimension_numbers<[1], [0], [0], [1], [0, 0, 1, 1], [], []>} : vector<32x384xbf16>, vector<384x128xbf16>, vector<32x128xf32> -> vector<32x128xf32>
    %c6 = arith.constant 6 : index
    %c0_230 = arith.constant 0 : index
    %182 = vector.load %arg2[%c6, %c0_230] : memref<20x128xf32, #tpu.memory_space<vmem>>, vector<1x128xf32>
    %c6_231 = arith.constant 6 : index
    %c0_232 = arith.constant 0 : index
    %183 = vector.load %arg3[%c6_231, %c0_232] : memref<20x128xf32, #tpu.memory_space<vmem>>, vector<1x128xf32>
    %184 = vector.broadcast %182 : vector<1x128xf32> to vector<32x128xf32>
    %185 = arith.mulf %181, %184 : vector<32x128xf32>
    %186 = vector.broadcast %183 : vector<1x128xf32> to vector<32x128xf32>
    %187 = arith.addf %185, %186 : vector<32x128xf32>
    %cst_233 = arith.constant 0.000000e+00 : f32
    %188 = vector.broadcast %cst_233 : f32 to vector<32x128xf32>
    %189 = arith.maximumf %187, %188 : vector<32x128xf32>
    %190 = arith.truncf %189 : vector<32x128xf32> to vector<32x128xbf16>
    %191 = vector.extract_strided_slice %190 {offsets = [0, 0], sizes = [16, 128], strides = [1, 1]} : vector<32x128xbf16> to vector<16x128xbf16>
    %c1_234 = arith.constant 1 : index
    %c0_235 = arith.constant 0 : index
    %192 = vector.load %arg9[%c1_234, %c0_235] : memref<36x128xbf16, #tpu.memory_space<vmem>>, vector<16x128xbf16>
    tpu.vector_store %arg9[%c1_234, %c0_235], %191 {strides = array<i32>} : memref<36x128xbf16, #tpu.memory_space<vmem>>, vector<16x128xbf16>,
    %193 = vector.extract_strided_slice %190 {offsets = [16, 0], sizes = [16, 128], strides = [1, 1]} : vector<32x128xbf16> to vector<16x128xbf16>
    %c19_236 = arith.constant 19 : index
    %c0_237 = arith.constant 0 : index
    %194 = vector.load %arg9[%c19_236, %c0_237] : memref<36x128xbf16, #tpu.memory_space<vmem>>, vector<16x128xbf16>
    tpu.vector_store %arg9[%c19_236, %c0_237], %193 {strides = array<i32>} : memref<36x128xbf16, #tpu.memory_space<vmem>>, vector<16x128xbf16>,
    %c0_238 = arith.constant 0 : index
    %c0_239 = arith.constant 0 : index
    %195 = vector.load %arg9[%c0_238, %c0_239] : memref<36x128xbf16, #tpu.memory_space<vmem>>, vector<16x128xbf16>
    %c0_240 = arith.constant 0 : index
    %c0_241 = arith.constant 0 : index
    %196 = vector.load %arg10[%c0_240, %c0_241] : memref<32x384xbf16, #tpu.memory_space<vmem>>, vector<16x128xbf16>
    tpu.vector_store %arg10[%c0_240, %c0_241], %195 {strides = array<i32>} : memref<32x384xbf16, #tpu.memory_space<vmem>>, vector<16x128xbf16>,
    %c1_242 = arith.constant 1 : index
    %c0_243 = arith.constant 0 : index
    %197 = vector.load %arg9[%c1_242, %c0_243] : memref<36x128xbf16, #tpu.memory_space<vmem>>, vector<16x128xbf16>
    %c0_244 = arith.constant 0 : index
    %c128_245 = arith.constant 128 : index
    %198 = vector.load %arg10[%c0_244, %c128_245] : memref<32x384xbf16, #tpu.memory_space<vmem>>, vector<16x128xbf16>
    tpu.vector_store %arg10[%c0_244, %c128_245], %197 {strides = array<i32>} : memref<32x384xbf16, #tpu.memory_space<vmem>>, vector<16x128xbf16>,
    %c2_246 = arith.constant 2 : index
    %c0_247 = arith.constant 0 : index
    %199 = vector.load %arg9[%c2_246, %c0_247] : memref<36x128xbf16, #tpu.memory_space<vmem>>, vector<16x128xbf16>
    %c0_248 = arith.constant 0 : index
    %c256_249 = arith.constant 256 : index
    %200 = vector.load %arg10[%c0_248, %c256_249] : memref<32x384xbf16, #tpu.memory_space<vmem>>, vector<16x128xbf16>
    tpu.vector_store %arg10[%c0_248, %c256_249], %199 {strides = array<i32>} : memref<32x384xbf16, #tpu.memory_space<vmem>>, vector<16x128xbf16>,
    %c18_250 = arith.constant 18 : index
    %c0_251 = arith.constant 0 : index
    %201 = vector.load %arg9[%c18_250, %c0_251] : memref<36x128xbf16, #tpu.memory_space<vmem>>, vector<16x128xbf16>
    %c16_252 = arith.constant 16 : index
    %c0_253 = arith.constant 0 : index
    %202 = vector.load %arg10[%c16_252, %c0_253] : memref<32x384xbf16, #tpu.memory_space<vmem>>, vector<16x128xbf16>
    tpu.vector_store %arg10[%c16_252, %c0_253], %201 {strides = array<i32>} : memref<32x384xbf16, #tpu.memory_space<vmem>>, vector<16x128xbf16>,
    %c19_254 = arith.constant 19 : index
    %c0_255 = arith.constant 0 : index
    %203 = vector.load %arg9[%c19_254, %c0_255] : memref<36x128xbf16, #tpu.memory_space<vmem>>, vector<16x128xbf16>
    %c16_256 = arith.constant 16 : index
    %c128_257 = arith.constant 128 : index
    %204 = vector.load %arg10[%c16_256, %c128_257] : memref<32x384xbf16, #tpu.memory_space<vmem>>, vector<16x128xbf16>
    tpu.vector_store %arg10[%c16_256, %c128_257], %203 {strides = array<i32>} : memref<32x384xbf16, #tpu.memory_space<vmem>>, vector<16x128xbf16>,
    %c20_258 = arith.constant 20 : index
    %c0_259 = arith.constant 0 : index
    %205 = vector.load %arg9[%c20_258, %c0_259] : memref<36x128xbf16, #tpu.memory_space<vmem>>, vector<16x128xbf16>
    %c16_260 = arith.constant 16 : index
    %c256_261 = arith.constant 256 : index
    %206 = vector.load %arg10[%c16_260, %c256_261] : memref<32x384xbf16, #tpu.memory_space<vmem>>, vector<16x128xbf16>
    tpu.vector_store %arg10[%c16_260, %c256_261], %205 {strides = array<i32>} : memref<32x384xbf16, #tpu.memory_space<vmem>>, vector<16x128xbf16>,
    %c0_262 = arith.constant 0 : index
    %c0_263 = arith.constant 0 : index
    %207 = vector.load %arg10[%c0_262, %c0_263] : memref<32x384xbf16, #tpu.memory_space<vmem>>, vector<32x384xbf16>
    %c6_264 = arith.constant 6 : index
    %c0_265 = arith.constant 0 : index
    %c0_266 = arith.constant 0 : index
    %208 = vector.load %arg4[%c6_264, %c0_265, %c0_266] : memref<20x384x128xbf16, #tpu.memory_space<vmem>>, vector<1x384x128xbf16>
    %209 = vector.shape_cast %208 : vector<1x384x128xbf16> to vector<384x128xbf16>
    %cst_267 = arith.constant dense<0.000000e+00> : vector<32x128xf32>
    %210 = tpu.matmul %207, %209, %cst_267 {dimension_numbers = #tpu.dot_dimension_numbers<[1], [0], [0], [1], [0, 0, 1, 1], [], []>} : vector<32x384xbf16>, vector<384x128xbf16>, vector<32x128xf32> -> vector<32x128xf32>
    %211 = arith.addf %210, %152 : vector<32x128xf32>
    %c0_268 = arith.constant 0 : index
    %c0_269 = arith.constant 0 : index
    %212 = vector.load %arg5[%c0_268, %c0_269] : memref<15x128xf32, #tpu.memory_space<vmem>>, vector<1x128xf32>
    %c0_270 = arith.constant 0 : index
    %c0_271 = arith.constant 0 : index
    %213 = vector.load %arg6[%c0_270, %c0_271] : memref<15x128xf32, #tpu.memory_space<vmem>>, vector<1x128xf32>
    %214 = vector.broadcast %212 : vector<1x128xf32> to vector<32x128xf32>
    %215 = arith.mulf %93, %214 : vector<32x128xf32>
    %216 = vector.broadcast %213 : vector<1x128xf32> to vector<32x128xf32>
    %217 = arith.addf %215, %216 : vector<32x128xf32>
    %cst_272 = arith.constant 0.000000e+00 : f32
    %218 = vector.broadcast %cst_272 : f32 to vector<32x128xf32>
    %219 = arith.maximumf %217, %218 : vector<32x128xf32>
    %220 = arith.truncf %219 : vector<32x128xf32> to vector<32x128xbf16>
    %c1_273 = arith.constant 1 : index
    %c0_274 = arith.constant 0 : index
    %221 = vector.load %arg5[%c1_273, %c0_274] : memref<15x128xf32, #tpu.memory_space<vmem>>, vector<1x128xf32>
    %c1_275 = arith.constant 1 : index
    %c0_276 = arith.constant 0 : index
    %222 = vector.load %arg6[%c1_275, %c0_276] : memref<15x128xf32, #tpu.memory_space<vmem>>, vector<1x128xf32>
    %223 = vector.broadcast %221 : vector<1x128xf32> to vector<32x128xf32>
    %224 = arith.mulf %152, %223 : vector<32x128xf32>
    %225 = vector.broadcast %222 : vector<1x128xf32> to vector<32x128xf32>
    %226 = arith.addf %224, %225 : vector<32x128xf32>
    %cst_277 = arith.constant 0.000000e+00 : f32
    %227 = vector.broadcast %cst_277 : f32 to vector<32x128xf32>
    %228 = arith.maximumf %226, %227 : vector<32x128xf32>
    %229 = arith.truncf %228 : vector<32x128xf32> to vector<32x128xbf16>
    %c2_278 = arith.constant 2 : index
    %c0_279 = arith.constant 0 : index
    %230 = vector.load %arg5[%c2_278, %c0_279] : memref<15x128xf32, #tpu.memory_space<vmem>>, vector<1x128xf32>
    %c2_280 = arith.constant 2 : index
    %c0_281 = arith.constant 0 : index
    %231 = vector.load %arg6[%c2_280, %c0_281] : memref<15x128xf32, #tpu.memory_space<vmem>>, vector<1x128xf32>
    %232 = vector.broadcast %230 : vector<1x128xf32> to vector<32x128xf32>
    %233 = arith.mulf %211, %232 : vector<32x128xf32>
    %234 = vector.broadcast %231 : vector<1x128xf32> to vector<32x128xf32>
    %235 = arith.addf %233, %234 : vector<32x128xf32>
    %cst_282 = arith.constant 0.000000e+00 : f32
    %236 = vector.broadcast %cst_282 : f32 to vector<32x128xf32>
    %237 = arith.maximumf %235, %236 : vector<32x128xf32>
    %238 = arith.truncf %237 : vector<32x128xf32> to vector<32x128xbf16>
    %c3_283 = arith.constant 3 : index
    %c0_284 = arith.constant 0 : index
    %239 = vector.load %arg5[%c3_283, %c0_284] : memref<15x128xf32, #tpu.memory_space<vmem>>, vector<1x128xf32>
    %c3_285 = arith.constant 3 : index
    %c0_286 = arith.constant 0 : index
    %240 = vector.load %arg6[%c3_285, %c0_286] : memref<15x128xf32, #tpu.memory_space<vmem>>, vector<1x128xf32>
    %241 = vector.broadcast %239 : vector<1x128xf32> to vector<32x128xf32>
    %242 = arith.mulf %34, %241 : vector<32x128xf32>
    %243 = vector.broadcast %240 : vector<1x128xf32> to vector<32x128xf32>
    %244 = arith.addf %242, %243 : vector<32x128xf32>
    %cst_287 = arith.constant 0.000000e+00 : f32
    %245 = vector.broadcast %cst_287 : f32 to vector<32x128xf32>
    %246 = arith.maximumf %244, %245 : vector<32x128xf32>
    %247 = arith.truncf %246 : vector<32x128xf32> to vector<32x128xbf16>
    %248 = tpu.concatenate %220, %229, %238, %247 in 1 : vector<32x128xbf16>, vector<32x128xbf16>, vector<32x128xbf16>, vector<32x128xbf16> -> vector<32x512xbf16>
    %c0_288 = arith.constant 0 : index
    %c0_289 = arith.constant 0 : index
    %249 = vector.load %arg7[%c0_288, %c0_289] : memref<1920x128xbf16, #tpu.memory_space<vmem>>, vector<512x128xbf16>
    %cst_290 = arith.constant dense<0.000000e+00> : vector<32x128xf32>
    %250 = tpu.matmul %248, %249, %cst_290 {dimension_numbers = #tpu.dot_dimension_numbers<[1], [0], [0], [1], [0, 0, 1, 1], [], []>} : vector<32x512xbf16>, vector<512x128xbf16>, vector<32x128xf32> -> vector<32x128xf32>
    %c7 = arith.constant 7 : index
    %c0_291 = arith.constant 0 : index
    %251 = vector.load %arg2[%c7, %c0_291] : memref<20x128xf32, #tpu.memory_space<vmem>>, vector<1x128xf32>
    %c7_292 = arith.constant 7 : index
    %c0_293 = arith.constant 0 : index
    %252 = vector.load %arg3[%c7_292, %c0_293] : memref<20x128xf32, #tpu.memory_space<vmem>>, vector<1x128xf32>
    %253 = vector.broadcast %251 : vector<1x128xf32> to vector<32x128xf32>
    %254 = arith.mulf %250, %253 : vector<32x128xf32>
    %255 = vector.broadcast %252 : vector<1x128xf32> to vector<32x128xf32>
    %256 = arith.addf %254, %255 : vector<32x128xf32>
    %cst_294 = arith.constant 0.000000e+00 : f32
    %257 = vector.broadcast %cst_294 : f32 to vector<32x128xf32>
    %258 = arith.maximumf %256, %257 : vector<32x128xf32>
    %259 = arith.truncf %258 : vector<32x128xf32> to vector<32x128xbf16>
    %260 = vector.extract_strided_slice %259 {offsets = [0, 0], sizes = [16, 128], strides = [1, 1]} : vector<32x128xbf16> to vector<16x128xbf16>
    %c1_295 = arith.constant 1 : index
    %c0_296 = arith.constant 0 : index
    %261 = vector.load %arg9[%c1_295, %c0_296] : memref<36x128xbf16, #tpu.memory_space<vmem>>, vector<16x128xbf16>
    tpu.vector_store %arg9[%c1_295, %c0_296], %260 {strides = array<i32>} : memref<36x128xbf16, #tpu.memory_space<vmem>>, vector<16x128xbf16>,
    %262 = vector.extract_strided_slice %259 {offsets = [16, 0], sizes = [16, 128], strides = [1, 1]} : vector<32x128xbf16> to vector<16x128xbf16>
    %c19_297 = arith.constant 19 : index
    %c0_298 = arith.constant 0 : index
    %263 = vector.load %arg9[%c19_297, %c0_298] : memref<36x128xbf16, #tpu.memory_space<vmem>>, vector<16x128xbf16>
    tpu.vector_store %arg9[%c19_297, %c0_298], %262 {strides = array<i32>} : memref<36x128xbf16, #tpu.memory_space<vmem>>, vector<16x128xbf16>,
    %c0_299 = arith.constant 0 : index
    %c0_300 = arith.constant 0 : index
    %264 = vector.load %arg9[%c0_299, %c0_300] : memref<36x128xbf16, #tpu.memory_space<vmem>>, vector<16x128xbf16>
    %c0_301 = arith.constant 0 : index
    %c0_302 = arith.constant 0 : index
    %265 = vector.load %arg10[%c0_301, %c0_302] : memref<32x384xbf16, #tpu.memory_space<vmem>>, vector<16x128xbf16>
    tpu.vector_store %arg10[%c0_301, %c0_302], %264 {strides = array<i32>} : memref<32x384xbf16, #tpu.memory_space<vmem>>, vector<16x128xbf16>,
    %c1_303 = arith.constant 1 : index
    %c0_304 = arith.constant 0 : index
    %266 = vector.load %arg9[%c1_303, %c0_304] : memref<36x128xbf16, #tpu.memory_space<vmem>>, vector<16x128xbf16>
    %c0_305 = arith.constant 0 : index
    %c128_306 = arith.constant 128 : index
    %267 = vector.load %arg10[%c0_305, %c128_306] : memref<32x384xbf16, #tpu.memory_space<vmem>>, vector<16x128xbf16>
    tpu.vector_store %arg10[%c0_305, %c128_306], %266 {strides = array<i32>} : memref<32x384xbf16, #tpu.memory_space<vmem>>, vector<16x128xbf16>,
    %c2_307 = arith.constant 2 : index
    %c0_308 = arith.constant 0 : index
    %268 = vector.load %arg9[%c2_307, %c0_308] : memref<36x128xbf16, #tpu.memory_space<vmem>>, vector<16x128xbf16>
    %c0_309 = arith.constant 0 : index
    %c256_310 = arith.constant 256 : index
    %269 = vector.load %arg10[%c0_309, %c256_310] : memref<32x384xbf16, #tpu.memory_space<vmem>>, vector<16x128xbf16>
    tpu.vector_store %arg10[%c0_309, %c256_310], %268 {strides = array<i32>} : memref<32x384xbf16, #tpu.memory_space<vmem>>, vector<16x128xbf16>,
    %c18_311 = arith.constant 18 : index
    %c0_312 = arith.constant 0 : index
    %270 = vector.load %arg9[%c18_311, %c0_312] : memref<36x128xbf16, #tpu.memory_space<vmem>>, vector<16x128xbf16>
    %c16_313 = arith.constant 16 : index
    %c0_314 = arith.constant 0 : index
    %271 = vector.load %arg10[%c16_313, %c0_314] : memref<32x384xbf16, #tpu.memory_space<vmem>>, vector<16x128xbf16>
    tpu.vector_store %arg10[%c16_313, %c0_314], %270 {strides = array<i32>} : memref<32x384xbf16, #tpu.memory_space<vmem>>, vector<16x128xbf16>,
    %c19_315 = arith.constant 19 : index
    %c0_316 = arith.constant 0 : index
    %272 = vector.load %arg9[%c19_315, %c0_316] : memref<36x128xbf16, #tpu.memory_space<vmem>>, vector<16x128xbf16>
    %c16_317 = arith.constant 16 : index
    %c128_318 = arith.constant 128 : index
    %273 = vector.load %arg10[%c16_317, %c128_318] : memref<32x384xbf16, #tpu.memory_space<vmem>>, vector<16x128xbf16>
    tpu.vector_store %arg10[%c16_317, %c128_318], %272 {strides = array<i32>} : memref<32x384xbf16, #tpu.memory_space<vmem>>, vector<16x128xbf16>,
    %c20_319 = arith.constant 20 : index
    %c0_320 = arith.constant 0 : index
    %274 = vector.load %arg9[%c20_319, %c0_320] : memref<36x128xbf16, #tpu.memory_space<vmem>>, vector<16x128xbf16>
    %c16_321 = arith.constant 16 : index
    %c256_322 = arith.constant 256 : index
    %275 = vector.load %arg10[%c16_321, %c256_322] : memref<32x384xbf16, #tpu.memory_space<vmem>>, vector<16x128xbf16>
    tpu.vector_store %arg10[%c16_321, %c256_322], %274 {strides = array<i32>} : memref<32x384xbf16, #tpu.memory_space<vmem>>, vector<16x128xbf16>,
    %c0_323 = arith.constant 0 : index
    %c0_324 = arith.constant 0 : index
    %276 = vector.load %arg10[%c0_323, %c0_324] : memref<32x384xbf16, #tpu.memory_space<vmem>>, vector<32x384xbf16>
    %c7_325 = arith.constant 7 : index
    %c0_326 = arith.constant 0 : index
    %c0_327 = arith.constant 0 : index
    %277 = vector.load %arg4[%c7_325, %c0_326, %c0_327] : memref<20x384x128xbf16, #tpu.memory_space<vmem>>, vector<1x384x128xbf16>
    %278 = vector.shape_cast %277 : vector<1x384x128xbf16> to vector<384x128xbf16>
    %cst_328 = arith.constant dense<0.000000e+00> : vector<32x128xf32>
    %279 = tpu.matmul %276, %278, %cst_328 {dimension_numbers = #tpu.dot_dimension_numbers<[1], [0], [0], [1], [0, 0, 1, 1], [], []>} : vector<32x384xbf16>, vector<384x128xbf16>, vector<32x128xf32> -> vector<32x128xf32>
    %c8 = arith.constant 8 : index
    %c0_329 = arith.constant 0 : index
    %280 = vector.load %arg2[%c8, %c0_329] : memref<20x128xf32, #tpu.memory_space<vmem>>, vector<1x128xf32>
    %c8_330 = arith.constant 8 : index
    %c0_331 = arith.constant 0 : index
    %281 = vector.load %arg3[%c8_330, %c0_331] : memref<20x128xf32, #tpu.memory_space<vmem>>, vector<1x128xf32>
    %282 = vector.broadcast %280 : vector<1x128xf32> to vector<32x128xf32>
    %283 = arith.mulf %279, %282 : vector<32x128xf32>
    %284 = vector.broadcast %281 : vector<1x128xf32> to vector<32x128xf32>
    %285 = arith.addf %283, %284 : vector<32x128xf32>
    %cst_332 = arith.constant 0.000000e+00 : f32
    %286 = vector.broadcast %cst_332 : f32 to vector<32x128xf32>
    %287 = arith.maximumf %285, %286 : vector<32x128xf32>
    %288 = arith.truncf %287 : vector<32x128xf32> to vector<32x128xbf16>
    %289 = vector.extract_strided_slice %288 {offsets = [0, 0], sizes = [16, 128], strides = [1, 1]} : vector<32x128xbf16> to vector<16x128xbf16>
    %c1_333 = arith.constant 1 : index
    %c0_334 = arith.constant 0 : index
    %290 = vector.load %arg9[%c1_333, %c0_334] : memref<36x128xbf16, #tpu.memory_space<vmem>>, vector<16x128xbf16>
    tpu.vector_store %arg9[%c1_333, %c0_334], %289 {strides = array<i32>} : memref<36x128xbf16, #tpu.memory_space<vmem>>, vector<16x128xbf16>,
    %291 = vector.extract_strided_slice %288 {offsets = [16, 0], sizes = [16, 128], strides = [1, 1]} : vector<32x128xbf16> to vector<16x128xbf16>
    %c19_335 = arith.constant 19 : index
    %c0_336 = arith.constant 0 : index
    %292 = vector.load %arg9[%c19_335, %c0_336] : memref<36x128xbf16, #tpu.memory_space<vmem>>, vector<16x128xbf16>
    tpu.vector_store %arg9[%c19_335, %c0_336], %291 {strides = array<i32>} : memref<36x128xbf16, #tpu.memory_space<vmem>>, vector<16x128xbf16>,
    %c0_337 = arith.constant 0 : index
    %c0_338 = arith.constant 0 : index
    %293 = vector.load %arg9[%c0_337, %c0_338] : memref<36x128xbf16, #tpu.memory_space<vmem>>, vector<16x128xbf16>
    %c0_339 = arith.constant 0 : index
    %c0_340 = arith.constant 0 : index
    %294 = vector.load %arg10[%c0_339, %c0_340] : memref<32x384xbf16, #tpu.memory_space<vmem>>, vector<16x128xbf16>
    tpu.vector_store %arg10[%c0_339, %c0_340], %293 {strides = array<i32>} : memref<32x384xbf16, #tpu.memory_space<vmem>>, vector<16x128xbf16>,
    %c1_341 = arith.constant 1 : index
    %c0_342 = arith.constant 0 : index
    %295 = vector.load %arg9[%c1_341, %c0_342] : memref<36x128xbf16, #tpu.memory_space<vmem>>, vector<16x128xbf16>
    %c0_343 = arith.constant 0 : index
    %c128_344 = arith.constant 128 : index
    %296 = vector.load %arg10[%c0_343, %c128_344] : memref<32x384xbf16, #tpu.memory_space<vmem>>, vector<16x128xbf16>
    tpu.vector_store %arg10[%c0_343, %c128_344], %295 {strides = array<i32>} : memref<32x384xbf16, #tpu.memory_space<vmem>>, vector<16x128xbf16>,
    %c2_345 = arith.constant 2 : index
    %c0_346 = arith.constant 0 : index
    %297 = vector.load %arg9[%c2_345, %c0_346] : memref<36x128xbf16, #tpu.memory_space<vmem>>, vector<16x128xbf16>
    %c0_347 = arith.constant 0 : index
    %c256_348 = arith.constant 256 : index
    %298 = vector.load %arg10[%c0_347, %c256_348] : memref<32x384xbf16, #tpu.memory_space<vmem>>, vector<16x128xbf16>
    tpu.vector_store %arg10[%c0_347, %c256_348], %297 {strides = array<i32>} : memref<32x384xbf16, #tpu.memory_space<vmem>>, vector<16x128xbf16>,
    %c18_349 = arith.constant 18 : index
    %c0_350 = arith.constant 0 : index
    %299 = vector.load %arg9[%c18_349, %c0_350] : memref<36x128xbf16, #tpu.memory_space<vmem>>, vector<16x128xbf16>
    %c16_351 = arith.constant 16 : index
    %c0_352 = arith.constant 0 : index
    %300 = vector.load %arg10[%c16_351, %c0_352] : memref<32x384xbf16, #tpu.memory_space<vmem>>, vector<16x128xbf16>
    tpu.vector_store %arg10[%c16_351, %c0_352], %299 {strides = array<i32>} : memref<32x384xbf16, #tpu.memory_space<vmem>>, vector<16x128xbf16>,
    %c19_353 = arith.constant 19 : index
    %c0_354 = arith.constant 0 : index
    %301 = vector.load %arg9[%c19_353, %c0_354] : memref<36x128xbf16, #tpu.memory_space<vmem>>, vector<16x128xbf16>
    %c16_355 = arith.constant 16 : index
    %c128_356 = arith.constant 128 : index
    %302 = vector.load %arg10[%c16_355, %c128_356] : memref<32x384xbf16, #tpu.memory_space<vmem>>, vector<16x128xbf16>
    tpu.vector_store %arg10[%c16_355, %c128_356], %301 {strides = array<i32>} : memref<32x384xbf16, #tpu.memory_space<vmem>>, vector<16x128xbf16>,
    %c20_357 = arith.constant 20 : index
    %c0_358 = arith.constant 0 : index
    %303 = vector.load %arg9[%c20_357, %c0_358] : memref<36x128xbf16, #tpu.memory_space<vmem>>, vector<16x128xbf16>
    %c16_359 = arith.constant 16 : index
    %c256_360 = arith.constant 256 : index
    %304 = vector.load %arg10[%c16_359, %c256_360] : memref<32x384xbf16, #tpu.memory_space<vmem>>, vector<16x128xbf16>
    tpu.vector_store %arg10[%c16_359, %c256_360], %303 {strides = array<i32>} : memref<32x384xbf16, #tpu.memory_space<vmem>>, vector<16x128xbf16>,
    %c0_361 = arith.constant 0 : index
    %c0_362 = arith.constant 0 : index
    %305 = vector.load %arg10[%c0_361, %c0_362] : memref<32x384xbf16, #tpu.memory_space<vmem>>, vector<32x384xbf16>
    %c8_363 = arith.constant 8 : index
    %c0_364 = arith.constant 0 : index
    %c0_365 = arith.constant 0 : index
    %306 = vector.load %arg4[%c8_363, %c0_364, %c0_365] : memref<20x384x128xbf16, #tpu.memory_space<vmem>>, vector<1x384x128xbf16>
    %307 = vector.shape_cast %306 : vector<1x384x128xbf16> to vector<384x128xbf16>
    %cst_366 = arith.constant dense<0.000000e+00> : vector<32x128xf32>
    %308 = tpu.matmul %305, %307, %cst_366 {dimension_numbers = #tpu.dot_dimension_numbers<[1], [0], [0], [1], [0, 0, 1, 1], [], []>} : vector<32x384xbf16>, vector<384x128xbf16>, vector<32x128xf32> -> vector<32x128xf32>
    %309 = arith.addf %308, %250 : vector<32x128xf32>
    %c9 = arith.constant 9 : index
    %c0_367 = arith.constant 0 : index
    %310 = vector.load %arg2[%c9, %c0_367] : memref<20x128xf32, #tpu.memory_space<vmem>>, vector<1x128xf32>
    %c9_368 = arith.constant 9 : index
    %c0_369 = arith.constant 0 : index
    %311 = vector.load %arg3[%c9_368, %c0_369] : memref<20x128xf32, #tpu.memory_space<vmem>>, vector<1x128xf32>
    %312 = vector.broadcast %310 : vector<1x128xf32> to vector<32x128xf32>
    %313 = arith.mulf %309, %312 : vector<32x128xf32>
    %314 = vector.broadcast %311 : vector<1x128xf32> to vector<32x128xf32>
    %315 = arith.addf %313, %314 : vector<32x128xf32>
    %cst_370 = arith.constant 0.000000e+00 : f32
    %316 = vector.broadcast %cst_370 : f32 to vector<32x128xf32>
    %317 = arith.maximumf %315, %316 : vector<32x128xf32>
    %318 = arith.truncf %317 : vector<32x128xf32> to vector<32x128xbf16>
    %319 = vector.extract_strided_slice %318 {offsets = [0, 0], sizes = [16, 128], strides = [1, 1]} : vector<32x128xbf16> to vector<16x128xbf16>
    %c1_371 = arith.constant 1 : index
    %c0_372 = arith.constant 0 : index
    %320 = vector.load %arg9[%c1_371, %c0_372] : memref<36x128xbf16, #tpu.memory_space<vmem>>, vector<16x128xbf16>
    tpu.vector_store %arg9[%c1_371, %c0_372], %319 {strides = array<i32>} : memref<36x128xbf16, #tpu.memory_space<vmem>>, vector<16x128xbf16>,
    %321 = vector.extract_strided_slice %318 {offsets = [16, 0], sizes = [16, 128], strides = [1, 1]} : vector<32x128xbf16> to vector<16x128xbf16>
    %c19_373 = arith.constant 19 : index
    %c0_374 = arith.constant 0 : index
    %322 = vector.load %arg9[%c19_373, %c0_374] : memref<36x128xbf16, #tpu.memory_space<vmem>>, vector<16x128xbf16>
    tpu.vector_store %arg9[%c19_373, %c0_374], %321 {strides = array<i32>} : memref<36x128xbf16, #tpu.memory_space<vmem>>, vector<16x128xbf16>,
    %c0_375 = arith.constant 0 : index
    %c0_376 = arith.constant 0 : index
    %323 = vector.load %arg9[%c0_375, %c0_376] : memref<36x128xbf16, #tpu.memory_space<vmem>>, vector<16x128xbf16>
    %c0_377 = arith.constant 0 : index
    %c0_378 = arith.constant 0 : index
    %324 = vector.load %arg10[%c0_377, %c0_378] : memref<32x384xbf16, #tpu.memory_space<vmem>>, vector<16x128xbf16>
    tpu.vector_store %arg10[%c0_377, %c0_378], %323 {strides = array<i32>} : memref<32x384xbf16, #tpu.memory_space<vmem>>, vector<16x128xbf16>,
    %c1_379 = arith.constant 1 : index
    %c0_380 = arith.constant 0 : index
    %325 = vector.load %arg9[%c1_379, %c0_380] : memref<36x128xbf16, #tpu.memory_space<vmem>>, vector<16x128xbf16>
    %c0_381 = arith.constant 0 : index
    %c128_382 = arith.constant 128 : index
    %326 = vector.load %arg10[%c0_381, %c128_382] : memref<32x384xbf16, #tpu.memory_space<vmem>>, vector<16x128xbf16>
    tpu.vector_store %arg10[%c0_381, %c128_382], %325 {strides = array<i32>} : memref<32x384xbf16, #tpu.memory_space<vmem>>, vector<16x128xbf16>,
    %c2_383 = arith.constant 2 : index
    %c0_384 = arith.constant 0 : index
    %327 = vector.load %arg9[%c2_383, %c0_384] : memref<36x128xbf16, #tpu.memory_space<vmem>>, vector<16x128xbf16>
    %c0_385 = arith.constant 0 : index
    %c256_386 = arith.constant 256 : index
    %328 = vector.load %arg10[%c0_385, %c256_386] : memref<32x384xbf16, #tpu.memory_space<vmem>>, vector<16x128xbf16>
    tpu.vector_store %arg10[%c0_385, %c256_386], %327 {strides = array<i32>} : memref<32x384xbf16, #tpu.memory_space<vmem>>, vector<16x128xbf16>,
    %c18_387 = arith.constant 18 : index
    %c0_388 = arith.constant 0 : index
    %329 = vector.load %arg9[%c18_387, %c0_388] : memref<36x128xbf16, #tpu.memory_space<vmem>>, vector<16x128xbf16>
    %c16_389 = arith.constant 16 : index
    %c0_390 = arith.constant 0 : index
    %330 = vector.load %arg10[%c16_389, %c0_390] : memref<32x384xbf16, #tpu.memory_space<vmem>>, vector<16x128xbf16>
    tpu.vector_store %arg10[%c16_389, %c0_390], %329 {strides = array<i32>} : memref<32x384xbf16, #tpu.memory_space<vmem>>, vector<16x128xbf16>,
    %c19_391 = arith.constant 19 : index
    %c0_392 = arith.constant 0 : index
    %331 = vector.load %arg9[%c19_391, %c0_392] : memref<36x128xbf16, #tpu.memory_space<vmem>>, vector<16x128xbf16>
    %c16_393 = arith.constant 16 : index
    %c128_394 = arith.constant 128 : index
    %332 = vector.load %arg10[%c16_393, %c128_394] : memref<32x384xbf16, #tpu.memory_space<vmem>>, vector<16x128xbf16>
    tpu.vector_store %arg10[%c16_393, %c128_394], %331 {strides = array<i32>} : memref<32x384xbf16, #tpu.memory_space<vmem>>, vector<16x128xbf16>,
    %c20_395 = arith.constant 20 : index
    %c0_396 = arith.constant 0 : index
    %333 = vector.load %arg9[%c20_395, %c0_396] : memref<36x128xbf16, #tpu.memory_space<vmem>>, vector<16x128xbf16>
    %c16_397 = arith.constant 16 : index
    %c256_398 = arith.constant 256 : index
    %334 = vector.load %arg10[%c16_397, %c256_398] : memref<32x384xbf16, #tpu.memory_space<vmem>>, vector<16x128xbf16>
    tpu.vector_store %arg10[%c16_397, %c256_398], %333 {strides = array<i32>} : memref<32x384xbf16, #tpu.memory_space<vmem>>, vector<16x128xbf16>,
    %c0_399 = arith.constant 0 : index
    %c0_400 = arith.constant 0 : index
    %335 = vector.load %arg10[%c0_399, %c0_400] : memref<32x384xbf16, #tpu.memory_space<vmem>>, vector<32x384xbf16>
    %c9_401 = arith.constant 9 : index
    %c0_402 = arith.constant 0 : index
    %c0_403 = arith.constant 0 : index
    %336 = vector.load %arg4[%c9_401, %c0_402, %c0_403] : memref<20x384x128xbf16, #tpu.memory_space<vmem>>, vector<1x384x128xbf16>
    %337 = vector.shape_cast %336 : vector<1x384x128xbf16> to vector<384x128xbf16>
    %cst_404 = arith.constant dense<0.000000e+00> : vector<32x128xf32>
    %338 = tpu.matmul %335, %337, %cst_404 {dimension_numbers = #tpu.dot_dimension_numbers<[1], [0], [0], [1], [0, 0, 1, 1], [], []>} : vector<32x384xbf16>, vector<384x128xbf16>, vector<32x128xf32> -> vector<32x128xf32>
    %c10 = arith.constant 10 : index
    %c0_405 = arith.constant 0 : index
    %339 = vector.load %arg2[%c10, %c0_405] : memref<20x128xf32, #tpu.memory_space<vmem>>, vector<1x128xf32>
    %c10_406 = arith.constant 10 : index
    %c0_407 = arith.constant 0 : index
    %340 = vector.load %arg3[%c10_406, %c0_407] : memref<20x128xf32, #tpu.memory_space<vmem>>, vector<1x128xf32>
    %341 = vector.broadcast %339 : vector<1x128xf32> to vector<32x128xf32>
    %342 = arith.mulf %338, %341 : vector<32x128xf32>
    %343 = vector.broadcast %340 : vector<1x128xf32> to vector<32x128xf32>
    %344 = arith.addf %342, %343 : vector<32x128xf32>
    %cst_408 = arith.constant 0.000000e+00 : f32
    %345 = vector.broadcast %cst_408 : f32 to vector<32x128xf32>
    %346 = arith.maximumf %344, %345 : vector<32x128xf32>
    %347 = arith.truncf %346 : vector<32x128xf32> to vector<32x128xbf16>
    %348 = vector.extract_strided_slice %347 {offsets = [0, 0], sizes = [16, 128], strides = [1, 1]} : vector<32x128xbf16> to vector<16x128xbf16>
    %c1_409 = arith.constant 1 : index
    %c0_410 = arith.constant 0 : index
    %349 = vector.load %arg9[%c1_409, %c0_410] : memref<36x128xbf16, #tpu.memory_space<vmem>>, vector<16x128xbf16>
    tpu.vector_store %arg9[%c1_409, %c0_410], %348 {strides = array<i32>} : memref<36x128xbf16, #tpu.memory_space<vmem>>, vector<16x128xbf16>,
    %350 = vector.extract_strided_slice %347 {offsets = [16, 0], sizes = [16, 128], strides = [1, 1]} : vector<32x128xbf16> to vector<16x128xbf16>
    %c19_411 = arith.constant 19 : index
    %c0_412 = arith.constant 0 : index
    %351 = vector.load %arg9[%c19_411, %c0_412] : memref<36x128xbf16, #tpu.memory_space<vmem>>, vector<16x128xbf16>
    tpu.vector_store %arg9[%c19_411, %c0_412], %350 {strides = array<i32>} : memref<36x128xbf16, #tpu.memory_space<vmem>>, vector<16x128xbf16>,
    %c0_413 = arith.constant 0 : index
    %c0_414 = arith.constant 0 : index
    %352 = vector.load %arg9[%c0_413, %c0_414] : memref<36x128xbf16, #tpu.memory_space<vmem>>, vector<16x128xbf16>
    %c0_415 = arith.constant 0 : index
    %c0_416 = arith.constant 0 : index
    %353 = vector.load %arg10[%c0_415, %c0_416] : memref<32x384xbf16, #tpu.memory_space<vmem>>, vector<16x128xbf16>
    tpu.vector_store %arg10[%c0_415, %c0_416], %352 {strides = array<i32>} : memref<32x384xbf16, #tpu.memory_space<vmem>>, vector<16x128xbf16>,
    %c1_417 = arith.constant 1 : index
    %c0_418 = arith.constant 0 : index
    %354 = vector.load %arg9[%c1_417, %c0_418] : memref<36x128xbf16, #tpu.memory_space<vmem>>, vector<16x128xbf16>
    %c0_419 = arith.constant 0 : index
    %c128_420 = arith.constant 128 : index
    %355 = vector.load %arg10[%c0_419, %c128_420] : memref<32x384xbf16, #tpu.memory_space<vmem>>, vector<16x128xbf16>
    tpu.vector_store %arg10[%c0_419, %c128_420], %354 {strides = array<i32>} : memref<32x384xbf16, #tpu.memory_space<vmem>>, vector<16x128xbf16>,
    %c2_421 = arith.constant 2 : index
    %c0_422 = arith.constant 0 : index
    %356 = vector.load %arg9[%c2_421, %c0_422] : memref<36x128xbf16, #tpu.memory_space<vmem>>, vector<16x128xbf16>
    %c0_423 = arith.constant 0 : index
    %c256_424 = arith.constant 256 : index
    %357 = vector.load %arg10[%c0_423, %c256_424] : memref<32x384xbf16, #tpu.memory_space<vmem>>, vector<16x128xbf16>
    tpu.vector_store %arg10[%c0_423, %c256_424], %356 {strides = array<i32>} : memref<32x384xbf16, #tpu.memory_space<vmem>>, vector<16x128xbf16>,
    %c18_425 = arith.constant 18 : index
    %c0_426 = arith.constant 0 : index
    %358 = vector.load %arg9[%c18_425, %c0_426] : memref<36x128xbf16, #tpu.memory_space<vmem>>, vector<16x128xbf16>
    %c16_427 = arith.constant 16 : index
    %c0_428 = arith.constant 0 : index
    %359 = vector.load %arg10[%c16_427, %c0_428] : memref<32x384xbf16, #tpu.memory_space<vmem>>, vector<16x128xbf16>
    tpu.vector_store %arg10[%c16_427, %c0_428], %358 {strides = array<i32>} : memref<32x384xbf16, #tpu.memory_space<vmem>>, vector<16x128xbf16>,
    %c19_429 = arith.constant 19 : index
    %c0_430 = arith.constant 0 : index
    %360 = vector.load %arg9[%c19_429, %c0_430] : memref<36x128xbf16, #tpu.memory_space<vmem>>, vector<16x128xbf16>
    %c16_431 = arith.constant 16 : index
    %c128_432 = arith.constant 128 : index
    %361 = vector.load %arg10[%c16_431, %c128_432] : memref<32x384xbf16, #tpu.memory_space<vmem>>, vector<16x128xbf16>
    tpu.vector_store %arg10[%c16_431, %c128_432], %360 {strides = array<i32>} : memref<32x384xbf16, #tpu.memory_space<vmem>>, vector<16x128xbf16>,
    %c20_433 = arith.constant 20 : index
    %c0_434 = arith.constant 0 : index
    %362 = vector.load %arg9[%c20_433, %c0_434] : memref<36x128xbf16, #tpu.memory_space<vmem>>, vector<16x128xbf16>
    %c16_435 = arith.constant 16 : index
    %c256_436 = arith.constant 256 : index
    %363 = vector.load %arg10[%c16_435, %c256_436] : memref<32x384xbf16, #tpu.memory_space<vmem>>, vector<16x128xbf16>
    tpu.vector_store %arg10[%c16_435, %c256_436], %362 {strides = array<i32>} : memref<32x384xbf16, #tpu.memory_space<vmem>>, vector<16x128xbf16>,
    %c0_437 = arith.constant 0 : index
    %c0_438 = arith.constant 0 : index
    %364 = vector.load %arg10[%c0_437, %c0_438] : memref<32x384xbf16, #tpu.memory_space<vmem>>, vector<32x384xbf16>
    %c10_439 = arith.constant 10 : index
    %c0_440 = arith.constant 0 : index
    %c0_441 = arith.constant 0 : index
    %365 = vector.load %arg4[%c10_439, %c0_440, %c0_441] : memref<20x384x128xbf16, #tpu.memory_space<vmem>>, vector<1x384x128xbf16>
    %366 = vector.shape_cast %365 : vector<1x384x128xbf16> to vector<384x128xbf16>
    %cst_442 = arith.constant dense<0.000000e+00> : vector<32x128xf32>
    %367 = tpu.matmul %364, %366, %cst_442 {dimension_numbers = #tpu.dot_dimension_numbers<[1], [0], [0], [1], [0, 0, 1, 1], [], []>} : vector<32x384xbf16>, vector<384x128xbf16>, vector<32x128xf32> -> vector<32x128xf32>
    %368 = arith.addf %367, %309 : vector<32x128xf32>
    %c11 = arith.constant 11 : index
    %c0_443 = arith.constant 0 : index
    %369 = vector.load %arg2[%c11, %c0_443] : memref<20x128xf32, #tpu.memory_space<vmem>>, vector<1x128xf32>
    %c11_444 = arith.constant 11 : index
    %c0_445 = arith.constant 0 : index
    %370 = vector.load %arg3[%c11_444, %c0_445] : memref<20x128xf32, #tpu.memory_space<vmem>>, vector<1x128xf32>
    %371 = vector.broadcast %369 : vector<1x128xf32> to vector<32x128xf32>
    %372 = arith.mulf %368, %371 : vector<32x128xf32>
    %373 = vector.broadcast %370 : vector<1x128xf32> to vector<32x128xf32>
    %374 = arith.addf %372, %373 : vector<32x128xf32>
    %cst_446 = arith.constant 0.000000e+00 : f32
    %375 = vector.broadcast %cst_446 : f32 to vector<32x128xf32>
    %376 = arith.maximumf %374, %375 : vector<32x128xf32>
    %377 = arith.truncf %376 : vector<32x128xf32> to vector<32x128xbf16>
    %378 = vector.extract_strided_slice %377 {offsets = [0, 0], sizes = [16, 128], strides = [1, 1]} : vector<32x128xbf16> to vector<16x128xbf16>
    %c1_447 = arith.constant 1 : index
    %c0_448 = arith.constant 0 : index
    %379 = vector.load %arg9[%c1_447, %c0_448] : memref<36x128xbf16, #tpu.memory_space<vmem>>, vector<16x128xbf16>
    tpu.vector_store %arg9[%c1_447, %c0_448], %378 {strides = array<i32>} : memref<36x128xbf16, #tpu.memory_space<vmem>>, vector<16x128xbf16>,
    %380 = vector.extract_strided_slice %377 {offsets = [16, 0], sizes = [16, 128], strides = [1, 1]} : vector<32x128xbf16> to vector<16x128xbf16>
    %c19_449 = arith.constant 19 : index
    %c0_450 = arith.constant 0 : index
    %381 = vector.load %arg9[%c19_449, %c0_450] : memref<36x128xbf16, #tpu.memory_space<vmem>>, vector<16x128xbf16>
    tpu.vector_store %arg9[%c19_449, %c0_450], %380 {strides = array<i32>} : memref<36x128xbf16, #tpu.memory_space<vmem>>, vector<16x128xbf16>,
    %c0_451 = arith.constant 0 : index
    %c0_452 = arith.constant 0 : index
    %382 = vector.load %arg9[%c0_451, %c0_452] : memref<36x128xbf16, #tpu.memory_space<vmem>>, vector<16x128xbf16>
    %c0_453 = arith.constant 0 : index
    %c0_454 = arith.constant 0 : index
    %383 = vector.load %arg10[%c0_453, %c0_454] : memref<32x384xbf16, #tpu.memory_space<vmem>>, vector<16x128xbf16>
    tpu.vector_store %arg10[%c0_453, %c0_454], %382 {strides = array<i32>} : memref<32x384xbf16, #tpu.memory_space<vmem>>, vector<16x128xbf16>,
    %c1_455 = arith.constant 1 : index
    %c0_456 = arith.constant 0 : index
    %384 = vector.load %arg9[%c1_455, %c0_456] : memref<36x128xbf16, #tpu.memory_space<vmem>>, vector<16x128xbf16>
    %c0_457 = arith.constant 0 : index
    %c128_458 = arith.constant 128 : index
    %385 = vector.load %arg10[%c0_457, %c128_458] : memref<32x384xbf16, #tpu.memory_space<vmem>>, vector<16x128xbf16>
    tpu.vector_store %arg10[%c0_457, %c128_458], %384 {strides = array<i32>} : memref<32x384xbf16, #tpu.memory_space<vmem>>, vector<16x128xbf16>,
    %c2_459 = arith.constant 2 : index
    %c0_460 = arith.constant 0 : index
    %386 = vector.load %arg9[%c2_459, %c0_460] : memref<36x128xbf16, #tpu.memory_space<vmem>>, vector<16x128xbf16>
    %c0_461 = arith.constant 0 : index
    %c256_462 = arith.constant 256 : index
    %387 = vector.load %arg10[%c0_461, %c256_462] : memref<32x384xbf16, #tpu.memory_space<vmem>>, vector<16x128xbf16>
    tpu.vector_store %arg10[%c0_461, %c256_462], %386 {strides = array<i32>} : memref<32x384xbf16, #tpu.memory_space<vmem>>, vector<16x128xbf16>,
    %c18_463 = arith.constant 18 : index
    %c0_464 = arith.constant 0 : index
    %388 = vector.load %arg9[%c18_463, %c0_464] : memref<36x128xbf16, #tpu.memory_space<vmem>>, vector<16x128xbf16>
    %c16_465 = arith.constant 16 : index
    %c0_466 = arith.constant 0 : index
    %389 = vector.load %arg10[%c16_465, %c0_466] : memref<32x384xbf16, #tpu.memory_space<vmem>>, vector<16x128xbf16>
    tpu.vector_store %arg10[%c16_465, %c0_466], %388 {strides = array<i32>} : memref<32x384xbf16, #tpu.memory_space<vmem>>, vector<16x128xbf16>,
    %c19_467 = arith.constant 19 : index
    %c0_468 = arith.constant 0 : index
    %390 = vector.load %arg9[%c19_467, %c0_468] : memref<36x128xbf16, #tpu.memory_space<vmem>>, vector<16x128xbf16>
    %c16_469 = arith.constant 16 : index
    %c128_470 = arith.constant 128 : index
    %391 = vector.load %arg10[%c16_469, %c128_470] : memref<32x384xbf16, #tpu.memory_space<vmem>>, vector<16x128xbf16>
    tpu.vector_store %arg10[%c16_469, %c128_470], %390 {strides = array<i32>} : memref<32x384xbf16, #tpu.memory_space<vmem>>, vector<16x128xbf16>,
    %c20_471 = arith.constant 20 : index
    %c0_472 = arith.constant 0 : index
    %392 = vector.load %arg9[%c20_471, %c0_472] : memref<36x128xbf16, #tpu.memory_space<vmem>>, vector<16x128xbf16>
    %c16_473 = arith.constant 16 : index
    %c256_474 = arith.constant 256 : index
    %393 = vector.load %arg10[%c16_473, %c256_474] : memref<32x384xbf16, #tpu.memory_space<vmem>>, vector<16x128xbf16>
    tpu.vector_store %arg10[%c16_473, %c256_474], %392 {strides = array<i32>} : memref<32x384xbf16, #tpu.memory_space<vmem>>, vector<16x128xbf16>,
    %c0_475 = arith.constant 0 : index
    %c0_476 = arith.constant 0 : index
    %394 = vector.load %arg10[%c0_475, %c0_476] : memref<32x384xbf16, #tpu.memory_space<vmem>>, vector<32x384xbf16>
    %c11_477 = arith.constant 11 : index
    %c0_478 = arith.constant 0 : index
    %c0_479 = arith.constant 0 : index
    %395 = vector.load %arg4[%c11_477, %c0_478, %c0_479] : memref<20x384x128xbf16, #tpu.memory_space<vmem>>, vector<1x384x128xbf16>
    %396 = vector.shape_cast %395 : vector<1x384x128xbf16> to vector<384x128xbf16>
    %cst_480 = arith.constant dense<0.000000e+00> : vector<32x128xf32>
    %397 = tpu.matmul %394, %396, %cst_480 {dimension_numbers = #tpu.dot_dimension_numbers<[1], [0], [0], [1], [0, 0, 1, 1], [], []>} : vector<32x384xbf16>, vector<384x128xbf16>, vector<32x128xf32> -> vector<32x128xf32>
    %c12 = arith.constant 12 : index
    %c0_481 = arith.constant 0 : index
    %398 = vector.load %arg2[%c12, %c0_481] : memref<20x128xf32, #tpu.memory_space<vmem>>, vector<1x128xf32>
    %c12_482 = arith.constant 12 : index
    %c0_483 = arith.constant 0 : index
    %399 = vector.load %arg3[%c12_482, %c0_483] : memref<20x128xf32, #tpu.memory_space<vmem>>, vector<1x128xf32>
    %400 = vector.broadcast %398 : vector<1x128xf32> to vector<32x128xf32>
    %401 = arith.mulf %397, %400 : vector<32x128xf32>
    %402 = vector.broadcast %399 : vector<1x128xf32> to vector<32x128xf32>
    %403 = arith.addf %401, %402 : vector<32x128xf32>
    %cst_484 = arith.constant 0.000000e+00 : f32
    %404 = vector.broadcast %cst_484 : f32 to vector<32x128xf32>
    %405 = arith.maximumf %403, %404 : vector<32x128xf32>
    %406 = arith.truncf %405 : vector<32x128xf32> to vector<32x128xbf16>
    %407 = vector.extract_strided_slice %406 {offsets = [0, 0], sizes = [16, 128], strides = [1, 1]} : vector<32x128xbf16> to vector<16x128xbf16>
    %c1_485 = arith.constant 1 : index
    %c0_486 = arith.constant 0 : index
    %408 = vector.load %arg9[%c1_485, %c0_486] : memref<36x128xbf16, #tpu.memory_space<vmem>>, vector<16x128xbf16>
    tpu.vector_store %arg9[%c1_485, %c0_486], %407 {strides = array<i32>} : memref<36x128xbf16, #tpu.memory_space<vmem>>, vector<16x128xbf16>,
    %409 = vector.extract_strided_slice %406 {offsets = [16, 0], sizes = [16, 128], strides = [1, 1]} : vector<32x128xbf16> to vector<16x128xbf16>
    %c19_487 = arith.constant 19 : index
    %c0_488 = arith.constant 0 : index
    %410 = vector.load %arg9[%c19_487, %c0_488] : memref<36x128xbf16, #tpu.memory_space<vmem>>, vector<16x128xbf16>
    tpu.vector_store %arg9[%c19_487, %c0_488], %409 {strides = array<i32>} : memref<36x128xbf16, #tpu.memory_space<vmem>>, vector<16x128xbf16>,
    %c0_489 = arith.constant 0 : index
    %c0_490 = arith.constant 0 : index
    %411 = vector.load %arg9[%c0_489, %c0_490] : memref<36x128xbf16, #tpu.memory_space<vmem>>, vector<16x128xbf16>
    %c0_491 = arith.constant 0 : index
    %c0_492 = arith.constant 0 : index
    %412 = vector.load %arg10[%c0_491, %c0_492] : memref<32x384xbf16, #tpu.memory_space<vmem>>, vector<16x128xbf16>
    tpu.vector_store %arg10[%c0_491, %c0_492], %411 {strides = array<i32>} : memref<32x384xbf16, #tpu.memory_space<vmem>>, vector<16x128xbf16>,
    %c1_493 = arith.constant 1 : index
    %c0_494 = arith.constant 0 : index
    %413 = vector.load %arg9[%c1_493, %c0_494] : memref<36x128xbf16, #tpu.memory_space<vmem>>, vector<16x128xbf16>
    %c0_495 = arith.constant 0 : index
    %c128_496 = arith.constant 128 : index
    %414 = vector.load %arg10[%c0_495, %c128_496] : memref<32x384xbf16, #tpu.memory_space<vmem>>, vector<16x128xbf16>
    tpu.vector_store %arg10[%c0_495, %c128_496], %413 {strides = array<i32>} : memref<32x384xbf16, #tpu.memory_space<vmem>>, vector<16x128xbf16>,
    %c2_497 = arith.constant 2 : index
    %c0_498 = arith.constant 0 : index
    %415 = vector.load %arg9[%c2_497, %c0_498] : memref<36x128xbf16, #tpu.memory_space<vmem>>, vector<16x128xbf16>
    %c0_499 = arith.constant 0 : index
    %c256_500 = arith.constant 256 : index
    %416 = vector.load %arg10[%c0_499, %c256_500] : memref<32x384xbf16, #tpu.memory_space<vmem>>, vector<16x128xbf16>
    tpu.vector_store %arg10[%c0_499, %c256_500], %415 {strides = array<i32>} : memref<32x384xbf16, #tpu.memory_space<vmem>>, vector<16x128xbf16>,
    %c18_501 = arith.constant 18 : index
    %c0_502 = arith.constant 0 : index
    %417 = vector.load %arg9[%c18_501, %c0_502] : memref<36x128xbf16, #tpu.memory_space<vmem>>, vector<16x128xbf16>
    %c16_503 = arith.constant 16 : index
    %c0_504 = arith.constant 0 : index
    %418 = vector.load %arg10[%c16_503, %c0_504] : memref<32x384xbf16, #tpu.memory_space<vmem>>, vector<16x128xbf16>
    tpu.vector_store %arg10[%c16_503, %c0_504], %417 {strides = array<i32>} : memref<32x384xbf16, #tpu.memory_space<vmem>>, vector<16x128xbf16>,
    %c19_505 = arith.constant 19 : index
    %c0_506 = arith.constant 0 : index
    %419 = vector.load %arg9[%c19_505, %c0_506] : memref<36x128xbf16, #tpu.memory_space<vmem>>, vector<16x128xbf16>
    %c16_507 = arith.constant 16 : index
    %c128_508 = arith.constant 128 : index
    %420 = vector.load %arg10[%c16_507, %c128_508] : memref<32x384xbf16, #tpu.memory_space<vmem>>, vector<16x128xbf16>
    tpu.vector_store %arg10[%c16_507, %c128_508], %419 {strides = array<i32>} : memref<32x384xbf16, #tpu.memory_space<vmem>>, vector<16x128xbf16>,
    %c20_509 = arith.constant 20 : index
    %c0_510 = arith.constant 0 : index
    %421 = vector.load %arg9[%c20_509, %c0_510] : memref<36x128xbf16, #tpu.memory_space<vmem>>, vector<16x128xbf16>
    %c16_511 = arith.constant 16 : index
    %c256_512 = arith.constant 256 : index
    %422 = vector.load %arg10[%c16_511, %c256_512] : memref<32x384xbf16, #tpu.memory_space<vmem>>, vector<16x128xbf16>
    tpu.vector_store %arg10[%c16_511, %c256_512], %421 {strides = array<i32>} : memref<32x384xbf16, #tpu.memory_space<vmem>>, vector<16x128xbf16>,
    %c0_513 = arith.constant 0 : index
    %c0_514 = arith.constant 0 : index
    %423 = vector.load %arg10[%c0_513, %c0_514] : memref<32x384xbf16, #tpu.memory_space<vmem>>, vector<32x384xbf16>
    %c12_515 = arith.constant 12 : index
    %c0_516 = arith.constant 0 : index
    %c0_517 = arith.constant 0 : index
    %424 = vector.load %arg4[%c12_515, %c0_516, %c0_517] : memref<20x384x128xbf16, #tpu.memory_space<vmem>>, vector<1x384x128xbf16>
    %425 = vector.shape_cast %424 : vector<1x384x128xbf16> to vector<384x128xbf16>
    %cst_518 = arith.constant dense<0.000000e+00> : vector<32x128xf32>
    %426 = tpu.matmul %423, %425, %cst_518 {dimension_numbers = #tpu.dot_dimension_numbers<[1], [0], [0], [1], [0, 0, 1, 1], [], []>} : vector<32x384xbf16>, vector<384x128xbf16>, vector<32x128xf32> -> vector<32x128xf32>
    %427 = arith.addf %426, %368 : vector<32x128xf32>
    %c4_519 = arith.constant 4 : index
    %c0_520 = arith.constant 0 : index
    %428 = vector.load %arg5[%c4_519, %c0_520] : memref<15x128xf32, #tpu.memory_space<vmem>>, vector<1x128xf32>
    %c4_521 = arith.constant 4 : index
    %c0_522 = arith.constant 0 : index
    %429 = vector.load %arg6[%c4_521, %c0_522] : memref<15x128xf32, #tpu.memory_space<vmem>>, vector<1x128xf32>
    %430 = vector.broadcast %428 : vector<1x128xf32> to vector<32x128xf32>
    %431 = arith.mulf %309, %430 : vector<32x128xf32>
    %432 = vector.broadcast %429 : vector<1x128xf32> to vector<32x128xf32>
    %433 = arith.addf %431, %432 : vector<32x128xf32>
    %cst_523 = arith.constant 0.000000e+00 : f32
    %434 = vector.broadcast %cst_523 : f32 to vector<32x128xf32>
    %435 = arith.maximumf %433, %434 : vector<32x128xf32>
    %436 = arith.truncf %435 : vector<32x128xf32> to vector<32x128xbf16>
    %c5_524 = arith.constant 5 : index
    %c0_525 = arith.constant 0 : index
    %437 = vector.load %arg5[%c5_524, %c0_525] : memref<15x128xf32, #tpu.memory_space<vmem>>, vector<1x128xf32>
    %c5_526 = arith.constant 5 : index
    %c0_527 = arith.constant 0 : index
    %438 = vector.load %arg6[%c5_526, %c0_527] : memref<15x128xf32, #tpu.memory_space<vmem>>, vector<1x128xf32>
    %439 = vector.broadcast %437 : vector<1x128xf32> to vector<32x128xf32>
    %440 = arith.mulf %368, %439 : vector<32x128xf32>
    %441 = vector.broadcast %438 : vector<1x128xf32> to vector<32x128xf32>
    %442 = arith.addf %440, %441 : vector<32x128xf32>
    %cst_528 = arith.constant 0.000000e+00 : f32
    %443 = vector.broadcast %cst_528 : f32 to vector<32x128xf32>
    %444 = arith.maximumf %442, %443 : vector<32x128xf32>
    %445 = arith.truncf %444 : vector<32x128xf32> to vector<32x128xbf16>
    %c6_529 = arith.constant 6 : index
    %c0_530 = arith.constant 0 : index
    %446 = vector.load %arg5[%c6_529, %c0_530] : memref<15x128xf32, #tpu.memory_space<vmem>>, vector<1x128xf32>
    %c6_531 = arith.constant 6 : index
    %c0_532 = arith.constant 0 : index
    %447 = vector.load %arg6[%c6_531, %c0_532] : memref<15x128xf32, #tpu.memory_space<vmem>>, vector<1x128xf32>
    %448 = vector.broadcast %446 : vector<1x128xf32> to vector<32x128xf32>
    %449 = arith.mulf %427, %448 : vector<32x128xf32>
    %450 = vector.broadcast %447 : vector<1x128xf32> to vector<32x128xf32>
    %451 = arith.addf %449, %450 : vector<32x128xf32>
    %cst_533 = arith.constant 0.000000e+00 : f32
    %452 = vector.broadcast %cst_533 : f32 to vector<32x128xf32>
    %453 = arith.maximumf %451, %452 : vector<32x128xf32>
    %454 = arith.truncf %453 : vector<32x128xf32> to vector<32x128xbf16>
    %c7_534 = arith.constant 7 : index
    %c0_535 = arith.constant 0 : index
    %455 = vector.load %arg5[%c7_534, %c0_535] : memref<15x128xf32, #tpu.memory_space<vmem>>, vector<1x128xf32>
    %c7_536 = arith.constant 7 : index
    %c0_537 = arith.constant 0 : index
    %456 = vector.load %arg6[%c7_536, %c0_537] : memref<15x128xf32, #tpu.memory_space<vmem>>, vector<1x128xf32>
    %457 = vector.broadcast %455 : vector<1x128xf32> to vector<32x128xf32>
    %458 = arith.mulf %34, %457 : vector<32x128xf32>
    %459 = vector.broadcast %456 : vector<1x128xf32> to vector<32x128xf32>
    %460 = arith.addf %458, %459 : vector<32x128xf32>
    %cst_538 = arith.constant 0.000000e+00 : f32
    %461 = vector.broadcast %cst_538 : f32 to vector<32x128xf32>
    %462 = arith.maximumf %460, %461 : vector<32x128xf32>
    %463 = arith.truncf %462 : vector<32x128xf32> to vector<32x128xbf16>
    %c8_539 = arith.constant 8 : index
    %c0_540 = arith.constant 0 : index
    %464 = vector.load %arg5[%c8_539, %c0_540] : memref<15x128xf32, #tpu.memory_space<vmem>>, vector<1x128xf32>
    %c8_541 = arith.constant 8 : index
    %c0_542 = arith.constant 0 : index
    %465 = vector.load %arg6[%c8_541, %c0_542] : memref<15x128xf32, #tpu.memory_space<vmem>>, vector<1x128xf32>
    %466 = vector.broadcast %464 : vector<1x128xf32> to vector<32x128xf32>
    %467 = arith.mulf %250, %466 : vector<32x128xf32>
    %468 = vector.broadcast %465 : vector<1x128xf32> to vector<32x128xf32>
    %469 = arith.addf %467, %468 : vector<32x128xf32>
    %cst_543 = arith.constant 0.000000e+00 : f32
    %470 = vector.broadcast %cst_543 : f32 to vector<32x128xf32>
    %471 = arith.maximumf %469, %470 : vector<32x128xf32>
    %472 = arith.truncf %471 : vector<32x128xf32> to vector<32x128xbf16>
    %473 = tpu.concatenate %436, %445, %454, %463, %472 in 1 : vector<32x128xbf16>, vector<32x128xbf16>, vector<32x128xbf16>, vector<32x128xbf16>, vector<32x128xbf16> -> vector<32x640xbf16>
    %c512 = arith.constant 512 : index
    %c0_544 = arith.constant 0 : index
    %474 = vector.load %arg7[%c512, %c0_544] : memref<1920x128xbf16, #tpu.memory_space<vmem>>, vector<640x128xbf16>
    %cst_545 = arith.constant dense<0.000000e+00> : vector<32x128xf32>
    %475 = tpu.matmul %473, %474, %cst_545 {dimension_numbers = #tpu.dot_dimension_numbers<[1], [0], [0], [1], [0, 0, 1, 1], [], []>} : vector<32x640xbf16>, vector<640x128xbf16>, vector<32x128xf32> -> vector<32x128xf32>
    %c13 = arith.constant 13 : index
    %c0_546 = arith.constant 0 : index
    %476 = vector.load %arg2[%c13, %c0_546] : memref<20x128xf32, #tpu.memory_space<vmem>>, vector<1x128xf32>
    %c13_547 = arith.constant 13 : index
    %c0_548 = arith.constant 0 : index
    %477 = vector.load %arg3[%c13_547, %c0_548] : memref<20x128xf32, #tpu.memory_space<vmem>>, vector<1x128xf32>
    %478 = vector.broadcast %476 : vector<1x128xf32> to vector<32x128xf32>
    %479 = arith.mulf %475, %478 : vector<32x128xf32>
    %480 = vector.broadcast %477 : vector<1x128xf32> to vector<32x128xf32>
    %481 = arith.addf %479, %480 : vector<32x128xf32>
    %cst_549 = arith.constant 0.000000e+00 : f32
    %482 = vector.broadcast %cst_549 : f32 to vector<32x128xf32>
    %483 = arith.maximumf %481, %482 : vector<32x128xf32>
    %484 = arith.truncf %483 : vector<32x128xf32> to vector<32x128xbf16>
    %485 = vector.extract_strided_slice %484 {offsets = [0, 0], sizes = [16, 128], strides = [1, 1]} : vector<32x128xbf16> to vector<16x128xbf16>
    %c1_550 = arith.constant 1 : index
    %c0_551 = arith.constant 0 : index
    %486 = vector.load %arg9[%c1_550, %c0_551] : memref<36x128xbf16, #tpu.memory_space<vmem>>, vector<16x128xbf16>
    tpu.vector_store %arg9[%c1_550, %c0_551], %485 {strides = array<i32>} : memref<36x128xbf16, #tpu.memory_space<vmem>>, vector<16x128xbf16>,
    %487 = vector.extract_strided_slice %484 {offsets = [16, 0], sizes = [16, 128], strides = [1, 1]} : vector<32x128xbf16> to vector<16x128xbf16>
    %c19_552 = arith.constant 19 : index
    %c0_553 = arith.constant 0 : index
    %488 = vector.load %arg9[%c19_552, %c0_553] : memref<36x128xbf16, #tpu.memory_space<vmem>>, vector<16x128xbf16>
    tpu.vector_store %arg9[%c19_552, %c0_553], %487 {strides = array<i32>} : memref<36x128xbf16, #tpu.memory_space<vmem>>, vector<16x128xbf16>,
    %c0_554 = arith.constant 0 : index
    %c0_555 = arith.constant 0 : index
    %489 = vector.load %arg9[%c0_554, %c0_555] : memref<36x128xbf16, #tpu.memory_space<vmem>>, vector<16x128xbf16>
    %c0_556 = arith.constant 0 : index
    %c0_557 = arith.constant 0 : index
    %490 = vector.load %arg10[%c0_556, %c0_557] : memref<32x384xbf16, #tpu.memory_space<vmem>>, vector<16x128xbf16>
    tpu.vector_store %arg10[%c0_556, %c0_557], %489 {strides = array<i32>} : memref<32x384xbf16, #tpu.memory_space<vmem>>, vector<16x128xbf16>,
    %c1_558 = arith.constant 1 : index
    %c0_559 = arith.constant 0 : index
    %491 = vector.load %arg9[%c1_558, %c0_559] : memref<36x128xbf16, #tpu.memory_space<vmem>>, vector<16x128xbf16>
    %c0_560 = arith.constant 0 : index
    %c128_561 = arith.constant 128 : index
    %492 = vector.load %arg10[%c0_560, %c128_561] : memref<32x384xbf16, #tpu.memory_space<vmem>>, vector<16x128xbf16>
    tpu.vector_store %arg10[%c0_560, %c128_561], %491 {strides = array<i32>} : memref<32x384xbf16, #tpu.memory_space<vmem>>, vector<16x128xbf16>,
    %c2_562 = arith.constant 2 : index
    %c0_563 = arith.constant 0 : index
    %493 = vector.load %arg9[%c2_562, %c0_563] : memref<36x128xbf16, #tpu.memory_space<vmem>>, vector<16x128xbf16>
    %c0_564 = arith.constant 0 : index
    %c256_565 = arith.constant 256 : index
    %494 = vector.load %arg10[%c0_564, %c256_565] : memref<32x384xbf16, #tpu.memory_space<vmem>>, vector<16x128xbf16>
    tpu.vector_store %arg10[%c0_564, %c256_565], %493 {strides = array<i32>} : memref<32x384xbf16, #tpu.memory_space<vmem>>, vector<16x128xbf16>,
    %c18_566 = arith.constant 18 : index
    %c0_567 = arith.constant 0 : index
    %495 = vector.load %arg9[%c18_566, %c0_567] : memref<36x128xbf16, #tpu.memory_space<vmem>>, vector<16x128xbf16>
    %c16_568 = arith.constant 16 : index
    %c0_569 = arith.constant 0 : index
    %496 = vector.load %arg10[%c16_568, %c0_569] : memref<32x384xbf16, #tpu.memory_space<vmem>>, vector<16x128xbf16>
    tpu.vector_store %arg10[%c16_568, %c0_569], %495 {strides = array<i32>} : memref<32x384xbf16, #tpu.memory_space<vmem>>, vector<16x128xbf16>,
    %c19_570 = arith.constant 19 : index
    %c0_571 = arith.constant 0 : index
    %497 = vector.load %arg9[%c19_570, %c0_571] : memref<36x128xbf16, #tpu.memory_space<vmem>>, vector<16x128xbf16>
    %c16_572 = arith.constant 16 : index
    %c128_573 = arith.constant 128 : index
    %498 = vector.load %arg10[%c16_572, %c128_573] : memref<32x384xbf16, #tpu.memory_space<vmem>>, vector<16x128xbf16>
    tpu.vector_store %arg10[%c16_572, %c128_573], %497 {strides = array<i32>} : memref<32x384xbf16, #tpu.memory_space<vmem>>, vector<16x128xbf16>,
    %c20_574 = arith.constant 20 : index
    %c0_575 = arith.constant 0 : index
    %499 = vector.load %arg9[%c20_574, %c0_575] : memref<36x128xbf16, #tpu.memory_space<vmem>>, vector<16x128xbf16>
    %c16_576 = arith.constant 16 : index
    %c256_577 = arith.constant 256 : index
    %500 = vector.load %arg10[%c16_576, %c256_577] : memref<32x384xbf16, #tpu.memory_space<vmem>>, vector<16x128xbf16>
    tpu.vector_store %arg10[%c16_576, %c256_577], %499 {strides = array<i32>} : memref<32x384xbf16, #tpu.memory_space<vmem>>, vector<16x128xbf16>,
    %c0_578 = arith.constant 0 : index
    %c0_579 = arith.constant 0 : index
    %501 = vector.load %arg10[%c0_578, %c0_579] : memref<32x384xbf16, #tpu.memory_space<vmem>>, vector<32x384xbf16>
    %c13_580 = arith.constant 13 : index
    %c0_581 = arith.constant 0 : index
    %c0_582 = arith.constant 0 : index
    %502 = vector.load %arg4[%c13_580, %c0_581, %c0_582] : memref<20x384x128xbf16, #tpu.memory_space<vmem>>, vector<1x384x128xbf16>
    %503 = vector.shape_cast %502 : vector<1x384x128xbf16> to vector<384x128xbf16>
    %cst_583 = arith.constant dense<0.000000e+00> : vector<32x128xf32>
    %504 = tpu.matmul %501, %503, %cst_583 {dimension_numbers = #tpu.dot_dimension_numbers<[1], [0], [0], [1], [0, 0, 1, 1], [], []>} : vector<32x384xbf16>, vector<384x128xbf16>, vector<32x128xf32> -> vector<32x128xf32>
    %c14 = arith.constant 14 : index
    %c0_584 = arith.constant 0 : index
    %505 = vector.load %arg2[%c14, %c0_584] : memref<20x128xf32, #tpu.memory_space<vmem>>, vector<1x128xf32>
    %c14_585 = arith.constant 14 : index
    %c0_586 = arith.constant 0 : index
    %506 = vector.load %arg3[%c14_585, %c0_586] : memref<20x128xf32, #tpu.memory_space<vmem>>, vector<1x128xf32>
    %507 = vector.broadcast %505 : vector<1x128xf32> to vector<32x128xf32>
    %508 = arith.mulf %504, %507 : vector<32x128xf32>
    %509 = vector.broadcast %506 : vector<1x128xf32> to vector<32x128xf32>
    %510 = arith.addf %508, %509 : vector<32x128xf32>
    %cst_587 = arith.constant 0.000000e+00 : f32
    %511 = vector.broadcast %cst_587 : f32 to vector<32x128xf32>
    %512 = arith.maximumf %510, %511 : vector<32x128xf32>
    %513 = arith.truncf %512 : vector<32x128xf32> to vector<32x128xbf16>
    %514 = vector.extract_strided_slice %513 {offsets = [0, 0], sizes = [16, 128], strides = [1, 1]} : vector<32x128xbf16> to vector<16x128xbf16>
    %c1_588 = arith.constant 1 : index
    %c0_589 = arith.constant 0 : index
    %515 = vector.load %arg9[%c1_588, %c0_589] : memref<36x128xbf16, #tpu.memory_space<vmem>>, vector<16x128xbf16>
    tpu.vector_store %arg9[%c1_588, %c0_589], %514 {strides = array<i32>} : memref<36x128xbf16, #tpu.memory_space<vmem>>, vector<16x128xbf16>,
    %516 = vector.extract_strided_slice %513 {offsets = [16, 0], sizes = [16, 128], strides = [1, 1]} : vector<32x128xbf16> to vector<16x128xbf16>
    %c19_590 = arith.constant 19 : index
    %c0_591 = arith.constant 0 : index
    %517 = vector.load %arg9[%c19_590, %c0_591] : memref<36x128xbf16, #tpu.memory_space<vmem>>, vector<16x128xbf16>
    tpu.vector_store %arg9[%c19_590, %c0_591], %516 {strides = array<i32>} : memref<36x128xbf16, #tpu.memory_space<vmem>>, vector<16x128xbf16>,
    %c0_592 = arith.constant 0 : index
    %c0_593 = arith.constant 0 : index
    %518 = vector.load %arg9[%c0_592, %c0_593] : memref<36x128xbf16, #tpu.memory_space<vmem>>, vector<16x128xbf16>
    %c0_594 = arith.constant 0 : index
    %c0_595 = arith.constant 0 : index
    %519 = vector.load %arg10[%c0_594, %c0_595] : memref<32x384xbf16, #tpu.memory_space<vmem>>, vector<16x128xbf16>
    tpu.vector_store %arg10[%c0_594, %c0_595], %518 {strides = array<i32>} : memref<32x384xbf16, #tpu.memory_space<vmem>>, vector<16x128xbf16>,
    %c1_596 = arith.constant 1 : index
    %c0_597 = arith.constant 0 : index
    %520 = vector.load %arg9[%c1_596, %c0_597] : memref<36x128xbf16, #tpu.memory_space<vmem>>, vector<16x128xbf16>
    %c0_598 = arith.constant 0 : index
    %c128_599 = arith.constant 128 : index
    %521 = vector.load %arg10[%c0_598, %c128_599] : memref<32x384xbf16, #tpu.memory_space<vmem>>, vector<16x128xbf16>
    tpu.vector_store %arg10[%c0_598, %c128_599], %520 {strides = array<i32>} : memref<32x384xbf16, #tpu.memory_space<vmem>>, vector<16x128xbf16>,
    %c2_600 = arith.constant 2 : index
    %c0_601 = arith.constant 0 : index
    %522 = vector.load %arg9[%c2_600, %c0_601] : memref<36x128xbf16, #tpu.memory_space<vmem>>, vector<16x128xbf16>
    %c0_602 = arith.constant 0 : index
    %c256_603 = arith.constant 256 : index
    %523 = vector.load %arg10[%c0_602, %c256_603] : memref<32x384xbf16, #tpu.memory_space<vmem>>, vector<16x128xbf16>
    tpu.vector_store %arg10[%c0_602, %c256_603], %522 {strides = array<i32>} : memref<32x384xbf16, #tpu.memory_space<vmem>>, vector<16x128xbf16>,
    %c18_604 = arith.constant 18 : index
    %c0_605 = arith.constant 0 : index
    %524 = vector.load %arg9[%c18_604, %c0_605] : memref<36x128xbf16, #tpu.memory_space<vmem>>, vector<16x128xbf16>
    %c16_606 = arith.constant 16 : index
    %c0_607 = arith.constant 0 : index
    %525 = vector.load %arg10[%c16_606, %c0_607] : memref<32x384xbf16, #tpu.memory_space<vmem>>, vector<16x128xbf16>
    tpu.vector_store %arg10[%c16_606, %c0_607], %524 {strides = array<i32>} : memref<32x384xbf16, #tpu.memory_space<vmem>>, vector<16x128xbf16>,
    %c19_608 = arith.constant 19 : index
    %c0_609 = arith.constant 0 : index
    %526 = vector.load %arg9[%c19_608, %c0_609] : memref<36x128xbf16, #tpu.memory_space<vmem>>, vector<16x128xbf16>
    %c16_610 = arith.constant 16 : index
    %c128_611 = arith.constant 128 : index
    %527 = vector.load %arg10[%c16_610, %c128_611] : memref<32x384xbf16, #tpu.memory_space<vmem>>, vector<16x128xbf16>
    tpu.vector_store %arg10[%c16_610, %c128_611], %526 {strides = array<i32>} : memref<32x384xbf16, #tpu.memory_space<vmem>>, vector<16x128xbf16>,
    %c20_612 = arith.constant 20 : index
    %c0_613 = arith.constant 0 : index
    %528 = vector.load %arg9[%c20_612, %c0_613] : memref<36x128xbf16, #tpu.memory_space<vmem>>, vector<16x128xbf16>
    %c16_614 = arith.constant 16 : index
    %c256_615 = arith.constant 256 : index
    %529 = vector.load %arg10[%c16_614, %c256_615] : memref<32x384xbf16, #tpu.memory_space<vmem>>, vector<16x128xbf16>
    tpu.vector_store %arg10[%c16_614, %c256_615], %528 {strides = array<i32>} : memref<32x384xbf16, #tpu.memory_space<vmem>>, vector<16x128xbf16>,
    %c0_616 = arith.constant 0 : index
    %c0_617 = arith.constant 0 : index
    %530 = vector.load %arg10[%c0_616, %c0_617] : memref<32x384xbf16, #tpu.memory_space<vmem>>, vector<32x384xbf16>
    %c14_618 = arith.constant 14 : index
    %c0_619 = arith.constant 0 : index
    %c0_620 = arith.constant 0 : index
    %531 = vector.load %arg4[%c14_618, %c0_619, %c0_620] : memref<20x384x128xbf16, #tpu.memory_space<vmem>>, vector<1x384x128xbf16>
    %532 = vector.shape_cast %531 : vector<1x384x128xbf16> to vector<384x128xbf16>
    %cst_621 = arith.constant dense<0.000000e+00> : vector<32x128xf32>
    %533 = tpu.matmul %530, %532, %cst_621 {dimension_numbers = #tpu.dot_dimension_numbers<[1], [0], [0], [1], [0, 0, 1, 1], [], []>} : vector<32x384xbf16>, vector<384x128xbf16>, vector<32x128xf32> -> vector<32x128xf32>
    %534 = arith.addf %533, %475 : vector<32x128xf32>
    %c15 = arith.constant 15 : index
    %c0_622 = arith.constant 0 : index
    %535 = vector.load %arg2[%c15, %c0_622] : memref<20x128xf32, #tpu.memory_space<vmem>>, vector<1x128xf32>
    %c15_623 = arith.constant 15 : index
    %c0_624 = arith.constant 0 : index
    %536 = vector.load %arg3[%c15_623, %c0_624] : memref<20x128xf32, #tpu.memory_space<vmem>>, vector<1x128xf32>
    %537 = vector.broadcast %535 : vector<1x128xf32> to vector<32x128xf32>
    %538 = arith.mulf %534, %537 : vector<32x128xf32>
    %539 = vector.broadcast %536 : vector<1x128xf32> to vector<32x128xf32>
    %540 = arith.addf %538, %539 : vector<32x128xf32>
    %cst_625 = arith.constant 0.000000e+00 : f32
    %541 = vector.broadcast %cst_625 : f32 to vector<32x128xf32>
    %542 = arith.maximumf %540, %541 : vector<32x128xf32>
    %543 = arith.truncf %542 : vector<32x128xf32> to vector<32x128xbf16>
    %544 = vector.extract_strided_slice %543 {offsets = [0, 0], sizes = [16, 128], strides = [1, 1]} : vector<32x128xbf16> to vector<16x128xbf16>
    %c1_626 = arith.constant 1 : index
    %c0_627 = arith.constant 0 : index
    %545 = vector.load %arg9[%c1_626, %c0_627] : memref<36x128xbf16, #tpu.memory_space<vmem>>, vector<16x128xbf16>
    tpu.vector_store %arg9[%c1_626, %c0_627], %544 {strides = array<i32>} : memref<36x128xbf16, #tpu.memory_space<vmem>>, vector<16x128xbf16>,
    %546 = vector.extract_strided_slice %543 {offsets = [16, 0], sizes = [16, 128], strides = [1, 1]} : vector<32x128xbf16> to vector<16x128xbf16>
    %c19_628 = arith.constant 19 : index
    %c0_629 = arith.constant 0 : index
    %547 = vector.load %arg9[%c19_628, %c0_629] : memref<36x128xbf16, #tpu.memory_space<vmem>>, vector<16x128xbf16>
    tpu.vector_store %arg9[%c19_628, %c0_629], %546 {strides = array<i32>} : memref<36x128xbf16, #tpu.memory_space<vmem>>, vector<16x128xbf16>,
    %c0_630 = arith.constant 0 : index
    %c0_631 = arith.constant 0 : index
    %548 = vector.load %arg9[%c0_630, %c0_631] : memref<36x128xbf16, #tpu.memory_space<vmem>>, vector<16x128xbf16>
    %c0_632 = arith.constant 0 : index
    %c0_633 = arith.constant 0 : index
    %549 = vector.load %arg10[%c0_632, %c0_633] : memref<32x384xbf16, #tpu.memory_space<vmem>>, vector<16x128xbf16>
    tpu.vector_store %arg10[%c0_632, %c0_633], %548 {strides = array<i32>} : memref<32x384xbf16, #tpu.memory_space<vmem>>, vector<16x128xbf16>,
    %c1_634 = arith.constant 1 : index
    %c0_635 = arith.constant 0 : index
    %550 = vector.load %arg9[%c1_634, %c0_635] : memref<36x128xbf16, #tpu.memory_space<vmem>>, vector<16x128xbf16>
    %c0_636 = arith.constant 0 : index
    %c128_637 = arith.constant 128 : index
    %551 = vector.load %arg10[%c0_636, %c128_637] : memref<32x384xbf16, #tpu.memory_space<vmem>>, vector<16x128xbf16>
    tpu.vector_store %arg10[%c0_636, %c128_637], %550 {strides = array<i32>} : memref<32x384xbf16, #tpu.memory_space<vmem>>, vector<16x128xbf16>,
    %c2_638 = arith.constant 2 : index
    %c0_639 = arith.constant 0 : index
    %552 = vector.load %arg9[%c2_638, %c0_639] : memref<36x128xbf16, #tpu.memory_space<vmem>>, vector<16x128xbf16>
    %c0_640 = arith.constant 0 : index
    %c256_641 = arith.constant 256 : index
    %553 = vector.load %arg10[%c0_640, %c256_641] : memref<32x384xbf16, #tpu.memory_space<vmem>>, vector<16x128xbf16>
    tpu.vector_store %arg10[%c0_640, %c256_641], %552 {strides = array<i32>} : memref<32x384xbf16, #tpu.memory_space<vmem>>, vector<16x128xbf16>,
    %c18_642 = arith.constant 18 : index
    %c0_643 = arith.constant 0 : index
    %554 = vector.load %arg9[%c18_642, %c0_643] : memref<36x128xbf16, #tpu.memory_space<vmem>>, vector<16x128xbf16>
    %c16_644 = arith.constant 16 : index
    %c0_645 = arith.constant 0 : index
    %555 = vector.load %arg10[%c16_644, %c0_645] : memref<32x384xbf16, #tpu.memory_space<vmem>>, vector<16x128xbf16>
    tpu.vector_store %arg10[%c16_644, %c0_645], %554 {strides = array<i32>} : memref<32x384xbf16, #tpu.memory_space<vmem>>, vector<16x128xbf16>,
    %c19_646 = arith.constant 19 : index
    %c0_647 = arith.constant 0 : index
    %556 = vector.load %arg9[%c19_646, %c0_647] : memref<36x128xbf16, #tpu.memory_space<vmem>>, vector<16x128xbf16>
    %c16_648 = arith.constant 16 : index
    %c128_649 = arith.constant 128 : index
    %557 = vector.load %arg10[%c16_648, %c128_649] : memref<32x384xbf16, #tpu.memory_space<vmem>>, vector<16x128xbf16>
    tpu.vector_store %arg10[%c16_648, %c128_649], %556 {strides = array<i32>} : memref<32x384xbf16, #tpu.memory_space<vmem>>, vector<16x128xbf16>,
    %c20_650 = arith.constant 20 : index
    %c0_651 = arith.constant 0 : index
    %558 = vector.load %arg9[%c20_650, %c0_651] : memref<36x128xbf16, #tpu.memory_space<vmem>>, vector<16x128xbf16>
    %c16_652 = arith.constant 16 : index
    %c256_653 = arith.constant 256 : index
    %559 = vector.load %arg10[%c16_652, %c256_653] : memref<32x384xbf16, #tpu.memory_space<vmem>>, vector<16x128xbf16>
    tpu.vector_store %arg10[%c16_652, %c256_653], %558 {strides = array<i32>} : memref<32x384xbf16, #tpu.memory_space<vmem>>, vector<16x128xbf16>,
    %c0_654 = arith.constant 0 : index
    %c0_655 = arith.constant 0 : index
    %560 = vector.load %arg10[%c0_654, %c0_655] : memref<32x384xbf16, #tpu.memory_space<vmem>>, vector<32x384xbf16>
    %c15_656 = arith.constant 15 : index
    %c0_657 = arith.constant 0 : index
    %c0_658 = arith.constant 0 : index
    %561 = vector.load %arg4[%c15_656, %c0_657, %c0_658] : memref<20x384x128xbf16, #tpu.memory_space<vmem>>, vector<1x384x128xbf16>
    %562 = vector.shape_cast %561 : vector<1x384x128xbf16> to vector<384x128xbf16>
    %cst_659 = arith.constant dense<0.000000e+00> : vector<32x128xf32>
    %563 = tpu.matmul %560, %562, %cst_659 {dimension_numbers = #tpu.dot_dimension_numbers<[1], [0], [0], [1], [0, 0, 1, 1], [], []>} : vector<32x384xbf16>, vector<384x128xbf16>, vector<32x128xf32> -> vector<32x128xf32>
    %c16_660 = arith.constant 16 : index
    %c0_661 = arith.constant 0 : index
    %564 = vector.load %arg2[%c16_660, %c0_661] : memref<20x128xf32, #tpu.memory_space<vmem>>, vector<1x128xf32>
    %c16_662 = arith.constant 16 : index
    %c0_663 = arith.constant 0 : index
    %565 = vector.load %arg3[%c16_662, %c0_663] : memref<20x128xf32, #tpu.memory_space<vmem>>, vector<1x128xf32>
    %566 = vector.broadcast %564 : vector<1x128xf32> to vector<32x128xf32>
    %567 = arith.mulf %563, %566 : vector<32x128xf32>
    %568 = vector.broadcast %565 : vector<1x128xf32> to vector<32x128xf32>
    %569 = arith.addf %567, %568 : vector<32x128xf32>
    %cst_664 = arith.constant 0.000000e+00 : f32
    %570 = vector.broadcast %cst_664 : f32 to vector<32x128xf32>
    %571 = arith.maximumf %569, %570 : vector<32x128xf32>
    %572 = arith.truncf %571 : vector<32x128xf32> to vector<32x128xbf16>
    %573 = vector.extract_strided_slice %572 {offsets = [0, 0], sizes = [16, 128], strides = [1, 1]} : vector<32x128xbf16> to vector<16x128xbf16>
    %c1_665 = arith.constant 1 : index
    %c0_666 = arith.constant 0 : index
    %574 = vector.load %arg9[%c1_665, %c0_666] : memref<36x128xbf16, #tpu.memory_space<vmem>>, vector<16x128xbf16>
    tpu.vector_store %arg9[%c1_665, %c0_666], %573 {strides = array<i32>} : memref<36x128xbf16, #tpu.memory_space<vmem>>, vector<16x128xbf16>,
    %575 = vector.extract_strided_slice %572 {offsets = [16, 0], sizes = [16, 128], strides = [1, 1]} : vector<32x128xbf16> to vector<16x128xbf16>
    %c19_667 = arith.constant 19 : index
    %c0_668 = arith.constant 0 : index
    %576 = vector.load %arg9[%c19_667, %c0_668] : memref<36x128xbf16, #tpu.memory_space<vmem>>, vector<16x128xbf16>
    tpu.vector_store %arg9[%c19_667, %c0_668], %575 {strides = array<i32>} : memref<36x128xbf16, #tpu.memory_space<vmem>>, vector<16x128xbf16>,
    %c0_669 = arith.constant 0 : index
    %c0_670 = arith.constant 0 : index
    %577 = vector.load %arg9[%c0_669, %c0_670] : memref<36x128xbf16, #tpu.memory_space<vmem>>, vector<16x128xbf16>
    %c0_671 = arith.constant 0 : index
    %c0_672 = arith.constant 0 : index
    %578 = vector.load %arg10[%c0_671, %c0_672] : memref<32x384xbf16, #tpu.memory_space<vmem>>, vector<16x128xbf16>
    tpu.vector_store %arg10[%c0_671, %c0_672], %577 {strides = array<i32>} : memref<32x384xbf16, #tpu.memory_space<vmem>>, vector<16x128xbf16>,
    %c1_673 = arith.constant 1 : index
    %c0_674 = arith.constant 0 : index
    %579 = vector.load %arg9[%c1_673, %c0_674] : memref<36x128xbf16, #tpu.memory_space<vmem>>, vector<16x128xbf16>
    %c0_675 = arith.constant 0 : index
    %c128_676 = arith.constant 128 : index
    %580 = vector.load %arg10[%c0_675, %c128_676] : memref<32x384xbf16, #tpu.memory_space<vmem>>, vector<16x128xbf16>
    tpu.vector_store %arg10[%c0_675, %c128_676], %579 {strides = array<i32>} : memref<32x384xbf16, #tpu.memory_space<vmem>>, vector<16x128xbf16>,
    %c2_677 = arith.constant 2 : index
    %c0_678 = arith.constant 0 : index
    %581 = vector.load %arg9[%c2_677, %c0_678] : memref<36x128xbf16, #tpu.memory_space<vmem>>, vector<16x128xbf16>
    %c0_679 = arith.constant 0 : index
    %c256_680 = arith.constant 256 : index
    %582 = vector.load %arg10[%c0_679, %c256_680] : memref<32x384xbf16, #tpu.memory_space<vmem>>, vector<16x128xbf16>
    tpu.vector_store %arg10[%c0_679, %c256_680], %581 {strides = array<i32>} : memref<32x384xbf16, #tpu.memory_space<vmem>>, vector<16x128xbf16>,
    %c18_681 = arith.constant 18 : index
    %c0_682 = arith.constant 0 : index
    %583 = vector.load %arg9[%c18_681, %c0_682] : memref<36x128xbf16, #tpu.memory_space<vmem>>, vector<16x128xbf16>
    %c16_683 = arith.constant 16 : index
    %c0_684 = arith.constant 0 : index
    %584 = vector.load %arg10[%c16_683, %c0_684] : memref<32x384xbf16, #tpu.memory_space<vmem>>, vector<16x128xbf16>
    tpu.vector_store %arg10[%c16_683, %c0_684], %583 {strides = array<i32>} : memref<32x384xbf16, #tpu.memory_space<vmem>>, vector<16x128xbf16>,
    %c19_685 = arith.constant 19 : index
    %c0_686 = arith.constant 0 : index
    %585 = vector.load %arg9[%c19_685, %c0_686] : memref<36x128xbf16, #tpu.memory_space<vmem>>, vector<16x128xbf16>
    %c16_687 = arith.constant 16 : index
    %c128_688 = arith.constant 128 : index
    %586 = vector.load %arg10[%c16_687, %c128_688] : memref<32x384xbf16, #tpu.memory_space<vmem>>, vector<16x128xbf16>
    tpu.vector_store %arg10[%c16_687, %c128_688], %585 {strides = array<i32>} : memref<32x384xbf16, #tpu.memory_space<vmem>>, vector<16x128xbf16>,
    %c20_689 = arith.constant 20 : index
    %c0_690 = arith.constant 0 : index
    %587 = vector.load %arg9[%c20_689, %c0_690] : memref<36x128xbf16, #tpu.memory_space<vmem>>, vector<16x128xbf16>
    %c16_691 = arith.constant 16 : index
    %c256_692 = arith.constant 256 : index
    %588 = vector.load %arg10[%c16_691, %c256_692] : memref<32x384xbf16, #tpu.memory_space<vmem>>, vector<16x128xbf16>
    tpu.vector_store %arg10[%c16_691, %c256_692], %587 {strides = array<i32>} : memref<32x384xbf16, #tpu.memory_space<vmem>>, vector<16x128xbf16>,
    %c0_693 = arith.constant 0 : index
    %c0_694 = arith.constant 0 : index
    %589 = vector.load %arg10[%c0_693, %c0_694] : memref<32x384xbf16, #tpu.memory_space<vmem>>, vector<32x384xbf16>
    %c16_695 = arith.constant 16 : index
    %c0_696 = arith.constant 0 : index
    %c0_697 = arith.constant 0 : index
    %590 = vector.load %arg4[%c16_695, %c0_696, %c0_697] : memref<20x384x128xbf16, #tpu.memory_space<vmem>>, vector<1x384x128xbf16>
    %591 = vector.shape_cast %590 : vector<1x384x128xbf16> to vector<384x128xbf16>
    %cst_698 = arith.constant dense<0.000000e+00> : vector<32x128xf32>
    %592 = tpu.matmul %589, %591, %cst_698 {dimension_numbers = #tpu.dot_dimension_numbers<[1], [0], [0], [1], [0, 0, 1, 1], [], []>} : vector<32x384xbf16>, vector<384x128xbf16>, vector<32x128xf32> -> vector<32x128xf32>
    %593 = arith.addf %592, %534 : vector<32x128xf32>
    %c17_699 = arith.constant 17 : index
    %c0_700 = arith.constant 0 : index
    %594 = vector.load %arg2[%c17_699, %c0_700] : memref<20x128xf32, #tpu.memory_space<vmem>>, vector<1x128xf32>
    %c17_701 = arith.constant 17 : index
    %c0_702 = arith.constant 0 : index
    %595 = vector.load %arg3[%c17_701, %c0_702] : memref<20x128xf32, #tpu.memory_space<vmem>>, vector<1x128xf32>
    %596 = vector.broadcast %594 : vector<1x128xf32> to vector<32x128xf32>
    %597 = arith.mulf %593, %596 : vector<32x128xf32>
    %598 = vector.broadcast %595 : vector<1x128xf32> to vector<32x128xf32>
    %599 = arith.addf %597, %598 : vector<32x128xf32>
    %cst_703 = arith.constant 0.000000e+00 : f32
    %600 = vector.broadcast %cst_703 : f32 to vector<32x128xf32>
    %601 = arith.maximumf %599, %600 : vector<32x128xf32>
    %602 = arith.truncf %601 : vector<32x128xf32> to vector<32x128xbf16>
    %603 = vector.extract_strided_slice %602 {offsets = [0, 0], sizes = [16, 128], strides = [1, 1]} : vector<32x128xbf16> to vector<16x128xbf16>
    %c1_704 = arith.constant 1 : index
    %c0_705 = arith.constant 0 : index
    %604 = vector.load %arg9[%c1_704, %c0_705] : memref<36x128xbf16, #tpu.memory_space<vmem>>, vector<16x128xbf16>
    tpu.vector_store %arg9[%c1_704, %c0_705], %603 {strides = array<i32>} : memref<36x128xbf16, #tpu.memory_space<vmem>>, vector<16x128xbf16>,
    %605 = vector.extract_strided_slice %602 {offsets = [16, 0], sizes = [16, 128], strides = [1, 1]} : vector<32x128xbf16> to vector<16x128xbf16>
    %c19_706 = arith.constant 19 : index
    %c0_707 = arith.constant 0 : index
    %606 = vector.load %arg9[%c19_706, %c0_707] : memref<36x128xbf16, #tpu.memory_space<vmem>>, vector<16x128xbf16>
    tpu.vector_store %arg9[%c19_706, %c0_707], %605 {strides = array<i32>} : memref<36x128xbf16, #tpu.memory_space<vmem>>, vector<16x128xbf16>,
    %c0_708 = arith.constant 0 : index
    %c0_709 = arith.constant 0 : index
    %607 = vector.load %arg9[%c0_708, %c0_709] : memref<36x128xbf16, #tpu.memory_space<vmem>>, vector<16x128xbf16>
    %c0_710 = arith.constant 0 : index
    %c0_711 = arith.constant 0 : index
    %608 = vector.load %arg10[%c0_710, %c0_711] : memref<32x384xbf16, #tpu.memory_space<vmem>>, vector<16x128xbf16>
    tpu.vector_store %arg10[%c0_710, %c0_711], %607 {strides = array<i32>} : memref<32x384xbf16, #tpu.memory_space<vmem>>, vector<16x128xbf16>,
    %c1_712 = arith.constant 1 : index
    %c0_713 = arith.constant 0 : index
    %609 = vector.load %arg9[%c1_712, %c0_713] : memref<36x128xbf16, #tpu.memory_space<vmem>>, vector<16x128xbf16>
    %c0_714 = arith.constant 0 : index
    %c128_715 = arith.constant 128 : index
    %610 = vector.load %arg10[%c0_714, %c128_715] : memref<32x384xbf16, #tpu.memory_space<vmem>>, vector<16x128xbf16>
    tpu.vector_store %arg10[%c0_714, %c128_715], %609 {strides = array<i32>} : memref<32x384xbf16, #tpu.memory_space<vmem>>, vector<16x128xbf16>,
    %c2_716 = arith.constant 2 : index
    %c0_717 = arith.constant 0 : index
    %611 = vector.load %arg9[%c2_716, %c0_717] : memref<36x128xbf16, #tpu.memory_space<vmem>>, vector<16x128xbf16>
    %c0_718 = arith.constant 0 : index
    %c256_719 = arith.constant 256 : index
    %612 = vector.load %arg10[%c0_718, %c256_719] : memref<32x384xbf16, #tpu.memory_space<vmem>>, vector<16x128xbf16>
    tpu.vector_store %arg10[%c0_718, %c256_719], %611 {strides = array<i32>} : memref<32x384xbf16, #tpu.memory_space<vmem>>, vector<16x128xbf16>,
    %c18_720 = arith.constant 18 : index
    %c0_721 = arith.constant 0 : index
    %613 = vector.load %arg9[%c18_720, %c0_721] : memref<36x128xbf16, #tpu.memory_space<vmem>>, vector<16x128xbf16>
    %c16_722 = arith.constant 16 : index
    %c0_723 = arith.constant 0 : index
    %614 = vector.load %arg10[%c16_722, %c0_723] : memref<32x384xbf16, #tpu.memory_space<vmem>>, vector<16x128xbf16>
    tpu.vector_store %arg10[%c16_722, %c0_723], %613 {strides = array<i32>} : memref<32x384xbf16, #tpu.memory_space<vmem>>, vector<16x128xbf16>,
    %c19_724 = arith.constant 19 : index
    %c0_725 = arith.constant 0 : index
    %615 = vector.load %arg9[%c19_724, %c0_725] : memref<36x128xbf16, #tpu.memory_space<vmem>>, vector<16x128xbf16>
    %c16_726 = arith.constant 16 : index
    %c128_727 = arith.constant 128 : index
    %616 = vector.load %arg10[%c16_726, %c128_727] : memref<32x384xbf16, #tpu.memory_space<vmem>>, vector<16x128xbf16>
    tpu.vector_store %arg10[%c16_726, %c128_727], %615 {strides = array<i32>} : memref<32x384xbf16, #tpu.memory_space<vmem>>, vector<16x128xbf16>,
    %c20_728 = arith.constant 20 : index
    %c0_729 = arith.constant 0 : index
    %617 = vector.load %arg9[%c20_728, %c0_729] : memref<36x128xbf16, #tpu.memory_space<vmem>>, vector<16x128xbf16>
    %c16_730 = arith.constant 16 : index
    %c256_731 = arith.constant 256 : index
    %618 = vector.load %arg10[%c16_730, %c256_731] : memref<32x384xbf16, #tpu.memory_space<vmem>>, vector<16x128xbf16>
    tpu.vector_store %arg10[%c16_730, %c256_731], %617 {strides = array<i32>} : memref<32x384xbf16, #tpu.memory_space<vmem>>, vector<16x128xbf16>,
    %c0_732 = arith.constant 0 : index
    %c0_733 = arith.constant 0 : index
    %619 = vector.load %arg10[%c0_732, %c0_733] : memref<32x384xbf16, #tpu.memory_space<vmem>>, vector<32x384xbf16>
    %c17_734 = arith.constant 17 : index
    %c0_735 = arith.constant 0 : index
    %c0_736 = arith.constant 0 : index
    %620 = vector.load %arg4[%c17_734, %c0_735, %c0_736] : memref<20x384x128xbf16, #tpu.memory_space<vmem>>, vector<1x384x128xbf16>
    %621 = vector.shape_cast %620 : vector<1x384x128xbf16> to vector<384x128xbf16>
    %cst_737 = arith.constant dense<0.000000e+00> : vector<32x128xf32>
    %622 = tpu.matmul %619, %621, %cst_737 {dimension_numbers = #tpu.dot_dimension_numbers<[1], [0], [0], [1], [0, 0, 1, 1], [], []>} : vector<32x384xbf16>, vector<384x128xbf16>, vector<32x128xf32> -> vector<32x128xf32>
    %c18_738 = arith.constant 18 : index
    %c0_739 = arith.constant 0 : index
    %623 = vector.load %arg2[%c18_738, %c0_739] : memref<20x128xf32, #tpu.memory_space<vmem>>, vector<1x128xf32>
    %c18_740 = arith.constant 18 : index
    %c0_741 = arith.constant 0 : index
    %624 = vector.load %arg3[%c18_740, %c0_741] : memref<20x128xf32, #tpu.memory_space<vmem>>, vector<1x128xf32>
    %625 = vector.broadcast %623 : vector<1x128xf32> to vector<32x128xf32>
    %626 = arith.mulf %622, %625 : vector<32x128xf32>
    %627 = vector.broadcast %624 : vector<1x128xf32> to vector<32x128xf32>
    %628 = arith.addf %626, %627 : vector<32x128xf32>
    %cst_742 = arith.constant 0.000000e+00 : f32
    %629 = vector.broadcast %cst_742 : f32 to vector<32x128xf32>
    %630 = arith.maximumf %628, %629 : vector<32x128xf32>
    %631 = arith.truncf %630 : vector<32x128xf32> to vector<32x128xbf16>
    %632 = vector.extract_strided_slice %631 {offsets = [0, 0], sizes = [16, 128], strides = [1, 1]} : vector<32x128xbf16> to vector<16x128xbf16>
    %c1_743 = arith.constant 1 : index
    %c0_744 = arith.constant 0 : index
    %633 = vector.load %arg9[%c1_743, %c0_744] : memref<36x128xbf16, #tpu.memory_space<vmem>>, vector<16x128xbf16>
    tpu.vector_store %arg9[%c1_743, %c0_744], %632 {strides = array<i32>} : memref<36x128xbf16, #tpu.memory_space<vmem>>, vector<16x128xbf16>,
    %634 = vector.extract_strided_slice %631 {offsets = [16, 0], sizes = [16, 128], strides = [1, 1]} : vector<32x128xbf16> to vector<16x128xbf16>
    %c19_745 = arith.constant 19 : index
    %c0_746 = arith.constant 0 : index
    %635 = vector.load %arg9[%c19_745, %c0_746] : memref<36x128xbf16, #tpu.memory_space<vmem>>, vector<16x128xbf16>
    tpu.vector_store %arg9[%c19_745, %c0_746], %634 {strides = array<i32>} : memref<36x128xbf16, #tpu.memory_space<vmem>>, vector<16x128xbf16>,
    %c0_747 = arith.constant 0 : index
    %c0_748 = arith.constant 0 : index
    %636 = vector.load %arg9[%c0_747, %c0_748] : memref<36x128xbf16, #tpu.memory_space<vmem>>, vector<16x128xbf16>
    %c0_749 = arith.constant 0 : index
    %c0_750 = arith.constant 0 : index
    %637 = vector.load %arg10[%c0_749, %c0_750] : memref<32x384xbf16, #tpu.memory_space<vmem>>, vector<16x128xbf16>
    tpu.vector_store %arg10[%c0_749, %c0_750], %636 {strides = array<i32>} : memref<32x384xbf16, #tpu.memory_space<vmem>>, vector<16x128xbf16>,
    %c1_751 = arith.constant 1 : index
    %c0_752 = arith.constant 0 : index
    %638 = vector.load %arg9[%c1_751, %c0_752] : memref<36x128xbf16, #tpu.memory_space<vmem>>, vector<16x128xbf16>
    %c0_753 = arith.constant 0 : index
    %c128_754 = arith.constant 128 : index
    %639 = vector.load %arg10[%c0_753, %c128_754] : memref<32x384xbf16, #tpu.memory_space<vmem>>, vector<16x128xbf16>
    tpu.vector_store %arg10[%c0_753, %c128_754], %638 {strides = array<i32>} : memref<32x384xbf16, #tpu.memory_space<vmem>>, vector<16x128xbf16>,
    %c2_755 = arith.constant 2 : index
    %c0_756 = arith.constant 0 : index
    %640 = vector.load %arg9[%c2_755, %c0_756] : memref<36x128xbf16, #tpu.memory_space<vmem>>, vector<16x128xbf16>
    %c0_757 = arith.constant 0 : index
    %c256_758 = arith.constant 256 : index
    %641 = vector.load %arg10[%c0_757, %c256_758] : memref<32x384xbf16, #tpu.memory_space<vmem>>, vector<16x128xbf16>
    tpu.vector_store %arg10[%c0_757, %c256_758], %640 {strides = array<i32>} : memref<32x384xbf16, #tpu.memory_space<vmem>>, vector<16x128xbf16>,
    %c18_759 = arith.constant 18 : index
    %c0_760 = arith.constant 0 : index
    %642 = vector.load %arg9[%c18_759, %c0_760] : memref<36x128xbf16, #tpu.memory_space<vmem>>, vector<16x128xbf16>
    %c16_761 = arith.constant 16 : index
    %c0_762 = arith.constant 0 : index
    %643 = vector.load %arg10[%c16_761, %c0_762] : memref<32x384xbf16, #tpu.memory_space<vmem>>, vector<16x128xbf16>
    tpu.vector_store %arg10[%c16_761, %c0_762], %642 {strides = array<i32>} : memref<32x384xbf16, #tpu.memory_space<vmem>>, vector<16x128xbf16>,
    %c19_763 = arith.constant 19 : index
    %c0_764 = arith.constant 0 : index
    %644 = vector.load %arg9[%c19_763, %c0_764] : memref<36x128xbf16, #tpu.memory_space<vmem>>, vector<16x128xbf16>
    %c16_765 = arith.constant 16 : index
    %c128_766 = arith.constant 128 : index
    %645 = vector.load %arg10[%c16_765, %c128_766] : memref<32x384xbf16, #tpu.memory_space<vmem>>, vector<16x128xbf16>
    tpu.vector_store %arg10[%c16_765, %c128_766], %644 {strides = array<i32>} : memref<32x384xbf16, #tpu.memory_space<vmem>>, vector<16x128xbf16>,
    %c20_767 = arith.constant 20 : index
    %c0_768 = arith.constant 0 : index
    %646 = vector.load %arg9[%c20_767, %c0_768] : memref<36x128xbf16, #tpu.memory_space<vmem>>, vector<16x128xbf16>
    %c16_769 = arith.constant 16 : index
    %c256_770 = arith.constant 256 : index
    %647 = vector.load %arg10[%c16_769, %c256_770] : memref<32x384xbf16, #tpu.memory_space<vmem>>, vector<16x128xbf16>
    tpu.vector_store %arg10[%c16_769, %c256_770], %646 {strides = array<i32>} : memref<32x384xbf16, #tpu.memory_space<vmem>>, vector<16x128xbf16>,
    %c0_771 = arith.constant 0 : index
    %c0_772 = arith.constant 0 : index
    %648 = vector.load %arg10[%c0_771, %c0_772] : memref<32x384xbf16, #tpu.memory_space<vmem>>, vector<32x384xbf16>
    %c18_773 = arith.constant 18 : index
    %c0_774 = arith.constant 0 : index
    %c0_775 = arith.constant 0 : index
    %649 = vector.load %arg4[%c18_773, %c0_774, %c0_775] : memref<20x384x128xbf16, #tpu.memory_space<vmem>>, vector<1x384x128xbf16>
    %650 = vector.shape_cast %649 : vector<1x384x128xbf16> to vector<384x128xbf16>
    %cst_776 = arith.constant dense<0.000000e+00> : vector<32x128xf32>
    %651 = tpu.matmul %648, %650, %cst_776 {dimension_numbers = #tpu.dot_dimension_numbers<[1], [0], [0], [1], [0, 0, 1, 1], [], []>} : vector<32x384xbf16>, vector<384x128xbf16>, vector<32x128xf32> -> vector<32x128xf32>
    %652 = arith.addf %651, %593 : vector<32x128xf32>
    %c9_777 = arith.constant 9 : index
    %c0_778 = arith.constant 0 : index
    %653 = vector.load %arg5[%c9_777, %c0_778] : memref<15x128xf32, #tpu.memory_space<vmem>>, vector<1x128xf32>
    %c9_779 = arith.constant 9 : index
    %c0_780 = arith.constant 0 : index
    %654 = vector.load %arg6[%c9_779, %c0_780] : memref<15x128xf32, #tpu.memory_space<vmem>>, vector<1x128xf32>
    %655 = vector.broadcast %653 : vector<1x128xf32> to vector<32x128xf32>
    %656 = arith.mulf %534, %655 : vector<32x128xf32>
    %657 = vector.broadcast %654 : vector<1x128xf32> to vector<32x128xf32>
    %658 = arith.addf %656, %657 : vector<32x128xf32>
    %cst_781 = arith.constant 0.000000e+00 : f32
    %659 = vector.broadcast %cst_781 : f32 to vector<32x128xf32>
    %660 = arith.maximumf %658, %659 : vector<32x128xf32>
    %661 = arith.truncf %660 : vector<32x128xf32> to vector<32x128xbf16>
    %c10_782 = arith.constant 10 : index
    %c0_783 = arith.constant 0 : index
    %662 = vector.load %arg5[%c10_782, %c0_783] : memref<15x128xf32, #tpu.memory_space<vmem>>, vector<1x128xf32>
    %c10_784 = arith.constant 10 : index
    %c0_785 = arith.constant 0 : index
    %663 = vector.load %arg6[%c10_784, %c0_785] : memref<15x128xf32, #tpu.memory_space<vmem>>, vector<1x128xf32>
    %664 = vector.broadcast %662 : vector<1x128xf32> to vector<32x128xf32>
    %665 = arith.mulf %593, %664 : vector<32x128xf32>
    %666 = vector.broadcast %663 : vector<1x128xf32> to vector<32x128xf32>
    %667 = arith.addf %665, %666 : vector<32x128xf32>
    %cst_786 = arith.constant 0.000000e+00 : f32
    %668 = vector.broadcast %cst_786 : f32 to vector<32x128xf32>
    %669 = arith.maximumf %667, %668 : vector<32x128xf32>
    %670 = arith.truncf %669 : vector<32x128xf32> to vector<32x128xbf16>
    %c11_787 = arith.constant 11 : index
    %c0_788 = arith.constant 0 : index
    %671 = vector.load %arg5[%c11_787, %c0_788] : memref<15x128xf32, #tpu.memory_space<vmem>>, vector<1x128xf32>
    %c11_789 = arith.constant 11 : index
    %c0_790 = arith.constant 0 : index
    %672 = vector.load %arg6[%c11_789, %c0_790] : memref<15x128xf32, #tpu.memory_space<vmem>>, vector<1x128xf32>
    %673 = vector.broadcast %671 : vector<1x128xf32> to vector<32x128xf32>
    %674 = arith.mulf %652, %673 : vector<32x128xf32>
    %675 = vector.broadcast %672 : vector<1x128xf32> to vector<32x128xf32>
    %676 = arith.addf %674, %675 : vector<32x128xf32>
    %cst_791 = arith.constant 0.000000e+00 : f32
    %677 = vector.broadcast %cst_791 : f32 to vector<32x128xf32>
    %678 = arith.maximumf %676, %677 : vector<32x128xf32>
    %679 = arith.truncf %678 : vector<32x128xf32> to vector<32x128xbf16>
    %c12_792 = arith.constant 12 : index
    %c0_793 = arith.constant 0 : index
    %680 = vector.load %arg5[%c12_792, %c0_793] : memref<15x128xf32, #tpu.memory_space<vmem>>, vector<1x128xf32>
    %c12_794 = arith.constant 12 : index
    %c0_795 = arith.constant 0 : index
    %681 = vector.load %arg6[%c12_794, %c0_795] : memref<15x128xf32, #tpu.memory_space<vmem>>, vector<1x128xf32>
    %682 = vector.broadcast %680 : vector<1x128xf32> to vector<32x128xf32>
    %683 = arith.mulf %34, %682 : vector<32x128xf32>
    %684 = vector.broadcast %681 : vector<1x128xf32> to vector<32x128xf32>
    %685 = arith.addf %683, %684 : vector<32x128xf32>
    %cst_796 = arith.constant 0.000000e+00 : f32
    %686 = vector.broadcast %cst_796 : f32 to vector<32x128xf32>
    %687 = arith.maximumf %685, %686 : vector<32x128xf32>
    %688 = arith.truncf %687 : vector<32x128xf32> to vector<32x128xbf16>
    %c13_797 = arith.constant 13 : index
    %c0_798 = arith.constant 0 : index
    %689 = vector.load %arg5[%c13_797, %c0_798] : memref<15x128xf32, #tpu.memory_space<vmem>>, vector<1x128xf32>
    %c13_799 = arith.constant 13 : index
    %c0_800 = arith.constant 0 : index
    %690 = vector.load %arg6[%c13_799, %c0_800] : memref<15x128xf32, #tpu.memory_space<vmem>>, vector<1x128xf32>
    %691 = vector.broadcast %689 : vector<1x128xf32> to vector<32x128xf32>
    %692 = arith.mulf %250, %691 : vector<32x128xf32>
    %693 = vector.broadcast %690 : vector<1x128xf32> to vector<32x128xf32>
    %694 = arith.addf %692, %693 : vector<32x128xf32>
    %cst_801 = arith.constant 0.000000e+00 : f32
    %695 = vector.broadcast %cst_801 : f32 to vector<32x128xf32>
    %696 = arith.maximumf %694, %695 : vector<32x128xf32>
    %697 = arith.truncf %696 : vector<32x128xf32> to vector<32x128xbf16>
    %c14_802 = arith.constant 14 : index
    %c0_803 = arith.constant 0 : index
    %698 = vector.load %arg5[%c14_802, %c0_803] : memref<15x128xf32, #tpu.memory_space<vmem>>, vector<1x128xf32>
    %c14_804 = arith.constant 14 : index
    %c0_805 = arith.constant 0 : index
    %699 = vector.load %arg6[%c14_804, %c0_805] : memref<15x128xf32, #tpu.memory_space<vmem>>, vector<1x128xf32>
    %700 = vector.broadcast %698 : vector<1x128xf32> to vector<32x128xf32>
    %701 = arith.mulf %475, %700 : vector<32x128xf32>
    %702 = vector.broadcast %699 : vector<1x128xf32> to vector<32x128xf32>
    %703 = arith.addf %701, %702 : vector<32x128xf32>
    %cst_806 = arith.constant 0.000000e+00 : f32
    %704 = vector.broadcast %cst_806 : f32 to vector<32x128xf32>
    %705 = arith.maximumf %703, %704 : vector<32x128xf32>
    %706 = arith.truncf %705 : vector<32x128xf32> to vector<32x128xbf16>
    %707 = tpu.concatenate %661, %670, %679, %688, %697, %706 in 1 : vector<32x128xbf16>, vector<32x128xbf16>, vector<32x128xbf16>, vector<32x128xbf16>, vector<32x128xbf16>, vector<32x128xbf16> -> vector<32x768xbf16>
    %c1152 = arith.constant 1152 : index
    %c0_807 = arith.constant 0 : index
    %708 = vector.load %arg7[%c1152, %c0_807] : memref<1920x128xbf16, #tpu.memory_space<vmem>>, vector<768x128xbf16>
    %cst_808 = arith.constant dense<0.000000e+00> : vector<32x128xf32>
    %709 = tpu.matmul %707, %708, %cst_808 {dimension_numbers = #tpu.dot_dimension_numbers<[1], [0], [0], [1], [0, 0, 1, 1], [], []>} : vector<32x768xbf16>, vector<768x128xbf16>, vector<32x128xf32> -> vector<32x128xf32>
    %c19_809 = arith.constant 19 : index
    %c0_810 = arith.constant 0 : index
    %710 = vector.load %arg2[%c19_809, %c0_810] : memref<20x128xf32, #tpu.memory_space<vmem>>, vector<1x128xf32>
    %c19_811 = arith.constant 19 : index
    %c0_812 = arith.constant 0 : index
    %711 = vector.load %arg3[%c19_811, %c0_812] : memref<20x128xf32, #tpu.memory_space<vmem>>, vector<1x128xf32>
    %712 = vector.broadcast %710 : vector<1x128xf32> to vector<32x128xf32>
    %713 = arith.mulf %709, %712 : vector<32x128xf32>
    %714 = vector.broadcast %711 : vector<1x128xf32> to vector<32x128xf32>
    %715 = arith.addf %713, %714 : vector<32x128xf32>
    %cst_813 = arith.constant 0.000000e+00 : f32
    %716 = vector.broadcast %cst_813 : f32 to vector<32x128xf32>
    %717 = arith.maximumf %715, %716 : vector<32x128xf32>
    %718 = arith.truncf %717 : vector<32x128xf32> to vector<32x128xbf16>
    %719 = vector.extract_strided_slice %718 {offsets = [0, 0], sizes = [16, 128], strides = [1, 1]} : vector<32x128xbf16> to vector<16x128xbf16>
    %c1_814 = arith.constant 1 : index
    %c0_815 = arith.constant 0 : index
    %720 = vector.load %arg9[%c1_814, %c0_815] : memref<36x128xbf16, #tpu.memory_space<vmem>>, vector<16x128xbf16>
    tpu.vector_store %arg9[%c1_814, %c0_815], %719 {strides = array<i32>} : memref<36x128xbf16, #tpu.memory_space<vmem>>, vector<16x128xbf16>,
    %721 = vector.extract_strided_slice %718 {offsets = [16, 0], sizes = [16, 128], strides = [1, 1]} : vector<32x128xbf16> to vector<16x128xbf16>
    %c19_816 = arith.constant 19 : index
    %c0_817 = arith.constant 0 : index
    %722 = vector.load %arg9[%c19_816, %c0_817] : memref<36x128xbf16, #tpu.memory_space<vmem>>, vector<16x128xbf16>
    tpu.vector_store %arg9[%c19_816, %c0_817], %721 {strides = array<i32>} : memref<36x128xbf16, #tpu.memory_space<vmem>>, vector<16x128xbf16>,
    %c0_818 = arith.constant 0 : index
    %c0_819 = arith.constant 0 : index
    %723 = vector.load %arg9[%c0_818, %c0_819] : memref<36x128xbf16, #tpu.memory_space<vmem>>, vector<16x128xbf16>
    %c0_820 = arith.constant 0 : index
    %c0_821 = arith.constant 0 : index
    %724 = vector.load %arg10[%c0_820, %c0_821] : memref<32x384xbf16, #tpu.memory_space<vmem>>, vector<16x128xbf16>
    tpu.vector_store %arg10[%c0_820, %c0_821], %723 {strides = array<i32>} : memref<32x384xbf16, #tpu.memory_space<vmem>>, vector<16x128xbf16>,
    %c1_822 = arith.constant 1 : index
    %c0_823 = arith.constant 0 : index
    %725 = vector.load %arg9[%c1_822, %c0_823] : memref<36x128xbf16, #tpu.memory_space<vmem>>, vector<16x128xbf16>
    %c0_824 = arith.constant 0 : index
    %c128_825 = arith.constant 128 : index
    %726 = vector.load %arg10[%c0_824, %c128_825] : memref<32x384xbf16, #tpu.memory_space<vmem>>, vector<16x128xbf16>
    tpu.vector_store %arg10[%c0_824, %c128_825], %725 {strides = array<i32>} : memref<32x384xbf16, #tpu.memory_space<vmem>>, vector<16x128xbf16>,
    %c2_826 = arith.constant 2 : index
    %c0_827 = arith.constant 0 : index
    %727 = vector.load %arg9[%c2_826, %c0_827] : memref<36x128xbf16, #tpu.memory_space<vmem>>, vector<16x128xbf16>
    %c0_828 = arith.constant 0 : index
    %c256_829 = arith.constant 256 : index
    %728 = vector.load %arg10[%c0_828, %c256_829] : memref<32x384xbf16, #tpu.memory_space<vmem>>, vector<16x128xbf16>
    tpu.vector_store %arg10[%c0_828, %c256_829], %727 {strides = array<i32>} : memref<32x384xbf16, #tpu.memory_space<vmem>>, vector<16x128xbf16>,
    %c18_830 = arith.constant 18 : index
    %c0_831 = arith.constant 0 : index
    %729 = vector.load %arg9[%c18_830, %c0_831] : memref<36x128xbf16, #tpu.memory_space<vmem>>, vector<16x128xbf16>
    %c16_832 = arith.constant 16 : index
    %c0_833 = arith.constant 0 : index
    %730 = vector.load %arg10[%c16_832, %c0_833] : memref<32x384xbf16, #tpu.memory_space<vmem>>, vector<16x128xbf16>
    tpu.vector_store %arg10[%c16_832, %c0_833], %729 {strides = array<i32>} : memref<32x384xbf16, #tpu.memory_space<vmem>>, vector<16x128xbf16>,
    %c19_834 = arith.constant 19 : index
    %c0_835 = arith.constant 0 : index
    %731 = vector.load %arg9[%c19_834, %c0_835] : memref<36x128xbf16, #tpu.memory_space<vmem>>, vector<16x128xbf16>
    %c16_836 = arith.constant 16 : index
    %c128_837 = arith.constant 128 : index
    %732 = vector.load %arg10[%c16_836, %c128_837] : memref<32x384xbf16, #tpu.memory_space<vmem>>, vector<16x128xbf16>
    tpu.vector_store %arg10[%c16_836, %c128_837], %731 {strides = array<i32>} : memref<32x384xbf16, #tpu.memory_space<vmem>>, vector<16x128xbf16>,
    %c20_838 = arith.constant 20 : index
    %c0_839 = arith.constant 0 : index
    %733 = vector.load %arg9[%c20_838, %c0_839] : memref<36x128xbf16, #tpu.memory_space<vmem>>, vector<16x128xbf16>
    %c16_840 = arith.constant 16 : index
    %c256_841 = arith.constant 256 : index
    %734 = vector.load %arg10[%c16_840, %c256_841] : memref<32x384xbf16, #tpu.memory_space<vmem>>, vector<16x128xbf16>
    tpu.vector_store %arg10[%c16_840, %c256_841], %733 {strides = array<i32>} : memref<32x384xbf16, #tpu.memory_space<vmem>>, vector<16x128xbf16>,
    %c0_842 = arith.constant 0 : index
    %c0_843 = arith.constant 0 : index
    %735 = vector.load %arg10[%c0_842, %c0_843] : memref<32x384xbf16, #tpu.memory_space<vmem>>, vector<32x384xbf16>
    %c19_844 = arith.constant 19 : index
    %c0_845 = arith.constant 0 : index
    %c0_846 = arith.constant 0 : index
    %736 = vector.load %arg4[%c19_844, %c0_845, %c0_846] : memref<20x384x128xbf16, #tpu.memory_space<vmem>>, vector<1x384x128xbf16>
    %737 = vector.shape_cast %736 : vector<1x384x128xbf16> to vector<384x128xbf16>
    %cst_847 = arith.constant dense<0.000000e+00> : vector<32x128xf32>
    %738 = tpu.matmul %735, %737, %cst_847 {dimension_numbers = #tpu.dot_dimension_numbers<[1], [0], [0], [1], [0, 0, 1, 1], [], []>} : vector<32x384xbf16>, vector<384x128xbf16>, vector<32x128xf32> -> vector<32x128xf32>
    %739 = arith.addf %738, %5 : vector<32x128xf32>
    %c0_848 = arith.constant 0 : index
    %c0_849 = arith.constant 0 : index
    %740 = vector.load %arg8[%c0_848, %c0_849] : memref<32x128xf32, #tpu.memory_space<vmem>>, vector<32x128xf32>
    tpu.vector_store %arg8[%c0_848, %c0_849], %739 {strides = array<i32>} : memref<32x128xf32, #tpu.memory_space<vmem>>, vector<32x128xf32>,
    return
  }
  func.func @transform_0(%arg0: i32) -> (i32, i32) {
    %c0_i32 = arith.constant 0 : i32
    %c0_i32_0 = arith.constant 0 : i32
    return %arg0, %c0_i32 : i32, i32
  }
  func.func @transform_1(%arg0: i32) -> (i32, i32) {
    %c0_i32 = arith.constant 0 : i32
    %c0_i32_0 = arith.constant 0 : i32
    %c0_i32_1 = arith.constant 0 : i32
    return %c0_i32, %c0_i32_0 : i32, i32
  }
  func.func @transform_2(%arg0: i32) -> (i32, i32) {
    %c0_i32 = arith.constant 0 : i32
    %c0_i32_0 = arith.constant 0 : i32
    %c0_i32_1 = arith.constant 0 : i32
    return %c0_i32, %c0_i32_0 : i32, i32
  }
  func.func @transform_3(%arg0: i32) -> (i32, i32, i32) {
    %c0_i32 = arith.constant 0 : i32
    %c0_i32_0 = arith.constant 0 : i32
    %c0_i32_1 = arith.constant 0 : i32
    %c0_i32_2 = arith.constant 0 : i32
    return %c0_i32, %c0_i32_0, %c0_i32_1 : i32, i32, i32
  }
  func.func @transform_4(%arg0: i32) -> (i32, i32) {
    %c0_i32 = arith.constant 0 : i32
    %c0_i32_0 = arith.constant 0 : i32
    %c0_i32_1 = arith.constant 0 : i32
    return %c0_i32, %c0_i32_0 : i32, i32
  }
  func.func @transform_5(%arg0: i32) -> (i32, i32) {
    %c0_i32 = arith.constant 0 : i32
    %c0_i32_0 = arith.constant 0 : i32
    %c0_i32_1 = arith.constant 0 : i32
    return %c0_i32, %c0_i32_0 : i32, i32
  }
  func.func @transform_6(%arg0: i32) -> (i32, i32) {
    %c0_i32 = arith.constant 0 : i32
    %c0_i32_0 = arith.constant 0 : i32
    %c0_i32_1 = arith.constant 0 : i32
    return %c0_i32, %c0_i32_0 : i32, i32
  }
  func.func @transform_7(%arg0: i32) -> (i32, i32) {
    %c0_i32 = arith.constant 0 : i32
    %c0_i32_0 = arith.constant 0 : i32
    return %arg0, %c0_i32 : i32, i32
  }
}

</mosaic_0001>

<bundles_post_ra>
// kernel: memnet_forward.1
= control target key start
LH: loop header
LB: loop body
LE: loop exit
PB: predicated region body
PF: predicated region fallthrough
CT: control target
= control target key end

     0   :  { %12 = vsyncpa [#allocation5], 0  ;;  %s16147_s0 = inlined_call_operand.vmem [shape: f32[32,128], index: 0, kind: input, shape index: {}]   ;;  %s16148_s1 = inlined_call_operand.hbm [shape: f32[20,128], index: 1, kind: input, shape index: {}]   ;;  %s16149_s2 = inlined_call_operand.hbm [shape: f32[20,128], index: 2, kind: input, shape index: {}]   ;;  %s16150_s3 = inlined_call_operand.hbm [shape: bf16[20,384,128], index: 3, kind: input, shape index: {}]   ;;  %s16151_s4 = inlined_call_operand.hbm [shape: f32[15,128], index: 4, kind: input, shape index: {}]   ;;  %s16152_s5 = inlined_call_operand.hbm [shape: f32[15,128], index: 5, kind: input, shape index: {}]   ;;  %s16153_s6 = inlined_call_operand.hbm [shape: bf16[1920,128], index: 6, kind: input, shape index: {}]   ;;  %s16154_s7 = inlined_call_operand.vmem [shape: f32[32,128], index: 7, kind: output, shape index: {}]  }
   0x1   :  { %13 = vsyncpa [#allocation7], 0 }
   0x2   :  { %14 = vsyncpa [#allocation10], 0 }
   0x3   :  { %15 = vsyncpa [#allocation13], 0  ;;  %s15255_s24 = smov [#allocation6]   ;;  %s15256_s26 = smov [#allocation9]  }
   0x4   :  { %s35_s25 = sshll.u32 %s15255_s24, 4  ;;  %s59_s27 = sshll.u32 %s15256_s26, 4  ;;  %s36_s25 = int_to_ptr.vmem [resolvable:$true] %s35_s25  ;;  %s15305_s27 = int_to_ptr.vmem [resolvable:$true] %s59_s27 }
   0x5   :  { %s15115_s30 = scalar_lea.hbm %s16149_s2, 384 }
   0x6   :  { %p15116_p0 = scmp.ne.s32.totalorder %s16149_s2, %s15115_s30  ;;  %p15119_p1 = scmp.lt.u32.totalorder %s15115_s30, %s16149_s2 }
   0x8   :  { %p15121_p2 = pnand %p15119_p1, %p15116_p0 }
   0xa   :  { %15124 = shalt.err (!%p15121_p2)
}
   0xb   :  { %s15125_s12 = scalar_lea.vmem %s36_s25, 384  ;;  %p15130_p4 = scmp.lt.s32.totalorder %s36_s25, %s36_s25 }
   0xc   :  { %p15126_p3 = scmp.ne.s32.totalorder %s36_s25, %s15125_s12  ;;  %p15131_p5 = scmp.lt.s32.totalorder %s15125_s12, %s15125_s12 }
   0xe   :  { %p15132_p6 = por %p15131_p5, %p15130_p4 }
  0x10   :  { %p15133_p7 = pnand %p15132_p6, %p15126_p3 }
  0x12   :  { %15136 = shalt.err (!%p15133_p7)
}
  0x13   :  { %s15257_s13 = smov 128   ;;  %s15258_s14 = smov 8  }
  0x14   :  { %41 = dma.hbm_to_vmem [thread:$0]  %s16149_s2, 384, %s36_s25, [#allocation7], %s15257_s13, %s15257_s13, %s15258_s14  }
  0x15   :  { %s15137_s19 = scalar_lea.hbm %s16151_s4, 256 }
  0x16   :  { %p15138_p8 = scmp.ne.s32.totalorder %s16151_s4, %s15137_s19  ;;  %p15141_p9 = scmp.lt.u32.totalorder %s15137_s19, %s16151_s4 }
  0x18   :  { %p15143_p10 = pnand %p15141_p9, %p15138_p8 }
  0x1a   :  { %15146 = shalt.err (!%p15143_p10)
}
  0x1b   :  { %s15147_s24 = scalar_lea.vmem %s15305_s27, 256  ;;  %p15152_p12 = scmp.lt.s32.totalorder %s15305_s27, %s15305_s27 }
  0x1c   :  { %p15148_p11 = scmp.ne.s32.totalorder %s15305_s27, %s15147_s24  ;;  %p15153_p13 = scmp.lt.s32.totalorder %s15147_s24, %s15147_s24 }
  0x1e   :  { %p15154_p0 = por %p15153_p13, %p15152_p12 }
  0x20   :  { %p15155_p1 = pnand %p15154_p0, %p15148_p11 }
  0x22   :  { %15158 = shalt.err (!%p15155_p1)
}
  0x23   :  { %65 = dma.hbm_to_vmem [thread:$0]  %s16151_s4, 256, %s15305_s27, [#allocation10], %s15257_s13, %s15257_s13, %s15258_s14  }
  0x24   :  { %s15259_s26 = smov [#allocation4]   ;;  %s15260_s29 = smov [#allocation8]  }
  0x25   :  { %s23_s28 = sshll.u32 %s15259_s26, 4  ;;  %s47_s30 = sshll.u32 %s15260_s29, 4  ;;  %s24_s28 = int_to_ptr.vmem [resolvable:$true] %s23_s28  ;;  %s15342_s30 = int_to_ptr.vmem [resolvable:$true] %s47_s30 }
  0x26   :  { %s15159_s10 = scalar_lea.hbm %s16148_s1, 384 }
  0x27   :  { %p15160_p2 = scmp.ne.s32.totalorder %s16148_s1, %s15159_s10  ;;  %p15163_p3 = scmp.lt.u32.totalorder %s15159_s10, %s16148_s1 }
  0x29   :  { %p15165_p4 = pnand %p15163_p3, %p15160_p2 }
  0x2b   :  { %15168 = shalt.err (!%p15165_p4)
}
  0x2c   :  { %s15169_s4 = scalar_lea.vmem %s24_s28, 384  ;;  %p15174_p6 = scmp.lt.s32.totalorder %s24_s28, %s24_s28 }
  0x2d   :  { %p15170_p5 = scmp.ne.s32.totalorder %s24_s28, %s15169_s4  ;;  %p15175_p7 = scmp.lt.s32.totalorder %s15169_s4, %s15169_s4 }
  0x2f   :  { %p15176_p8 = por %p15175_p7, %p15174_p6 }
  0x31   :  { %p15177_p9 = pnand %p15176_p8, %p15170_p5 }
  0x33   :  { %15180 = shalt.err (!%p15177_p9)
}
  0x34   :  { %29 = dma.hbm_to_vmem [thread:$0]  %s16148_s1, 384, %s24_s28, [#allocation5], %s15257_s13, %s15257_s13, %s15258_s14  }
  0x35   :  { %s15181_s20 = scalar_lea.hbm %s16150_s3, 61440 }
  0x36   :  { %p15182_p10 = scmp.ne.s32.totalorder %s16150_s3, %s15181_s20  ;;  %p15185_p11 = scmp.lt.u32.totalorder %s15181_s20, %s16150_s3 }
  0x38   :  { %p15187_p12 = pnand %p15185_p11, %p15182_p10 }
  0x3a   :  { %15190 = shalt.err (!%p15187_p12)
}
  0x3b   :  { %s15191_s2 = scalar_lea.vmem %s15342_s30, 61440  ;;  %p15196_p0 = scmp.lt.s32.totalorder %s15342_s30, %s15342_s30 }
  0x3c   :  { %p15192_p13 = scmp.ne.s32.totalorder %s15342_s30, %s15191_s2  ;;  %p15197_p1 = scmp.lt.s32.totalorder %s15191_s2, %s15191_s2 }
  0x3e   :  { %p15198_p2 = por %p15197_p1, %p15196_p0 }
  0x40   :  { %p15199_p3 = pnand %p15198_p2, %p15192_p13 }
  0x42   :  { %15202 = shalt.err (!%p15199_p3)
}
  0x43   :  { %s15261_s1 = smov 64   ;;  %s15262_s25 = smov 4  }
  0x44   :  { %53 = dma.hbm_to_vmem [thread:$0]  %s16150_s3, 61440, %s15342_s30, [#allocation7], %s15261_s1, %s15261_s1, %s15262_s25  }
  0x45   :  { %s15263_s29 = smov [#allocation11]   ;;  %s15264_s9 = smov [#allocation12]  }
  0x46   :  { %s71_s8 = sshll.u32 %s15263_s29, 4  ;;  %s83_s10 = sshll.u32 %s15264_s9, 4  ;;  %s72_s8 = int_to_ptr.vmem [resolvable:$true] %s71_s8  ;;  %s15379_s10 = int_to_ptr.vmem [resolvable:$true] %s83_s10 }
  0x47   :  { %s15203_s15 = scalar_lea.hbm %s16152_s5, 256 }
  0x48   :  { %p15204_p4 = scmp.ne.s32.totalorder %s16152_s5, %s15203_s15  ;;  %p15207_p5 = scmp.lt.u32.totalorder %s15203_s15, %s16152_s5 }
  0x4a   :  { %p15209_p6 = pnand %p15207_p5, %p15204_p4 }
  0x4c   :  { %15212 = shalt.err (!%p15209_p6)
}
  0x4d   :  { %s15213_s3 = scalar_lea.vmem %s72_s8, 256  ;;  %p15218_p8 = scmp.lt.s32.totalorder %s72_s8, %s72_s8 }
  0x4e   :  { %p15214_p7 = scmp.ne.s32.totalorder %s72_s8, %s15213_s3  ;;  %p15219_p9 = scmp.lt.s32.totalorder %s15213_s3, %s15213_s3 }
  0x50   :  { %p15220_p10 = por %p15219_p9, %p15218_p8 }
  0x52   :  { %p15221_p11 = pnand %p15220_p10, %p15214_p7 }
  0x54   :  { %15224 = shalt.err (!%p15221_p11)
}
  0x55   :  { %77 = dma.hbm_to_vmem [thread:$0]  %s16152_s5, 256, %s72_s8, [#allocation10], %s15257_s13, %s15257_s13, %s15258_s14  }
  0x56   :  { %s15225_s21 = scalar_lea.hbm %s16153_s6, 15360 }
  0x57   :  { %p15226_p12 = scmp.ne.s32.totalorder %s16153_s6, %s15225_s21  ;;  %p15229_p13 = scmp.lt.u32.totalorder %s15225_s21, %s16153_s6 }
  0x59   :  { %p15231_p0 = pnand %p15229_p13, %p15226_p12 }
  0x5b   :  { %15234 = shalt.err (!%p15231_p0)
}
  0x5c   :  { %s15235_s26 = scalar_lea.vmem %s15379_s10, 15360  ;;  %p15240_p2 = scmp.lt.s32.totalorder %s15379_s10, %s15379_s10 }
  0x5d   :  { %p15236_p1 = scmp.ne.s32.totalorder %s15379_s10, %s15235_s26  ;;  %p15241_p3 = scmp.lt.s32.totalorder %s15235_s26, %s15235_s26 }
  0x5f   :  { %p15242_p4 = por %p15241_p3, %p15240_p2 }
  0x61   :  { %p15243_p5 = pnand %p15242_p4, %p15236_p1 }
  0x63   :  { %15246 = shalt.err (!%p15243_p5)
}
  0x64   :  { %89 = dma.hbm_to_vmem [thread:$0]  %s16153_s6, 15360, %s15379_s10, [#allocation13], %s15261_s1, %s15261_s1, %s15262_s25  }
  0x65   :  { %15247 = dma.done.wait [#allocation5], 384  }
  0x66   :  { %15248 = vsyncadd [#allocation5], 4294966912 }
  0x67   :  { %15249 = dma.done.wait [#allocation7], 61824  }
  0x68   :  { %15250 = vsyncadd [#allocation7], 4294905472 }
  0x69   :  { %15251 = dma.done.wait [#allocation10], 512  }
  0x6a   :  { %15252 = vsyncadd [#allocation10], 4294966784 }
  0x6b   :  { %15253 = dma.done.wait [#allocation13], 15360  }
  0x6c   :  { %15254 = vsyncadd [#allocation13], 4294951936  ;;  %v14298_v0 = vld [vmem:[#allocation8 + $0x40] sm:$0xff]   ;;  %v14301_v3 = vld [vmem:[#allocation8 + $0x48] sm:$0xff]   ;;  %vm110_vm0 = vsmask.f32 256 }
  0x6d   :  { %v14299_v1 = vld [vmem:[#allocation8] sm:$0xff]   ;;  %12902 = vmatprep.subr.bf16.mxu0 %v14298_v0  ;;  %vm115_vm1 = vsmask.f32 7938  ;;  %v14302_v4 = vld [vmem:[#allocation8 + $0x8] sm:$0xff]   ;;  %vm121_vm2 = vsmask.f32 1280 }
  0x6e   :  { %v14300_v2 = vld [vmem:[#allocation8 + $0x80] sm:$0xff]   ;;  %12903 = vmatpush3.bf16.msra.mxu0 %v14299_v1  ;;  %v14303_v5 = vld [vmem:[#allocation8 + $0x88] sm:$0xff]   ;;  %v14304_v6 = vld [vmem:[#allocation8 + $0x50] sm:$0xff]   ;;  %vm109_vm3 = vcmask 1040384   ;;  %vm120_vm4 = vcmask 1041409   ;;  %vm186_vm10 = vcmask 1043456  }
  0x6f   :  { %13868 = vmatprep.subr.bf16.mxu1 %v14300_v2  ;;  %12904 = vmatprep.subr.bf16.mxu0 %v14301_v3  ;;  %v14305_v7 = vld [vmem:[#allocation8 + $0x10] sm:$0xff]   ;;  %v14307_v9 = vld [vmem:[#allocation8 + $0x58] sm:$0xff]   ;;  %v14310_v12 = vld [vmem:[#allocation8 + $0x60] sm:$0xff]   ;;  %vm126_vm5 = vsmask.f32 7942  ;;  %vm224_vm13 = vcmask 1043457  }
  0x70   :  { %13869 = vmatpush3.bf16.msra.mxu1 %v14300_v2  ;;  %v14306_v8 = vld [vmem:[#allocation8 + $0x90] sm:$0xff]   ;;  %v14308_v10 = vld [vmem:[#allocation8 + $0x18] sm:$0xff]   ;;  %v14312_v13 = vld [vmem:[#allocation8 + $0xa0] sm:$0xff]   ;;  %vm164_vm11 = vsmask.f32 4368  ;;  %vm230_vm14 = vcmask 1041408  }
  0x71   :  { %13870 = vmatprep.subr.bf16.mxu1 %v14303_v5  ;;  %v14309_v11 = vld [vmem:[#allocation8 + $0x98] sm:$0xff]   ;;  %vm15417_vm6 = vmand %vm109_vm3, %vm110_vm0  ;;  %v14311_v16 = vld [vmem:[#allocation8 + $0x20] sm:$0xff]   ;;  %vm200_vm12 = vsmask.f32 5392 }
  0x72   :  { %12905 = vmatpush3.bf16.msra.mxu0 %v14302_v4  ;;  %vm15422_vm7 = vmand %vm109_vm3, %vm115_vm1  ;;  %v14313_v17 = vld [vmem:[#allocation8 + $0x68] sm:$0xff]   ;;  %v14316_v22 = vld [vmem:[#allocation8 + $0x70] sm:$0xff]  }
  0x73   :  { %12906 = vmatprep.subr.bf16.mxu0 %v14304_v6  ;;  %vm15427_vm8 = vmand %vm120_vm4, %vm121_vm2  ;;  %v14315_v20 = vld [vmem:[#allocation8 + $0xa8] sm:$0xff]   ;;  %v14317_v23 = vld [vmem:[#allocation8 + $0x30] sm:$0xff]  }
  0x74   :  { %13871 = vmatpush3.bf16.msra.mxu1 %v14303_v5  ;;  %vm15432_vm9 = vmand %vm120_vm4, %vm126_vm5  ;;  %v14314_v21 = vld [vmem:[#allocation8 + $0x28] sm:$0xff]   ;;  %v14318_v24 = vld [vmem:[#allocation8 + $0xb0] sm:$0xff]  }
  0x75   :  { %13872 = vmatprep.subr.bf16.mxu1 %v14306_v8  ;;  %v14319_v25 = vld [vmem:[#allocation8 + $0x78] sm:$0xff]   ;;  %v117_v28 = vld [vmem:[#allocation2 + $0x8] sm:$0x1]  ;;  %v11852_v33 = vld [vmem:[#allocation4] ss:$0 sm:$0xff] }
  0x76   :  { %12907 = vmatpush3.bf16.msra.mxu0 %v14305_v7  ;;  %v14321_v26 = vld [vmem:[#allocation8 + $0xb8] sm:$0xff]   ;;  %v118_v31 = vsel %vm15422_vm7, 0, %v117_v28  ;;  %v132_v32 = vld [vmem:[%s16147_s0 + $0x8] sm:$0xff]  ;;  %v133_v34 = vld [vmem:[%s16147_s0 + $0x10] sm:$0xff]  ;;  %vm345_vm7 = vcmask 1045504  }
  0x77   :  { %12908 = vmatprep.subr.bf16.mxu0 %v14307_v9  ;;  %v112_v27 = vld [vmem:[#allocation2] sm:$0x1]  ;;  %119 = vst [vmem:[#allocation2 + $0x8] sm:$0x1] %v118_v31  ;;  %v11853_v35 = vld [vmem:[#allocation6] ss:$0 sm:$0xff]  ;;  %v142_v37 = vmul.f32 %v11852_v33, %v132_v32  ;;  %v143_v40 = vmul.f32 %v11852_v33, %v133_v34  ;;  %vm15458_vm15 = vmor %vm110_vm0, %vm164_vm11 }
  0x78   :  { %13873 = vmatpush3.bf16.msra.mxu1 %v14306_v8  ;;  %v131_v29 = vld [vmem:[%s16147_s0] sm:$0xff]  ;;  %v113_v30 = vsel %vm15417_vm6, 0, %v112_v27  ;;  %v123_v38 = vld [vmem:[#allocation2 + $0x8] sm:$0x2]  ;;  %v128_v39 = vld [vmem:[#allocation2 + $0x10] sm:$0x2] }
  0x79   :  { %13874 = vmatprep.subr.bf16.mxu1 %v14309_v11  ;;  %114 = vst [vmem:[#allocation2] sm:$0x1] %v113_v30  ;;  %v141_v36 = vmul.f32 %v11852_v33, %v131_v29  ;;  %v14320_v41 = vld [vmem:[#allocation8 + $0x38] sm:$0xff]   ;;  %v124_v42 = vsel %vm15427_vm8, 0, %v123_v38  ;;  %v129_v43 = vsel %vm15432_vm9, 0, %v128_v39  ;;  %v150_v46 = vadd.f32 %v11853_v35, %v142_v37  ;;  %vm15464_vm3 = vmand %vm186_vm10, %vm115_vm1 }
  0x7a   :  { %12909 = vmatpush3.bf16.msra.mxu0 %v14308_v10  ;;  %v134_v44 = vld [vmem:[%s16147_s0 + $0x18] sm:$0xff]  ;;  %125 = vst [vmem:[#allocation2 + $0x8] sm:$0x2] %v124_v42  ;;  %130 = vst [vmem:[#allocation2 + $0x10] sm:$0x2] %v129_v43  ;;  %v151_v48 = vadd.f32 %v11853_v35, %v143_v40 }
  0x7b   :  { %12910 = vmatprep.subr.bf16.mxu0 %v14310_v12  ;;  %v149_v45 = vadd.f32 %v11853_v35, %v141_v36  ;;  %v144_v47 = vmul.f32 %v11852_v33, %v134_v44  ;;  %v154_v50 = vmax.f32 %v150_v46, 0.0  ;;  %vm15470_vm0 = vmand %vm224_vm13, %vm126_vm5  ;;  %vm255_vm5 = vsmask.f32 7424 }
  0x7c   :  { %13875 = vmatpush3.bf16.msra.mxu1 %v14309_v11  ;;  %v155_v52 = vmax.f32 %v151_v48, 0.0  ;;  %vm15476_vm1 = vmor %vm121_vm2, %vm200_vm12  ;;  %vm314_vm8 = vsmask.f32 6400 }
  0x7d   :  { %13876 = vmatprep.subr.bf16.mxu1 %v14312_v13  ;;  %v153_v49 = vmax.f32 %v149_v45, 0.0  ;;  %v152_v51 = vadd.f32 %v11853_v35, %v144_v47  ;;  %v12823_v54 = vpack.c.bf16 %v154_v50, %v154_v50  ;;  %vm15490_vm4 = vmand %vm230_vm14, %vm121_vm2  ;;  %vm281_vm2 = vcmask 1046528  }
  0x7e   :  { %12911 = vmatpush3.bf16.msra.mxu0 %v14311_v16  ;;  %v12824_v56 = vpack.c.bf16 %v155_v52, %v155_v52  ;;  %v192_v62 = vld [vmem:[#allocation2 + $0x8] sm:$0x1] }
  0x7f   :  { %12912 = vmatprep.subr.bf16.mxu0 %v14313_v17  ;;  %v12822_v53 = vpack.c.bf16 %v153_v49, %v153_v49  ;;  %v156_v55 = vmax.f32 %v152_v51, 0.0  ;;  %v175_v59 = vshrl.u32 %v12823_v54, 16  ;;  %v178_v60 = vshll.u32 %v12823_v54, 16 }
  0x80   :  { %13877 = vmatpush3.bf16.msra.mxu1 %v14312_v13  ;;  %v188_v61 = vld [vmem:[#allocation2] sm:$0xf]  ;;  %v203_v0 = vshrl.u32 %v12824_v56, 16  ;;  %v206_v1 = vshll.u32 %v12824_v56, 16 }
  0x81   :  { %13878 = vmatprep.subr.bf16.mxu1 %v14315_v20  ;;  %v167_v57 = vshrl.u32 %v12822_v53, 16  ;;  %v170_v58 = vshll.u32 %v12822_v53, 16  ;;  %v12825_v63 = vpack.c.bf16 %v156_v55, %v156_v55  ;;  %v177_v4 = vrot.slane %v175_v59, 7  ;;  %v226_v5 = vld [vmem:[#allocation2 + $0x8] sm:$0xe] }
  0x82   :  { %12913 = vmatpush3.bf16.msra.mxu0 %v14314_v21  ;;  %v205_v7 = vrot.slane %v203_v0, 6  ;;  %v208_v8 = vrot.slane %v206_v1, 7 }
  0x83   :  { %12914 = vmatprep.subr.bf16.mxu0 %v14316_v22  ;;  %v169_v3 = vrot.slane %v167_v57, 7  ;;  %v212_v9 = vshrl.u32 %v12825_v63, 16  ;;  %v215_v10 = vshll.u32 %v12825_v63, 16  ;;  %v180_v13 = vor.u32 %v178_v60, %v177_v4 }
  0x84   :  { %13879 = vmatpush3.bf16.msra.mxu1 %v14315_v20  ;;  %v182_v15 = vrot.slane %v177_v4, 4  ;;  %v209_v18 = vor.u32 %v208_v8, %v205_v7  ;;  %v14333_v8 = vld [vmem:[#allocation8 + $0x100] sm:$0xff]  }
  0x85   :  { %13880 = vmatprep.subr.bf16.mxu1 %v14318_v24  ;;  %v172_v11 = vor.u32 %v170_v58, %v169_v3  ;;  %v173_v12 = vrot.slane %v169_v3, 4  ;;  %v214_v19 = vrot.slane %v212_v9, 6  ;;  %v217_v20 = vrot.slane %v215_v10, 7  ;;  %v14334_v9 = vld [vmem:[#allocation8 + $0xc0] sm:$0xff]   ;;  %v14335_v10 = vld [vmem:[#allocation8 + $0x108] sm:$0xff]  }
  0x86   :  { %12915 = vmatpush3.bf16.msra.mxu0 %v14317_v23  ;;  %v193_v23 = vsel %vm15417_vm6, %v182_v15, %v192_v62  ;;  %v227_v27 = vsel %vm15470_vm0, %v209_v18, %v226_v5  ;;  %v14340_v15 = vld [vmem:[#allocation8 + $0x148] sm:$0xff]  }
  0x87   :  { %12916 = vmatprep.subr.bf16.mxu0 %v14319_v25  ;;  %v181_v21 = vsel %vm15458_vm15, %v173_v12, %v180_v13  ;;  %v189_v22 = vsel %vm15464_vm3, %v172_v11, %v188_v61  ;;  %194 = vst [vmem:[#allocation2 + $0x8] sm:$0x1] %v193_v23  ;;  %v210_v25 = vrot.slane %v209_v18, 4  ;;  %228 = vst [vmem:[#allocation2 + $0x8] sm:$0xe] %v227_v27  ;;  %v14337_v11 = vld [vmem:[#allocation8 + $0x140] sm:$0xff]  }
  0x88   :  { %13881 = vmatpush3.bf16.msra.mxu1 %v14318_v24  ;;  %v232_v24 = vld [vmem:[#allocation2 + $0x10] sm:$0x3]  ;;  %190 = vst [vmem:[#allocation2] sm:$0xf] %v189_v22  ;;  %191 = vst [vmem:[#allocation2 + $0x4] sm:$0xf] %v181_v21 }
  0x89   :  { %13882 = vmatprep.subr.bf16.mxu1 %v14321_v26  ;;  %v14336_v12 = vld [vmem:[#allocation8 + $0xc8] sm:$0xff]   ;;  %v14338_v13 = vld [vmem:[#allocation8 + $0x110] sm:$0xff]   ;;  %v14342_v21 = vld [vmem:[#allocation8 + $0xd8] sm:$0xff]  }
  0x8a   :  { %12917 = vmatpush3.bf16.msra.mxu0 %v14320_v41  ;;  %v14339_v18 = vld [vmem:[#allocation8 + $0xd0] sm:$0xff]   ;;  %v14344_v22 = vld [vmem:[#allocation8 + $0x120] sm:$0xff]   ;;  %v14346_v23 = vld [vmem:[#allocation8 + $0x158] sm:$0xff]  }
  0x8b   :  { %12940 = vmatprep.subr.bf16.mxu0 %v14333_v8  ;;  %v14348_v27 = vld [vmem:[#allocation8 + $0xe8] sm:$0xff]  }
  0x8c   :  { %13883 = vmatpush3.bf16.msra.mxu1 %v14321_v26  ;;  %v218_v26 = vor.u32 %v217_v20, %v214_v19  ;;  %v14341_v19 = vld [vmem:[#allocation8 + $0x118] sm:$0xff]   ;;  %v14343_v20 = vld [vmem:[#allocation8 + $0x150] sm:$0xff]  }
  0x8d   :  { %13888 = vmatprep.subr.bf16.mxu1 %v14337_v11 }
  0x8e   :  { %v219_v29 = vsel %vm15476_vm1, %v210_v25, %v218_v26  ;;  %v220_v30 = vrot.slane %v218_v26, 4  ;;  %v14323_v33 = vld [vmem:[#allocation2 + $0x8] ss:$0 sps:$4 sm:$0x11]   ;;  %v14347_v25 = vld [vmem:[#allocation8 + $0x128] sm:$0xff]  }
  0x8f   :  { %229 = vst [vmem:[#allocation2 + $0xc] sm:$0xf] %v219_v29  ;;  %v14322_v32 = vld [vmem:[#allocation2] sm:$0xff]   ;;  %v264_v36 = vshll.u32 %v14323_v33, 16  ;;  %v14350_v29 = vld [vmem:[#allocation8 + $0x130] sm:$0xff]  }
  0x90   :  { %v233_v31 = vsel %vm15490_vm4, %v220_v30, %v232_v24  ;;  %v257_v34 = vshrl.u32 %v14322_v32, 16  ;;  %v259_v35 = vshll.u32 %v14322_v32, 16  ;;  %v14325_v37 = vld [vmem:[#allocation2] sm:$0xfe]   ;;  %v14352_v30 = vld [vmem:[#allocation8 + $0x168] sm:$0xff]   ;;  %v14355_v33 = vld [vmem:[#allocation8 + $0x170] sm:$0xff]  }
  0x91   :  { %234 = vst [vmem:[#allocation2 + $0x10] sm:$0x3] %v233_v31  ;;  %v266_v39 = vrot.slane %v264_v36, 1  ;;  %v14326_v40 = vld [vmem:[#allocation2 + $0x8] ss:$0 sps:$4 sm:$0x11]  }
  0x92   :  { %v261_v38 = vrot.slane %v259_v35, 1  ;;  %v14324_v41 = vld [vmem:[#allocation2] sm:$0xff]   ;;  %v282_v42 = vrot.slane %v14325_v37, 1  ;;  %v283_v44 = vrot.slane %v14326_v40, 1  ;;  %v14351_v31 = vld [vmem:[#allocation8 + $0xf0] sm:$0xff]  }
  0x93   :  { %v14345_v24 = vld [vmem:[#allocation8 + $0xe0] sm:$0xff]   ;;  %v14353_v32 = vld [vmem:[#allocation8 + $0x138] sm:$0xff]  }
  0x94   :  { %v262_v43 = vor.u32 %v261_v38, %v257_v34  ;;  %v284_v48 = vsel %vm281_vm2, %v282_v42, %v283_v44  ;;  %v14349_v26 = vld [vmem:[#allocation8 + $0x160] sm:$0xff]   ;;  %v14354_v34 = vld [vmem:[#allocation8 + $0xf8] sm:$0xff]  }
  0x95   :  { %13884 = vmatprep.mubr.bf16.mxu1 %v284_v48  ;;  %v14356_v35 = vld [vmem:[#allocation8 + $0x178] sm:$0xff]  }
  0x96   :  { %v14327_v45 = vld [vmem:[#allocation2 + $0x8] sm:$0xfc]   ;;  %v267_v47 = vsel %vm255_vm5, %v262_v43, %v266_v39  ;;  %v11893_v39 = vld [vmem:[#allocation4 + $0x1] ss:$0 sm:$0xff]  ;;  %v696_v8 = vld [vmem:[#allocation2] sm:$0xf] }
  0x97   :  { %v346_v49 = vrot.slane %v14327_v45, 2  ;;  %v14329_v51 = vld [vmem:[#allocation2 + $0x8] sm:$0xfe]   ;;  %581 = vmatprep.mubr.bf16.mxu0 %v267_v47 }
  0x98   :  { %v14328_v46 = vld [vmem:[#allocation2 + $0x10] ss:$0 sps:$4 sm:$0x33]   ;;  %582 = vmatmul.mubr.bf16.vlgmr.msra.gmra.mrb[0].mxu0 %v14324_v41  ;;  %v316_v54 = vshrl.u32 %v14329_v51, 16  ;;  %v319_v55 = vshll.u32 %v14329_v51, 16 }
  0x99   :  { %v347_v50 = vrot.slane %v14328_v46, 2  ;;  %v14330_v52 = vld [vmem:[#allocation2 + $0x10] ss:$0 sps:$4 sm:$0x33]   ;;  %v14331_v56 = vld [vmem:[#allocation2 + $0x8] sm:$0xfe]   ;;  %12941 = vmatpush3.bf16.msra.mxu0 %v14334_v9 }
  0x9a   :  { %v324_v57 = vshrl.u32 %v14330_v52, 16  ;;  %v327_v58 = vshll.u32 %v14330_v52, 16  ;;  %v14332_v59 = vld [vmem:[#allocation2 + $0x10] ss:$0 sps:$4 sm:$0x11]   ;;  %v318_v60 = vrot.slane %v316_v54, 1  ;;  %12942 = vmatprep.subr.bf16.mxu0 %v14335_v10 }
  0x9b   :  { %v348_v53 = vsel %vm345_vm7, %v346_v49, %v347_v50  ;;  %v321_v61 = vrot.slane %v319_v55, 2  ;;  %v298_v62 = vrot.slane %v14331_v56, 1  ;;  %v299_v1 = vrot.slane %v14332_v59, 1  ;;  %v11894_v43 = vld [vmem:[#allocation6 + $0x1] ss:$0 sm:$0xff] }
  0x9c   :  { %13885 = vmatmul.mubr.bf16.vlgmr.msra.gmra.mrb[0].mxu1 %v348_v53  ;;  %v326_v63 = vrot.slane %v324_v57, 1  ;;  %v329_v0 = vrot.slane %v327_v58, 2 }
  0x9d   :  { %v322_v3 = vor.u32 %v321_v61, %v318_v60  ;;  %v300_v5 = vsel %vm281_vm2, %v298_v62, %v299_v1  ;;  %12943 = vmatpush3.bf16.msra.mxu0 %v14336_v12  ;;  %13889 = vmatpush3.bf16.msra.mxu1 %v14337_v11  ;;  %v12145_v62 = vld [vmem:[#allocation9 + $0x3] ss:$0 sm:$0xff]  ;;  %v12431_v1 = vld [vmem:[#allocation9 + $0x7] ss:$0 sm:$0xff] }
  0x9e   :  { %v330_v4 = vor.u32 %v329_v0, %v326_v63  ;;  %12944 = vmatprep.subr.bf16.mxu0 %v14338_v13  ;;  %13890 = vmatprep.subr.bf16.mxu1 %v14340_v15 }
  0xa0   :  { %v331_v7 = vsel %vm314_vm8, %v322_v3, %v330_v4 }
  0xa1   :  { %589 = vmatprep.mubr.bf16.mxu0 %v331_v7  ;;  %12945 = vmatpush3.bf16.msra.mxu0 %v14339_v18  ;;  %v12146_v7 = vld [vmem:[#allocation11 + $0x3] ss:$0 sm:$0xff] }
  0xa2   :  { %590 = vmatmul.mubr.bf16.gmra.mrb[4].mxu0 %v300_v5  ;;  %13891 = vmatpush3.bf16.msra.mxu1 %v14340_v15 }
  0xa3   :  { %12946 = vmatprep.subr.bf16.mxu0 %v14341_v19  ;;  %13892 = vmatprep.subr.bf16.mxu1 %v14343_v20  ;;  %v700_v19 = vld [vmem:[#allocation2 + $0x8] sm:$0x1] }
  0xa5   :  { %12947 = vmatpush3.bf16.msra.mxu0 %v14342_v21 }
  0xa6   :  { %13893 = vmatpush3.bf16.msra.mxu1 %v14343_v20  ;;  %12948 = vmatprep.subr.bf16.mxu0 %v14344_v22 }
  0xa7   :  { %13894 = vmatprep.subr.bf16.mxu1 %v14346_v23 }
  0xa9   :  { %12949 = vmatpush3.bf16.msra.mxu0 %v14345_v24  ;;  %v12432_v24 = vld [vmem:[#allocation11 + $0x7] ss:$0 sm:$0xff] }
  0xaa   :  { %13895 = vmatpush3.bf16.msra.mxu1 %v14346_v23  ;;  %12950 = vmatprep.subr.bf16.mxu0 %v14347_v25 }
  0xab   :  { %13896 = vmatprep.subr.bf16.mxu1 %v14349_v26 }
  0xad   :  { %12951 = vmatpush3.bf16.msra.mxu0 %v14348_v27 }
  0xae   :  { %13897 = vmatpush3.bf16.msra.mxu1 %v14349_v26  ;;  %12952 = vmatprep.subr.bf16.mxu0 %v14350_v29 }
  0xaf   :  { %13898 = vmatprep.subr.bf16.mxu1 %v14352_v30 }
  0xb1   :  { %12953 = vmatpush3.bf16.msra.mxu0 %v14351_v31 }
  0xb2   :  { %13899 = vmatpush3.bf16.msra.mxu1 %v14352_v30  ;;  %12954 = vmatprep.subr.bf16.mxu0 %v14353_v32 }
  0xb3   :  { %13900 = vmatprep.subr.bf16.mxu1 %v14355_v33 }
  0xb5   :  { %12955 = vmatpush3.bf16.msra.mxu0 %v14354_v34 }
  0xb6   :  { %13901 = vmatpush3.bf16.msra.mxu1 %v14355_v33 }
  0xb7   :  { %13902 = vmatprep.subr.bf16.mxu1 %v14356_v35 }
  0xba   :  { %13903 = vmatpush3.bf16.msra.mxu1 %v14356_v35 }
 0x16b   :  { %v12918_v36 = vpop.f32.mrb[0].mxu0 }
 0x16c   :  { %v12919_v37 = vpop.f32.mrb[1].mxu0 }
 0x16d   :  { %v12920_v40 = vadd.f32 %v12919_v37, %v12918_v36  ;;  %v12921_v41 = vpop.f32.mrb[2].mxu0 }
 0x16e   :  { %v12922_v44 = vpop.f32.mrb[3].mxu0 }
 0x16f   :  { %v13886_v38 = vpop.f32.mrb[0].mxu1  ;;  %v12923_v47 = vadd.f32 %v12922_v44, %v12921_v41 }
 0x170   :  { %v632_v42 = vpop.f32.mrb[1].mxu1 }
 0x171   :  { %v13887_v45 = vpop.f32.mrb[2].mxu1  ;;  %v15503_v46 = vadd.f32 %v12920_v40, %v632_v42 }
 0x172   :  { %v635_v48 = vpop.f32.mrb[3].mxu1 }
 0x173   :  { %v653_v49 = vmul.f32 %v11893_v39, %v15503_v46  ;;  %v15506_v50 = vadd.f32 %v12923_v47, %v635_v48 }
 0x175   :  { %v661_v51 = vadd.f32 %v11894_v43, %v653_v49  ;;  %v654_v52 = vmul.f32 %v11893_v39, %v15506_v50  ;;  %v12924_v53 = vpop.f32.mrb[4].mxu0  ;;  %v730_v49 = vld [vmem:[#allocation2 + $0x8] sm:$0xe] }
 0x176   :  { %v12925_v56 = vpop.f32.mrb[5].mxu0 }
 0x177   :  { %v665_v54 = vmax.f32 %v661_v51, 0.0  ;;  %v662_v55 = vadd.f32 %v11894_v43, %v654_v52  ;;  %v12926_v57 = vadd.f32 %v12925_v56, %v12924_v53  ;;  %v12927_v58 = vpop.f32.mrb[6].mxu0 }
 0x178   :  { %v12928_v61 = vpop.f32.mrb[7].mxu0 }
 0x179   :  { %v12826_v59 = vpack.c.bf16 %v665_v54, %v665_v54  ;;  %v666_v60 = vmax.f32 %v662_v55, 0.0  ;;  %v15509_v63 = vadd.f32 %v13886_v38, %v12926_v57  ;;  %v12929_v0 = vadd.f32 %v12928_v61, %v12927_v58 }
 0x17b   :  { %v677_v3 = vshrl.u32 %v12826_v59, 16  ;;  %v680_v4 = vshll.u32 %v12826_v59, 16  ;;  %v12827_v5 = vpack.c.bf16 %v666_v60, %v666_v60  ;;  %v655_v9 = vmul.f32 %v11893_v39, %v15509_v63 }
 0x17c   :  { %v15512_v10 = vadd.f32 %v13887_v45, %v12929_v0  ;;  %v3721_v11 = vmul.f32 %v12145_v62, %v15509_v63  ;;  %v7165_v18 = vmul.f32 %v12431_v1, %v15509_v63 }
 0x17d   :  { %v679_v12 = vrot.slane %v677_v3, 7  ;;  %v685_v13 = vshrl.u32 %v12827_v5, 16  ;;  %v688_v15 = vshll.u32 %v12827_v5, 16  ;;  %v663_v20 = vadd.f32 %v11894_v43, %v655_v9 }
 0x17e   :  { %v656_v21 = vmul.f32 %v11893_v39, %v15512_v10  ;;  %v3722_v22 = vmul.f32 %v12145_v62, %v15512_v10  ;;  %v3729_v23 = vadd.f32 %v12146_v7, %v3721_v11  ;;  %v7166_v29 = vmul.f32 %v12431_v1, %v15512_v10  ;;  %v734_v62 = vld [vmem:[#allocation2 + $0x10] sm:$0x3] }
 0x17f   :  { %v682_v25 = vor.u32 %v680_v4, %v679_v12  ;;  %v683_v26 = vrot.slane %v679_v12, 4  ;;  %v687_v27 = vrot.slane %v685_v13, 7  ;;  %v667_v30 = vmax.f32 %v663_v20, 0.0 }
 0x180   :  { %v664_v31 = vadd.f32 %v11894_v43, %v656_v21  ;;  %v3730_v32 = vadd.f32 %v12146_v7, %v3722_v22  ;;  %v3733_v33 = vmax.f32 %v3729_v23, 0.0  ;;  %v7173_v37 = vadd.f32 %v12432_v24, %v7165_v18 }
 0x181   :  { %v697_v34 = vsel %vm15464_vm3, %v682_v25, %v696_v8  ;;  %v690_v35 = vor.u32 %v688_v15, %v687_v27  ;;  %v692_v36 = vrot.slane %v687_v27, 4  ;;  %v12828_v38 = vpack.c.bf16 %v667_v30, %v667_v30 }
 0x182   :  { %698 = vst [vmem:[#allocation2] sm:$0xf] %v697_v34  ;;  %v668_v39 = vmax.f32 %v664_v31, 0.0  ;;  %v3734_v40 = vmax.f32 %v3730_v32, 0.0  ;;  %v7174_v41 = vadd.f32 %v12432_v24, %v7166_v29  ;;  %v7177_v11 = vmax.f32 %v7173_v37, 0.0 }
 0x183   :  { %v691_v42 = vsel %vm15458_vm15, %v683_v26, %v690_v35  ;;  %v701_v44 = vsel %vm15417_vm6, %v692_v36, %v700_v19  ;;  %v709_v43 = vshrl.u32 %v12828_v38, 16  ;;  %v712_v45 = vshll.u32 %v12828_v38, 16 }
 0x184   :  { %699 = vst [vmem:[#allocation2 + $0x4] sm:$0xf] %v691_v42  ;;  %702 = vst [vmem:[#allocation2 + $0x8] sm:$0x1] %v701_v44  ;;  %v12829_v47 = vpack.c.bf16 %v668_v39, %v668_v39  ;;  %v15525_v48 = vpack.c.bf16 %v3734_v40, %v3733_v33  ;;  %v7178_v18 = vmax.f32 %v7174_v41, 0.0 }
 0x185   :  { %v711_v51 = vrot.slane %v709_v43, 6  ;;  %v714_v52 = vrot.slane %v712_v45, 7 }
 0x186   :  { %v718_v53 = vshrl.u32 %v12829_v47, 16  ;;  %v721_v54 = vshll.u32 %v12829_v47, 16  ;;  %v15533_v25 = vpack.c.bf16 %v7178_v18, %v7177_v11  ;;  %v14364_v11 = vld [vmem:[#allocation8 + $0x188] sm:$0xff]   ;;  %v14369_v18 = vld [vmem:[#allocation8 + $0x210] sm:$0xff]  }
 0x187   :  { %v715_v55 = vor.u32 %v714_v52, %v711_v51 }
 0x188   :  { %v720_v56 = vrot.slane %v718_v53, 6  ;;  %v723_v57 = vrot.slane %v721_v54, 7 }
 0x189   :  { %v746_v58 = vld [vmem:[#allocation2] sm:$0xf]  ;;  %v716_v59 = vrot.slane %v715_v55, 4  ;;  %v731_v60 = vsel %vm15470_vm0, %v715_v55, %v730_v49 }
 0x18a   :  { %v724_v61 = vor.u32 %v723_v57, %v720_v56  ;;  %v771_v0 = vld [vmem:[#allocation2] sm:$0xe]  ;;  %732 = vst [vmem:[#allocation2 + $0x8] sm:$0xe] %v731_v60 }
 0x18b   :  { %v747_v1 = vld [vmem:[#allocation2 + $0x4] sm:$0xf]  ;;  %v748_v3 = vld [vmem:[#allocation2 + $0x8] sm:$0x1]  ;;  %v737_v30 = vld [vmem:[#allocation2] sm:$0xf] }
 0x18c   :  { %v772_v4 = vld [vmem:[#allocation2 + $0x4] sm:$0xf]  ;;  %v773_v5 = vld [vmem:[#allocation2 + $0x8] sm:$0x1]  ;;  %v725_v7 = vsel %vm15476_vm1, %v716_v59, %v724_v61  ;;  %v11900_v8 = vcombine.low %v746_v58, %v747_v1  ;;  %v11901_v9 = vcombine.low %v748_v3, %v748_v3  ;;  %v726_v12 = vrot.slane %v724_v61, 4 }
 0x18d   :  { %733 = vst [vmem:[#allocation2 + $0xc] sm:$0xf] %v725_v7  ;;  %v11902_v13 = vcombine.low %v771_v0, %v772_v4  ;;  %v11903_v15 = vcombine.low %v773_v5, %v773_v5  ;;  %v738_v21 = vld [vmem:[#allocation2 + $0x4] sm:$0xf] }
 0x18e   :  { %v760_v19 = vshll.u32 %v11900_v8, 16  ;;  %v765_v20 = vshll.u32 %v11901_v9, 16  ;;  %v735_v22 = vsel %vm15490_vm4, %v726_v12, %v734_v62  ;;  %v758_v26 = vshrl.u32 %v11900_v8, 16  ;;  %v14360_v5 = vld [vmem:[#allocation8 + $0x1c0] sm:$0xff]   ;;  %v14362_v9 = vld [vmem:[#allocation8 + $0x1c8] sm:$0xff]  }
 0x18f   :  { %v782_v23 = vrot.slane %v11902_v13, 1  ;;  %v783_v24 = vrot.slane %v11903_v15, 1  ;;  %736 = vst [vmem:[#allocation2 + $0x10] sm:$0x3] %v735_v22  ;;  %v11899_v39 = vcombine.low %v737_v30, %v738_v21  ;;  %12978 = vmatprep.subr.bf16.mxu0 %v14360_v5  ;;  %v14361_v7 = vld [vmem:[#allocation8 + $0x180] sm:$0xff]   ;;  %v14366_v12 = vld [vmem:[#allocation8 + $0x208] sm:$0xff]  }
 0x190   :  { %v762_v27 = vrot.slane %v760_v19, 1  ;;  %v767_v33 = vrot.slane %v765_v20, 1  ;;  %v14363_v8 = vld [vmem:[#allocation8 + $0x200] sm:$0xff]   ;;  %v14365_v13 = vld [vmem:[#allocation8 + $0x1d0] sm:$0xff]   ;;  %v14368_v19 = vld [vmem:[#allocation8 + $0x1d8] sm:$0xff]  }
 0x191   :  { %v784_v29 = vsel %vm281_vm2, %v782_v23, %v783_v24  ;;  %v803_v31 = vld [vmem:[#allocation2 + $0x8] sm:$0xe]  ;;  %13908 = vmatprep.subr.bf16.mxu1 %v14363_v8  ;;  %v14367_v15 = vld [vmem:[#allocation8 + $0x190] sm:$0xff]   ;;  %v14370_v20 = vld [vmem:[#allocation8 + $0x198] sm:$0xff]  }
 0x192   :  { %13904 = vmatprep.mubr.bf16.mxu1 %v784_v29  ;;  %v763_v32 = vor.u32 %v762_v27, %v758_v26  ;;  %v833_v34 = vld [vmem:[#allocation2 + $0x8] sm:$0xc]  ;;  %v12727_v21 = vld [vmem:[#allocation9 + $0xc] ss:$0 sm:$0xff]  ;;  %v12728_v22 = vld [vmem:[#allocation11 + $0xc] ss:$0 sm:$0xff] }
 0x193   :  { %v787_v40 = vld [vmem:[#allocation2 + $0x8] sm:$0xe]  ;;  %v14372_v23 = vld [vmem:[#allocation8 + $0x218] sm:$0xff]   ;;  %v10746_v24 = vmul.f32 %v12727_v21, %v15509_v63  ;;  %v10747_v26 = vmul.f32 %v12727_v21, %v15512_v10 }
 0x194   :  { %v788_v35 = vld [vmem:[#allocation2 + $0xc] sm:$0xf]  ;;  %v768_v38 = vsel %vm255_vm5, %v763_v32, %v767_v33  ;;  %v14371_v27 = vld [vmem:[#allocation8 + $0x1e0] sm:$0xff]  }
 0x195   :  { %v804_v36 = vld [vmem:[#allocation2 + $0xc] sm:$0xf]  ;;  %1080 = vmatprep.mubr.bf16.mxu0 %v768_v38  ;;  %v11904_v45 = vcombine.low %v787_v40, %v788_v35  ;;  %v14373_v29 = vld [vmem:[#allocation8 + $0x1a0] sm:$0xff]   ;;  %v10754_v30 = vadd.f32 %v12728_v22, %v10746_v24  ;;  %v14379_v40 = vld [vmem:[#allocation8 + $0x1b0] sm:$0xff]  }
 0x196   :  { %v834_v37 = vld [vmem:[#allocation2 + $0xc] sm:$0xf]  ;;  %v11906_v42 = vcombine.low %v803_v31, %v804_v36  ;;  %1081 = vmatmul.mubr.bf16.vlgmr.msra.gmra.mrb[8].mxu0 %v11899_v39  ;;  %v14357_v44 = vld [vmem:[#allocation2 + $0x10] ss:$0 sps:$4 sm:$0x33]   ;;  %v10755_v31 = vadd.f32 %v12728_v22, %v10747_v26  ;;  %v14375_v32 = vld [vmem:[#allocation8 + $0x220] sm:$0xff]  }
 0x197   :  { %v11908_v41 = vcombine.low %v833_v34, %v834_v37  ;;  %v14358_v47 = vld [vmem:[#allocation2 + $0x10] ss:$0 sps:$4 sm:$0x33]   ;;  %v845_v52 = vrot.slane %v14357_v44, 2  ;;  %v798_v59 = vrot.slane %v11904_v45, 1  ;;  %12979 = vmatpush3.bf16.msra.mxu0 %v14361_v7  ;;  %v10758_v33 = vmax.f32 %v10754_v30, 0.0 }
 0x198   :  { %v815_v49 = vshrl.u32 %v11906_v42, 16  ;;  %v818_v51 = vshll.u32 %v11906_v42, 16  ;;  %v14359_v53 = vld [vmem:[#allocation2 + $0x10] ss:$0 sps:$4 sm:$0x11]   ;;  %v823_v56 = vshrl.u32 %v14358_v47, 16  ;;  %12980 = vmatprep.subr.bf16.mxu0 %v14362_v9 }
 0x199   :  { %v844_v43 = vrot.slane %v11908_v41, 2  ;;  %v826_v57 = vshll.u32 %v14358_v47, 16  ;;  %v799_v60 = vrot.slane %v14359_v53, 1  ;;  %v14374_v34 = vld [vmem:[#allocation8 + $0x1e8] sm:$0xff]   ;;  %v10759_v35 = vmax.f32 %v10755_v31, 0.0  ;;  %v14377_v39 = vld [vmem:[#allocation8 + $0x1f0] sm:$0xff]  }
 0x19a   :  { %v817_v54 = vrot.slane %v815_v49, 1  ;;  %v820_v55 = vrot.slane %v818_v51, 2  ;;  %v825_v62 = vrot.slane %v823_v56, 1  ;;  %v14376_v36 = vld [vmem:[#allocation8 + $0x1a8] sm:$0xff]   ;;  %v14382_v41 = vld [vmem:[#allocation8 + $0x230] sm:$0xff]   ;;  %v14381_v42 = vld [vmem:[#allocation8 + $0x1f8] sm:$0xff]  }
 0x19b   :  { %v846_v58 = vsel %vm345_vm7, %v844_v43, %v845_v52  ;;  %v828_v0 = vrot.slane %v826_v57, 2  ;;  %v800_v4 = vsel %vm281_vm2, %v798_v59, %v799_v60  ;;  %12981 = vmatpush3.bf16.msra.mxu0 %v14364_v11  ;;  %v15542_v37 = vpack.c.bf16 %v10759_v35, %v10758_v33  ;;  %v14378_v38 = vld [vmem:[#allocation8 + $0x228] sm:$0xff]   ;;  %v14383_v44 = vld [vmem:[#allocation8 + $0x1b8] sm:$0xff]   ;;  %v11934_v56 = vld [vmem:[#allocation4 + $0x2] ss:$0 sm:$0xff] }
 0x19c   :  { %13905 = vmatmul.mubr.bf16.vlgmr.msra.gmra.mrb[4].mxu1 %v846_v58  ;;  %v821_v61 = vor.u32 %v820_v55, %v817_v54  ;;  %12982 = vmatprep.subr.bf16.mxu0 %v14365_v13  ;;  %v14384_v43 = vld [vmem:[#allocation8 + $0x238] sm:$0xff]   ;;  %v11935_v59 = vld [vmem:[#allocation6 + $0x2] ss:$0 sm:$0xff] }
 0x19d   :  { %v829_v1 = vor.u32 %v828_v0, %v825_v62  ;;  %13909 = vmatpush3.bf16.msra.mxu1 %v14363_v8 }
 0x19e   :  { %13910 = vmatprep.subr.bf16.mxu1 %v14366_v12 }
 0x19f   :  { %v830_v3 = vsel %vm314_vm8, %v821_v61, %v829_v1  ;;  %12983 = vmatpush3.bf16.msra.mxu0 %v14367_v15 }
 0x1a0   :  { %1088 = vmatprep.mubr.bf16.mxu0 %v830_v3  ;;  %12984 = vmatprep.subr.bf16.mxu0 %v14368_v19 }
 0x1a1   :  { %1089 = vmatmul.mubr.bf16.gmra.mrb[12].mxu0 %v800_v4  ;;  %13911 = vmatpush3.bf16.msra.mxu1 %v14366_v12 }
 0x1a2   :  { %13912 = vmatprep.subr.bf16.mxu1 %v14369_v18 }
 0x1a3   :  { %12985 = vmatpush3.bf16.msra.mxu0 %v14370_v20 }
 0x1a4   :  { %12986 = vmatprep.subr.bf16.mxu0 %v14371_v27 }
 0x1a5   :  { %13913 = vmatpush3.bf16.msra.mxu1 %v14369_v18 }
 0x1a6   :  { %13914 = vmatprep.subr.bf16.mxu1 %v14372_v23 }
 0x1a7   :  { %12987 = vmatpush3.bf16.msra.mxu0 %v14373_v29 }
 0x1a8   :  { %12988 = vmatprep.subr.bf16.mxu0 %v14374_v34  ;;  %v1195_v34 = vld [vmem:[#allocation2] sm:$0xf] }
 0x1a9   :  { %13915 = vmatpush3.bf16.msra.mxu1 %v14372_v23 }
 0x1aa   :  { %13916 = vmatprep.subr.bf16.mxu1 %v14375_v32 }
 0x1ab   :  { %12989 = vmatpush3.bf16.msra.mxu0 %v14376_v36 }
 0x1ac   :  { %12990 = vmatprep.subr.bf16.mxu0 %v14377_v39 }
 0x1ad   :  { %13917 = vmatpush3.bf16.msra.mxu1 %v14375_v32 }
 0x1ae   :  { %13918 = vmatprep.subr.bf16.mxu1 %v14378_v38 }
 0x1af   :  { %12991 = vmatpush3.bf16.msra.mxu0 %v14379_v40 }
 0x1b0   :  { %12992 = vmatprep.subr.bf16.mxu0 %v14381_v42  ;;  %v1199_v42 = vld [vmem:[#allocation2 + $0x8] sm:$0x1] }
 0x1b1   :  { %13919 = vmatpush3.bf16.msra.mxu1 %v14378_v38 }
 0x1b2   :  { %13920 = vmatprep.subr.bf16.mxu1 %v14382_v41 }
 0x1b3   :  { %12993 = vmatpush3.bf16.msra.mxu0 %v14383_v44 }
 0x1b5   :  { %13921 = vmatpush3.bf16.msra.mxu1 %v14382_v41 }
 0x1b6   :  { %13922 = vmatprep.subr.bf16.mxu1 %v14384_v43 }
 0x1b9   :  { %13923 = vmatpush3.bf16.msra.mxu1 %v14384_v43 }
 0x269   :  { %v12956_v45 = vpop.f32.mrb[8].mxu0 }
 0x26a   :  { %v12957_v47 = vpop.f32.mrb[9].mxu0 }
 0x26b   :  { %v12958_v49 = vadd.f32 %v12957_v47, %v12956_v45  ;;  %v12959_v51 = vpop.f32.mrb[10].mxu0 }
 0x26c   :  { %v12960_v52 = vpop.f32.mrb[11].mxu0 }
 0x26d   :  { %v12961_v53 = vadd.f32 %v12960_v52, %v12959_v51 }
 0x26f   :  { %v13906_v54 = vpop.f32.mrb[4].mxu1 }
 0x270   :  { %v1131_v55 = vpop.f32.mrb[5].mxu1 }
 0x271   :  { %v1132_v57 = vadd.f32 %v12958_v49, %v1131_v55  ;;  %v13907_v58 = vpop.f32.mrb[6].mxu1 }
 0x272   :  { %v1134_v60 = vpop.f32.mrb[7].mxu1 }
 0x273   :  { %v1152_v61 = vmul.f32 %v11934_v56, %v1132_v57  ;;  %v1135_v62 = vadd.f32 %v12961_v53, %v1134_v60  ;;  %v1229_v57 = vld [vmem:[#allocation2 + $0x8] sm:$0xe] }
 0x274   :  { %v12962_v3 = vpop.f32.mrb[12].mxu0 }
 0x275   :  { %v1160_v0 = vadd.f32 %v11935_v59, %v1152_v61  ;;  %v1153_v1 = vmul.f32 %v11934_v56, %v1135_v62  ;;  %v12963_v4 = vpop.f32.mrb[13].mxu0 }
 0x276   :  { %v12964_v8 = vadd.f32 %v12963_v4, %v12962_v3  ;;  %v12965_v9 = vpop.f32.mrb[14].mxu0 }
 0x277   :  { %v1164_v5 = vmax.f32 %v1160_v0, 0.0  ;;  %v1161_v7 = vadd.f32 %v11935_v59, %v1153_v1  ;;  %v12966_v11 = vpop.f32.mrb[15].mxu0 }
 0x278   :  { %v1140_v15 = vadd.f32 %v13906_v54, %v12964_v8  ;;  %v12967_v18 = vadd.f32 %v12966_v11, %v12965_v9 }
 0x279   :  { %v12830_v12 = vpack.c.bf16 %v1164_v5, %v1164_v5  ;;  %v1165_v13 = vmax.f32 %v1161_v7, 0.0 }
 0x27a   :  { %v1154_v21 = vmul.f32 %v11934_v56, %v1140_v15  ;;  %v1143_v22 = vadd.f32 %v13907_v58, %v12967_v18 }
 0x27b   :  { %v1176_v19 = vshrl.u32 %v12830_v12, 16  ;;  %v12831_v20 = vpack.c.bf16 %v1165_v13, %v1165_v13  ;;  %v1179_v24 = vshll.u32 %v12830_v12, 16  ;;  %v1233_v13 = vld [vmem:[#allocation2 + $0x10] sm:$0x3] }
 0x27c   :  { %v1162_v27 = vadd.f32 %v11935_v59, %v1154_v21  ;;  %v1155_v29 = vmul.f32 %v11934_v56, %v1143_v22 }
 0x27d   :  { %v1178_v23 = vrot.slane %v1176_v19, 7  ;;  %v1184_v26 = vshrl.u32 %v12831_v20, 16  ;;  %v1187_v32 = vshll.u32 %v12831_v20, 16 }
 0x27e   :  { %v1166_v33 = vmax.f32 %v1162_v27, 0.0  ;;  %v1163_v36 = vadd.f32 %v11935_v59, %v1155_v29 }
 0x27f   :  { %v1181_v30 = vor.u32 %v1179_v24, %v1178_v23  ;;  %v1186_v31 = vrot.slane %v1184_v26, 7  ;;  %v1182_v35 = vrot.slane %v1178_v23, 4 }
 0x280   :  { %v12832_v41 = vpack.c.bf16 %v1166_v33, %v1166_v33  ;;  %v1167_v44 = vmax.f32 %v1163_v36, 0.0 }
 0x281   :  { %v1196_v38 = vsel %vm15464_vm3, %v1181_v30, %v1195_v34  ;;  %v1189_v39 = vor.u32 %v1187_v32, %v1186_v31  ;;  %v1191_v40 = vrot.slane %v1186_v31, 4 }
 0x282   :  { %1197 = vst [vmem:[#allocation2] sm:$0xf] %v1196_v38  ;;  %v1208_v47 = vshrl.u32 %v12832_v41, 16  ;;  %v1211_v49 = vshll.u32 %v12832_v41, 16  ;;  %v12833_v51 = vpack.c.bf16 %v1167_v44, %v1167_v44 }
 0x283   :  { %v1190_v43 = vsel %vm15458_vm15, %v1182_v35, %v1189_v39  ;;  %v1200_v45 = vsel %vm15417_vm6, %v1191_v40, %v1199_v42 }
 0x284   :  { %1198 = vst [vmem:[#allocation2 + $0x4] sm:$0xf] %v1190_v43  ;;  %1201 = vst [vmem:[#allocation2 + $0x8] sm:$0x1] %v1200_v45  ;;  %v1210_v52 = vrot.slane %v1208_v47, 6  ;;  %v1213_v53 = vrot.slane %v1211_v49, 7 }
 0x285   :  { %v1217_v54 = vshrl.u32 %v12833_v51, 16  ;;  %v1220_v55 = vshll.u32 %v12833_v51, 16 }
 0x286   :  { %v1214_v56 = vor.u32 %v1213_v53, %v1210_v52 }
 0x287   :  { %v1219_v58 = vrot.slane %v1217_v54, 6  ;;  %v1222_v59 = vrot.slane %v1220_v55, 7 }
 0x288   :  { %v1230_v60 = vsel %vm15470_vm0, %v1214_v56, %v1229_v57  ;;  %v1215_v61 = vrot.slane %v1214_v56, 4 }
 0x289   :  { %1231 = vst [vmem:[#allocation2 + $0x8] sm:$0xe] %v1230_v60  ;;  %v1223_v62 = vor.u32 %v1222_v59, %v1219_v58  ;;  %v1245_v0 = vld [vmem:[#allocation2] sm:$0xf] }
 0x28a   :  { %v1236_v30 = vld [vmem:[#allocation2] sm:$0xf] }
 0x28b   :  { %v1246_v1 = vld [vmem:[#allocation2 + $0x4] sm:$0xf]  ;;  %v1247_v3 = vld [vmem:[#allocation2 + $0x8] sm:$0x1]  ;;  %v1224_v5 = vsel %vm15476_vm1, %v1215_v61, %v1223_v62  ;;  %v1225_v9 = vrot.slane %v1223_v62, 4 }
 0x28c   :  { %v1272_v4 = vld [vmem:[#allocation2 + $0x8] sm:$0x1]  ;;  %v11941_v7 = vcombine.low %v1245_v0, %v1246_v1  ;;  %v11942_v8 = vcombine.low %v1247_v3, %v1247_v3  ;;  %1232 = vst [vmem:[#allocation2 + $0xc] sm:$0xf] %v1224_v5  ;;  %v14380_v11 = vld [vmem:[#allocation2] sm:$0xfe]  }
 0x28d   :  { %v11944_v12 = vcombine.low %v1272_v4, %v1272_v4  ;;  %v1234_v19 = vsel %vm15490_vm4, %v1225_v9, %v1233_v13  ;;  %v1281_v20 = vrot.slane %v14380_v11, 1  ;;  %v1237_v24 = vld [vmem:[#allocation2 + $0x4] sm:$0xf]  ;;  %v14392_v1 = vld [vmem:[#allocation8 + $0x288] sm:$0xff]   ;;  %v14395_v5 = vld [vmem:[#allocation8 + $0x290] sm:$0xff]  }
 0x28e   :  { %v1259_v15 = vshll.u32 %v11941_v7, 16  ;;  %v1264_v18 = vshll.u32 %v11942_v8, 16  ;;  %1235 = vst [vmem:[#allocation2 + $0x10] sm:$0x3] %v1234_v19  ;;  %v1257_v22 = vshrl.u32 %v11941_v7, 16  ;;  %v11940_v34 = vcombine.low %v1236_v30, %v1237_v24  ;;  %v14390_v62 = vld [vmem:[#allocation8 + $0x280] sm:$0xff]  }
 0x28f   :  { %v1282_v21 = vrot.slane %v11944_v12, 1  ;;  %v14391_v0 = vld [vmem:[#allocation8 + $0x240] sm:$0xff]   ;;  %13016 = vmatprep.subr.bf16.mxu0 %v14390_v62  ;;  %v14393_v3 = vld [vmem:[#allocation8 + $0x248] sm:$0xff]   ;;  %v14396_v7 = vld [vmem:[#allocation8 + $0x250] sm:$0xff]  }
 0x290   :  { %v1261_v23 = vrot.slane %v1259_v15, 1  ;;  %v1266_v29 = vrot.slane %v1264_v18, 1  ;;  %v1302_v31 = vld [vmem:[#allocation2 + $0x8] sm:$0xe]  ;;  %v14397_v8 = vld [vmem:[#allocation8 + $0x2c8] sm:$0xff]   ;;  %v14398_v9 = vld [vmem:[#allocation8 + $0x298] sm:$0xff]  }
 0x291   :  { %v1283_v26 = vsel %vm281_vm2, %v1281_v20, %v1282_v21  ;;  %v14394_v4 = vld [vmem:[#allocation8 + $0x2c0] sm:$0xff]   ;;  %v14399_v11 = vld [vmem:[#allocation8 + $0x258] sm:$0xff]   ;;  %v14400_v12 = vld [vmem:[#allocation8 + $0x2d0] sm:$0xff]  }
 0x292   :  { %13924 = vmatprep.mubr.bf16.mxu1 %v1283_v26  ;;  %v1262_v27 = vor.u32 %v1261_v23, %v1257_v22  ;;  %13928 = vmatprep.subr.bf16.mxu1 %v14394_v4  ;;  %v14401_v13 = vld [vmem:[#allocation8 + $0x2a0] sm:$0xff]   ;;  %v14403_v18 = vld [vmem:[#allocation8 + $0x2d8] sm:$0xff]   ;;  %v14404_v19 = vld [vmem:[#allocation8 + $0x2a8] sm:$0xff]  }
 0x293   :  { %v1303_v32 = vld [vmem:[#allocation2 + $0xc] sm:$0xf]  ;;  %v14402_v15 = vld [vmem:[#allocation8 + $0x260] sm:$0xff]   ;;  %v14407_v22 = vld [vmem:[#allocation8 + $0x2b0] sm:$0xff]  }
 0x294   :  { %v1267_v33 = vsel %vm255_vm5, %v1262_v27, %v1266_v29  ;;  %v11947_v35 = vcombine.low %v1302_v31, %v1303_v32  ;;  %v14385_v36 = vld [vmem:[#allocation2 + $0x8] sm:$0xfc]   ;;  %v14408_v23 = vld [vmem:[#allocation8 + $0x270] sm:$0xff]   ;;  %v14412_v26 = vld [vmem:[#allocation8 + $0x2b8] sm:$0xff]  }
 0x295   :  { %1579 = vmatprep.mubr.bf16.mxu0 %v1267_v33  ;;  %v14386_v39 = vld [vmem:[#allocation2 + $0x10] ss:$0 sps:$4 sm:$0x33]   ;;  %v1343_v44 = vrot.slane %v14385_v36, 2  ;;  %v14388_v53 = vld [vmem:[#allocation2 + $0x8] sm:$0xfe]  }
 0x296   :  { %1580 = vmatmul.mubr.bf16.vlgmr.msra.gmra.mrb[16].mxu0 %v11940_v34  ;;  %v1314_v38 = vshrl.u32 %v11947_v35, 16  ;;  %v1317_v40 = vshll.u32 %v11947_v35, 16  ;;  %v14387_v41 = vld [vmem:[#allocation2 + $0x10] ss:$0 sps:$4 sm:$0x33]   ;;  %v1344_v43 = vrot.slane %v14386_v39, 2 }
 0x297   :  { %v14389_v47 = vld [vmem:[#allocation2 + $0x10] ss:$0 sps:$4 sm:$0x11]   ;;  %v1322_v49 = vshrl.u32 %v14387_v41, 16  ;;  %v1325_v51 = vshll.u32 %v14387_v41, 16  ;;  %v1297_v59 = vrot.slane %v14388_v53, 1  ;;  %13017 = vmatpush3.bf16.msra.mxu0 %v14391_v0 }
 0x298   :  { %v1316_v42 = vrot.slane %v1314_v38, 1  ;;  %v1319_v45 = vrot.slane %v1317_v40, 2  ;;  %v1345_v52 = vsel %vm345_vm7, %v1343_v44, %v1344_v43  ;;  %v1298_v57 = vrot.slane %v14389_v47, 1  ;;  %13018 = vmatprep.subr.bf16.mxu0 %v14392_v1  ;;  %v14405_v20 = vld [vmem:[#allocation8 + $0x268] sm:$0xff]   ;;  %v14406_v21 = vld [vmem:[#allocation8 + $0x2e0] sm:$0xff]   ;;  %v14413_v27 = vld [vmem:[#allocation8 + $0x278] sm:$0xff]  }
 0x299   :  { %13925 = vmatmul.mubr.bf16.vlgmr.msra.gmra.mrb[8].mxu1 %v1345_v52  ;;  %v1324_v55 = vrot.slane %v1322_v49, 1  ;;  %v1327_v56 = vrot.slane %v1325_v51, 2  ;;  %v14409_v24 = vld [vmem:[#allocation8 + $0x2e8] sm:$0xff]   ;;  %v14414_v29 = vld [vmem:[#allocation8 + $0x2f0] sm:$0xff]   ;;  %v14418_v30 = vld [vmem:[#allocation8 + $0x2f8] sm:$0xff]  }
 0x29a   :  { %v1320_v54 = vor.u32 %v1319_v45, %v1316_v42  ;;  %v1299_v61 = vsel %vm281_vm2, %v1297_v59, %v1298_v57  ;;  %13929 = vmatpush3.bf16.msra.mxu1 %v14394_v4  ;;  %v11975_v42 = vld [vmem:[#allocation4 + $0x3] ss:$0 sm:$0xff]  ;;  %v11976_v45 = vld [vmem:[#allocation6 + $0x3] ss:$0 sm:$0xff] }
 0x29b   :  { %v1328_v58 = vor.u32 %v1327_v56, %v1324_v55  ;;  %13019 = vmatpush3.bf16.msra.mxu0 %v14393_v3  ;;  %13930 = vmatprep.subr.bf16.mxu1 %v14397_v8 }
 0x29c   :  { %13020 = vmatprep.subr.bf16.mxu0 %v14395_v5 }
 0x29d   :  { %v1329_v60 = vsel %vm314_vm8, %v1320_v54, %v1328_v58 }
 0x29e   :  { %1587 = vmatprep.mubr.bf16.mxu0 %v1329_v60  ;;  %13931 = vmatpush3.bf16.msra.mxu1 %v14397_v8 }
 0x29f   :  { %1588 = vmatmul.mubr.bf16.gmra.mrb[20].mxu0 %v1299_v61  ;;  %13932 = vmatprep.subr.bf16.mxu1 %v14400_v12 }
 0x2a0   :  { %13021 = vmatpush3.bf16.msra.mxu0 %v14396_v7 }
 0x2a1   :  { %13022 = vmatprep.subr.bf16.mxu0 %v14398_v9 }
 0x2a2   :  { %13933 = vmatpush3.bf16.msra.mxu1 %v14400_v12 }
 0x2a3   :  { %13934 = vmatprep.subr.bf16.mxu1 %v14403_v18 }
 0x2a4   :  { %13023 = vmatpush3.bf16.msra.mxu0 %v14399_v11 }
 0x2a5   :  { %13024 = vmatprep.subr.bf16.mxu0 %v14401_v13 }
 0x2a6   :  { %13935 = vmatpush3.bf16.msra.mxu1 %v14403_v18 }
 0x2a7   :  { %13936 = vmatprep.subr.bf16.mxu1 %v14406_v21 }
 0x2a8   :  { %13025 = vmatpush3.bf16.msra.mxu0 %v14402_v15 }
 0x2a9   :  { %13026 = vmatprep.subr.bf16.mxu0 %v14404_v19 }
 0x2aa   :  { %13937 = vmatpush3.bf16.msra.mxu1 %v14406_v21 }
 0x2ab   :  { %13938 = vmatprep.subr.bf16.mxu1 %v14409_v24 }
 0x2ac   :  { %13027 = vmatpush3.bf16.msra.mxu0 %v14405_v20  ;;  %v1694_v20 = vld [vmem:[#allocation2] sm:$0xf] }
 0x2ad   :  { %13028 = vmatprep.subr.bf16.mxu0 %v14407_v22 }
 0x2ae   :  { %13939 = vmatpush3.bf16.msra.mxu1 %v14409_v24 }
 0x2af   :  { %13940 = vmatprep.subr.bf16.mxu1 %v14414_v29 }
 0x2b0   :  { %13029 = vmatpush3.bf16.msra.mxu0 %v14408_v23 }
 0x2b1   :  { %13030 = vmatprep.subr.bf16.mxu0 %v14412_v26  ;;  %v1698_v26 = vld [vmem:[#allocation2 + $0x8] sm:$0x1] }
 0x2b2   :  { %13941 = vmatpush3.bf16.msra.mxu1 %v14414_v29 }
 0x2b3   :  { %13942 = vmatprep.subr.bf16.mxu1 %v14418_v30 }
 0x2b4   :  { %13031 = vmatpush3.bf16.msra.mxu0 %v14413_v27 }
 0x2b6   :  { %13943 = vmatpush3.bf16.msra.mxu1 %v14418_v30 }
 0x369   :  { %v12994_v31 = vpop.f32.mrb[16].mxu0 }
 0x36a   :  { %v12995_v32 = vpop.f32.mrb[17].mxu0 }
 0x36b   :  { %v12996_v33 = vadd.f32 %v12995_v32, %v12994_v31  ;;  %v12997_v34 = vpop.f32.mrb[18].mxu0 }
 0x36c   :  { %v12998_v35 = vpop.f32.mrb[19].mxu0  ;;  %v13926_v39 = vpop.f32.mrb[8].mxu1 }
 0x36d   :  { %v12999_v36 = vadd.f32 %v12998_v35, %v12997_v34  ;;  %v1582_v38 = vadd.f32 %v12996_v33, %v15503_v46  ;;  %v1630_v41 = vpop.f32.mrb[9].mxu1 }
 0x36e   :  { %v13927_v43 = vpop.f32.mrb[10].mxu1 }
 0x36f   :  { %v1585_v40 = vadd.f32 %v12999_v36, %v15506_v50  ;;  %v15563_v44 = vadd.f32 %v1630_v41, %v1582_v38  ;;  %v1633_v47 = vpop.f32.mrb[11].mxu1 }
 0x371   :  { %v1651_v49 = vmul.f32 %v11975_v42, %v15563_v44  ;;  %v15566_v51 = vadd.f32 %v1633_v47, %v1585_v40 }
 0x372   :  { %v13000_v54 = vpop.f32.mrb[20].mxu0 }
 0x373   :  { %v1659_v52 = vadd.f32 %v11976_v45, %v1651_v49  ;;  %v1652_v53 = vmul.f32 %v11975_v42, %v15566_v51  ;;  %v13001_v55 = vpop.f32.mrb[21].mxu0 }
 0x374   :  { %v13003_v58 = vpop.f32.mrb[22].mxu0  ;;  %v13002_v59 = vadd.f32 %v13001_v55, %v13000_v54 }
 0x375   :  { %v1663_v56 = vmax.f32 %v1659_v52, 0.0  ;;  %v1660_v57 = vadd.f32 %v11976_v45, %v1652_v53  ;;  %v13004_v60 = vpop.f32.mrb[23].mxu0 }
 0x376   :  { %v13005_v0 = vadd.f32 %v13004_v60, %v13003_v58  ;;  %v1590_v1 = vadd.f32 %v13002_v59, %v15509_v63 }
 0x377   :  { %v12834_v61 = vpack.c.bf16 %v1663_v56, %v1663_v56  ;;  %v1664_v62 = vmax.f32 %v1660_v57, 0.0 }
 0x378   :  { %v15570_v5 = vadd.f32 %v13926_v39, %v1590_v1  ;;  %v1593_v7 = vadd.f32 %v13005_v0, %v15512_v10 }
 0x379   :  { %v1675_v3 = vshrl.u32 %v12834_v61, 16  ;;  %v12835_v4 = vpack.c.bf16 %v1664_v62, %v1664_v62  ;;  %v1678_v9 = vshll.u32 %v12834_v61, 16  ;;  %v1732_v62 = vld [vmem:[#allocation2 + $0x10] sm:$0x3] }
 0x37a   :  { %v1653_v12 = vmul.f32 %v11975_v42, %v15570_v5  ;;  %v15574_v13 = vadd.f32 %v13927_v43, %v1593_v7 }
 0x37b   :  { %v1677_v8 = vrot.slane %v1675_v3, 7  ;;  %v1683_v11 = vshrl.u32 %v12835_v4, 16  ;;  %v1686_v19 = vshll.u32 %v12835_v4, 16 }
 0x37c   :  { %v1661_v21 = vadd.f32 %v11976_v45, %v1653_v12  ;;  %v1654_v63 = vmul.f32 %v11975_v42, %v15574_v13  ;;  %v1728_v42 = vld [vmem:[#allocation2 + $0x8] sm:$0xe] }
 0x37d   :  { %v1680_v15 = vor.u32 %v1678_v9, %v1677_v8  ;;  %v1685_v18 = vrot.slane %v1683_v11, 7  ;;  %v1681_v22 = vrot.slane %v1677_v8, 4 }
 0x37e   :  { %v1665_v27 = vmax.f32 %v1661_v21, 0.0  ;;  %v1662_v29 = vadd.f32 %v11976_v45, %v1654_v63 }
 0x37f   :  { %v1695_v23 = vsel %vm15464_vm3, %v1680_v15, %v1694_v20  ;;  %v1688_v24 = vor.u32 %v1686_v19, %v1685_v18  ;;  %v1690_v10 = vrot.slane %v1685_v18, 4 }
 0x380   :  { %1696 = vst [vmem:[#allocation2] sm:$0xf] %v1695_v23  ;;  %v12836_v32 = vpack.c.bf16 %v1665_v27, %v1665_v27  ;;  %v1666_v33 = vmax.f32 %v1662_v29, 0.0 }
 0x381   :  { %v1689_v30 = vsel %vm15458_vm15, %v1681_v22, %v1688_v24  ;;  %v1699_v31 = vsel %vm15417_vm6, %v1690_v10, %v1698_v26 }
 0x382   :  { %1697 = vst [vmem:[#allocation2 + $0x4] sm:$0xf] %v1689_v30  ;;  %1700 = vst [vmem:[#allocation2 + $0x8] sm:$0x1] %v1699_v31  ;;  %v1707_v34 = vshrl.u32 %v12836_v32, 16  ;;  %v1710_v35 = vshll.u32 %v12836_v32, 16  ;;  %v12837_v36 = vpack.c.bf16 %v1666_v33, %v1666_v33 }
 0x384   :  { %v1709_v38 = vrot.slane %v1707_v34, 6  ;;  %v1712_v39 = vrot.slane %v1710_v35, 7  ;;  %v1716_v40 = vshrl.u32 %v12837_v36, 16  ;;  %v1719_v41 = vshll.u32 %v12837_v36, 16 }
 0x386   :  { %v1713_v43 = vor.u32 %v1712_v39, %v1709_v38  ;;  %v1718_v45 = vrot.slane %v1716_v40, 6  ;;  %v1721_v47 = vrot.slane %v1719_v41, 7 }
 0x388   :  { %v1714_v52 = vrot.slane %v1713_v43, 4  ;;  %v1729_v53 = vsel %vm15470_vm0, %v1713_v43, %v1728_v42  ;;  %v1722_v54 = vor.u32 %v1721_v47, %v1718_v45  ;;  %v14425_v42 = vld [vmem:[#allocation8 + $0x340] sm:$0xff]   ;;  %v14427_v45 = vld [vmem:[#allocation8 + $0x348] sm:$0xff]  }
 0x389   :  { %v14410_v49 = vld [vmem:[#allocation2] sm:$0xfe]   ;;  %v14411_v55 = vld [vmem:[#allocation2 + $0x8] ss:$0 sps:$4 sm:$0x11]   ;;  %13054 = vmatprep.subr.bf16.mxu0 %v14425_v42 }
 0x38a   :  { %1730 = vst [vmem:[#allocation2 + $0x8] sm:$0xe] %v1729_v53  ;;  %v1780_v56 = vrot.slane %v14410_v49, 1  ;;  %v14415_v57 = vld [vmem:[#allocation2] sm:$0xff]   ;;  %v1723_v58 = vsel %vm15476_vm1, %v1714_v52, %v1722_v54  ;;  %v1724_v59 = vrot.slane %v1722_v54, 4  ;;  %v1781_v60 = vrot.slane %v14411_v55, 1 }
 0x38b   :  { %v14416_v61 = vld [vmem:[#allocation2 + $0x8] ss:$0 sps:$4 sm:$0x11]   ;;  %1731 = vst [vmem:[#allocation2 + $0xc] sm:$0xf] %v1723_v58  ;;  %v1758_v0 = vshll.u32 %v14415_v57, 16 }
 0x38c   :  { %v1733_v1 = vsel %vm15490_vm4, %v1724_v59, %v1732_v62  ;;  %v1782_v3 = vsel %vm281_vm2, %v1780_v56, %v1781_v60  ;;  %v1763_v4 = vshll.u32 %v14416_v61, 16  ;;  %v1756_v7 = vshrl.u32 %v14415_v57, 16  ;;  %v14417_v15 = vld [vmem:[#allocation2] sm:$0xff]   ;;  %v14429_v49 = vld [vmem:[#allocation8 + $0x308] sm:$0xff]   ;;  %v14430_v52 = vld [vmem:[#allocation8 + $0x350] sm:$0xff]  }
 0x38d   :  { %1734 = vst [vmem:[#allocation2 + $0x10] sm:$0x3] %v1733_v1  ;;  %13944 = vmatprep.mubr.bf16.mxu1 %v1782_v3  ;;  %v1760_v8 = vrot.slane %v1758_v0, 1  ;;  %v14426_v43 = vld [vmem:[#allocation8 + $0x300] sm:$0xff]   ;;  %v14431_v53 = vld [vmem:[#allocation8 + $0x388] sm:$0xff]   ;;  %v14432_v54 = vld [vmem:[#allocation8 + $0x310] sm:$0xff]  }
 0x38e   :  { %v1765_v11 = vrot.slane %v1763_v4, 1  ;;  %v14428_v47 = vld [vmem:[#allocation8 + $0x380] sm:$0xff]   ;;  %v14433_v55 = vld [vmem:[#allocation8 + $0x358] sm:$0xff]   ;;  %v14434_v56 = vld [vmem:[#allocation8 + $0x390] sm:$0xff]  }
 0x38f   :  { %v1761_v9 = vor.u32 %v1760_v8, %v1756_v7  ;;  %13948 = vmatprep.subr.bf16.mxu1 %v14428_v47  ;;  %v14435_v57 = vld [vmem:[#allocation8 + $0x318] sm:$0xff]   ;;  %v14436_v58 = vld [vmem:[#allocation8 + $0x360] sm:$0xff]   ;;  %v14439_v61 = vld [vmem:[#allocation8 + $0x368] sm:$0xff]  }
 0x390   :  { %v14437_v59 = vld [vmem:[#allocation8 + $0x398] sm:$0xff]   ;;  %v14438_v60 = vld [vmem:[#allocation8 + $0x320] sm:$0xff]   ;;  %v14441_v0 = vld [vmem:[#allocation8 + $0x328] sm:$0xff]  }
 0x391   :  { %v1766_v12 = vsel %vm255_vm5, %v1761_v9, %v1765_v11  ;;  %v14440_v62 = vld [vmem:[#allocation8 + $0x3a0] sm:$0xff]   ;;  %v14442_v1 = vld [vmem:[#allocation8 + $0x370] sm:$0xff]   ;;  %v14443_v3 = vld [vmem:[#allocation8 + $0x3a8] sm:$0xff]  }
 0x392   :  { %2078 = vmatprep.mubr.bf16.mxu0 %v1766_v12  ;;  %v14419_v18 = vld [vmem:[#allocation2 + $0x8] sm:$0xfc]   ;;  %v14444_v4 = vld [vmem:[#allocation8 + $0x330] sm:$0xff]   ;;  %v14447_v7 = vld [vmem:[#allocation8 + $0x378] sm:$0xff]  }
 0x393   :  { %2079 = vmatmul.mubr.bf16.vlgmr.msra.gmra.mrb[24].mxu0 %v14417_v15  ;;  %v14421_v19 = vld [vmem:[#allocation2 + $0x8] sm:$0xfe]   ;;  %v1842_v22 = vrot.slane %v14419_v18, 2  ;;  %v14448_v8 = vld [vmem:[#allocation8 + $0x3b0] sm:$0xff]   ;;  %v14449_v9 = vld [vmem:[#allocation8 + $0x338] sm:$0xff]  }
 0x394   :  { %v14420_v20 = vld [vmem:[#allocation2 + $0x10] ss:$0 sps:$4 sm:$0x33]   ;;  %v1813_v63 = vshrl.u32 %v14421_v19, 16  ;;  %v1816_v24 = vshll.u32 %v14421_v19, 16  ;;  %13055 = vmatpush3.bf16.msra.mxu0 %v14426_v43  ;;  %v14453_v11 = vld [vmem:[#allocation8 + $0x3b8] sm:$0xff]  }
 0x395   :  { %v14422_v21 = vld [vmem:[#allocation2 + $0x10] ss:$0 sps:$4 sm:$0x33]   ;;  %v1843_v23 = vrot.slane %v14420_v20, 2  ;;  %v14423_v32 = vld [vmem:[#allocation2 + $0x8] sm:$0xfe]   ;;  %13056 = vmatprep.subr.bf16.mxu0 %v14427_v45 }
 0x396   :  { %v1815_v10 = vrot.slane %v1813_v63, 1  ;;  %v1821_v26 = vshrl.u32 %v14422_v21, 16  ;;  %v1824_v27 = vshll.u32 %v14422_v21, 16  ;;  %v14424_v29 = vld [vmem:[#allocation2 + $0x10] ss:$0 sps:$4 sm:$0x11]  }
 0x397   :  { %v1844_v30 = vsel %vm345_vm7, %v1842_v22, %v1843_v23  ;;  %v1818_v31 = vrot.slane %v1816_v24, 2  ;;  %v1797_v35 = vrot.slane %v14424_v29, 1  ;;  %v1796_v39 = vrot.slane %v14423_v32, 1  ;;  %v12016_v23 = vld [vmem:[#allocation4 + $0x4] ss:$0 sm:$0xff] }
 0x398   :  { %13945 = vmatmul.mubr.bf16.vlgmr.msra.gmra.mrb[12].mxu1 %v1844_v30  ;;  %v1823_v33 = vrot.slane %v1821_v26, 1  ;;  %v1826_v34 = vrot.slane %v1824_v27, 2  ;;  %13057 = vmatpush3.bf16.msra.mxu0 %v14429_v49  ;;  %v12017_v26 = vld [vmem:[#allocation6 + $0x4] ss:$0 sm:$0xff] }
 0x399   :  { %v1819_v36 = vor.u32 %v1818_v31, %v1815_v10  ;;  %v1798_v41 = vsel %vm281_vm2, %v1796_v39, %v1797_v35  ;;  %13949 = vmatpush3.bf16.msra.mxu1 %v14428_v47  ;;  %13058 = vmatprep.subr.bf16.mxu0 %v14430_v52 }
 0x39a   :  { %v1827_v38 = vor.u32 %v1826_v34, %v1823_v33  ;;  %13950 = vmatprep.subr.bf16.mxu1 %v14431_v53 }
 0x39c   :  { %v1828_v40 = vsel %vm314_vm8, %v1819_v36, %v1827_v38  ;;  %13059 = vmatpush3.bf16.msra.mxu0 %v14432_v54 }
 0x39d   :  { %2086 = vmatprep.mubr.bf16.mxu0 %v1828_v40  ;;  %13951 = vmatpush3.bf16.msra.mxu1 %v14431_v53 }
 0x39e   :  { %2087 = vmatmul.mubr.bf16.gmra.mrb[28].mxu0 %v1798_v41  ;;  %13060 = vmatprep.subr.bf16.mxu0 %v14433_v55 }
 0x39f   :  { %13952 = vmatprep.subr.bf16.mxu1 %v14434_v56 }
 0x3a0   :  { %13061 = vmatpush3.bf16.msra.mxu0 %v14435_v57 }
 0x3a1   :  { %13953 = vmatpush3.bf16.msra.mxu1 %v14434_v56  ;;  %13062 = vmatprep.subr.bf16.mxu0 %v14436_v58 }
 0x3a2   :  { %13954 = vmatprep.subr.bf16.mxu1 %v14437_v59 }
 0x3a4   :  { %13063 = vmatpush3.bf16.msra.mxu0 %v14438_v60 }
 0x3a5   :  { %13955 = vmatpush3.bf16.msra.mxu1 %v14437_v59  ;;  %13064 = vmatprep.subr.bf16.mxu0 %v14439_v61 }
 0x3a6   :  { %13956 = vmatprep.subr.bf16.mxu1 %v14440_v62 }
 0x3a8   :  { %13065 = vmatpush3.bf16.msra.mxu0 %v14441_v0 }
 0x3a9   :  { %13957 = vmatpush3.bf16.msra.mxu1 %v14440_v62  ;;  %13066 = vmatprep.subr.bf16.mxu0 %v14442_v1  ;;  %v2193_v1 = vld [vmem:[#allocation2] sm:$0xf] }
 0x3aa   :  { %13958 = vmatprep.subr.bf16.mxu1 %v14443_v3 }
 0x3ac   :  { %13067 = vmatpush3.bf16.msra.mxu0 %v14444_v4 }
 0x3ad   :  { %13959 = vmatpush3.bf16.msra.mxu1 %v14443_v3  ;;  %13068 = vmatprep.subr.bf16.mxu0 %v14447_v7 }
 0x3ae   :  { %13960 = vmatprep.subr.bf16.mxu1 %v14448_v8 }
 0x3b0   :  { %13069 = vmatpush3.bf16.msra.mxu0 %v14449_v9 }
 0x3b1   :  { %13961 = vmatpush3.bf16.msra.mxu1 %v14448_v8 }
 0x3b2   :  { %13962 = vmatprep.subr.bf16.mxu1 %v14453_v11 }
 0x3b5   :  { %13963 = vmatpush3.bf16.msra.mxu1 %v14453_v11  ;;  %v2197_v11 = vld [vmem:[#allocation2 + $0x8] sm:$0x1] }
 0x466   :  { %v13032_v12 = vpop.f32.mrb[24].mxu0 }
 0x467   :  { %v13033_v15 = vpop.f32.mrb[25].mxu0 }
 0x468   :  { %v13034_v18 = vadd.f32 %v13033_v15, %v13032_v12  ;;  %v13035_v19 = vpop.f32.mrb[26].mxu0 }
 0x469   :  { %v13036_v20 = vpop.f32.mrb[27].mxu0 }
 0x46a   :  { %v13037_v21 = vadd.f32 %v13036_v20, %v13035_v19 }
 0x46b   :  { %v13946_v63 = vpop.f32.mrb[12].mxu1 }
 0x46c   :  { %v2129_v22 = vpop.f32.mrb[13].mxu1 }
 0x46d   :  { %v2130_v24 = vadd.f32 %v13034_v18, %v2129_v22  ;;  %v13947_v10 = vpop.f32.mrb[14].mxu1 }
 0x46e   :  { %v2132_v27 = vpop.f32.mrb[15].mxu1 }
 0x46f   :  { %v2150_v29 = vmul.f32 %v12016_v23, %v2130_v24  ;;  %v2133_v30 = vadd.f32 %v13037_v21, %v2132_v27 }
 0x471   :  { %v2158_v31 = vadd.f32 %v12017_v26, %v2150_v29  ;;  %v2151_v32 = vmul.f32 %v12016_v23, %v2133_v30  ;;  %v13038_v33 = vpop.f32.mrb[28].mxu0 }
 0x472   :  { %v13039_v34 = vpop.f32.mrb[29].mxu0 }
 0x473   :  { %v2162_v35 = vmax.f32 %v2158_v31, 0.0  ;;  %v2159_v36 = vadd.f32 %v12017_v26, %v2151_v32  ;;  %v13040_v38 = vadd.f32 %v13039_v34, %v13038_v33  ;;  %v13041_v39 = vpop.f32.mrb[30].mxu0  ;;  %v2231_v33 = vld [vmem:[#allocation2 + $0x10] sm:$0x3] }
 0x474   :  { %v13042_v40 = vpop.f32.mrb[31].mxu0 }
 0x475   :  { %v12838_v41 = vpack.c.bf16 %v2162_v35, %v2162_v35  ;;  %v2163_v42 = vmax.f32 %v2159_v36, 0.0  ;;  %v2138_v43 = vadd.f32 %v13946_v63, %v13040_v38  ;;  %v13043_v45 = vadd.f32 %v13042_v40, %v13041_v39 }
 0x477   :  { %v2174_v47 = vshrl.u32 %v12838_v41, 16  ;;  %v12839_v49 = vpack.c.bf16 %v2163_v42, %v2163_v42  ;;  %v2152_v52 = vmul.f32 %v12016_v23, %v2138_v43  ;;  %v2141_v53 = vadd.f32 %v13947_v10, %v13043_v45 }
 0x478   :  { %v2177_v55 = vshll.u32 %v12838_v41, 16 }
 0x479   :  { %v2176_v54 = vrot.slane %v2174_v47, 7  ;;  %v2182_v56 = vshrl.u32 %v12839_v49, 16  ;;  %v2160_v57 = vadd.f32 %v12017_v26, %v2152_v52  ;;  %v2153_v58 = vmul.f32 %v12016_v23, %v2141_v53 }
 0x47a   :  { %v2185_v61 = vshll.u32 %v12839_v49, 16 }
 0x47b   :  { %v2179_v59 = vor.u32 %v2177_v55, %v2176_v54  ;;  %v2184_v60 = vrot.slane %v2182_v56, 7  ;;  %v2164_v62 = vmax.f32 %v2160_v57, 0.0  ;;  %v2180_v0 = vrot.slane %v2176_v54, 4 }
 0x47c   :  { %v2161_v3 = vadd.f32 %v12017_v26, %v2153_v58  ;;  %v2227_v26 = vld [vmem:[#allocation2 + $0x8] sm:$0xe] }
 0x47d   :  { %v2194_v4 = vsel %vm15464_vm3, %v2179_v59, %v2193_v1  ;;  %v2187_v7 = vor.u32 %v2185_v61, %v2184_v60  ;;  %v2189_v8 = vrot.slane %v2184_v60, 4  ;;  %v12840_v9 = vpack.c.bf16 %v2164_v62, %v2164_v62 }
 0x47e   :  { %2195 = vst [vmem:[#allocation2] sm:$0xf] %v2194_v4  ;;  %v2165_v12 = vmax.f32 %v2161_v3, 0.0 }
 0x47f   :  { %v2188_v15 = vsel %vm15458_vm15, %v2180_v0, %v2187_v7  ;;  %v2198_v18 = vsel %vm15417_vm6, %v2189_v8, %v2197_v11  ;;  %v2206_v19 = vshrl.u32 %v12840_v9, 16  ;;  %v2209_v20 = vshll.u32 %v12840_v9, 16 }
 0x480   :  { %2196 = vst [vmem:[#allocation2 + $0x4] sm:$0xf] %v2188_v15  ;;  %2199 = vst [vmem:[#allocation2 + $0x8] sm:$0x1] %v2198_v18  ;;  %v12841_v21 = vpack.c.bf16 %v2165_v12, %v2165_v12 }
 0x481   :  { %v2208_v63 = vrot.slane %v2206_v19, 6  ;;  %v2211_v22 = vrot.slane %v2209_v20, 7 }
 0x482   :  { %v2215_v23 = vshrl.u32 %v12841_v21, 16  ;;  %v2218_v24 = vshll.u32 %v12841_v21, 16 }
 0x483   :  { %v2212_v10 = vor.u32 %v2211_v22, %v2208_v63 }
 0x484   :  { %v2217_v27 = vrot.slane %v2215_v23, 6  ;;  %v2220_v29 = vrot.slane %v2218_v24, 7 }
 0x485   :  { %v2213_v30 = vrot.slane %v2212_v10, 4  ;;  %v2228_v31 = vsel %vm15470_vm0, %v2212_v10, %v2227_v26  ;;  %v14460_v10 = vld [vmem:[#allocation8 + $0x400] sm:$0xff]  }
 0x486   :  { %2229 = vst [vmem:[#allocation2 + $0x8] sm:$0xe] %v2228_v31  ;;  %v2221_v32 = vor.u32 %v2220_v29, %v2217_v27  ;;  %13092 = vmatprep.subr.bf16.mxu0 %v14460_v10  ;;  %v14461_v26 = vld [vmem:[#allocation8 + $0x3c0] sm:$0xff]   ;;  %v14462_v27 = vld [vmem:[#allocation8 + $0x408] sm:$0xff]   ;;  %v14465_v31 = vld [vmem:[#allocation8 + $0x410] sm:$0xff]  }
 0x487   :  { %v14445_v34 = vld [vmem:[#allocation2] sm:$0xfe]   ;;  %v14446_v38 = vld [vmem:[#allocation2 + $0x8] ss:$0 sps:$4 sm:$0x11]   ;;  %v14463_v29 = vld [vmem:[#allocation8 + $0x3c8] sm:$0xff]  }
 0x488   :  { %v2222_v35 = vsel %vm15476_vm1, %v2213_v30, %v2221_v32  ;;  %v2223_v36 = vrot.slane %v2221_v32, 4  ;;  %v2279_v39 = vrot.slane %v14445_v34, 1  ;;  %v14450_v40 = vld [vmem:[#allocation2] sm:$0xff]   ;;  %v2280_v42 = vrot.slane %v14446_v38, 1  ;;  %v14466_v32 = vld [vmem:[#allocation8 + $0x3d0] sm:$0xff]  }
 0x489   :  { %2230 = vst [vmem:[#allocation2 + $0xc] sm:$0xf] %v2222_v35  ;;  %v14451_v43 = vld [vmem:[#allocation2 + $0x8] ss:$0 sps:$4 sm:$0x11]   ;;  %v2257_v45 = vshll.u32 %v14450_v40, 16 }
 0x48a   :  { %v2232_v41 = vsel %vm15490_vm4, %v2223_v36, %v2231_v33  ;;  %v2281_v47 = vsel %vm281_vm2, %v2279_v39, %v2280_v42  ;;  %v2262_v49 = vshll.u32 %v14451_v43, 16  ;;  %v2255_v52 = vshrl.u32 %v14450_v40, 16  ;;  %v14452_v58 = vld [vmem:[#allocation2] sm:$0xff]   ;;  %v14467_v33 = vld [vmem:[#allocation8 + $0x448] sm:$0xff]   ;;  %v14470_v36 = vld [vmem:[#allocation8 + $0x450] sm:$0xff]  }
 0x48b   :  { %2233 = vst [vmem:[#allocation2 + $0x10] sm:$0x3] %v2232_v41  ;;  %13964 = vmatprep.mubr.bf16.mxu1 %v2281_v47  ;;  %v2259_v53 = vrot.slane %v2257_v45, 1  ;;  %v14464_v30 = vld [vmem:[#allocation8 + $0x440] sm:$0xff]   ;;  %v14468_v34 = vld [vmem:[#allocation8 + $0x418] sm:$0xff]   ;;  %v14474_v41 = vld [vmem:[#allocation8 + $0x428] sm:$0xff]  }
 0x48c   :  { %v2264_v55 = vrot.slane %v2262_v49, 1  ;;  %13968 = vmatprep.subr.bf16.mxu1 %v14464_v30  ;;  %v14469_v35 = vld [vmem:[#allocation8 + $0x3d8] sm:$0xff]   ;;  %v14471_v38 = vld [vmem:[#allocation8 + $0x420] sm:$0xff]   ;;  %v14475_v42 = vld [vmem:[#allocation8 + $0x3e8] sm:$0xff]  }
 0x48d   :  { %v2260_v54 = vor.u32 %v2259_v53, %v2255_v52  ;;  %v14472_v39 = vld [vmem:[#allocation8 + $0x3e0] sm:$0xff]   ;;  %v14473_v40 = vld [vmem:[#allocation8 + $0x458] sm:$0xff]   ;;  %v14477_v45 = vld [vmem:[#allocation8 + $0x430] sm:$0xff]  }
 0x48e   :  { %v14476_v43 = vld [vmem:[#allocation8 + $0x460] sm:$0xff]   ;;  %v14478_v47 = vld [vmem:[#allocation8 + $0x3f0] sm:$0xff]   ;;  %v14479_v49 = vld [vmem:[#allocation8 + $0x468] sm:$0xff]  }
 0x48f   :  { %v2265_v57 = vsel %vm255_vm5, %v2260_v54, %v2264_v55  ;;  %v14482_v52 = vld [vmem:[#allocation8 + $0x438] sm:$0xff]   ;;  %v14484_v54 = vld [vmem:[#allocation8 + $0x470] sm:$0xff]  }
 0x490   :  { %v14454_v56 = vld [vmem:[#allocation2 + $0x8] sm:$0xfc]   ;;  %2577 = vmatprep.mubr.bf16.mxu0 %v2265_v57  ;;  %v14483_v53 = vld [vmem:[#allocation8 + $0x3f8] sm:$0xff]  }
 0x491   :  { %v14456_v59 = vld [vmem:[#allocation2 + $0x8] sm:$0xfe]   ;;  %2578 = vmatmul.mubr.bf16.vlgmr.msra.gmra.mrb[32].mxu0 %v14452_v58  ;;  %v2341_v0 = vrot.slane %v14454_v56, 2  ;;  %v14488_v55 = vld [vmem:[#allocation8 + $0x478] sm:$0xff]  }
 0x492   :  { %v14455_v60 = vld [vmem:[#allocation2 + $0x10] ss:$0 sps:$4 sm:$0x33]   ;;  %v2312_v62 = vshrl.u32 %v14456_v59, 16  ;;  %v2315_v3 = vshll.u32 %v14456_v59, 16  ;;  %13093 = vmatpush3.bf16.msra.mxu0 %v14461_v26 }
 0x493   :  { %v14457_v61 = vld [vmem:[#allocation2 + $0x10] ss:$0 sps:$4 sm:$0x33]   ;;  %v2342_v1 = vrot.slane %v14455_v60, 2  ;;  %v14458_v15 = vld [vmem:[#allocation2 + $0x8] sm:$0xfe]   ;;  %13094 = vmatprep.subr.bf16.mxu0 %v14462_v27 }
 0x494   :  { %v2314_v4 = vrot.slane %v2312_v62, 1  ;;  %v2320_v7 = vshrl.u32 %v14457_v61, 16  ;;  %v2323_v8 = vshll.u32 %v14457_v61, 16  ;;  %v14459_v9 = vld [vmem:[#allocation2 + $0x10] ss:$0 sps:$4 sm:$0x11]  }
 0x495   :  { %v2343_v11 = vsel %vm345_vm7, %v2341_v0, %v2342_v1  ;;  %v2317_v12 = vrot.slane %v2315_v3, 2  ;;  %v2296_v20 = vrot.slane %v14459_v9, 1  ;;  %v2295_v22 = vrot.slane %v14458_v15, 1  ;;  %v12057_v3 = vld [vmem:[#allocation4 + $0x5] ss:$0 sm:$0xff] }
 0x496   :  { %13965 = vmatmul.mubr.bf16.vlgmr.msra.gmra.mrb[16].mxu1 %v2343_v11  ;;  %v2322_v18 = vrot.slane %v2320_v7, 1  ;;  %v2325_v19 = vrot.slane %v2323_v8, 2  ;;  %13095 = vmatpush3.bf16.msra.mxu0 %v14463_v29  ;;  %v12058_v9 = vld [vmem:[#allocation6 + $0x5] ss:$0 sm:$0xff] }
 0x497   :  { %v2318_v21 = vor.u32 %v2317_v12, %v2314_v4  ;;  %v2297_v24 = vsel %vm281_vm2, %v2295_v22, %v2296_v20  ;;  %13969 = vmatpush3.bf16.msra.mxu1 %v14464_v30  ;;  %13096 = vmatprep.subr.bf16.mxu0 %v14465_v31 }
 0x498   :  { %v2326_v63 = vor.u32 %v2325_v19, %v2322_v18  ;;  %13970 = vmatprep.subr.bf16.mxu1 %v14467_v33 }
 0x49a   :  { %v2327_v23 = vsel %vm314_vm8, %v2318_v21, %v2326_v63  ;;  %13097 = vmatpush3.bf16.msra.mxu0 %v14466_v32 }
 0x49b   :  { %2585 = vmatprep.mubr.bf16.mxu0 %v2327_v23  ;;  %13971 = vmatpush3.bf16.msra.mxu1 %v14467_v33 }
 0x49c   :  { %2586 = vmatmul.mubr.bf16.gmra.mrb[36].mxu0 %v2297_v24  ;;  %13098 = vmatprep.subr.bf16.mxu0 %v14468_v34 }
 0x49d   :  { %13972 = vmatprep.subr.bf16.mxu1 %v14470_v36 }
 0x49e   :  { %13099 = vmatpush3.bf16.msra.mxu0 %v14469_v35 }
 0x49f   :  { %13973 = vmatpush3.bf16.msra.mxu1 %v14470_v36  ;;  %13100 = vmatprep.subr.bf16.mxu0 %v14471_v38 }
 0x4a0   :  { %13974 = vmatprep.subr.bf16.mxu1 %v14473_v40 }
 0x4a2   :  { %13101 = vmatpush3.bf16.msra.mxu0 %v14472_v39 }
 0x4a3   :  { %13975 = vmatpush3.bf16.msra.mxu1 %v14473_v40  ;;  %13102 = vmatprep.subr.bf16.mxu0 %v14474_v41 }
 0x4a4   :  { %13976 = vmatprep.subr.bf16.mxu1 %v14476_v43 }
 0x4a6   :  { %13103 = vmatpush3.bf16.msra.mxu0 %v14475_v42 }
 0x4a7   :  { %13977 = vmatpush3.bf16.msra.mxu1 %v14476_v43  ;;  %13104 = vmatprep.subr.bf16.mxu0 %v14477_v45 }
 0x4a8   :  { %13978 = vmatprep.subr.bf16.mxu1 %v14479_v49 }
 0x4aa   :  { %13105 = vmatpush3.bf16.msra.mxu0 %v14478_v47 }
 0x4ab   :  { %13106 = vmatprep.subr.bf16.mxu0 %v14482_v52  ;;  %13979 = vmatpush3.bf16.msra.mxu1 %v14479_v49  ;;  %v2692_v49 = vld [vmem:[#allocation2] sm:$0xf] }
 0x4ac   :  { %13980 = vmatprep.subr.bf16.mxu1 %v14484_v54 }
 0x4ae   :  { %13107 = vmatpush3.bf16.msra.mxu0 %v14483_v53 }
 0x4af   :  { %13981 = vmatpush3.bf16.msra.mxu1 %v14484_v54 }
 0x4b0   :  { %13982 = vmatprep.subr.bf16.mxu1 %v14488_v55 }
 0x4b3   :  { %13983 = vmatpush3.bf16.msra.mxu1 %v14488_v55 }
 0x564   :  { %v13070_v56 = vpop.f32.mrb[32].mxu0 }
 0x565   :  { %v13071_v57 = vpop.f32.mrb[33].mxu0 }
 0x566   :  { %v13072_v58 = vadd.f32 %v13071_v57, %v13070_v56  ;;  %v13073_v59 = vpop.f32.mrb[34].mxu0  ;;  %v2696_v57 = vld [vmem:[#allocation2 + $0x8] sm:$0x1] }
 0x567   :  { %v13074_v60 = vpop.f32.mrb[35].mxu0 }
 0x568   :  { %v13075_v61 = vadd.f32 %v13074_v60, %v13073_v59  ;;  %v2580_v0 = vadd.f32 %v13072_v58, %v15563_v44 }
 0x569   :  { %v13966_v62 = vpop.f32.mrb[16].mxu1 }
 0x56a   :  { %v2628_v1 = vpop.f32.mrb[17].mxu1  ;;  %v2583_v8 = vadd.f32 %v13075_v61, %v15566_v51 }
 0x56b   :  { %v15612_v4 = vadd.f32 %v2628_v1, %v2580_v0  ;;  %v13967_v7 = vpop.f32.mrb[18].mxu1 }
 0x56c   :  { %v2631_v11 = vpop.f32.mrb[19].mxu1 }
 0x56d   :  { %v2649_v12 = vmul.f32 %v12057_v3, %v15612_v4  ;;  %v15616_v15 = vadd.f32 %v2631_v11, %v2583_v8 }
 0x56f   :  { %v2657_v18 = vadd.f32 %v12058_v9, %v2649_v12  ;;  %v2650_v19 = vmul.f32 %v12057_v3, %v15616_v15  ;;  %v13076_v20 = vpop.f32.mrb[36].mxu0 }
 0x570   :  { %v13077_v21 = vpop.f32.mrb[37].mxu0 }
 0x571   :  { %v2661_v63 = vmax.f32 %v2657_v18, 0.0  ;;  %v2658_v22 = vadd.f32 %v12058_v9, %v2650_v19  ;;  %v13078_v23 = vadd.f32 %v13077_v21, %v13076_v20  ;;  %v13079_v24 = vpop.f32.mrb[38].mxu0  ;;  %v2726_v19 = vld [vmem:[#allocation2 + $0x8] sm:$0xe] }
 0x572   :  { %v13080_v10 = vpop.f32.mrb[39].mxu0 }
 0x573   :  { %v12842_v26 = vpack.c.bf16 %v2661_v63, %v2661_v63  ;;  %v2662_v27 = vmax.f32 %v2658_v22, 0.0  ;;  %v2588_v29 = vadd.f32 %v13078_v23, %v15570_v5  ;;  %v13081_v30 = vadd.f32 %v13080_v10, %v13079_v24 }
 0x575   :  { %v2673_v31 = vshrl.u32 %v12842_v26, 16  ;;  %v12843_v32 = vpack.c.bf16 %v2662_v27, %v2662_v27  ;;  %v15620_v33 = vadd.f32 %v13966_v62, %v2588_v29  ;;  %v2591_v34 = vadd.f32 %v13081_v30, %v15574_v13 }
 0x576   :  { %v2676_v36 = vshll.u32 %v12842_v26, 16 }
 0x577   :  { %v2675_v35 = vrot.slane %v2673_v31, 7  ;;  %v2681_v38 = vshrl.u32 %v12843_v32, 16  ;;  %v2651_v39 = vmul.f32 %v12057_v3, %v15620_v33  ;;  %v15624_v40 = vadd.f32 %v13967_v7, %v2591_v34  ;;  %v2730_v34 = vld [vmem:[#allocation2 + $0x10] sm:$0x3] }
 0x578   :  { %v2684_v43 = vshll.u32 %v12843_v32, 16 }
 0x579   :  { %v2678_v41 = vor.u32 %v2676_v36, %v2675_v35  ;;  %v2683_v42 = vrot.slane %v2681_v38, 7  ;;  %v2659_v45 = vadd.f32 %v12058_v9, %v2651_v39  ;;  %v2679_v47 = vrot.slane %v2675_v35, 4 }
 0x57a   :  { %v2652_v52 = vmul.f32 %v12057_v3, %v15624_v40 }
 0x57b   :  { %v2693_v53 = vsel %vm15464_vm3, %v2678_v41, %v2692_v49  ;;  %v2686_v54 = vor.u32 %v2684_v43, %v2683_v42  ;;  %v2688_v55 = vrot.slane %v2683_v42, 4  ;;  %v2663_v56 = vmax.f32 %v2659_v45, 0.0 }
 0x57c   :  { %2694 = vst [vmem:[#allocation2] sm:$0xf] %v2693_v53  ;;  %v2660_v58 = vadd.f32 %v12058_v9, %v2652_v52 }
 0x57d   :  { %v2687_v59 = vsel %vm15458_vm15, %v2679_v47, %v2686_v54  ;;  %v2697_v60 = vsel %vm15417_vm6, %v2688_v55, %v2696_v57  ;;  %v12844_v61 = vpack.c.bf16 %v2663_v56, %v2663_v56 }
 0x57e   :  { %2695 = vst [vmem:[#allocation2 + $0x4] sm:$0xf] %v2687_v59  ;;  %2698 = vst [vmem:[#allocation2 + $0x8] sm:$0x1] %v2697_v60  ;;  %v2664_v62 = vmax.f32 %v2660_v58, 0.0 }
 0x57f   :  { %v2705_v0 = vshrl.u32 %v12844_v61, 16  ;;  %v2708_v1 = vshll.u32 %v12844_v61, 16 }
 0x580   :  { %v12845_v3 = vpack.c.bf16 %v2664_v62, %v2664_v62 }
 0x581   :  { %v2707_v7 = vrot.slane %v2705_v0, 6  ;;  %v2710_v8 = vrot.slane %v2708_v1, 7 }
 0x582   :  { %v2714_v11 = vshrl.u32 %v12845_v3, 16  ;;  %v2717_v12 = vshll.u32 %v12845_v3, 16 }
 0x583   :  { %v2711_v18 = vor.u32 %v2710_v8, %v2707_v7 }
 0x584   :  { %v2716_v9 = vrot.slane %v2714_v11, 6  ;;  %v2719_v20 = vrot.slane %v2717_v12, 7 }
 0x585   :  { %v2712_v21 = vrot.slane %v2711_v18, 4  ;;  %v2727_v63 = vsel %vm15470_vm0, %v2711_v18, %v2726_v19  ;;  %v14485_v22 = vld [vmem:[#allocation2] sm:$0xff]   ;;  %v14481_v10 = vld [vmem:[#allocation2 + $0x8] ss:$0 sps:$4 sm:$0x11]  }
 0x586   :  { %2728 = vst [vmem:[#allocation2 + $0x8] sm:$0xe] %v2727_v63  ;;  %v2720_v23 = vor.u32 %v2719_v20, %v2716_v9  ;;  %v14480_v24 = vld [vmem:[#allocation2] sm:$0xfe]   ;;  %v2756_v26 = vshll.u32 %v14485_v22, 16  ;;  %v2779_v31 = vrot.slane %v14481_v10, 1 }
 0x587   :  { %v2778_v30 = vrot.slane %v14480_v24, 1  ;;  %v14486_v32 = vld [vmem:[#allocation2 + $0x8] ss:$0 sps:$4 sm:$0x11]   ;;  %v2754_v35 = vshrl.u32 %v14485_v22, 16  ;;  %v14487_v47 = vld [vmem:[#allocation2] sm:$0xff]  }
 0x588   :  { %v2721_v27 = vsel %vm15476_vm1, %v2712_v21, %v2720_v23  ;;  %v2722_v29 = vrot.slane %v2720_v23, 4  ;;  %v2758_v36 = vrot.slane %v2756_v26, 1  ;;  %v2761_v41 = vshll.u32 %v14486_v32, 16  ;;  %v14495_v21 = vld [vmem:[#allocation8 + $0x4c0] sm:$0xff]   ;;  %v14497_v22 = vld [vmem:[#allocation8 + $0x4c8] sm:$0xff]   ;;  %v14500_v10 = vld [vmem:[#allocation8 + $0x4d0] sm:$0xff]  }
 0x589   :  { %2729 = vst [vmem:[#allocation2 + $0xc] sm:$0xf] %v2721_v27  ;;  %v2780_v39 = vsel %vm281_vm2, %v2778_v30, %v2779_v31  ;;  %v14496_v63 = vld [vmem:[#allocation8 + $0x480] sm:$0xff]   ;;  %13130 = vmatprep.subr.bf16.mxu0 %v14495_v21  ;;  %v14498_v23 = vld [vmem:[#allocation8 + $0x488] sm:$0xff]   ;;  %v14501_v26 = vld [vmem:[#allocation8 + $0x490] sm:$0xff]  }
 0x58a   :  { %v2731_v38 = vsel %vm15490_vm4, %v2722_v29, %v2730_v34  ;;  %13984 = vmatprep.mubr.bf16.mxu1 %v2780_v39  ;;  %v2759_v42 = vor.u32 %v2758_v36, %v2754_v35  ;;  %v2763_v43 = vrot.slane %v2761_v41, 1  ;;  %v14499_v24 = vld [vmem:[#allocation8 + $0x500] sm:$0xff]   ;;  %v14502_v27 = vld [vmem:[#allocation8 + $0x508] sm:$0xff]   ;;  %v14503_v29 = vld [vmem:[#allocation8 + $0x4d8] sm:$0xff]  }
 0x58b   :  { %2732 = vst [vmem:[#allocation2 + $0x10] sm:$0x3] %v2731_v38  ;;  %13988 = vmatprep.subr.bf16.mxu1 %v14499_v24  ;;  %v14504_v30 = vld [vmem:[#allocation8 + $0x498] sm:$0xff]   ;;  %v14505_v31 = vld [vmem:[#allocation8 + $0x510] sm:$0xff]   ;;  %v14506_v32 = vld [vmem:[#allocation8 + $0x4e0] sm:$0xff]  }
 0x58c   :  { %v2764_v45 = vsel %vm255_vm5, %v2759_v42, %v2763_v43  ;;  %v14507_v34 = vld [vmem:[#allocation8 + $0x4a0] sm:$0xff]   ;;  %v14508_v35 = vld [vmem:[#allocation8 + $0x518] sm:$0xff]   ;;  %v14509_v36 = vld [vmem:[#allocation8 + $0x4e8] sm:$0xff]  }
 0x58d   :  { %3076 = vmatprep.mubr.bf16.mxu0 %v2764_v45  ;;  %v14510_v38 = vld [vmem:[#allocation8 + $0x4a8] sm:$0xff]   ;;  %v14511_v39 = vld [vmem:[#allocation8 + $0x520] sm:$0xff]   ;;  %v14512_v41 = vld [vmem:[#allocation8 + $0x4f0] sm:$0xff]  }
 0x58e   :  { %3077 = vmatmul.mubr.bf16.vlgmr.msra.gmra.mrb[40].mxu0 %v14487_v47  ;;  %v14513_v42 = vld [vmem:[#allocation8 + $0x4b0] sm:$0xff]   ;;  %v14514_v43 = vld [vmem:[#allocation8 + $0x528] sm:$0xff]   ;;  %v14515_v45 = vld [vmem:[#allocation8 + $0x4f8] sm:$0xff]  }
 0x58f   :  { %13131 = vmatpush3.bf16.msra.mxu0 %v14496_v63  ;;  %v14518_v47 = vld [vmem:[#allocation8 + $0x4b8] sm:$0xff]  }
 0x590   :  { %v14489_v49 = vld [vmem:[#allocation2 + $0x8] sm:$0xfc]   ;;  %13132 = vmatprep.subr.bf16.mxu0 %v14497_v22 }
 0x591   :  { %v14491_v52 = vld [vmem:[#allocation2 + $0x8] sm:$0xfe]   ;;  %v2840_v56 = vrot.slane %v14489_v49, 2  ;;  %v14519_v49 = vld [vmem:[#allocation8 + $0x530] sm:$0xff]  }
 0x592   :  { %v14490_v53 = vld [vmem:[#allocation2 + $0x10] ss:$0 sps:$4 sm:$0x33]   ;;  %v2811_v55 = vshrl.u32 %v14491_v52, 16  ;;  %v2814_v58 = vshll.u32 %v14491_v52, 16  ;;  %v14522_v52 = vld [vmem:[#allocation12 + $0x40] sm:$0xff]  }
 0x593   :  { %v14492_v54 = vld [vmem:[#allocation2 + $0x10] ss:$0 sps:$4 sm:$0x33]   ;;  %v2841_v57 = vrot.slane %v14490_v53, 2  ;;  %v14493_v3 = vld [vmem:[#allocation2 + $0x8] sm:$0xfe]   ;;  %13133 = vmatpush3.bf16.msra.mxu0 %v14498_v23 }
 0x594   :  { %v2813_v59 = vrot.slane %v2811_v55, 1  ;;  %v2819_v60 = vshrl.u32 %v14492_v54, 16  ;;  %v2822_v61 = vshll.u32 %v14492_v54, 16  ;;  %v14494_v62 = vld [vmem:[#allocation2 + $0x10] ss:$0 sps:$4 sm:$0x11]   ;;  %13134 = vmatprep.subr.bf16.mxu0 %v14500_v10 }
 0x595   :  { %v2842_v0 = vsel %vm345_vm7, %v2840_v56, %v2841_v57  ;;  %v2816_v1 = vrot.slane %v2814_v58, 2  ;;  %v2795_v11 = vrot.slane %v14494_v62, 1  ;;  %v2794_v19 = vrot.slane %v14493_v3, 1  ;;  %v14524_v53 = vld [vmem:[#allocation8 + $0x538] sm:$0xff]   ;;  %v14546_v54 = vld [vmem:[#allocation12 + $0xc0] sm:$0xff]  }
 0x596   :  { %13985 = vmatmul.mubr.bf16.vlgmr.msra.gmra.mrb[20].mxu1 %v2842_v0  ;;  %v2821_v7 = vrot.slane %v2819_v60, 1  ;;  %v2824_v8 = vrot.slane %v2822_v61, 2  ;;  %v12098_v0 = vld [vmem:[#allocation4 + $0x6] ss:$0 sm:$0xff] }
 0x597   :  { %v2817_v12 = vor.u32 %v2816_v1, %v2813_v59  ;;  %v2796_v20 = vsel %vm281_vm2, %v2794_v19, %v2795_v11  ;;  %13989 = vmatpush3.bf16.msra.mxu1 %v14499_v24  ;;  %13135 = vmatpush3.bf16.msra.mxu0 %v14501_v26 }
 0x598   :  { %v2825_v18 = vor.u32 %v2824_v8, %v2821_v7  ;;  %13990 = vmatprep.subr.bf16.mxu1 %v14502_v27  ;;  %13136 = vmatprep.subr.bf16.mxu0 %v14503_v29  ;;  %v12099_v7 = vld [vmem:[#allocation6 + $0x6] ss:$0 sm:$0xff] }
 0x59a   :  { %v2826_v9 = vsel %vm314_vm8, %v2817_v12, %v2825_v18 }
 0x59b   :  { %3084 = vmatprep.mubr.bf16.mxu0 %v2826_v9  ;;  %13991 = vmatpush3.bf16.msra.mxu1 %v14502_v27 }
 0x59c   :  { %3085 = vmatmul.mubr.bf16.gmra.mrb[44].mxu0 %v2796_v20  ;;  %13992 = vmatprep.subr.bf16.mxu1 %v14505_v31 }
 0x59d   :  { %13137 = vmatpush3.bf16.msra.mxu0 %v14504_v30 }
 0x59e   :  { %13138 = vmatprep.subr.bf16.mxu0 %v14506_v32 }
 0x59f   :  { %13993 = vmatpush3.bf16.msra.mxu1 %v14505_v31 }
 0x5a0   :  { %13994 = vmatprep.subr.bf16.mxu1 %v14508_v35 }
 0x5a1   :  { %13139 = vmatpush3.bf16.msra.mxu0 %v14507_v34 }
 0x5a2   :  { %13140 = vmatprep.subr.bf16.mxu0 %v14509_v36 }
 0x5a3   :  { %13995 = vmatpush3.bf16.msra.mxu1 %v14508_v35 }
 0x5a4   :  { %13996 = vmatprep.subr.bf16.mxu1 %v14511_v39 }
 0x5a5   :  { %13141 = vmatpush3.bf16.msra.mxu0 %v14510_v38 }
 0x5a6   :  { %13142 = vmatprep.subr.bf16.mxu0 %v14512_v41 }
 0x5a7   :  { %13997 = vmatpush3.bf16.msra.mxu1 %v14511_v39 }
 0x5a8   :  { %13998 = vmatprep.subr.bf16.mxu1 %v14514_v43 }
 0x5a9   :  { %13143 = vmatpush3.bf16.msra.mxu0 %v14513_v42 }
 0x5aa   :  { %13144 = vmatprep.subr.bf16.mxu0 %v14515_v45 }
 0x5ab   :  { %13999 = vmatpush3.bf16.msra.mxu1 %v14514_v43 }
 0x5ac   :  { %14000 = vmatprep.subr.bf16.mxu1 %v14519_v49 }
 0x5ad   :  { %13145 = vmatpush3.bf16.msra.mxu0 %v14518_v47 }
 0x5ae   :  { %13168 = vmatprep.subr.bf16.mxu0 %v14522_v52  ;;  %v3191_v52 = vld [vmem:[#allocation2] sm:$0xf] }
 0x5af   :  { %14001 = vmatpush3.bf16.msra.mxu1 %v14519_v49 }
 0x5b0   :  { %14002 = vmatprep.subr.bf16.mxu1 %v14524_v53 }
 0x5b3   :  { %14003 = vmatpush3.bf16.msra.mxu1 %v14524_v53 }
 0x5b4   :  { %13196 = vmatprep.subr.bf16.mxu1 %v14546_v54 }
 0x661   :  { %v13108_v55 = vpop.f32.mrb[40].mxu0 }
 0x662   :  { %v13109_v56 = vpop.f32.mrb[41].mxu0 }
 0x663   :  { %v13110_v57 = vadd.f32 %v13109_v56, %v13108_v55  ;;  %v13111_v58 = vpop.f32.mrb[42].mxu0 }
 0x664   :  { %v13112_v59 = vpop.f32.mrb[43].mxu0 }
 0x665   :  { %v13113_v60 = vadd.f32 %v13112_v59, %v13111_v58  ;;  %v3195_v58 = vld [vmem:[#allocation2 + $0x8] sm:$0x1] }
 0x669   :  { %v13986_v61 = vpop.f32.mrb[20].mxu1 }
 0x66a   :  { %v3127_v62 = vpop.f32.mrb[21].mxu1 }
 0x66b   :  { %v3128_v1 = vadd.f32 %v13110_v57, %v3127_v62  ;;  %v13987_v3 = vpop.f32.mrb[22].mxu1 }
 0x66c   :  { %v3130_v8 = vpop.f32.mrb[23].mxu1 }
 0x66d   :  { %v3148_v11 = vmul.f32 %v12098_v0, %v3128_v1  ;;  %v3131_v12 = vadd.f32 %v13113_v60, %v3130_v8 }
 0x66f   :  { %v3156_v18 = vadd.f32 %v12099_v7, %v3148_v11  ;;  %v3149_v19 = vmul.f32 %v12098_v0, %v3131_v12  ;;  %v13114_v9 = vpop.f32.mrb[44].mxu0 }
 0x670   :  { %v13115_v20 = vpop.f32.mrb[45].mxu0 }
 0x671   :  { %v3160_v21 = vmax.f32 %v3156_v18, 0.0  ;;  %v3157_v63 = vadd.f32 %v12099_v7, %v3149_v19  ;;  %v13116_v22 = vadd.f32 %v13115_v20, %v13114_v9  ;;  %v13117_v23 = vpop.f32.mrb[46].mxu0  ;;  %v3225_v18 = vld [vmem:[#allocation2 + $0x8] sm:$0xe] }
 0x672   :  { %v13118_v24 = vpop.f32.mrb[47].mxu0 }
 0x673   :  { %v12846_v10 = vpack.c.bf16 %v3160_v21, %v3160_v21  ;;  %v3161_v26 = vmax.f32 %v3157_v63, 0.0  ;;  %v3136_v27 = vadd.f32 %v13986_v61, %v13116_v22  ;;  %v13119_v29 = vadd.f32 %v13118_v24, %v13117_v23  ;;  %v3229_v22 = vld [vmem:[#allocation2 + $0x10] sm:$0x3]  ;;  %v15105_v24 = vld [vmem:[#allocation9 + $0x3] ss:$0 sm:$0xff] }
 0x675   :  { %v3172_v30 = vshrl.u32 %v12846_v10, 16  ;;  %v12847_v31 = vpack.c.bf16 %v3161_v26, %v3161_v26  ;;  %v3150_v32 = vmul.f32 %v12098_v0, %v3136_v27  ;;  %v3139_v34 = vadd.f32 %v13987_v3, %v13119_v29 }
 0x676   :  { %v3175_v36 = vshll.u32 %v12846_v10, 16  ;;  %v3719_v10 = vmul.f32 %v15105_v24, %v15503_v46 }
 0x677   :  { %v3174_v35 = vrot.slane %v3172_v30, 7  ;;  %v3180_v38 = vshrl.u32 %v12847_v31, 16  ;;  %v3158_v39 = vadd.f32 %v12099_v7, %v3150_v32  ;;  %v3151_v41 = vmul.f32 %v12098_v0, %v3139_v34 }
 0x678   :  { %v3183_v45 = vshll.u32 %v12847_v31, 16  ;;  %v3720_v32 = vmul.f32 %v15105_v24, %v15506_v50 }
 0x679   :  { %v3177_v42 = vor.u32 %v3175_v36, %v3174_v35  ;;  %v3182_v43 = vrot.slane %v3180_v38, 7  ;;  %v3162_v47 = vmax.f32 %v3158_v39, 0.0  ;;  %v3178_v49 = vrot.slane %v3174_v35, 4  ;;  %v15106_v39 = vld [vmem:[#allocation11 + $0x3] ss:$0 sm:$0xff] }
 0x67a   :  { %v3159_v53 = vadd.f32 %v12099_v7, %v3151_v41  ;;  %v3727_v41 = vadd.f32 %v15106_v39, %v3719_v10 }
 0x67b   :  { %v3192_v54 = vsel %vm15464_vm3, %v3177_v42, %v3191_v52  ;;  %v3185_v55 = vor.u32 %v3183_v45, %v3182_v43  ;;  %v3187_v56 = vrot.slane %v3182_v43, 4  ;;  %v12848_v57 = vpack.c.bf16 %v3162_v47, %v3162_v47  ;;  %v15659_v52 = vld [vmem:[#allocation9 + $0x1] ss:$0 sm:$0xff] }
 0x67c   :  { %3193 = vst [vmem:[#allocation2] sm:$0xf] %v3192_v54  ;;  %v3163_v59 = vmax.f32 %v3159_v53, 0.0 }
 0x67d   :  { %v3186_v60 = vsel %vm15458_vm15, %v3178_v49, %v3185_v55  ;;  %v3196_v61 = vsel %vm15417_vm6, %v3187_v56, %v3195_v58  ;;  %v3204_v62 = vshrl.u32 %v12848_v57, 16  ;;  %v3207_v0 = vshll.u32 %v12848_v57, 16  ;;  %v14525_v55 = vld [vmem:[#allocation12] sm:$0xff]   ;;  %v14526_v56 = vld [vmem:[#allocation12 + $0x48] sm:$0xff]  }
 0x67e   :  { %3194 = vst [vmem:[#allocation2 + $0x4] sm:$0xf] %v3186_v60  ;;  %3197 = vst [vmem:[#allocation2 + $0x8] sm:$0x1] %v3196_v61  ;;  %v12849_v1 = vpack.c.bf16 %v3163_v59, %v3163_v59  ;;  %v3728_v49 = vadd.f32 %v15106_v39, %v3720_v32  ;;  %v3731_v57 = vmax.f32 %v3727_v41, 0.0  ;;  %v3672_v58 = vmul.f32 %v15659_v52, %v15616_v15  ;;  %v14548_v32 = vld [vmem:[#allocation12 + $0xc8] sm:$0xff]  }
 0x67f   :  { %v3206_v3 = vrot.slane %v3204_v62, 6  ;;  %v3209_v7 = vrot.slane %v3207_v0, 7 }
 0x680   :  { %v3213_v8 = vshrl.u32 %v12849_v1, 16  ;;  %v3216_v11 = vshll.u32 %v12849_v1, 16  ;;  %v3732_v62 = vmax.f32 %v3728_v49, 0.0  ;;  %v15664_v1 = vld [vmem:[#allocation11 + $0x1] ss:$0 sm:$0xff]  ;;  %v14549_v49 = vld [vmem:[#allocation12 + $0x88] sm:$0xff]  }
 0x681   :  { %v3210_v12 = vor.u32 %v3209_v7, %v3206_v3  ;;  %v3671_v3 = vmul.f32 %v15659_v52, %v15612_v4 }
 0x682   :  { %v3215_v19 = vrot.slane %v3213_v8, 6  ;;  %v3218_v9 = vrot.slane %v3216_v11, 7  ;;  %v14529_v8 = vld [vmem:[#allocation12 + $0x8] sm:$0xff]   ;;  %v14530_v11 = vld [vmem:[#allocation12 + $0x50] sm:$0xff]  }
 0x683   :  { %v3211_v20 = vrot.slane %v3210_v12, 4  ;;  %v3226_v21 = vsel %vm15470_vm0, %v3210_v12, %v3225_v18 }
 0x684   :  { %3227 = vst [vmem:[#allocation2 + $0x8] sm:$0xe] %v3226_v21  ;;  %v3219_v63 = vor.u32 %v3218_v9, %v3215_v19  ;;  %v3680_v21 = vadd.f32 %v15664_v1, %v3672_v58  ;;  %v14538_v58 = vld [vmem:[#allocation12 + $0x60] sm:$0xff]  }
 0x685   :  { %v14516_v23 = vld [vmem:[#allocation2] sm:$0xfe]   ;;  %v14517_v29 = vld [vmem:[#allocation2 + $0x8] ss:$0 sps:$4 sm:$0x11]  }
 0x686   :  { %v3220_v26 = vsel %vm15476_vm1, %v3211_v20, %v3219_v63  ;;  %v3221_v27 = vrot.slane %v3219_v63, 4  ;;  %v3277_v30 = vrot.slane %v14516_v23, 1  ;;  %v14520_v31 = vld [vmem:[#allocation2] sm:$0xff]   ;;  %v3278_v35 = vrot.slane %v14517_v29, 1 }
 0x687   :  { %3228 = vst [vmem:[#allocation2 + $0xc] sm:$0xf] %v3220_v26  ;;  %v14521_v36 = vld [vmem:[#allocation2 + $0x8] ss:$0 sps:$4 sm:$0x11]   ;;  %v3255_v38 = vshll.u32 %v14520_v31, 16 }
 0x688   :  { %v3230_v34 = vsel %vm15490_vm4, %v3221_v27, %v3229_v22  ;;  %v3279_v42 = vsel %vm281_vm2, %v3277_v30, %v3278_v35  ;;  %v3260_v43 = vshll.u32 %v14521_v36, 16  ;;  %v3253_v45 = vshrl.u32 %v14520_v31, 16  ;;  %v14523_v61 = vld [vmem:[#allocation2] sm:$0xff]   ;;  %v14533_v36 = vld [vmem:[#allocation12 + $0x10] sm:$0xff]  }
 0x689   :  { %3231 = vst [vmem:[#allocation2 + $0x10] sm:$0x3] %v3230_v34  ;;  %14004 = vmatprep.mubr.bf16.mxu1 %v3279_v42  ;;  %v3257_v47 = vrot.slane %v3255_v38, 1  ;;  %v14547_v63 = vld [vmem:[#allocation12 + $0x80] sm:$0xff]   ;;  %v3735_v27 = vpack.c.bf16 %v3732_v62, %v3731_v57  ;;  %v3679_v31 = vadd.f32 %v15664_v1, %v3671_v3  ;;  %v3684_v39 = vmax.f32 %v3680_v21, 0.0  ;;  %v14537_v57 = vld [vmem:[#allocation12 + $0x18] sm:$0xff]  }
 0x68a   :  { %v3262_v54 = vrot.slane %v3260_v43, 1  ;;  %v14536_v43 = vld [vmem:[#allocation12 + $0x58] sm:$0xff]   ;;  %v14540_v62 = vld [vmem:[#allocation12 + $0x68] sm:$0xff]   ;;  %v12139_v3 = vld [vmem:[#allocation9] ss:$0 sm:$0xff] }
 0x68b   :  { %v3258_v53 = vor.u32 %v3257_v47, %v3253_v45  ;;  %v3683_v47 = vmax.f32 %v3679_v31, 0.0 }
 0x68d   :  { %v3263_v60 = vsel %vm255_vm5, %v3258_v53, %v3262_v54  ;;  %v14550_v54 = vld [vmem:[#allocation12 + $0xd0] sm:$0xff]  }
 0x68e   :  { %v14527_v59 = vld [vmem:[#allocation2 + $0x8] sm:$0xfc]   ;;  %3575 = vmatprep.mubr.bf16.mxu0 %v3263_v60  ;;  %v14552_v60 = vld [vmem:[#allocation12 + $0xd8] sm:$0xff]  }
 0x68f   :  { %v14531_v0 = vld [vmem:[#allocation2 + $0x8] sm:$0xfe]   ;;  %3576 = vmatmul.mubr.bf16.vlgmr.msra.gmra.mrb[48].mxu0 %v14523_v61  ;;  %v3339_v19 = vrot.slane %v14527_v59, 2  ;;  %v14551_v59 = vld [vmem:[#allocation12 + $0x90] sm:$0xff]  }
 0x690   :  { %v14528_v7 = vld [vmem:[#allocation2 + $0x10] ss:$0 sps:$4 sm:$0x33]   ;;  %v3310_v18 = vshrl.u32 %v14531_v0, 16  ;;  %13169 = vmatpush3.bf16.msra.mxu0 %v14525_v55  ;;  %v3313_v20 = vshll.u32 %v14531_v0, 16  ;;  %v14539_v61 = vld [vmem:[#allocation12 + $0x20] sm:$0xff]  }
 0x691   :  { %v14532_v12 = vld [vmem:[#allocation2 + $0x10] ss:$0 sps:$4 sm:$0x33]   ;;  %v3340_v9 = vrot.slane %v14528_v7, 2  ;;  %13170 = vmatprep.subr.bf16.mxu0 %v14526_v56  ;;  %v14534_v30 = vld [vmem:[#allocation2 + $0x8] sm:$0xfe]   ;;  %v3687_v56 = vpack.c.bf16 %v3684_v39, %v3683_v47 }
 0x692   :  { %v3312_v22 = vrot.slane %v3310_v18, 1  ;;  %v3318_v23 = vshrl.u32 %v14532_v12, 16  ;;  %v3321_v24 = vshll.u32 %v14532_v12, 16  ;;  %v14535_v10 = vld [vmem:[#allocation2 + $0x10] ss:$0 sps:$4 sm:$0x11]   ;;  %v3674_v12 = vmul.f32 %v15659_v52, %v15624_v40 }
 0x693   :  { %v3341_v26 = vsel %vm345_vm7, %v3339_v19, %v3340_v9  ;;  %v3315_v29 = vrot.slane %v3313_v20, 2  ;;  %v3294_v38 = vrot.slane %v14535_v10, 1  ;;  %v3293_v45 = vrot.slane %v14534_v30, 1  ;;  %v14553_v0 = vld [vmem:[#allocation12 + $0x98] sm:$0xff]   ;;  %v14541_v7 = vld [vmem:[#allocation12 + $0x28] sm:$0xff]   ;;  %v14543_v9 = vld [vmem:[#allocation12 + $0x30] sm:$0xff]  }
 0x694   :  { %14005 = vmatmul.mubr.bf16.vlgmr.msra.gmra.mrb[24].mxu1 %v3341_v26  ;;  %v3320_v34 = vrot.slane %v3318_v23, 1  ;;  %v3323_v35 = vrot.slane %v3321_v24, 2  ;;  %13171 = vmatpush3.bf16.msra.mxu0 %v14529_v8  ;;  %v3648_v8 = vmul.f32 %v12139_v3, %v15566_v51  ;;  %v3647_v18 = vmul.f32 %v12139_v3, %v15563_v44  ;;  %v12140_v19 = vld [vmem:[#allocation11] ss:$0 sm:$0xff]  ;;  %v14545_v23 = vld [vmem:[#allocation12 + $0x38] sm:$0xff]   ;;  %v14555_v39 = vld [vmem:[#allocation12 + $0xa0] sm:$0xff]  }
 0x695   :  { %4074 = vmatprep.mubr.bf16.mxu1 %v3735_v27  ;;  %13172 = vmatprep.subr.bf16.mxu0 %v14530_v11  ;;  %v3316_v41 = vor.u32 %v3315_v29, %v3312_v22  ;;  %v3295_v55 = vsel %vm281_vm2, %v3293_v45, %v3294_v38  ;;  %v14542_v11 = vld [vmem:[#allocation12 + $0x70] sm:$0xff]   ;;  %v3673_v20 = vmul.f32 %v15659_v52, %v15620_v33  ;;  %v14561_v45 = vld [vmem:[#allocation12 + $0xb8] sm:$0xff]  }
 0x696   :  { %v3324_v42 = vor.u32 %v3323_v35, %v3320_v34  ;;  %13197 = vmatpush3.bf16.msra.mxu1 %v14547_v63  ;;  %v3656_v21 = vadd.f32 %v12140_v19, %v3648_v8  ;;  %v14544_v63 = vld [vmem:[#allocation12 + $0x78] sm:$0xff]   ;;  %v3682_v22 = vadd.f32 %v15664_v1, %v3674_v12  ;;  %v3655_v51 = vadd.f32 %v12140_v19, %v3647_v18 }
 0x697   :  { %13198 = vmatprep.subr.bf16.mxu1 %v14548_v32  ;;  %v3681_v24 = vadd.f32 %v15664_v1, %v3673_v20  ;;  %v3650_v44 = vmul.f32 %v12139_v3, %v15574_v13  ;;  %v3649_v29 = vmul.f32 %v12139_v3, %v15570_v5  ;;  %v14554_v1 = vld [vmem:[#allocation12 + $0xe0] sm:$0xff]   ;;  %v14556_v13 = vld [vmem:[#allocation12 + $0xe8] sm:$0xff]   ;;  %v14558_v5 = vld [vmem:[#allocation12 + $0xf0] sm:$0xff]  }
 0x698   :  { %v3325_v53 = vsel %vm314_vm8, %v3316_v41, %v3324_v42  ;;  %13173 = vmatpush3.bf16.msra.mxu0 %v14533_v36  ;;  %v3660_v10 = vmax.f32 %v3656_v21, 0.0  ;;  %v3686_v26 = vmax.f32 %v3682_v22, 0.0  ;;  %v3659_v27 = vmax.f32 %v3655_v51, 0.0  ;;  %v14557_v41 = vld [vmem:[#allocation12 + $0xa8] sm:$0xff]   ;;  %v14559_v42 = vld [vmem:[#allocation12 + $0xb0] sm:$0xff]  }
 0x699   :  { %3583 = vmatprep.mubr.bf16.mxu0 %v3325_v53  ;;  %13174 = vmatprep.subr.bf16.mxu0 %v14536_v43  ;;  %v3685_v52 = vmax.f32 %v3681_v24, 0.0  ;;  %v3658_v31 = vadd.f32 %v12140_v19, %v3650_v44  ;;  %v3657_v34 = vadd.f32 %v12140_v19, %v3649_v29  ;;  %v14560_v43 = vld [vmem:[#allocation12 + $0xf8] sm:$0xff]   ;;  %v12144_v3 = vld [vmem:[#allocation11 + $0x2] ss:$0 sm:$0xff] }
 0x69a   :  { %3584 = vmatmul.mubr.bf16.gmra.mrb[52].mxu0 %v3295_v55  ;;  %13199 = vmatpush3.bf16.msra.mxu1 %v14549_v49  ;;  %v3663_v30 = vpack.c.bf16 %v3660_v10, %v3659_v27 }
 0x69b   :  { %4025 = vmatprep.mubr.bf16.mxu0 %v3687_v56  ;;  %13200 = vmatprep.subr.bf16.mxu1 %v14550_v54  ;;  %v3688_v32 = vpack.c.bf16 %v3686_v26, %v3685_v52  ;;  %v3662_v35 = vmax.f32 %v3658_v31, 0.0  ;;  %v3661_v36 = vmax.f32 %v3657_v34, 0.0 }
 0x69c   :  { %13175 = vmatpush3.bf16.msra.mxu0 %v14537_v57 }
 0x69d   :  { %13176 = vmatprep.subr.bf16.mxu0 %v14538_v58  ;;  %v3664_v38 = vpack.c.bf16 %v3662_v35, %v3661_v36 }
 0x69e   :  { %13201 = vmatpush3.bf16.msra.mxu1 %v14551_v59 }
 0x69f   :  { %13202 = vmatprep.subr.bf16.mxu1 %v14552_v60  ;;  %v12143_v60 = vld [vmem:[#allocation9 + $0x2] ss:$0 sm:$0xff] }
 0x6a0   :  { %13177 = vmatpush3.bf16.msra.mxu0 %v14539_v61 }
 0x6a1   :  { %13178 = vmatprep.subr.bf16.mxu0 %v14540_v62 }
 0x6a2   :  { %13203 = vmatpush3.bf16.msra.mxu1 %v14553_v0 }
 0x6a3   :  { %13204 = vmatprep.subr.bf16.mxu1 %v14554_v1 }
 0x6a4   :  { %13179 = vmatpush3.bf16.msra.mxu0 %v14541_v7 }
 0x6a5   :  { %13180 = vmatprep.subr.bf16.mxu0 %v14542_v11 }
 0x6a6   :  { %13205 = vmatpush3.bf16.msra.mxu1 %v14555_v39 }
 0x6a7   :  { %13206 = vmatprep.subr.bf16.mxu1 %v14556_v13 }
 0x6a8   :  { %13181 = vmatpush3.bf16.msra.mxu0 %v14543_v9 }
 0x6a9   :  { %13182 = vmatprep.subr.bf16.mxu0 %v14544_v63 }
 0x6aa   :  { %13207 = vmatpush3.bf16.msra.mxu1 %v14557_v41 }
 0x6ab   :  { %13208 = vmatprep.subr.bf16.mxu1 %v14558_v5 }
 0x6ac   :  { %13183 = vmatpush3.bf16.msra.mxu0 %v14545_v23 }
 0x6ae   :  { %13209 = vmatpush3.bf16.msra.mxu1 %v14559_v42 }
 0x6af   :  { %4026 = vmatmul.mubr.bf16.vlgmr.msra.gmra.mrb[56].mxu0 %v3663_v30  ;;  %13210 = vmatprep.subr.bf16.mxu1 %v14560_v43  ;;  %v14562_v43 = vld [vmem:[#allocation8 + $0x580] sm:$0xff]  }
 0x6b0   :  { %4033 = vmatprep.mubr.bf16.mxu0 %v3688_v32  ;;  %13224 = vmatprep.subr.bf16.mxu0 %v14562_v43 }
 0x6b2   :  { %13211 = vmatpush3.bf16.msra.mxu1 %v14561_v45  ;;  %v14563_v45 = vld [vmem:[#allocation8 + $0x540] sm:$0xff]  }
 0x6b3   :  { %13225 = vmatpush3.bf16.msra.mxu0 %v14563_v45 }
 0x6b7   :  { %4034 = vmatmul.mubr.bf16.gmra.mrb[60].mxu0 %v3664_v38 }
 0x762   :  { %v13146_v47 = vpop.f32.mrb[48].mxu0 }
 0x763   :  { %v13147_v49 = vpop.f32.mrb[49].mxu0 }
 0x764   :  { %v13148_v53 = vadd.f32 %v13147_v49, %v13146_v47  ;;  %v13149_v54 = vpop.f32.mrb[50].mxu0  ;;  %v14564_v47 = vld [vmem:[#allocation8 + $0x588] sm:$0xff]  }
 0x765   :  { %v13150_v55 = vpop.f32.mrb[51].mxu0  ;;  %v14565_v49 = vld [vmem:[#allocation8 + $0x548] sm:$0xff]   ;;  %13226 = vmatprep.subr.bf16.mxu0 %v14564_v47 }
 0x766   :  { %v13151_v56 = vadd.f32 %v13150_v55, %v13149_v54  ;;  %v3578_v58 = vadd.f32 %v13148_v53, %v15612_v4  ;;  %v14566_v53 = vld [vmem:[#allocation8 + $0x5c0] sm:$0xff]   ;;  %13227 = vmatpush3.bf16.msra.mxu0 %v14565_v49  ;;  %v14567_v54 = vld [vmem:[#allocation8 + $0x590] sm:$0xff]  }
 0x767   :  { %v14006_v57 = vpop.f32.mrb[24].mxu1  ;;  %14008 = vmatprep.subr.bf16.mxu1 %v14566_v53  ;;  %v14568_v55 = vld [vmem:[#allocation8 + $0x550] sm:$0xff]   ;;  %13228 = vmatprep.subr.bf16.mxu0 %v14567_v54 }
 0x768   :  { %v3626_v59 = vpop.f32.mrb[25].mxu1  ;;  %v3581_v0 = vadd.f32 %v13151_v56, %v15616_v15  ;;  %v14569_v56 = vld [vmem:[#allocation8 + $0x5c8] sm:$0xff]  }
 0x769   :  { %v3627_v61 = vadd.f32 %v3626_v59, %v3578_v58  ;;  %v14007_v62 = vpop.f32.mrb[26].mxu1  ;;  %v14571_v58 = vld [vmem:[#allocation8 + $0x558] sm:$0xff]   ;;  %v14572_v59 = vld [vmem:[#allocation8 + $0x5d0] sm:$0xff]  }
 0x76a   :  { %v3629_v7 = vpop.f32.mrb[27].mxu1  ;;  %13229 = vmatpush3.bf16.msra.mxu0 %v14568_v55 }
 0x76b   :  { %v3695_v8 = vmul.f32 %v12143_v60, %v3627_v61  ;;  %v3630_v11 = vadd.f32 %v3629_v7, %v3581_v0  ;;  %v14574_v61 = vld [vmem:[#allocation8 + $0x560] sm:$0xff]   ;;  %v14576_v0 = vld [vmem:[#allocation8 + $0x5a8] sm:$0xff]  }
 0x76c   :  { %v14578_v7 = vld [vmem:[#allocation8 + $0x5e0] sm:$0xff]  }
 0x76d   :  { %v3703_v12 = vadd.f32 %v12144_v3, %v3695_v8  ;;  %v3696_v18 = vmul.f32 %v12143_v60, %v3630_v11  ;;  %v13152_v19 = vpop.f32.mrb[52].mxu0  ;;  %v14579_v8 = vld [vmem:[#allocation8 + $0x5b0] sm:$0xff]  }
 0x76e   :  { %v13153_v9 = vpop.f32.mrb[53].mxu0  ;;  %v14580_v11 = vld [vmem:[#allocation8 + $0x570] sm:$0xff]  }
 0x76f   :  { %v3704_v20 = vadd.f32 %v12144_v3, %v3696_v18  ;;  %v13154_v21 = vadd.f32 %v13153_v9, %v13152_v19  ;;  %v13155_v63 = vpop.f32.mrb[54].mxu0  ;;  %v3707_v51 = vmax.f32 %v3703_v12, 0.0  ;;  %v14581_v12 = vld [vmem:[#allocation8 + $0x5e8] sm:$0xff]   ;;  %v14584_v18 = vld [vmem:[#allocation8 + $0x5b8] sm:$0xff]   ;;  %v14586_v9 = vld [vmem:[#allocation8 + $0x5f0] sm:$0xff]  }
 0x770   :  { %v13156_v22 = vpop.f32.mrb[55].mxu0  ;;  %v14585_v19 = vld [vmem:[#allocation8 + $0x578] sm:$0xff]  }
 0x771   :  { %v3708_v4 = vmax.f32 %v3704_v20, 0.0  ;;  %v3586_v23 = vadd.f32 %v13154_v21, %v15620_v33  ;;  %v13157_v24 = vadd.f32 %v13156_v22, %v13155_v63  ;;  %v14590_v20 = vld [vmem:[#allocation8 + $0x5f8] sm:$0xff]  }
 0x773   :  { %v3711_v10 = vpack.c.bf16 %v3708_v4, %v3707_v51  ;;  %v3635_v44 = vadd.f32 %v14006_v57, %v3586_v23  ;;  %v3589_v15 = vadd.f32 %v13157_v24, %v15624_v40  ;;  %v14570_v57 = vld [vmem:[#allocation8 + $0x598] sm:$0xff]   ;;  %v12179_v4 = vld [vmem:[#allocation4 + $0x7] ss:$0 sm:$0xff] }
 0x774   :  { %13230 = vmatprep.subr.bf16.mxu0 %v14570_v57  ;;  %v4140_v57 = vld [vmem:[#allocation2] sm:$0xf] }
 0x775   :  { %v3697_v26 = vmul.f32 %v12143_v60, %v3635_v44  ;;  %v3638_v27 = vadd.f32 %v14007_v62, %v3589_v15  ;;  %4075 = vmatmul.mubr.bf16.vlgmr.msra.gmra.mrb[28].mxu1 %v3711_v10  ;;  %13231 = vmatpush3.bf16.msra.mxu0 %v14571_v58  ;;  %v14575_v62 = vld [vmem:[#allocation8 + $0x5d8] sm:$0xff]   ;;  %v12180_v44 = vld [vmem:[#allocation6 + $0x7] ss:$0 sm:$0xff] }
 0x776   :  { %4082 = vmatprep.mubr.bf16.mxu1 %v15525_v48  ;;  %14009 = vmatpush3.bf16.msra.mxu1 %v14566_v53 }
 0x777   :  { %v3698_v29 = vmul.f32 %v12143_v60, %v3638_v27  ;;  %v3705_v52 = vadd.f32 %v12144_v3, %v3697_v26  ;;  %14010 = vmatprep.subr.bf16.mxu1 %v14569_v56  ;;  %v14573_v60 = vld [vmem:[#allocation8 + $0x5a0] sm:$0xff]  }
 0x778   :  { %13232 = vmatprep.subr.bf16.mxu0 %v14573_v60 }
 0x779   :  { %v3706_v30 = vadd.f32 %v12144_v3, %v3698_v29  ;;  %v3709_v31 = vmax.f32 %v3705_v52, 0.0  ;;  %13233 = vmatpush3.bf16.msra.mxu0 %v14574_v61  ;;  %v14577_v3 = vld [vmem:[#allocation8 + $0x568] sm:$0xff]  }
 0x77a   :  { %14011 = vmatpush3.bf16.msra.mxu1 %v14569_v56  ;;  %13234 = vmatprep.subr.bf16.mxu0 %v14576_v0 }
 0x77b   :  { %v3710_v32 = vmax.f32 %v3706_v30, 0.0  ;;  %14012 = vmatprep.subr.bf16.mxu1 %v14572_v59 }
 0x77d   :  { %v3712_v34 = vpack.c.bf16 %v3710_v32, %v3709_v31  ;;  %13235 = vmatpush3.bf16.msra.mxu0 %v14577_v3 }
 0x77e   :  { %14013 = vmatpush3.bf16.msra.mxu1 %v14572_v59  ;;  %13236 = vmatprep.subr.bf16.mxu0 %v14579_v8 }
 0x77f   :  { %4083 = vmatmul.mubr.bf16.gmra.mrb[32].mxu1 %v3712_v34  ;;  %14014 = vmatprep.subr.bf16.mxu1 %v14575_v62 }
 0x781   :  { %13237 = vmatpush3.bf16.msra.mxu0 %v14580_v11 }
 0x782   :  { %v13184_v35 = vpop.f32.mrb[56].mxu0  ;;  %14015 = vmatpush3.bf16.msra.mxu1 %v14575_v62  ;;  %13238 = vmatprep.subr.bf16.mxu0 %v14584_v18  ;;  %v4144_v62 = vld [vmem:[#allocation2 + $0x8] sm:$0x1] }
 0x783   :  { %v13185_v36 = vpop.f32.mrb[57].mxu0  ;;  %14016 = vmatprep.subr.bf16.mxu1 %v14578_v7 }
 0x784   :  { %v15688_v33 = vadd.f32 %v13185_v36, %v13184_v35  ;;  %v13187_v38 = vpop.f32.mrb[58].mxu0 }
 0x785   :  { %v13188_v1 = vpop.f32.mrb[59].mxu0  ;;  %13239 = vmatpush3.bf16.msra.mxu0 %v14585_v19 }
 0x786   :  { %v15690_v39 = vadd.f32 %v13188_v1, %v13187_v38  ;;  %14017 = vmatpush3.bf16.msra.mxu1 %v14578_v7 }
 0x787   :  { %14018 = vmatprep.subr.bf16.mxu1 %v14581_v12 }
 0x78a   :  { %v13190_v40 = vpop.f32.mrb[60].mxu0  ;;  %14019 = vmatpush3.bf16.msra.mxu1 %v14581_v12 }
 0x78b   :  { %v13191_v13 = vpop.f32.mrb[61].mxu0  ;;  %14020 = vmatprep.subr.bf16.mxu1 %v14586_v9 }
 0x78c   :  { %v15692_v41 = vadd.f32 %v13191_v13, %v13190_v40  ;;  %v13193_v48 = vpop.f32.mrb[62].mxu0 }
 0x78d   :  { %v13194_v5 = vpop.f32.mrb[63].mxu0 }
 0x78e   :  { %v15694_v42 = vadd.f32 %v13194_v5, %v13193_v48  ;;  %14021 = vmatpush3.bf16.msra.mxu1 %v14586_v9 }
 0x78f   :  { %14022 = vmatprep.subr.bf16.mxu1 %v14590_v20 }
 0x792   :  { %14023 = vmatpush3.bf16.msra.mxu1 %v14590_v20 }
 0x848   :  { %v13212_v21 = vpop.f32.mrb[28].mxu1 }
 0x849   :  { %v13213_v63 = vpop.f32.mrb[29].mxu1 }
 0x84a   :  { %v13214_v22 = vadd.f32 %v13213_v63, %v13212_v21  ;;  %v13215_v51 = vpop.f32.mrb[30].mxu1 }
 0x84b   :  { %v13216_v23 = vpop.f32.mrb[31].mxu1 }
 0x84c   :  { %v15697_v24 = vadd.f32 %v13214_v22, %v15688_v33  ;;  %v13217_v10 = vadd.f32 %v13216_v23, %v13215_v51  ;;  %v4174_v22 = vld [vmem:[#allocation2 + $0x8] sm:$0xe] }
 0x84e   :  { %v4097_v15 = vmul.f32 %v12179_v4, %v15697_v24  ;;  %v15701_v26 = vadd.f32 %v13217_v10, %v15690_v39 }
 0x850   :  { %v4105_v27 = vadd.f32 %v12180_v44, %v4097_v15  ;;  %v4098_v29 = vmul.f32 %v12179_v4, %v15701_v26 }
 0x852   :  { %v4109_v52 = vmax.f32 %v4105_v27, 0.0  ;;  %v4106_v30 = vadd.f32 %v12180_v44, %v4098_v29  ;;  %v13218_v31 = vpop.f32.mrb[32].mxu1 }
 0x853   :  { %v13219_v32 = vpop.f32.mrb[33].mxu1 }
 0x854   :  { %v12850_v34 = vpack.c.bf16 %v4109_v52, %v4109_v52  ;;  %v4110_v35 = vmax.f32 %v4106_v30, 0.0  ;;  %v13220_v36 = vadd.f32 %v13219_v32, %v13218_v31  ;;  %v13221_v38 = vpop.f32.mrb[34].mxu1 }
 0x855   :  { %v13222_v33 = vpop.f32.mrb[35].mxu1 }
 0x856   :  { %v4121_v1 = vshrl.u32 %v12850_v34, 16  ;;  %v12851_v40 = vpack.c.bf16 %v4110_v35, %v4110_v35  ;;  %v15705_v13 = vadd.f32 %v13220_v36, %v15692_v41  ;;  %v13223_v48 = vadd.f32 %v13222_v33, %v13221_v38  ;;  %v4178_v36 = vld [vmem:[#allocation2 + $0x10] sm:$0x3] }
 0x857   :  { %v4124_v5 = vshll.u32 %v12850_v34, 16 }
 0x858   :  { %v4123_v39 = vrot.slane %v4121_v1, 7  ;;  %v4129_v43 = vshrl.u32 %v12851_v40, 16  ;;  %v4099_v45 = vmul.f32 %v12179_v4, %v15705_v13  ;;  %v15709_v47 = vadd.f32 %v13223_v48, %v15694_v42 }
 0x859   :  { %v4132_v54 = vshll.u32 %v12851_v40, 16 }
 0x85a   :  { %v4126_v49 = vor.u32 %v4124_v5, %v4123_v39  ;;  %v4131_v53 = vrot.slane %v4129_v43, 7  ;;  %v4107_v55 = vadd.f32 %v12180_v44, %v4099_v45  ;;  %v4127_v56 = vrot.slane %v4123_v39, 4 }
 0x85b   :  { %v4100_v58 = vmul.f32 %v12179_v4, %v15709_v47 }
 0x85c   :  { %v4141_v41 = vsel %vm15464_vm3, %v4126_v49, %v4140_v57  ;;  %v4134_v59 = vor.u32 %v4132_v54, %v4131_v53  ;;  %v4136_v60 = vrot.slane %v4131_v53, 4  ;;  %v4111_v61 = vmax.f32 %v4107_v55, 0.0 }
 0x85d   :  { %4142 = vst [vmem:[#allocation2] sm:$0xf] %v4141_v41  ;;  %v4108_v0 = vadd.f32 %v12180_v44, %v4100_v58 }
 0x85e   :  { %v4135_v42 = vsel %vm15458_vm15, %v4127_v56, %v4134_v59  ;;  %v4145_v3 = vsel %vm15417_vm6, %v4136_v60, %v4144_v62  ;;  %v12852_v7 = vpack.c.bf16 %v4111_v61, %v4111_v61 }
 0x85f   :  { %4143 = vst [vmem:[#allocation2 + $0x4] sm:$0xf] %v4135_v42  ;;  %4146 = vst [vmem:[#allocation2 + $0x8] sm:$0x1] %v4145_v3  ;;  %v4112_v8 = vmax.f32 %v4108_v0, 0.0 }
 0x860   :  { %v4153_v11 = vshrl.u32 %v12852_v7, 16  ;;  %v4156_v12 = vshll.u32 %v12852_v7, 16 }
 0x861   :  { %v12853_v18 = vpack.c.bf16 %v4112_v8, %v4112_v8 }
 0x862   :  { %v4155_v19 = vrot.slane %v4153_v11, 6  ;;  %v4158_v9 = vrot.slane %v4156_v12, 7 }
 0x863   :  { %v4162_v20 = vshrl.u32 %v12853_v18, 16  ;;  %v4165_v21 = vshll.u32 %v12853_v18, 16 }
 0x864   :  { %v4159_v63 = vor.u32 %v4158_v9, %v4155_v19 }
 0x865   :  { %v4164_v51 = vrot.slane %v4162_v20, 6  ;;  %v4167_v4 = vrot.slane %v4165_v21, 7  ;;  %v14597_v21 = vld [vmem:[#allocation8 + $0x640] sm:$0xff]  }
 0x866   :  { %v4160_v23 = vrot.slane %v4159_v63, 4  ;;  %v4175_v10 = vsel %vm15470_vm0, %v4159_v63, %v4174_v22  ;;  %v14587_v44 = vld [vmem:[#allocation2] sm:$0xff]   ;;  %v14583_v29 = vld [vmem:[#allocation2 + $0x8] ss:$0 sps:$4 sm:$0x11]   ;;  %13262 = vmatprep.subr.bf16.mxu0 %v14597_v21  ;;  %v14599_v22 = vld [vmem:[#allocation8 + $0x648] sm:$0xff]  }
 0x867   :  { %4176 = vst [vmem:[#allocation2 + $0x8] sm:$0xe] %v4175_v10  ;;  %v4168_v15 = vor.u32 %v4167_v4, %v4164_v51  ;;  %v14582_v27 = vld [vmem:[#allocation2] sm:$0xfe]   ;;  %v4204_v52 = vshll.u32 %v14587_v44, 16  ;;  %v4227_v34 = vrot.slane %v14583_v29, 1 }
 0x868   :  { %v4226_v32 = vrot.slane %v14582_v27, 1  ;;  %v14588_v35 = vld [vmem:[#allocation2 + $0x8] ss:$0 sps:$4 sm:$0x11]   ;;  %v4202_v38 = vshrl.u32 %v14587_v44, 16  ;;  %v14589_v45 = vld [vmem:[#allocation2] sm:$0xff]  }
 0x869   :  { %v4169_v30 = vsel %vm15476_vm1, %v4160_v23, %v4168_v15  ;;  %v4170_v31 = vrot.slane %v4168_v15, 4  ;;  %v4206_v33 = vrot.slane %v4204_v52, 1  ;;  %v4209_v48 = vshll.u32 %v14588_v35, 16  ;;  %v14598_v63 = vld [vmem:[#allocation8 + $0x600] sm:$0xff]   ;;  %v14601_v4 = vld [vmem:[#allocation8 + $0x608] sm:$0xff]   ;;  %v14602_v23 = vld [vmem:[#allocation8 + $0x650] sm:$0xff]  }
 0x86a   :  { %4177 = vst [vmem:[#allocation2 + $0xc] sm:$0xf] %v4169_v30  ;;  %v4228_v40 = vsel %vm281_vm2, %v4226_v32, %v4227_v34  ;;  %v14600_v51 = vld [vmem:[#allocation8 + $0x680] sm:$0xff]   ;;  %v14603_v10 = vld [vmem:[#allocation8 + $0x688] sm:$0xff]   ;;  %v14604_v44 = vld [vmem:[#allocation8 + $0x610] sm:$0xff]  }
 0x86b   :  { %v4179_v1 = vsel %vm15490_vm4, %v4170_v31, %v4178_v36  ;;  %14024 = vmatprep.mubr.bf16.mxu1 %v4228_v40  ;;  %v4207_v39 = vor.u32 %v4206_v33, %v4202_v38  ;;  %v4211_v5 = vrot.slane %v4209_v48, 1  ;;  %14028 = vmatprep.subr.bf16.mxu1 %v14600_v51  ;;  %v14605_v15 = vld [vmem:[#allocation8 + $0x658] sm:$0xff]   ;;  %v14606_v27 = vld [vmem:[#allocation8 + $0x690] sm:$0xff]   ;;  %v14608_v52 = vld [vmem:[#allocation8 + $0x660] sm:$0xff]  }
 0x86c   :  { %4180 = vst [vmem:[#allocation2 + $0x10] sm:$0x3] %v4179_v1  ;;  %v14607_v29 = vld [vmem:[#allocation8 + $0x618] sm:$0xff]   ;;  %v14610_v31 = vld [vmem:[#allocation8 + $0x620] sm:$0xff]   ;;  %v14611_v32 = vld [vmem:[#allocation8 + $0x668] sm:$0xff]  }
 0x86d   :  { %v4212_v43 = vsel %vm255_vm5, %v4207_v39, %v4211_v5  ;;  %v14609_v30 = vld [vmem:[#allocation8 + $0x698] sm:$0xff]   ;;  %v14612_v34 = vld [vmem:[#allocation8 + $0x6a0] sm:$0xff]   ;;  %v14613_v35 = vld [vmem:[#allocation8 + $0x628] sm:$0xff]  }
 0x86e   :  { %4524 = vmatprep.mubr.bf16.mxu0 %v4212_v43  ;;  %v14614_v36 = vld [vmem:[#allocation8 + $0x670] sm:$0xff]   ;;  %v14615_v38 = vld [vmem:[#allocation8 + $0x6a8] sm:$0xff]   ;;  %v14619_v1 = vld [vmem:[#allocation8 + $0x678] sm:$0xff]  }
 0x86f   :  { %4525 = vmatmul.mubr.bf16.vlgmr.msra.gmra.mrb[64].mxu0 %v14589_v45  ;;  %v14616_v33 = vld [vmem:[#allocation8 + $0x630] sm:$0xff]   ;;  %v14621_v48 = vld [vmem:[#allocation8 + $0x638] sm:$0xff]  }
 0x870   :  { %13263 = vmatpush3.bf16.msra.mxu0 %v14598_v63  ;;  %v14620_v40 = vld [vmem:[#allocation8 + $0x6b0] sm:$0xff]   ;;  %v14625_v39 = vld [vmem:[#allocation8 + $0x6b8] sm:$0xff]  }
 0x871   :  { %v14591_v49 = vld [vmem:[#allocation2 + $0x8] sm:$0xfc]   ;;  %13264 = vmatprep.subr.bf16.mxu0 %v14599_v22 }
 0x872   :  { %v14593_v53 = vld [vmem:[#allocation2 + $0x8] sm:$0xfe]   ;;  %v4288_v57 = vrot.slane %v14591_v49, 2 }
 0x873   :  { %v14592_v54 = vld [vmem:[#allocation2 + $0x10] ss:$0 sps:$4 sm:$0x33]   ;;  %v4259_v56 = vshrl.u32 %v14593_v53, 16  ;;  %v4262_v41 = vshll.u32 %v14593_v53, 16 }
 0x874   :  { %v14594_v55 = vld [vmem:[#allocation2 + $0x10] ss:$0 sps:$4 sm:$0x33]   ;;  %v4289_v58 = vrot.slane %v14592_v54, 2  ;;  %v14595_v3 = vld [vmem:[#allocation2 + $0x8] sm:$0xfe]   ;;  %13265 = vmatpush3.bf16.msra.mxu0 %v14601_v4 }
 0x875   :  { %v4261_v59 = vrot.slane %v4259_v56, 1  ;;  %v4267_v60 = vshrl.u32 %v14594_v55, 16  ;;  %v4270_v61 = vshll.u32 %v14594_v55, 16  ;;  %v14596_v62 = vld [vmem:[#allocation2 + $0x10] ss:$0 sps:$4 sm:$0x11]   ;;  %13266 = vmatprep.subr.bf16.mxu0 %v14602_v23 }
 0x876   :  { %v4290_v0 = vsel %vm345_vm7, %v4288_v57, %v4289_v58  ;;  %v4264_v42 = vrot.slane %v4262_v41, 2  ;;  %v4243_v11 = vrot.slane %v14596_v62, 1  ;;  %v4242_v19 = vrot.slane %v14595_v3, 1  ;;  %v12220_v57 = vld [vmem:[#allocation4 + $0x8] ss:$0 sm:$0xff] }
 0x877   :  { %14025 = vmatmul.mubr.bf16.vlgmr.msra.gmra.mrb[36].mxu1 %v4290_v0  ;;  %v4269_v7 = vrot.slane %v4267_v60, 1  ;;  %v4272_v8 = vrot.slane %v4270_v61, 2 }
 0x878   :  { %v4265_v12 = vor.u32 %v4264_v42, %v4261_v59  ;;  %v4244_v20 = vsel %vm281_vm2, %v4242_v19, %v4243_v11  ;;  %14029 = vmatpush3.bf16.msra.mxu1 %v14600_v51  ;;  %13267 = vmatpush3.bf16.msra.mxu0 %v14604_v44  ;;  %v12221_v59 = vld [vmem:[#allocation6 + $0x8] ss:$0 sm:$0xff] }
 0x879   :  { %v4273_v18 = vor.u32 %v4272_v8, %v4269_v7  ;;  %14030 = vmatprep.subr.bf16.mxu1 %v14603_v10  ;;  %13268 = vmatprep.subr.bf16.mxu0 %v14605_v15 }
 0x87b   :  { %v4274_v9 = vsel %vm314_vm8, %v4265_v12, %v4273_v18 }
 0x87c   :  { %4532 = vmatprep.mubr.bf16.mxu0 %v4274_v9  ;;  %14031 = vmatpush3.bf16.msra.mxu1 %v14603_v10 }
 0x87d   :  { %4533 = vmatmul.mubr.bf16.gmra.mrb[68].mxu0 %v4244_v20  ;;  %14032 = vmatprep.subr.bf16.mxu1 %v14606_v27 }
 0x87e   :  { %13269 = vmatpush3.bf16.msra.mxu0 %v14607_v29 }
 0x87f   :  { %13270 = vmatprep.subr.bf16.mxu0 %v14608_v52 }
 0x880   :  { %14033 = vmatpush3.bf16.msra.mxu1 %v14606_v27 }
 0x881   :  { %14034 = vmatprep.subr.bf16.mxu1 %v14609_v30 }
 0x882   :  { %13271 = vmatpush3.bf16.msra.mxu0 %v14610_v31 }
 0x883   :  { %13272 = vmatprep.subr.bf16.mxu0 %v14611_v32 }
 0x884   :  { %14035 = vmatpush3.bf16.msra.mxu1 %v14609_v30 }
 0x885   :  { %14036 = vmatprep.subr.bf16.mxu1 %v14612_v34 }
 0x886   :  { %13273 = vmatpush3.bf16.msra.mxu0 %v14613_v35  ;;  %v4639_v35 = vld [vmem:[#allocation2] sm:$0xf] }
 0x887   :  { %13274 = vmatprep.subr.bf16.mxu0 %v14614_v36 }
 0x888   :  { %14037 = vmatpush3.bf16.msra.mxu1 %v14612_v34 }
 0x889   :  { %14038 = vmatprep.subr.bf16.mxu1 %v14615_v38 }
 0x88a   :  { %13275 = vmatpush3.bf16.msra.mxu0 %v14616_v33 }
 0x88b   :  { %13276 = vmatprep.subr.bf16.mxu0 %v14619_v1 }
 0x88c   :  { %14039 = vmatpush3.bf16.msra.mxu1 %v14615_v38 }
 0x88d   :  { %14040 = vmatprep.subr.bf16.mxu1 %v14620_v40 }
 0x88e   :  { %13277 = vmatpush3.bf16.msra.mxu0 %v14621_v48  ;;  %v4643_v48 = vld [vmem:[#allocation2 + $0x8] sm:$0x1] }
 0x890   :  { %14041 = vmatpush3.bf16.msra.mxu1 %v14620_v40 }
 0x891   :  { %14042 = vmatprep.subr.bf16.mxu1 %v14625_v39 }
 0x894   :  { %14043 = vmatpush3.bf16.msra.mxu1 %v14625_v39 }
 0x942   :  { %v13240_v5 = vpop.f32.mrb[64].mxu0 }
 0x943   :  { %v13241_v43 = vpop.f32.mrb[65].mxu0 }
 0x944   :  { %v13242_v45 = vadd.f32 %v13241_v43, %v13240_v5  ;;  %v13243_v49 = vpop.f32.mrb[66].mxu0 }
 0x945   :  { %v13244_v53 = vpop.f32.mrb[67].mxu0 }
 0x946   :  { %v13245_v54 = vadd.f32 %v13244_v53, %v13243_v49 }
 0x94a   :  { %v14026_v55 = vpop.f32.mrb[36].mxu1 }
 0x94b   :  { %v4575_v56 = vpop.f32.mrb[37].mxu1 }
 0x94c   :  { %v4576_v58 = vadd.f32 %v13242_v45, %v4575_v56  ;;  %v14027_v41 = vpop.f32.mrb[38].mxu1 }
 0x94d   :  { %v4578_v60 = vpop.f32.mrb[39].mxu1 }
 0x94e   :  { %v4596_v61 = vmul.f32 %v12220_v57, %v4576_v58  ;;  %v4579_v62 = vadd.f32 %v13245_v54, %v4578_v60 }
 0x950   :  { %v4604_v0 = vadd.f32 %v12221_v59, %v4596_v61  ;;  %v4597_v42 = vmul.f32 %v12220_v57, %v4579_v62  ;;  %v13246_v3 = vpop.f32.mrb[68].mxu0 }
 0x951   :  { %v13247_v7 = vpop.f32.mrb[69].mxu0 }
 0x952   :  { %v4608_v8 = vmax.f32 %v4604_v0, 0.0  ;;  %v4605_v11 = vadd.f32 %v12221_v59, %v4597_v42  ;;  %v13248_v12 = vadd.f32 %v13247_v7, %v13246_v3  ;;  %v13249_v18 = vpop.f32.mrb[70].mxu0  ;;  %v4677_v42 = vld [vmem:[#allocation2 + $0x10] sm:$0x3] }
 0x953   :  { %v13250_v19 = vpop.f32.mrb[71].mxu0 }
 0x954   :  { %v12854_v9 = vpack.c.bf16 %v4608_v8, %v4608_v8  ;;  %v4609_v20 = vmax.f32 %v4605_v11, 0.0  ;;  %v4584_v21 = vadd.f32 %v14026_v55, %v13248_v12  ;;  %v13251_v63 = vadd.f32 %v13250_v19, %v13249_v18 }
 0x956   :  { %v4620_v22 = vshrl.u32 %v12854_v9, 16  ;;  %v12855_v51 = vpack.c.bf16 %v4609_v20, %v4609_v20  ;;  %v4598_v4 = vmul.f32 %v12220_v57, %v4584_v21  ;;  %v4587_v23 = vadd.f32 %v14027_v41, %v13251_v63  ;;  %v4673_v41 = vld [vmem:[#allocation2 + $0x8] sm:$0xe] }
 0x957   :  { %v4623_v44 = vshll.u32 %v12854_v9, 16 }
 0x958   :  { %v4622_v10 = vrot.slane %v4620_v22, 7  ;;  %v4628_v15 = vshrl.u32 %v12855_v51, 16  ;;  %v4606_v27 = vadd.f32 %v12221_v59, %v4598_v4  ;;  %v4599_v29 = vmul.f32 %v12220_v57, %v4587_v23 }
 0x959   :  { %v4631_v31 = vshll.u32 %v12855_v51, 16 }
 0x95a   :  { %v4625_v52 = vor.u32 %v4623_v44, %v4622_v10  ;;  %v4630_v30 = vrot.slane %v4628_v15, 7  ;;  %v4610_v32 = vmax.f32 %v4606_v27, 0.0  ;;  %v4626_v34 = vrot.slane %v4622_v10, 4 }
 0x95b   :  { %v4607_v36 = vadd.f32 %v12221_v59, %v4599_v29 }
 0x95c   :  { %v4640_v38 = vsel %vm15464_vm3, %v4625_v52, %v4639_v35  ;;  %v4633_v33 = vor.u32 %v4631_v31, %v4630_v30  ;;  %v4635_v1 = vrot.slane %v4630_v30, 4  ;;  %v12856_v40 = vpack.c.bf16 %v4610_v32, %v4610_v32 }
 0x95d   :  { %4641 = vst [vmem:[#allocation2] sm:$0xf] %v4640_v38  ;;  %v4611_v39 = vmax.f32 %v4607_v36, 0.0 }
 0x95e   :  { %v4634_v5 = vsel %vm15458_vm15, %v4626_v34, %v4633_v33  ;;  %v4644_v43 = vsel %vm15417_vm6, %v4635_v1, %v4643_v48  ;;  %v4652_v45 = vshrl.u32 %v12856_v40, 16  ;;  %v4655_v49 = vshll.u32 %v12856_v40, 16 }
 0x95f   :  { %4642 = vst [vmem:[#allocation2 + $0x4] sm:$0xf] %v4634_v5  ;;  %4645 = vst [vmem:[#allocation2 + $0x8] sm:$0x1] %v4644_v43  ;;  %v12857_v53 = vpack.c.bf16 %v4611_v39, %v4611_v39 }
 0x960   :  { %v4654_v54 = vrot.slane %v4652_v45, 6  ;;  %v4657_v55 = vrot.slane %v4655_v49, 7 }
 0x961   :  { %v4661_v56 = vshrl.u32 %v12857_v53, 16  ;;  %v4664_v57 = vshll.u32 %v12857_v53, 16 }
 0x962   :  { %v4658_v58 = vor.u32 %v4657_v55, %v4654_v54 }
 0x963   :  { %v4663_v59 = vrot.slane %v4661_v56, 6  ;;  %v4666_v60 = vrot.slane %v4664_v57, 7  ;;  %v14632_v57 = vld [vmem:[#allocation8 + $0x700] sm:$0xff]  }
 0x964   :  { %v4659_v61 = vrot.slane %v4658_v58, 4  ;;  %v4674_v62 = vsel %vm15470_vm0, %v4658_v58, %v4673_v41  ;;  %13300 = vmatprep.subr.bf16.mxu0 %v14632_v57  ;;  %v14633_v58 = vld [vmem:[#allocation8 + $0x6c0] sm:$0xff]   ;;  %v14634_v41 = vld [vmem:[#allocation8 + $0x708] sm:$0xff]  }
 0x965   :  { %4675 = vst [vmem:[#allocation2 + $0x8] sm:$0xe] %v4674_v62  ;;  %v4667_v0 = vor.u32 %v4666_v60, %v4663_v59  ;;  %v14635_v59 = vld [vmem:[#allocation8 + $0x6c8] sm:$0xff]   ;;  %v14636_v60 = vld [vmem:[#allocation8 + $0x740] sm:$0xff]   ;;  %v14638_v62 = vld [vmem:[#allocation8 + $0x6d0] sm:$0xff]  }
 0x966   :  { %v14617_v3 = vld [vmem:[#allocation2] sm:$0xfe]   ;;  %v14618_v11 = vld [vmem:[#allocation2 + $0x8] ss:$0 sps:$4 sm:$0x11]   ;;  %14048 = vmatprep.subr.bf16.mxu1 %v14636_v60 }
 0x967   :  { %v4668_v7 = vsel %vm15476_vm1, %v4659_v61, %v4667_v0  ;;  %v4669_v8 = vrot.slane %v4667_v0, 4  ;;  %v4725_v12 = vrot.slane %v14617_v3, 1  ;;  %v14622_v18 = vld [vmem:[#allocation2] sm:$0xff]   ;;  %v4726_v9 = vrot.slane %v14618_v11, 1  ;;  %v14637_v61 = vld [vmem:[#allocation8 + $0x710] sm:$0xff]   ;;  %v14639_v0 = vld [vmem:[#allocation8 + $0x748] sm:$0xff]  }
 0x968   :  { %4676 = vst [vmem:[#allocation2 + $0xc] sm:$0xf] %v4668_v7  ;;  %v14623_v20 = vld [vmem:[#allocation2 + $0x8] ss:$0 sps:$4 sm:$0x11]   ;;  %v4703_v21 = vshll.u32 %v14622_v18, 16 }
 0x969   :  { %v4678_v19 = vsel %vm15490_vm4, %v4669_v8, %v4677_v42  ;;  %v4727_v63 = vsel %vm281_vm2, %v4725_v12, %v4726_v9  ;;  %v4708_v22 = vshll.u32 %v14623_v20, 16  ;;  %v4701_v51 = vshrl.u32 %v14622_v18, 16  ;;  %v14624_v27 = vld [vmem:[#allocation2] sm:$0xff]   ;;  %v14642_v7 = vld [vmem:[#allocation8 + $0x750] sm:$0xff]   ;;  %v14646_v18 = vld [vmem:[#allocation8 + $0x728] sm:$0xff]  }
 0x96a   :  { %4679 = vst [vmem:[#allocation2 + $0x10] sm:$0x3] %v4678_v19  ;;  %14044 = vmatprep.mubr.bf16.mxu1 %v4727_v63  ;;  %v4705_v4 = vrot.slane %v4703_v21, 1  ;;  %v14640_v42 = vld [vmem:[#allocation8 + $0x718] sm:$0xff]   ;;  %v14643_v8 = vld [vmem:[#allocation8 + $0x720] sm:$0xff]   ;;  %v14647_v19 = vld [vmem:[#allocation8 + $0x6e8] sm:$0xff]  }
 0x96b   :  { %v4710_v10 = vrot.slane %v4708_v22, 1  ;;  %v14641_v3 = vld [vmem:[#allocation8 + $0x6d8] sm:$0xff]   ;;  %v14644_v11 = vld [vmem:[#allocation8 + $0x6e0] sm:$0xff]   ;;  %v14649_v20 = vld [vmem:[#allocation8 + $0x730] sm:$0xff]  }
 0x96c   :  { %v4706_v23 = vor.u32 %v4705_v4, %v4701_v51  ;;  %v14645_v12 = vld [vmem:[#allocation8 + $0x758] sm:$0xff]   ;;  %v14648_v9 = vld [vmem:[#allocation8 + $0x760] sm:$0xff]   ;;  %v14650_v21 = vld [vmem:[#allocation8 + $0x6f0] sm:$0xff]  }
 0x96d   :  { %v14651_v63 = vld [vmem:[#allocation8 + $0x768] sm:$0xff]   ;;  %v14654_v22 = vld [vmem:[#allocation8 + $0x738] sm:$0xff]   ;;  %v14656_v4 = vld [vmem:[#allocation8 + $0x770] sm:$0xff]  }
 0x96e   :  { %v4711_v15 = vsel %vm255_vm5, %v4706_v23, %v4710_v10  ;;  %v14655_v51 = vld [vmem:[#allocation8 + $0x6f8] sm:$0xff]  }
 0x96f   :  { %v14626_v44 = vld [vmem:[#allocation2 + $0x8] sm:$0xfc]   ;;  %5023 = vmatprep.mubr.bf16.mxu0 %v4711_v15  ;;  %v14660_v23 = vld [vmem:[#allocation8 + $0x778] sm:$0xff]  }
 0x970   :  { %v14628_v29 = vld [vmem:[#allocation2 + $0x8] sm:$0xfe]   ;;  %5024 = vmatmul.mubr.bf16.vlgmr.msra.gmra.mrb[72].mxu0 %v14624_v27  ;;  %v4787_v32 = vrot.slane %v14626_v44, 2 }
 0x971   :  { %v14627_v52 = vld [vmem:[#allocation2 + $0x10] ss:$0 sps:$4 sm:$0x33]   ;;  %v4758_v31 = vshrl.u32 %v14628_v29, 16  ;;  %v4761_v35 = vshll.u32 %v14628_v29, 16  ;;  %13301 = vmatpush3.bf16.msra.mxu0 %v14633_v58 }
 0x972   :  { %v14629_v30 = vld [vmem:[#allocation2 + $0x10] ss:$0 sps:$4 sm:$0x33]   ;;  %v4788_v34 = vrot.slane %v14627_v52, 2  ;;  %v14630_v39 = vld [vmem:[#allocation2 + $0x8] sm:$0xfe]   ;;  %13302 = vmatprep.subr.bf16.mxu0 %v14634_v41 }
 0x973   :  { %v4760_v36 = vrot.slane %v4758_v31, 1  ;;  %v4766_v38 = vshrl.u32 %v14629_v30, 16  ;;  %v4769_v33 = vshll.u32 %v14629_v30, 16  ;;  %v14631_v1 = vld [vmem:[#allocation2 + $0x10] ss:$0 sps:$4 sm:$0x11]  }
 0x974   :  { %v4789_v40 = vsel %vm345_vm7, %v4787_v32, %v4788_v34  ;;  %v4763_v48 = vrot.slane %v4761_v35, 2  ;;  %v4742_v45 = vrot.slane %v14631_v1, 1  ;;  %v4741_v54 = vrot.slane %v14630_v39, 1  ;;  %v12261_v34 = vld [vmem:[#allocation4 + $0x9] ss:$0 sm:$0xff] }
 0x975   :  { %14045 = vmatmul.mubr.bf16.vlgmr.msra.gmra.mrb[40].mxu1 %v4789_v40  ;;  %v4768_v5 = vrot.slane %v4766_v38, 1  ;;  %v4771_v43 = vrot.slane %v4769_v33, 2  ;;  %13303 = vmatpush3.bf16.msra.mxu0 %v14635_v59  ;;  %v12262_v33 = vld [vmem:[#allocation6 + $0x9] ss:$0 sm:$0xff] }
 0x976   :  { %v4764_v49 = vor.u32 %v4763_v48, %v4760_v36  ;;  %v4743_v56 = vsel %vm281_vm2, %v4741_v54, %v4742_v45  ;;  %14049 = vmatpush3.bf16.msra.mxu1 %v14636_v60  ;;  %13304 = vmatprep.subr.bf16.mxu0 %v14637_v61 }
 0x977   :  { %v4772_v53 = vor.u32 %v4771_v43, %v4768_v5  ;;  %14050 = vmatprep.subr.bf16.mxu1 %v14639_v0 }
 0x979   :  { %v4773_v55 = vsel %vm314_vm8, %v4764_v49, %v4772_v53  ;;  %13305 = vmatpush3.bf16.msra.mxu0 %v14638_v62 }
 0x97a   :  { %5031 = vmatprep.mubr.bf16.mxu0 %v4773_v55  ;;  %14051 = vmatpush3.bf16.msra.mxu1 %v14639_v0 }
 0x97b   :  { %5032 = vmatmul.mubr.bf16.gmra.mrb[76].mxu0 %v4743_v56  ;;  %13306 = vmatprep.subr.bf16.mxu0 %v14640_v42 }
 0x97c   :  { %14052 = vmatprep.subr.bf16.mxu1 %v14642_v7 }
 0x97d   :  { %13307 = vmatpush3.bf16.msra.mxu0 %v14641_v3 }
 0x97e   :  { %14053 = vmatpush3.bf16.msra.mxu1 %v14642_v7  ;;  %13308 = vmatprep.subr.bf16.mxu0 %v14643_v8 }
 0x97f   :  { %14054 = vmatprep.subr.bf16.mxu1 %v14645_v12 }
 0x981   :  { %13309 = vmatpush3.bf16.msra.mxu0 %v14644_v11 }
 0x982   :  { %14055 = vmatpush3.bf16.msra.mxu1 %v14645_v12  ;;  %13310 = vmatprep.subr.bf16.mxu0 %v14646_v18 }
 0x983   :  { %14056 = vmatprep.subr.bf16.mxu1 %v14648_v9 }
 0x985   :  { %13311 = vmatpush3.bf16.msra.mxu0 %v14647_v19 }
 0x986   :  { %14057 = vmatpush3.bf16.msra.mxu1 %v14648_v9  ;;  %13312 = vmatprep.subr.bf16.mxu0 %v14649_v20  ;;  %v5138_v9 = vld [vmem:[#allocation2] sm:$0xf] }
 0x987   :  { %14058 = vmatprep.subr.bf16.mxu1 %v14651_v63 }
 0x989   :  { %13313 = vmatpush3.bf16.msra.mxu0 %v14650_v21 }
 0x98a   :  { %13314 = vmatprep.subr.bf16.mxu0 %v14654_v22  ;;  %14059 = vmatpush3.bf16.msra.mxu1 %v14651_v63 }
 0x98b   :  { %14060 = vmatprep.subr.bf16.mxu1 %v14656_v4 }
 0x98d   :  { %13315 = vmatpush3.bf16.msra.mxu0 %v14655_v51 }
 0x98e   :  { %14061 = vmatpush3.bf16.msra.mxu1 %v14656_v4 }
 0x98f   :  { %14062 = vmatprep.subr.bf16.mxu1 %v14660_v23 }
 0x992   :  { %14063 = vmatpush3.bf16.msra.mxu1 %v14660_v23  ;;  %v5142_v23 = vld [vmem:[#allocation2 + $0x8] sm:$0x1] }
 0xa43   :  { %v13278_v10 = vpop.f32.mrb[72].mxu0 }
 0xa44   :  { %v13279_v44 = vpop.f32.mrb[73].mxu0 }
 0xa45   :  { %v13280_v15 = vadd.f32 %v13279_v44, %v13278_v10  ;;  %v13281_v27 = vpop.f32.mrb[74].mxu0 }
 0xa46   :  { %v13282_v29 = vpop.f32.mrb[75].mxu0 }
 0xa47   :  { %v13283_v52 = vadd.f32 %v13282_v29, %v13281_v27  ;;  %v5026_v31 = vadd.f32 %v13280_v15, %v15697_v24 }
 0xa48   :  { %v14046_v30 = vpop.f32.mrb[40].mxu1 }
 0xa49   :  { %v5074_v32 = vpop.f32.mrb[41].mxu1  ;;  %v5029_v38 = vadd.f32 %v13283_v52, %v15701_v26 }
 0xa4a   :  { %v15747_v35 = vadd.f32 %v5074_v32, %v5026_v31  ;;  %v14047_v36 = vpop.f32.mrb[42].mxu1 }
 0xa4b   :  { %v5077_v1 = vpop.f32.mrb[43].mxu1 }
 0xa4c   :  { %v5095_v40 = vmul.f32 %v12261_v34, %v15747_v35  ;;  %v15751_v48 = vadd.f32 %v5077_v1, %v5029_v38 }
 0xa4e   :  { %v5103_v39 = vadd.f32 %v12262_v33, %v5095_v40  ;;  %v5096_v5 = vmul.f32 %v12261_v34, %v15751_v48  ;;  %v13284_v43 = vpop.f32.mrb[76].mxu0 }
 0xa4f   :  { %v13285_v45 = vpop.f32.mrb[77].mxu0 }
 0xa50   :  { %v5107_v49 = vmax.f32 %v5103_v39, 0.0  ;;  %v5104_v53 = vadd.f32 %v12262_v33, %v5096_v5  ;;  %v13287_v54 = vpop.f32.mrb[78].mxu0  ;;  %v13286_v55 = vadd.f32 %v13285_v45, %v13284_v43  ;;  %v5172_v39 = vld [vmem:[#allocation2 + $0x8] sm:$0xe] }
 0xa51   :  { %v13288_v56 = vpop.f32.mrb[79].mxu0 }
 0xa52   :  { %v12858_v57 = vpack.c.bf16 %v5107_v49, %v5107_v49  ;;  %v5108_v58 = vmax.f32 %v5104_v53, 0.0  ;;  %v13289_v41 = vadd.f32 %v13288_v56, %v13287_v54  ;;  %v5034_v59 = vadd.f32 %v13286_v55, %v15705_v13 }
 0xa54   :  { %v5119_v60 = vshrl.u32 %v12858_v57, 16  ;;  %v12859_v61 = vpack.c.bf16 %v5108_v58, %v5108_v58  ;;  %v15755_v62 = vadd.f32 %v14046_v30, %v5034_v59  ;;  %v5037_v0 = vadd.f32 %v13289_v41, %v15709_v47 }
 0xa55   :  { %v5122_v3 = vshll.u32 %v12858_v57, 16 }
 0xa56   :  { %v5121_v42 = vrot.slane %v5119_v60, 7  ;;  %v5127_v7 = vshrl.u32 %v12859_v61, 16  ;;  %v5097_v8 = vmul.f32 %v12261_v34, %v15755_v62  ;;  %v15759_v11 = vadd.f32 %v14047_v36, %v5037_v0  ;;  %v5176_v60 = vld [vmem:[#allocation2 + $0x10] sm:$0x3] }
 0xa57   :  { %v5130_v19 = vshll.u32 %v12859_v61, 16 }
 0xa58   :  { %v5124_v12 = vor.u32 %v5122_v3, %v5121_v42  ;;  %v5129_v18 = vrot.slane %v5127_v7, 7  ;;  %v5105_v20 = vadd.f32 %v12262_v33, %v5097_v8  ;;  %v5098_v21 = vmul.f32 %v12261_v34, %v15759_v11 }
 0xa59   :  { %v5125_v63 = vrot.slane %v5121_v42, 4 }
 0xa5a   :  { %v5139_v22 = vsel %vm15464_vm3, %v5124_v12, %v5138_v9  ;;  %v5132_v51 = vor.u32 %v5130_v19, %v5129_v18  ;;  %v5134_v4 = vrot.slane %v5129_v18, 4  ;;  %v5109_v10 = vmax.f32 %v5105_v20, 0.0 }
 0xa5b   :  { %5140 = vst [vmem:[#allocation2] sm:$0xf] %v5139_v22  ;;  %v5106_v44 = vadd.f32 %v12262_v33, %v5098_v21 }
 0xa5c   :  { %v5133_v15 = vsel %vm15458_vm15, %v5125_v63, %v5132_v51  ;;  %v5143_v27 = vsel %vm15417_vm6, %v5134_v4, %v5142_v23  ;;  %v12860_v29 = vpack.c.bf16 %v5109_v10, %v5109_v10 }
 0xa5d   :  { %5141 = vst [vmem:[#allocation2 + $0x4] sm:$0xf] %v5133_v15  ;;  %5144 = vst [vmem:[#allocation2 + $0x8] sm:$0x1] %v5143_v27  ;;  %v5110_v52 = vmax.f32 %v5106_v44, 0.0 }
 0xa5e   :  { %v5151_v30 = vshrl.u32 %v12860_v29, 16  ;;  %v5154_v31 = vshll.u32 %v12860_v29, 16 }
 0xa5f   :  { %v12861_v32 = vpack.c.bf16 %v5110_v52, %v5110_v52 }
 0xa60   :  { %v5153_v34 = vrot.slane %v5151_v30, 6  ;;  %v5156_v36 = vrot.slane %v5154_v31, 7 }
 0xa61   :  { %v5160_v38 = vshrl.u32 %v12861_v32, 16  ;;  %v5163_v1 = vshll.u32 %v12861_v32, 16 }
 0xa62   :  { %v5157_v40 = vor.u32 %v5156_v36, %v5153_v34 }
 0xa63   :  { %v5162_v33 = vrot.slane %v5160_v38, 6  ;;  %v5165_v5 = vrot.slane %v5163_v1, 7 }
 0xa64   :  { %v14652_v43 = vld [vmem:[#allocation2] sm:$0xfe]   ;;  %v5158_v45 = vrot.slane %v5157_v40, 4  ;;  %v5173_v49 = vsel %vm15470_vm0, %v5157_v40, %v5172_v39  ;;  %v14653_v54 = vld [vmem:[#allocation2 + $0x8] ss:$0 sps:$4 sm:$0x11]  }
 0xa65   :  { %v5166_v53 = vor.u32 %v5165_v5, %v5162_v33  ;;  %5174 = vst [vmem:[#allocation2 + $0x8] sm:$0xe] %v5173_v49  ;;  %v5224_v55 = vrot.slane %v14652_v43, 1  ;;  %v14657_v56 = vld [vmem:[#allocation2] sm:$0xff]   ;;  %v5225_v41 = vrot.slane %v14653_v54, 1  ;;  %v14672_v54 = vld [vmem:[#allocation8 + $0x7d0] sm:$0xff]  }
 0xa66   :  { %v14658_v59 = vld [vmem:[#allocation2 + $0x8] ss:$0 sps:$4 sm:$0x11]   ;;  %v5202_v61 = vshll.u32 %v14657_v56, 16  ;;  %v5200_v7 = vshrl.u32 %v14657_v56, 16  ;;  %v14659_v9 = vld [vmem:[#allocation2] sm:$0xff]  }
 0xa67   :  { %v5167_v57 = vsel %vm15476_vm1, %v5158_v45, %v5166_v53  ;;  %v5168_v58 = vrot.slane %v5166_v53, 4  ;;  %v5226_v42 = vsel %vm281_vm2, %v5224_v55, %v5225_v41  ;;  %v5207_v3 = vshll.u32 %v14658_v59, 16  ;;  %v14667_v5 = vld [vmem:[#allocation8 + $0x7c0] sm:$0xff]   ;;  %v14669_v45 = vld [vmem:[#allocation8 + $0x7c8] sm:$0xff]   ;;  %v14674_v56 = vld [vmem:[#allocation8 + $0x790] sm:$0xff]  }
 0xa68   :  { %5175 = vst [vmem:[#allocation2 + $0xc] sm:$0xf] %v5167_v57  ;;  %14064 = vmatprep.mubr.bf16.mxu1 %v5226_v42  ;;  %v5204_v8 = vrot.slane %v5202_v61, 1  ;;  %13338 = vmatprep.subr.bf16.mxu0 %v14667_v5  ;;  %v14668_v43 = vld [vmem:[#allocation8 + $0x780] sm:$0xff]   ;;  %v14671_v53 = vld [vmem:[#allocation8 + $0x788] sm:$0xff]   ;;  %v14675_v57 = vld [vmem:[#allocation8 + $0x7d8] sm:$0xff]  }
 0xa69   :  { %v5177_v0 = vsel %vm15490_vm4, %v5168_v58, %v5176_v60  ;;  %v5209_v18 = vrot.slane %v5207_v3, 1  ;;  %v14670_v49 = vld [vmem:[#allocation8 + $0x800] sm:$0xff]   ;;  %v14673_v55 = vld [vmem:[#allocation8 + $0x808] sm:$0xff]   ;;  %v14676_v58 = vld [vmem:[#allocation8 + $0x810] sm:$0xff]  }
 0xa6a   :  { %5178 = vst [vmem:[#allocation2 + $0x10] sm:$0x3] %v5177_v0  ;;  %v5205_v12 = vor.u32 %v5204_v8, %v5200_v7  ;;  %14068 = vmatprep.subr.bf16.mxu1 %v14670_v49  ;;  %v14677_v41 = vld [vmem:[#allocation8 + $0x798] sm:$0xff]   ;;  %v14678_v59 = vld [vmem:[#allocation8 + $0x7e0] sm:$0xff]   ;;  %v14681_v0 = vld [vmem:[#allocation8 + $0x7e8] sm:$0xff]  }
 0xa6b   :  { %v14679_v60 = vld [vmem:[#allocation8 + $0x818] sm:$0xff]   ;;  %v14680_v61 = vld [vmem:[#allocation8 + $0x7a0] sm:$0xff]   ;;  %v14683_v3 = vld [vmem:[#allocation8 + $0x7a8] sm:$0xff]  }
 0xa6c   :  { %v5210_v19 = vsel %vm255_vm5, %v5205_v12, %v5209_v18  ;;  %v14682_v42 = vld [vmem:[#allocation8 + $0x820] sm:$0xff]   ;;  %v14684_v7 = vld [vmem:[#allocation8 + $0x7f0] sm:$0xff]   ;;  %v14685_v8 = vld [vmem:[#allocation8 + $0x828] sm:$0xff]  }
 0xa6d   :  { %5522 = vmatprep.mubr.bf16.mxu0 %v5210_v19  ;;  %v14686_v12 = vld [vmem:[#allocation8 + $0x7b0] sm:$0xff]   ;;  %v14689_v18 = vld [vmem:[#allocation8 + $0x7f8] sm:$0xff]  }
 0xa6e   :  { %5523 = vmatmul.mubr.bf16.vlgmr.msra.gmra.mrb[80].mxu0 %v14659_v9  ;;  %v14690_v19 = vld [vmem:[#allocation8 + $0x830] sm:$0xff]   ;;  %v14691_v9 = vld [vmem:[#allocation8 + $0x7b8] sm:$0xff]  }
 0xa6f   :  { %v14661_v20 = vld [vmem:[#allocation2 + $0x8] sm:$0xfc]   ;;  %13339 = vmatpush3.bf16.msra.mxu0 %v14668_v43 }
 0xa70   :  { %v14663_v21 = vld [vmem:[#allocation2 + $0x8] sm:$0xfe]   ;;  %v5286_v4 = vrot.slane %v14661_v20, 2  ;;  %13340 = vmatprep.subr.bf16.mxu0 %v14669_v45  ;;  %v14695_v20 = vld [vmem:[#allocation8 + $0x838] sm:$0xff]  }
 0xa71   :  { %v14662_v63 = vld [vmem:[#allocation2 + $0x10] ss:$0 sps:$4 sm:$0x33]   ;;  %v5257_v51 = vshrl.u32 %v14663_v21, 16  ;;  %v5260_v10 = vshll.u32 %v14663_v21, 16 }
 0xa72   :  { %v14664_v22 = vld [vmem:[#allocation2 + $0x10] ss:$0 sps:$4 sm:$0x33]   ;;  %v5287_v23 = vrot.slane %v14662_v63, 2  ;;  %v14665_v31 = vld [vmem:[#allocation2 + $0x8] sm:$0xfe]  }
 0xa73   :  { %v5259_v44 = vrot.slane %v5257_v51, 1  ;;  %v5265_v15 = vshrl.u32 %v14664_v22, 16  ;;  %v5268_v27 = vshll.u32 %v14664_v22, 16  ;;  %v14666_v29 = vld [vmem:[#allocation2 + $0x10] ss:$0 sps:$4 sm:$0x11]   ;;  %13341 = vmatpush3.bf16.msra.mxu0 %v14671_v53 }
 0xa74   :  { %v5288_v52 = vsel %vm345_vm7, %v5286_v4, %v5287_v23  ;;  %v5262_v30 = vrot.slane %v5260_v10, 2  ;;  %v5241_v36 = vrot.slane %v14666_v29, 1  ;;  %v5240_v40 = vrot.slane %v14665_v31, 1  ;;  %13342 = vmatprep.subr.bf16.mxu0 %v14672_v54 }
 0xa75   :  { %14065 = vmatmul.mubr.bf16.vlgmr.msra.gmra.mrb[44].mxu1 %v5288_v52  ;;  %v5267_v32 = vrot.slane %v5265_v15, 1  ;;  %v5270_v34 = vrot.slane %v5268_v27, 2  ;;  %v12302_v15 = vld [vmem:[#allocation4 + $0xa] ss:$0 sm:$0xff]  ;;  %v12303_v52 = vld [vmem:[#allocation6 + $0xa] ss:$0 sm:$0xff] }
 0xa76   :  { %v5263_v38 = vor.u32 %v5262_v30, %v5259_v44  ;;  %v5242_v33 = vsel %vm281_vm2, %v5240_v40, %v5241_v36  ;;  %14069 = vmatpush3.bf16.msra.mxu1 %v14670_v49 }
 0xa77   :  { %v5271_v1 = vor.u32 %v5270_v34, %v5267_v32  ;;  %14070 = vmatprep.subr.bf16.mxu1 %v14673_v55  ;;  %13343 = vmatpush3.bf16.msra.mxu0 %v14674_v56 }
 0xa78   :  { %13344 = vmatprep.subr.bf16.mxu0 %v14675_v57 }
 0xa79   :  { %v5272_v39 = vsel %vm314_vm8, %v5263_v38, %v5271_v1 }
 0xa7a   :  { %5530 = vmatprep.mubr.bf16.mxu0 %v5272_v39  ;;  %14071 = vmatpush3.bf16.msra.mxu1 %v14673_v55 }
 0xa7b   :  { %5531 = vmatmul.mubr.bf16.gmra.mrb[84].mxu0 %v5242_v33  ;;  %14072 = vmatprep.subr.bf16.mxu1 %v14676_v58 }
 0xa7c   :  { %13345 = vmatpush3.bf16.msra.mxu0 %v14677_v41 }
 0xa7d   :  { %13346 = vmatprep.subr.bf16.mxu0 %v14678_v59 }
 0xa7e   :  { %14073 = vmatpush3.bf16.msra.mxu1 %v14676_v58 }
 0xa7f   :  { %14074 = vmatprep.subr.bf16.mxu1 %v14679_v60 }
 0xa80   :  { %13347 = vmatpush3.bf16.msra.mxu0 %v14680_v61 }
 0xa81   :  { %13348 = vmatprep.subr.bf16.mxu0 %v14681_v0 }
 0xa82   :  { %14075 = vmatpush3.bf16.msra.mxu1 %v14679_v60 }
 0xa83   :  { %14076 = vmatprep.subr.bf16.mxu1 %v14682_v42 }
 0xa84   :  { %13349 = vmatpush3.bf16.msra.mxu0 %v14683_v3 }
 0xa85   :  { %13350 = vmatprep.subr.bf16.mxu0 %v14684_v7 }
 0xa86   :  { %14077 = vmatpush3.bf16.msra.mxu1 %v14682_v42 }
 0xa87   :  { %14078 = vmatprep.subr.bf16.mxu1 %v14685_v8 }
 0xa88   :  { %13351 = vmatpush3.bf16.msra.mxu0 %v14686_v12 }
 0xa89   :  { %13352 = vmatprep.subr.bf16.mxu0 %v14689_v18  ;;  %v5637_v18 = vld [vmem:[#allocation2] sm:$0xf] }
 0xa8a   :  { %14079 = vmatpush3.bf16.msra.mxu1 %v14685_v8 }
 0xa8b   :  { %14080 = vmatprep.subr.bf16.mxu1 %v14690_v19 }
 0xa8c   :  { %13353 = vmatpush3.bf16.msra.mxu0 %v14691_v9 }
 0xa8e   :  { %14081 = vmatpush3.bf16.msra.mxu1 %v14690_v19 }
 0xa8f   :  { %14082 = vmatprep.subr.bf16.mxu1 %v14695_v20 }
 0xa92   :  { %14083 = vmatpush3.bf16.msra.mxu1 %v14695_v20 }
 0xb41   :  { %v13316_v21 = vpop.f32.mrb[80].mxu0 }
 0xb42   :  { %v13317_v63 = vpop.f32.mrb[81].mxu0 }
 0xb43   :  { %v13318_v22 = vadd.f32 %v13317_v63, %v13316_v21  ;;  %v13319_v51 = vpop.f32.mrb[82].mxu0 }
 0xb44   :  { %v13320_v4 = vpop.f32.mrb[83].mxu0 }
 0xb45   :  { %v13321_v23 = vadd.f32 %v13320_v4, %v13319_v51 }
 0xb48   :  { %v14066_v10 = vpop.f32.mrb[44].mxu1 }
 0xb49   :  { %v5573_v44 = vpop.f32.mrb[45].mxu1 }
 0xb4a   :  { %v5574_v27 = vadd.f32 %v13318_v22, %v5573_v44  ;;  %v14067_v29 = vpop.f32.mrb[46].mxu1  ;;  %v5641_v22 = vld [vmem:[#allocation2 + $0x8] sm:$0x1] }
 0xb4b   :  { %v5576_v30 = vpop.f32.mrb[47].mxu1 }
 0xb4c   :  { %v5594_v31 = vmul.f32 %v12302_v15, %v5574_v27  ;;  %v5577_v32 = vadd.f32 %v13321_v23, %v5576_v30 }
 0xb4e   :  { %v5602_v34 = vadd.f32 %v12303_v52, %v5594_v31  ;;  %v5595_v36 = vmul.f32 %v12302_v15, %v5577_v32  ;;  %v13322_v38 = vpop.f32.mrb[84].mxu0  ;;  %v5671_v32 = vld [vmem:[#allocation2 + $0x8] sm:$0xe] }
 0xb4f   :  { %v13323_v1 = vpop.f32.mrb[85].mxu0 }
 0xb50   :  { %v5606_v40 = vmax.f32 %v5602_v34, 0.0  ;;  %v5603_v39 = vadd.f32 %v12303_v52, %v5595_v36  ;;  %v13324_v33 = vadd.f32 %v13323_v1, %v13322_v38  ;;  %v13325_v5 = vpop.f32.mrb[86].mxu0 }
 0xb51   :  { %v13326_v43 = vpop.f32.mrb[87].mxu0 }
 0xb52   :  { %v12862_v45 = vpack.c.bf16 %v5606_v40, %v5606_v40  ;;  %v5607_v49 = vmax.f32 %v5603_v39, 0.0  ;;  %v5582_v53 = vadd.f32 %v14066_v10, %v13324_v33  ;;  %v13327_v54 = vadd.f32 %v13326_v43, %v13325_v5  ;;  %v5675_v39 = vld [vmem:[#allocation2 + $0x10] sm:$0x3] }
 0xb54   :  { %v5618_v55 = vshrl.u32 %v12862_v45, 16  ;;  %v12863_v56 = vpack.c.bf16 %v5607_v49, %v5607_v49  ;;  %v5596_v57 = vmul.f32 %v12302_v15, %v5582_v53  ;;  %v5585_v58 = vadd.f32 %v14067_v29, %v13327_v54 }
 0xb55   :  { %v5621_v59 = vshll.u32 %v12862_v45, 16 }
 0xb56   :  { %v5620_v41 = vrot.slane %v5618_v55, 7  ;;  %v5626_v60 = vshrl.u32 %v12863_v56, 16  ;;  %v5604_v61 = vadd.f32 %v12303_v52, %v5596_v57  ;;  %v5597_v0 = vmul.f32 %v12302_v15, %v5585_v58 }
 0xb57   :  { %v5629_v7 = vshll.u32 %v12863_v56, 16 }
 0xb58   :  { %v5623_v42 = vor.u32 %v5621_v59, %v5620_v41  ;;  %v5628_v3 = vrot.slane %v5626_v60, 7  ;;  %v5608_v8 = vmax.f32 %v5604_v61, 0.0  ;;  %v5624_v12 = vrot.slane %v5620_v41, 4 }
 0xb59   :  { %v5605_v19 = vadd.f32 %v12303_v52, %v5597_v0 }
 0xb5a   :  { %v5638_v9 = vsel %vm15464_vm3, %v5623_v42, %v5637_v18  ;;  %v5631_v20 = vor.u32 %v5629_v7, %v5628_v3  ;;  %v5633_v21 = vrot.slane %v5628_v3, 4  ;;  %v12864_v63 = vpack.c.bf16 %v5608_v8, %v5608_v8 }
 0xb5b   :  { %5639 = vst [vmem:[#allocation2] sm:$0xf] %v5638_v9  ;;  %v5609_v51 = vmax.f32 %v5605_v19, 0.0 }
 0xb5c   :  { %v5632_v4 = vsel %vm15458_vm15, %v5624_v12, %v5631_v20  ;;  %v5642_v23 = vsel %vm15417_vm6, %v5633_v21, %v5641_v22  ;;  %v5650_v10 = vshrl.u32 %v12864_v63, 16  ;;  %v5653_v44 = vshll.u32 %v12864_v63, 16 }
 0xb5d   :  { %5640 = vst [vmem:[#allocation2 + $0x4] sm:$0xf] %v5632_v4  ;;  %5643 = vst [vmem:[#allocation2 + $0x8] sm:$0x1] %v5642_v23  ;;  %v12865_v15 = vpack.c.bf16 %v5609_v51, %v5609_v51 }
 0xb5e   :  { %v5652_v27 = vrot.slane %v5650_v10, 6  ;;  %v5655_v29 = vrot.slane %v5653_v44, 7 }
 0xb5f   :  { %v5659_v52 = vshrl.u32 %v12865_v15, 16  ;;  %v5662_v30 = vshll.u32 %v12865_v15, 16 }
 0xb60   :  { %v5656_v31 = vor.u32 %v5655_v29, %v5652_v27 }
 0xb61   :  { %v5661_v34 = vrot.slane %v5659_v52, 6  ;;  %v5664_v36 = vrot.slane %v5662_v30, 7 }
 0xb62   :  { %v5657_v38 = vrot.slane %v5656_v31, 4  ;;  %v5672_v1 = vsel %vm15470_vm0, %v5656_v31, %v5671_v32 }
 0xb63   :  { %5673 = vst [vmem:[#allocation2 + $0x8] sm:$0xe] %v5672_v1  ;;  %v5665_v40 = vor.u32 %v5664_v36, %v5661_v34  ;;  %v14702_v36 = vld [vmem:[#allocation8 + $0x880] sm:$0xff]   ;;  %v14704_v1 = vld [vmem:[#allocation8 + $0x888] sm:$0xff]  }
 0xb64   :  { %v14687_v33 = vld [vmem:[#allocation2] sm:$0xfe]   ;;  %v14688_v45 = vld [vmem:[#allocation2 + $0x8] ss:$0 sps:$4 sm:$0x11]   ;;  %13376 = vmatprep.subr.bf16.mxu0 %v14702_v36 }
 0xb65   :  { %v5666_v5 = vsel %vm15476_vm1, %v5657_v38, %v5665_v40  ;;  %v5667_v43 = vrot.slane %v5665_v40, 4  ;;  %v5723_v49 = vrot.slane %v14687_v33, 1  ;;  %v14692_v53 = vld [vmem:[#allocation2] sm:$0xff]   ;;  %v5724_v55 = vrot.slane %v14688_v45, 1  ;;  %v14705_v40 = vld [vmem:[#allocation8 + $0x848] sm:$0xff]   ;;  %v14707_v33 = vld [vmem:[#allocation8 + $0x890] sm:$0xff]  }
 0xb66   :  { %5674 = vst [vmem:[#allocation2 + $0xc] sm:$0xf] %v5666_v5  ;;  %v14693_v56 = vld [vmem:[#allocation2 + $0x8] ss:$0 sps:$4 sm:$0x11]   ;;  %v5701_v57 = vshll.u32 %v14692_v53, 16 }
 0xb67   :  { %v5676_v54 = vsel %vm15490_vm4, %v5667_v43, %v5675_v39  ;;  %v5725_v58 = vsel %vm281_vm2, %v5723_v49, %v5724_v55  ;;  %v5706_v41 = vshll.u32 %v14693_v56, 16  ;;  %v5699_v59 = vshrl.u32 %v14692_v53, 16  ;;  %v14694_v7 = vld [vmem:[#allocation2] sm:$0xff]   ;;  %v14708_v5 = vld [vmem:[#allocation8 + $0x850] sm:$0xff]   ;;  %v14709_v43 = vld [vmem:[#allocation8 + $0x8c8] sm:$0xff]  }
 0xb68   :  { %5677 = vst [vmem:[#allocation2 + $0x10] sm:$0x3] %v5676_v54  ;;  %14084 = vmatprep.mubr.bf16.mxu1 %v5725_v58  ;;  %v5703_v60 = vrot.slane %v5701_v57, 1  ;;  %v14703_v38 = vld [vmem:[#allocation8 + $0x840] sm:$0xff]   ;;  %v14710_v45 = vld [vmem:[#allocation8 + $0x898] sm:$0xff]   ;;  %v14712_v53 = vld [vmem:[#allocation8 + $0x8d0] sm:$0xff]  }
 0xb69   :  { %v5708_v0 = vrot.slane %v5706_v41, 1  ;;  %v14706_v39 = vld [vmem:[#allocation8 + $0x8c0] sm:$0xff]   ;;  %v14711_v49 = vld [vmem:[#allocation8 + $0x858] sm:$0xff]   ;;  %v14716_v57 = vld [vmem:[#allocation8 + $0x8a8] sm:$0xff]  }
 0xb6a   :  { %v5704_v61 = vor.u32 %v5703_v60, %v5699_v59  ;;  %14088 = vmatprep.subr.bf16.mxu1 %v14706_v39  ;;  %v14713_v54 = vld [vmem:[#allocation8 + $0x8a0] sm:$0xff]   ;;  %v14715_v56 = vld [vmem:[#allocation8 + $0x8d8] sm:$0xff]   ;;  %v14717_v58 = vld [vmem:[#allocation8 + $0x868] sm:$0xff]  }
 0xb6b   :  { %v14714_v55 = vld [vmem:[#allocation8 + $0x860] sm:$0xff]   ;;  %v14719_v59 = vld [vmem:[#allocation8 + $0x8b0] sm:$0xff]  }
 0xb6c   :  { %v5709_v3 = vsel %vm255_vm5, %v5704_v61, %v5708_v0  ;;  %v14718_v41 = vld [vmem:[#allocation8 + $0x8e0] sm:$0xff]   ;;  %v14720_v60 = vld [vmem:[#allocation8 + $0x870] sm:$0xff]   ;;  %v14721_v61 = vld [vmem:[#allocation8 + $0x8e8] sm:$0xff]  }
 0xb6d   :  { %v14696_v42 = vld [vmem:[#allocation2 + $0x8] sm:$0xfc]   ;;  %6021 = vmatprep.mubr.bf16.mxu0 %v5709_v3  ;;  %v14724_v0 = vld [vmem:[#allocation8 + $0x8b8] sm:$0xff]   ;;  %v14726_v3 = vld [vmem:[#allocation8 + $0x8f0] sm:$0xff]  }
 0xb6e   :  { %v14698_v8 = vld [vmem:[#allocation2 + $0x8] sm:$0xfe]   ;;  %6022 = vmatmul.mubr.bf16.vlgmr.msra.gmra.mrb[88].mxu0 %v14694_v7  ;;  %v5785_v9 = vrot.slane %v14696_v42, 2  ;;  %v14725_v42 = vld [vmem:[#allocation8 + $0x878] sm:$0xff]  }
 0xb6f   :  { %v14697_v12 = vld [vmem:[#allocation2 + $0x10] ss:$0 sps:$4 sm:$0x33]   ;;  %v5756_v19 = vshrl.u32 %v14698_v8, 16  ;;  %v5759_v21 = vshll.u32 %v14698_v8, 16  ;;  %13377 = vmatpush3.bf16.msra.mxu0 %v14703_v38  ;;  %v14730_v7 = vld [vmem:[#allocation8 + $0x8f8] sm:$0xff]  }
 0xb70   :  { %v14699_v18 = vld [vmem:[#allocation2 + $0x10] ss:$0 sps:$4 sm:$0x33]   ;;  %v5786_v20 = vrot.slane %v14697_v12, 2  ;;  %v14700_v44 = vld [vmem:[#allocation2 + $0x8] sm:$0xfe]   ;;  %13378 = vmatprep.subr.bf16.mxu0 %v14704_v1 }
 0xb71   :  { %v5758_v63 = vrot.slane %v5756_v19, 1  ;;  %v5764_v22 = vshrl.u32 %v14699_v18, 16  ;;  %v5767_v51 = vshll.u32 %v14699_v18, 16  ;;  %v14701_v4 = vld [vmem:[#allocation2 + $0x10] ss:$0 sps:$4 sm:$0x11]  }
 0xb72   :  { %v5787_v23 = vsel %vm345_vm7, %v5785_v9, %v5786_v20  ;;  %v5761_v10 = vrot.slane %v5759_v21, 2  ;;  %v5740_v29 = vrot.slane %v14701_v4, 1  ;;  %v5739_v31 = vrot.slane %v14700_v44, 1  ;;  %v12344_v44 = vld [vmem:[#allocation6 + $0xb] ss:$0 sm:$0xff] }
 0xb73   :  { %14085 = vmatmul.mubr.bf16.vlgmr.msra.gmra.mrb[48].mxu1 %v5787_v23  ;;  %v5766_v15 = vrot.slane %v5764_v22, 1  ;;  %v5769_v27 = vrot.slane %v5767_v51, 2  ;;  %13379 = vmatpush3.bf16.msra.mxu0 %v14705_v40  ;;  %v12343_v51 = vld [vmem:[#allocation4 + $0xb] ss:$0 sm:$0xff] }
 0xb74   :  { %v5762_v52 = vor.u32 %v5761_v10, %v5758_v63  ;;  %v5741_v34 = vsel %vm281_vm2, %v5739_v31, %v5740_v29  ;;  %14089 = vmatpush3.bf16.msra.mxu1 %v14706_v39  ;;  %13380 = vmatprep.subr.bf16.mxu0 %v14707_v33 }
 0xb75   :  { %v5770_v30 = vor.u32 %v5769_v27, %v5766_v15  ;;  %14090 = vmatprep.subr.bf16.mxu1 %v14709_v43 }
 0xb77   :  { %v5771_v32 = vsel %vm314_vm8, %v5762_v52, %v5770_v30  ;;  %13381 = vmatpush3.bf16.msra.mxu0 %v14708_v5 }
 0xb78   :  { %6029 = vmatprep.mubr.bf16.mxu0 %v5771_v32  ;;  %14091 = vmatpush3.bf16.msra.mxu1 %v14709_v43 }
 0xb79   :  { %6030 = vmatmul.mubr.bf16.gmra.mrb[92].mxu0 %v5741_v34  ;;  %13382 = vmatprep.subr.bf16.mxu0 %v14710_v45 }
 0xb7a   :  { %14092 = vmatprep.subr.bf16.mxu1 %v14712_v53 }
 0xb7b   :  { %13383 = vmatpush3.bf16.msra.mxu0 %v14711_v49 }
 0xb7c   :  { %14093 = vmatpush3.bf16.msra.mxu1 %v14712_v53  ;;  %13384 = vmatprep.subr.bf16.mxu0 %v14713_v54 }
 0xb7d   :  { %14094 = vmatprep.subr.bf16.mxu1 %v14715_v56 }
 0xb7f   :  { %13385 = vmatpush3.bf16.msra.mxu0 %v14714_v55 }
 0xb80   :  { %14095 = vmatpush3.bf16.msra.mxu1 %v14715_v56  ;;  %13386 = vmatprep.subr.bf16.mxu0 %v14716_v57 }
 0xb81   :  { %14096 = vmatprep.subr.bf16.mxu1 %v14718_v41 }
 0xb83   :  { %13387 = vmatpush3.bf16.msra.mxu0 %v14717_v58 }
 0xb84   :  { %14097 = vmatpush3.bf16.msra.mxu1 %v14718_v41  ;;  %13388 = vmatprep.subr.bf16.mxu0 %v14719_v59 }
 0xb85   :  { %14098 = vmatprep.subr.bf16.mxu1 %v14721_v61 }
 0xb87   :  { %13389 = vmatpush3.bf16.msra.mxu0 %v14720_v60 }
 0xb88   :  { %13390 = vmatprep.subr.bf16.mxu0 %v14724_v0  ;;  %14099 = vmatpush3.bf16.msra.mxu1 %v14721_v61 }
 0xb89   :  { %14100 = vmatprep.subr.bf16.mxu1 %v14726_v3 }
 0xb8b   :  { %13391 = vmatpush3.bf16.msra.mxu0 %v14725_v42 }
 0xb8c   :  { %14101 = vmatpush3.bf16.msra.mxu1 %v14726_v3  ;;  %v6136_v3 = vld [vmem:[#allocation2] sm:$0xf] }
 0xb8d   :  { %14102 = vmatprep.subr.bf16.mxu1 %v14730_v7 }
 0xb90   :  { %14103 = vmatpush3.bf16.msra.mxu1 %v14730_v7 }
 0xc41   :  { %v13354_v8 = vpop.f32.mrb[88].mxu0 }
 0xc42   :  { %v13355_v12 = vpop.f32.mrb[89].mxu0 }
 0xc43   :  { %v13356_v18 = vadd.f32 %v13355_v12, %v13354_v8  ;;  %v13357_v19 = vpop.f32.mrb[90].mxu0 }
 0xc44   :  { %v13358_v9 = vpop.f32.mrb[91].mxu0 }
 0xc45   :  { %v13359_v20 = vadd.f32 %v13358_v9, %v13357_v19  ;;  %v6024_v63 = vadd.f32 %v13356_v18, %v15747_v35  ;;  %v6140_v9 = vld [vmem:[#allocation2 + $0x8] sm:$0x1] }
 0xc46   :  { %v14086_v21 = vpop.f32.mrb[48].mxu1 }
 0xc47   :  { %v6072_v22 = vpop.f32.mrb[49].mxu1  ;;  %v6027_v10 = vadd.f32 %v13359_v20, %v15751_v48 }
 0xc48   :  { %v15797_v4 = vadd.f32 %v6072_v22, %v6024_v63  ;;  %v14087_v23 = vpop.f32.mrb[50].mxu1 }
 0xc49   :  { %v6075_v15 = vpop.f32.mrb[51].mxu1 }
 0xc4a   :  { %v6093_v27 = vmul.f32 %v12343_v51, %v15797_v4  ;;  %v15801_v29 = vadd.f32 %v6075_v15, %v6027_v10 }
 0xc4c   :  { %v6101_v52 = vadd.f32 %v12344_v44, %v6093_v27  ;;  %v6094_v30 = vmul.f32 %v12343_v51, %v15801_v29  ;;  %v13360_v31 = vpop.f32.mrb[92].mxu0 }
 0xc4d   :  { %v13361_v32 = vpop.f32.mrb[93].mxu0 }
 0xc4e   :  { %v6105_v34 = vmax.f32 %v6101_v52, 0.0  ;;  %v6102_v36 = vadd.f32 %v12344_v44, %v6094_v30  ;;  %v13362_v38 = vadd.f32 %v13361_v32, %v13360_v31  ;;  %v13363_v1 = vpop.f32.mrb[94].mxu0 }
 0xc4f   :  { %v13364_v40 = vpop.f32.mrb[95].mxu0 }
 0xc50   :  { %v12866_v39 = vpack.c.bf16 %v6105_v34, %v6105_v34  ;;  %v6106_v33 = vmax.f32 %v6102_v36, 0.0  ;;  %v6032_v5 = vadd.f32 %v13362_v38, %v15755_v62  ;;  %v13365_v43 = vadd.f32 %v13364_v40, %v13363_v1  ;;  %v6170_v34 = vld [vmem:[#allocation2 + $0x8] sm:$0xe] }
 0xc52   :  { %v6117_v45 = vshrl.u32 %v12866_v39, 16  ;;  %v12867_v49 = vpack.c.bf16 %v6106_v33, %v6106_v33  ;;  %v15805_v53 = vadd.f32 %v14086_v21, %v6032_v5  ;;  %v6035_v54 = vadd.f32 %v13365_v43, %v15759_v11 }
 0xc53   :  { %v6120_v56 = vshll.u32 %v12866_v39, 16 }
 0xc54   :  { %v6119_v55 = vrot.slane %v6117_v45, 7  ;;  %v6125_v57 = vshrl.u32 %v12867_v49, 16  ;;  %v6095_v58 = vmul.f32 %v12343_v51, %v15805_v53  ;;  %v15809_v41 = vadd.f32 %v14087_v23, %v6035_v54 }
 0xc55   :  { %v6128_v61 = vshll.u32 %v12867_v49, 16 }
 0xc56   :  { %v6122_v59 = vor.u32 %v6120_v56, %v6119_v55  ;;  %v6127_v60 = vrot.slane %v6125_v57, 7  ;;  %v6103_v0 = vadd.f32 %v12344_v44, %v6095_v58  ;;  %v6123_v42 = vrot.slane %v6119_v55, 4  ;;  %v6174_v57 = vld [vmem:[#allocation2 + $0x10] sm:$0x3] }
 0xc57   :  { %v6096_v7 = vmul.f32 %v12343_v51, %v15809_v41 }
 0xc58   :  { %v6137_v8 = vsel %vm15464_vm3, %v6122_v59, %v6136_v3  ;;  %v6130_v12 = vor.u32 %v6128_v61, %v6127_v60  ;;  %v6132_v18 = vrot.slane %v6127_v60, 4  ;;  %v6107_v19 = vmax.f32 %v6103_v0, 0.0 }
 0xc59   :  { %6138 = vst [vmem:[#allocation2] sm:$0xf] %v6137_v8  ;;  %v6104_v20 = vadd.f32 %v12344_v44, %v6096_v7 }
 0xc5a   :  { %v6131_v21 = vsel %vm15458_vm15, %v6123_v42, %v6130_v12  ;;  %v6141_v63 = vsel %vm15417_vm6, %v6132_v18, %v6140_v9  ;;  %v12868_v22 = vpack.c.bf16 %v6107_v19, %v6107_v19 }
 0xc5b   :  { %6139 = vst [vmem:[#allocation2 + $0x4] sm:$0xf] %v6131_v21  ;;  %6142 = vst [vmem:[#allocation2 + $0x8] sm:$0x1] %v6141_v63  ;;  %v6108_v23 = vmax.f32 %v6104_v20, 0.0 }
 0xc5c   :  { %v6149_v51 = vshrl.u32 %v12868_v22, 16  ;;  %v6152_v10 = vshll.u32 %v12868_v22, 16 }
 0xc5d   :  { %v12869_v15 = vpack.c.bf16 %v6108_v23, %v6108_v23 }
 0xc5e   :  { %v6151_v27 = vrot.slane %v6149_v51, 6  ;;  %v6154_v52 = vrot.slane %v6152_v10, 7 }
 0xc5f   :  { %v6158_v30 = vshrl.u32 %v12869_v15, 16  ;;  %v6161_v31 = vshll.u32 %v12869_v15, 16 }
 0xc60   :  { %v6155_v32 = vor.u32 %v6154_v52, %v6151_v27 }
 0xc61   :  { %v6160_v44 = vrot.slane %v6158_v30, 6  ;;  %v6163_v36 = vrot.slane %v6161_v31, 7 }
 0xc62   :  { %v6156_v38 = vrot.slane %v6155_v32, 4  ;;  %v6171_v1 = vsel %vm15470_vm0, %v6155_v32, %v6170_v34  ;;  %v14727_v40 = vld [vmem:[#allocation2] sm:$0xff]   ;;  %v14723_v5 = vld [vmem:[#allocation2 + $0x8] ss:$0 sps:$4 sm:$0x11]  }
 0xc63   :  { %6172 = vst [vmem:[#allocation2 + $0x8] sm:$0xe] %v6171_v1  ;;  %v6164_v39 = vor.u32 %v6163_v36, %v6160_v44  ;;  %v14722_v33 = vld [vmem:[#allocation2] sm:$0xfe]   ;;  %v6200_v43 = vshll.u32 %v14727_v40, 16  ;;  %v6223_v55 = vrot.slane %v14723_v5, 1 }
 0xc64   :  { %v6222_v54 = vrot.slane %v14722_v33, 1  ;;  %v14728_v56 = vld [vmem:[#allocation2 + $0x8] ss:$0 sps:$4 sm:$0x11]   ;;  %v6198_v58 = vshrl.u32 %v14727_v40, 16  ;;  %v14729_v8 = vld [vmem:[#allocation2] sm:$0xff]  }
 0xc65   :  { %v6165_v45 = vsel %vm15476_vm1, %v6156_v38, %v6164_v39  ;;  %v6166_v49 = vrot.slane %v6164_v39, 4  ;;  %v6202_v59 = vrot.slane %v6200_v43, 1  ;;  %v6205_v0 = vshll.u32 %v14728_v56, 16  ;;  %v14737_v39 = vld [vmem:[#allocation8 + $0x940] sm:$0xff]   ;;  %v14739_v5 = vld [vmem:[#allocation8 + $0x948] sm:$0xff]   ;;  %v14745_v56 = vld [vmem:[#allocation8 + $0x958] sm:$0xff]  }
 0xc66   :  { %6173 = vst [vmem:[#allocation2 + $0xc] sm:$0xf] %v6165_v45  ;;  %v6224_v61 = vsel %vm281_vm2, %v6222_v54, %v6223_v55  ;;  %v14738_v33 = vld [vmem:[#allocation8 + $0x900] sm:$0xff]   ;;  %13414 = vmatprep.subr.bf16.mxu0 %v14737_v39  ;;  %v14740_v43 = vld [vmem:[#allocation8 + $0x908] sm:$0xff]   ;;  %v14743_v54 = vld [vmem:[#allocation8 + $0x910] sm:$0xff]  }
 0xc67   :  { %v6175_v60 = vsel %vm15490_vm4, %v6166_v49, %v6174_v57  ;;  %14104 = vmatprep.mubr.bf16.mxu1 %v6224_v61  ;;  %v6203_v42 = vor.u32 %v6202_v59, %v6198_v58  ;;  %v6207_v3 = vrot.slane %v6205_v0, 1  ;;  %v14741_v45 = vld [vmem:[#allocation8 + $0x980] sm:$0xff]   ;;  %v14742_v49 = vld [vmem:[#allocation8 + $0x950] sm:$0xff]   ;;  %v14744_v55 = vld [vmem:[#allocation8 + $0x988] sm:$0xff]  }
 0xc68   :  { %6176 = vst [vmem:[#allocation2 + $0x10] sm:$0x3] %v6175_v60  ;;  %14108 = vmatprep.subr.bf16.mxu1 %v14741_v45  ;;  %v14746_v57 = vld [vmem:[#allocation8 + $0x918] sm:$0xff]   ;;  %v14747_v58 = vld [vmem:[#allocation8 + $0x990] sm:$0xff]   ;;  %v14748_v59 = vld [vmem:[#allocation8 + $0x960] sm:$0xff]  }
 0xc69   :  { %v6208_v7 = vsel %vm255_vm5, %v6203_v42, %v6207_v3  ;;  %v14749_v60 = vld [vmem:[#allocation8 + $0x920] sm:$0xff]   ;;  %v14750_v61 = vld [vmem:[#allocation8 + $0x998] sm:$0xff]   ;;  %v14751_v0 = vld [vmem:[#allocation8 + $0x968] sm:$0xff]  }
 0xc6a   :  { %6520 = vmatprep.mubr.bf16.mxu0 %v6208_v7  ;;  %v14752_v42 = vld [vmem:[#allocation8 + $0x928] sm:$0xff]   ;;  %v14753_v3 = vld [vmem:[#allocation8 + $0x9a0] sm:$0xff]   ;;  %v14754_v7 = vld [vmem:[#allocation8 + $0x970] sm:$0xff]  }
 0xc6b   :  { %6521 = vmatmul.mubr.bf16.vlgmr.msra.gmra.mrb[96].mxu0 %v14729_v8  ;;  %v14755_v8 = vld [vmem:[#allocation8 + $0x930] sm:$0xff]  }
 0xc6c   :  { %13415 = vmatpush3.bf16.msra.mxu0 %v14738_v33 }
 0xc6d   :  { %v14731_v12 = vld [vmem:[#allocation2 + $0x8] sm:$0xfc]   ;;  %13416 = vmatprep.subr.bf16.mxu0 %v14739_v5 }
 0xc6e   :  { %v14733_v18 = vld [vmem:[#allocation2 + $0x8] sm:$0xfe]   ;;  %v6284_v21 = vrot.slane %v14731_v12, 2 }
 0xc6f   :  { %v14732_v19 = vld [vmem:[#allocation2 + $0x10] ss:$0 sps:$4 sm:$0x33]   ;;  %v6255_v20 = vshrl.u32 %v14733_v18, 16  ;;  %v6258_v22 = vshll.u32 %v14733_v18, 16  ;;  %v14757_v18 = vld [vmem:[#allocation8 + $0x978] sm:$0xff]  }
 0xc70   :  { %v14734_v9 = vld [vmem:[#allocation2 + $0x10] ss:$0 sps:$4 sm:$0x33]   ;;  %v6285_v63 = vrot.slane %v14732_v19, 2  ;;  %v14735_v30 = vld [vmem:[#allocation2 + $0x8] sm:$0xfe]   ;;  %13417 = vmatpush3.bf16.msra.mxu0 %v14740_v43 }
 0xc71   :  { %v6257_v23 = vrot.slane %v6255_v20, 1  ;;  %v6263_v51 = vshrl.u32 %v14734_v9, 16  ;;  %v6266_v10 = vshll.u32 %v14734_v9, 16  ;;  %v14736_v15 = vld [vmem:[#allocation2 + $0x10] ss:$0 sps:$4 sm:$0x11]   ;;  %13418 = vmatprep.subr.bf16.mxu0 %v14742_v49 }
 0xc72   :  { %v6286_v27 = vsel %vm345_vm7, %v6284_v21, %v6285_v63  ;;  %v6260_v52 = vrot.slane %v6258_v22, 2  ;;  %v6239_v34 = vrot.slane %v14736_v15, 1  ;;  %v6238_v38 = vrot.slane %v14735_v30, 1  ;;  %v14756_v12 = vld [vmem:[#allocation8 + $0x9a8] sm:$0xff]   ;;  %v14760_v19 = vld [vmem:[#allocation8 + $0x938] sm:$0xff]   ;;  %v14761_v9 = vld [vmem:[#allocation8 + $0x9b0] sm:$0xff]  }
 0xc73   :  { %14105 = vmatmul.mubr.bf16.vlgmr.msra.gmra.mrb[52].mxu1 %v6286_v27  ;;  %v6265_v31 = vrot.slane %v6263_v51, 1  ;;  %v6268_v32 = vrot.slane %v6266_v10, 2  ;;  %v14764_v20 = vld [vmem:[#allocation12 + $0x140] sm:$0xff]   ;;  %v14766_v21 = vld [vmem:[#allocation8 + $0x9b8] sm:$0xff]  }
 0xc74   :  { %v6261_v44 = vor.u32 %v6260_v52, %v6257_v23  ;;  %v6240_v40 = vsel %vm281_vm2, %v6238_v38, %v6239_v34  ;;  %14109 = vmatpush3.bf16.msra.mxu1 %v14741_v45  ;;  %13419 = vmatpush3.bf16.msra.mxu0 %v14743_v54  ;;  %v14796_v63 = vld [vmem:[#allocation12 + $0x1c0] sm:$0xff]  }
 0xc75   :  { %v6269_v36 = vor.u32 %v6268_v32, %v6265_v31  ;;  %14110 = vmatprep.subr.bf16.mxu1 %v14744_v55  ;;  %13420 = vmatprep.subr.bf16.mxu0 %v14745_v56  ;;  %v12384_v31 = vld [vmem:[#allocation4 + $0xc] ss:$0 sm:$0xff] }
 0xc77   :  { %v6270_v1 = vsel %vm314_vm8, %v6261_v44, %v6269_v36  ;;  %v12385_v44 = vld [vmem:[#allocation6 + $0xc] ss:$0 sm:$0xff] }
 0xc78   :  { %6528 = vmatprep.mubr.bf16.mxu0 %v6270_v1  ;;  %14111 = vmatpush3.bf16.msra.mxu1 %v14744_v55 }
 0xc79   :  { %6529 = vmatmul.mubr.bf16.gmra.mrb[100].mxu0 %v6240_v40  ;;  %14112 = vmatprep.subr.bf16.mxu1 %v14747_v58 }
 0xc7a   :  { %13421 = vmatpush3.bf16.msra.mxu0 %v14746_v57 }
 0xc7b   :  { %13422 = vmatprep.subr.bf16.mxu0 %v14748_v59 }
 0xc7c   :  { %14113 = vmatpush3.bf16.msra.mxu1 %v14747_v58 }
 0xc7d   :  { %14114 = vmatprep.subr.bf16.mxu1 %v14750_v61 }
 0xc7e   :  { %13423 = vmatpush3.bf16.msra.mxu0 %v14749_v60 }
 0xc7f   :  { %13424 = vmatprep.subr.bf16.mxu0 %v14751_v0 }
 0xc80   :  { %14115 = vmatpush3.bf16.msra.mxu1 %v14750_v61 }
 0xc81   :  { %14116 = vmatprep.subr.bf16.mxu1 %v14753_v3 }
 0xc82   :  { %13425 = vmatpush3.bf16.msra.mxu0 %v14752_v42 }
 0xc83   :  { %13426 = vmatprep.subr.bf16.mxu0 %v14754_v7 }
 0xc84   :  { %14117 = vmatpush3.bf16.msra.mxu1 %v14753_v3 }
 0xc85   :  { %14118 = vmatprep.subr.bf16.mxu1 %v14756_v12 }
 0xc86   :  { %13427 = vmatpush3.bf16.msra.mxu0 %v14755_v8 }
 0xc87   :  { %13428 = vmatprep.subr.bf16.mxu0 %v14757_v18 }
 0xc88   :  { %14119 = vmatpush3.bf16.msra.mxu1 %v14756_v12 }
 0xc89   :  { %14120 = vmatprep.subr.bf16.mxu1 %v14761_v9 }
 0xc8a   :  { %13429 = vmatpush3.bf16.msra.mxu0 %v14760_v19 }
 0xc8b   :  { %13452 = vmatprep.subr.bf16.mxu0 %v14764_v20 }
 0xc8c   :  { %14121 = vmatpush3.bf16.msra.mxu1 %v14761_v9 }
 0xc8d   :  { %14122 = vmatprep.subr.bf16.mxu1 %v14766_v21 }
 0xc90   :  { %14123 = vmatpush3.bf16.msra.mxu1 %v14766_v21 }
 0xc91   :  { %13480 = vmatprep.subr.bf16.mxu1 %v14796_v63 }
 0xd3e   :  { %v13392_v22 = vpop.f32.mrb[96].mxu0 }
 0xd3f   :  { %v13393_v23 = vpop.f32.mrb[97].mxu0 }
 0xd40   :  { %v13394_v51 = vadd.f32 %v13393_v23, %v13392_v22  ;;  %v13395_v10 = vpop.f32.mrb[98].mxu0  ;;  %v6635_v22 = vld [vmem:[#allocation2] sm:$0xf] }
 0xd41   :  { %v13396_v15 = vpop.f32.mrb[99].mxu0 }
 0xd42   :  { %v13397_v27 = vadd.f32 %v13396_v15, %v13395_v10 }
 0xd46   :  { %v14106_v52 = vpop.f32.mrb[52].mxu1 }
 0xd47   :  { %v6571_v30 = vpop.f32.mrb[53].mxu1 }
 0xd48   :  { %v6572_v32 = vadd.f32 %v13394_v51, %v6571_v30  ;;  %v14107_v34 = vpop.f32.mrb[54].mxu1 }
 0xd49   :  { %v6574_v36 = vpop.f32.mrb[55].mxu1 }
 0xd4a   :  { %v6592_v38 = vmul.f32 %v12384_v31, %v6572_v32  ;;  %v6575_v1 = vadd.f32 %v13397_v27, %v6574_v36 }
 0xd4c   :  { %v6600_v40 = vadd.f32 %v12385_v44, %v6592_v38  ;;  %v6593_v39 = vmul.f32 %v12384_v31, %v6575_v1  ;;  %v13398_v33 = vpop.f32.mrb[100].mxu0 }
 0xd4d   :  { %v13399_v5 = vpop.f32.mrb[101].mxu0 }
 0xd4e   :  { %v6604_v43 = vmax.f32 %v6600_v40, 0.0  ;;  %v6601_v45 = vadd.f32 %v12385_v44, %v6593_v39  ;;  %v13400_v49 = vadd.f32 %v13399_v5, %v13398_v33  ;;  %v13401_v54 = vpop.f32.mrb[102].mxu0  ;;  %v6669_v5 = vld [vmem:[#allocation2 + $0x8] sm:$0xe] }
 0xd4f   :  { %v13402_v55 = vpop.f32.mrb[103].mxu0 }
 0xd50   :  { %v12870_v56 = vpack.c.bf16 %v6604_v43, %v6604_v43  ;;  %v6605_v57 = vmax.f32 %v6601_v45, 0.0  ;;  %v6580_v58 = vadd.f32 %v14106_v52, %v13400_v49  ;;  %v13403_v59 = vadd.f32 %v13402_v55, %v13401_v54  ;;  %v6639_v52 = vld [vmem:[#allocation2 + $0x8] sm:$0x1] }
 0xd52   :  { %v6616_v60 = vshrl.u32 %v12870_v56, 16  ;;  %v12871_v61 = vpack.c.bf16 %v6605_v57, %v6605_v57  ;;  %v6594_v0 = vmul.f32 %v12384_v31, %v6580_v58  ;;  %v6583_v42 = vadd.f32 %v14107_v34, %v13403_v59  ;;  %v15107_v58 = vld [vmem:[#allocation9 + $0x7] ss:$0 sm:$0xff] }
 0xd53   :  { %v6619_v7 = vshll.u32 %v12870_v56, 16  ;;  %v6673_v56 = vld [vmem:[#allocation2 + $0x10] sm:$0x3]  ;;  %v7163_v59 = vmul.f32 %v15107_v58, %v15503_v46 }
 0xd54   :  { %v6618_v3 = vrot.slane %v6616_v60, 7  ;;  %v6624_v8 = vshrl.u32 %v12871_v61, 16  ;;  %v6602_v12 = vadd.f32 %v12385_v44, %v6594_v0  ;;  %v6595_v18 = vmul.f32 %v12384_v31, %v6583_v42 }
 0xd55   :  { %v6627_v20 = vshll.u32 %v12871_v61, 16 }
 0xd56   :  { %v6621_v19 = vor.u32 %v6619_v7, %v6618_v3  ;;  %v6626_v9 = vrot.slane %v6624_v8, 7  ;;  %v6606_v21 = vmax.f32 %v6602_v12, 0.0  ;;  %v6622_v63 = vrot.slane %v6618_v3, 4 }
 0xd57   :  { %v6603_v23 = vadd.f32 %v12385_v44, %v6595_v18  ;;  %v7164_v7 = vmul.f32 %v15107_v58, %v15506_v50  ;;  %v14797_v58 = vld [vmem:[#allocation12 + $0x180] sm:$0xff]  }
 0xd58   :  { %v6636_v51 = vsel %vm15464_vm3, %v6621_v19, %v6635_v22  ;;  %v6629_v10 = vor.u32 %v6627_v20, %v6626_v9  ;;  %v6631_v15 = vrot.slane %v6626_v9, 4  ;;  %v12872_v27 = vpack.c.bf16 %v6606_v21, %v6606_v21  ;;  %v15108_v9 = vld [vmem:[#allocation11 + $0x7] ss:$0 sm:$0xff] }
 0xd59   :  { %6637 = vst [vmem:[#allocation2] sm:$0xf] %v6636_v51  ;;  %v6607_v30 = vmax.f32 %v6603_v23, 0.0  ;;  %v7171_v20 = vadd.f32 %v15108_v9, %v7163_v59  ;;  %v7172_v51 = vadd.f32 %v15108_v9, %v7164_v7 }
 0xd5a   :  { %v6630_v32 = vsel %vm15458_vm15, %v6622_v63, %v6629_v10  ;;  %v6640_v31 = vsel %vm15417_vm6, %v6631_v15, %v6639_v52  ;;  %v6648_v34 = vshrl.u32 %v12872_v27, 16  ;;  %v6651_v36 = vshll.u32 %v12872_v27, 16  ;;  %v15844_v10 = vld [vmem:[#allocation9 + $0x5] ss:$0 sm:$0xff] }
 0xd5b   :  { %6638 = vst [vmem:[#allocation2 + $0x4] sm:$0xf] %v6630_v32  ;;  %6641 = vst [vmem:[#allocation2 + $0x8] sm:$0x1] %v6640_v31  ;;  %v12873_v44 = vpack.c.bf16 %v6607_v30, %v6607_v30  ;;  %v14767_v52 = vld [vmem:[#allocation12 + $0x100] sm:$0xff]   ;;  %v14768_v30 = vld [vmem:[#allocation12 + $0x148] sm:$0xff]   ;;  %v7116_v31 = vmul.f32 %v15844_v10, %v15801_v29 }
 0xd5c   :  { %v6650_v38 = vrot.slane %v6648_v34, 6  ;;  %v6653_v1 = vrot.slane %v6651_v36, 7  ;;  %v7175_v32 = vmax.f32 %v7171_v20, 0.0  ;;  %v14775_v20 = vld [vmem:[#allocation12 + $0x110] sm:$0xff]  }
 0xd5d   :  { %v6657_v40 = vshrl.u32 %v12873_v44, 16  ;;  %v6660_v39 = vshll.u32 %v12873_v44, 16 }
 0xd5e   :  { %v6654_v33 = vor.u32 %v6653_v1, %v6650_v38  ;;  %v7176_v38 = vmax.f32 %v7172_v51, 0.0  ;;  %v14778_v51 = vld [vmem:[#allocation12 + $0x158] sm:$0xff]  }
 0xd5f   :  { %v6659_v43 = vrot.slane %v6657_v40, 6  ;;  %v6662_v45 = vrot.slane %v6660_v39, 7  ;;  %v15849_v40 = vld [vmem:[#allocation11 + $0x5] ss:$0 sm:$0xff]  ;;  %v7115_v39 = vmul.f32 %v15844_v10, %v15797_v4 }
 0xd60   :  { %v6655_v49 = vrot.slane %v6654_v33, 4  ;;  %v6670_v54 = vsel %vm15470_vm0, %v6654_v33, %v6669_v5  ;;  %v14771_v5 = vld [vmem:[#allocation12 + $0x108] sm:$0xff]  }
 0xd61   :  { %6671 = vst [vmem:[#allocation2 + $0x8] sm:$0xe] %v6670_v54  ;;  %v6663_v55 = vor.u32 %v6662_v45, %v6659_v43  ;;  %v14772_v43 = vld [vmem:[#allocation12 + $0x150] sm:$0xff]  }
 0xd62   :  { %v14758_v57 = vld [vmem:[#allocation2] sm:$0xfe]   ;;  %v14759_v0 = vld [vmem:[#allocation2 + $0x8] ss:$0 sps:$4 sm:$0x11]  }
 0xd63   :  { %v6664_v60 = vsel %vm15476_vm1, %v6655_v49, %v6663_v55  ;;  %v6665_v61 = vrot.slane %v6663_v55, 4  ;;  %v6721_v42 = vrot.slane %v14758_v57, 1  ;;  %v14762_v3 = vld [vmem:[#allocation2] sm:$0xff]   ;;  %v6722_v12 = vrot.slane %v14759_v0, 1 }
 0xd64   :  { %6672 = vst [vmem:[#allocation2 + $0xc] sm:$0xf] %v6664_v60  ;;  %v14763_v18 = vld [vmem:[#allocation2 + $0x8] ss:$0 sps:$4 sm:$0x11]   ;;  %v6699_v19 = vshll.u32 %v14762_v3, 16  ;;  %v7124_v57 = vadd.f32 %v15849_v40, %v7116_v31 }
 0xd65   :  { %v6674_v8 = vsel %vm15490_vm4, %v6665_v61, %v6673_v56  ;;  %v6723_v21 = vsel %vm281_vm2, %v6721_v42, %v6722_v12  ;;  %v6704_v63 = vshll.u32 %v14763_v18, 16  ;;  %v6697_v22 = vshrl.u32 %v14762_v3, 16  ;;  %v14765_v44 = vld [vmem:[#allocation2] sm:$0xff]   ;;  %v14798_v18 = vld [vmem:[#allocation12 + $0x1c8] sm:$0xff]  }
 0xd66   :  { %6675 = vst [vmem:[#allocation2 + $0x10] sm:$0x3] %v6674_v8  ;;  %14124 = vmatprep.mubr.bf16.mxu1 %v6723_v21  ;;  %v6701_v23 = vrot.slane %v6699_v19, 1  ;;  %v7179_v3 = vpack.c.bf16 %v7176_v38, %v7175_v32  ;;  %v7123_v12 = vadd.f32 %v15849_v40, %v7115_v39  ;;  %v14800_v32 = vld [vmem:[#allocation12 + $0x1d0] sm:$0xff]   ;;  %v14781_v39 = vld [vmem:[#allocation12 + $0x120] sm:$0xff]  }
 0xd67   :  { %v6706_v27 = vrot.slane %v6704_v63, 1  ;;  %v7128_v63 = vmax.f32 %v7124_v57, 0.0  ;;  %v14801_v38 = vld [vmem:[#allocation12 + $0x190] sm:$0xff]  }
 0xd68   :  { %v6702_v15 = vor.u32 %v6701_v23, %v6697_v22  ;;  %v12426_v57 = vld [vmem:[#allocation11 + $0x4] ss:$0 sm:$0xff] }
 0xd6a   :  { %v6707_v36 = vsel %vm255_vm5, %v6702_v15, %v6706_v27  ;;  %v7127_v27 = vmax.f32 %v7123_v12, 0.0 }
 0xd6b   :  { %v14769_v34 = vld [vmem:[#allocation2 + $0x8] sm:$0xfc]   ;;  %7019 = vmatprep.mubr.bf16.mxu0 %v6707_v36  ;;  %v14779_v36 = vld [vmem:[#allocation12 + $0x118] sm:$0xff]  }
 0xd6c   :  { %v14773_v1 = vld [vmem:[#allocation2 + $0x8] sm:$0xfe]   ;;  %7020 = vmatmul.mubr.bf16.vlgmr.msra.gmra.mrb[104].mxu0 %v14765_v44  ;;  %v6783_v54 = vrot.slane %v14769_v34, 2  ;;  %v7131_v34 = vpack.c.bf16 %v7128_v63, %v7127_v27 }
 0xd6d   :  { %v14770_v33 = vld [vmem:[#allocation2 + $0x10] ss:$0 sps:$4 sm:$0x33]   ;;  %v6754_v49 = vshrl.u32 %v14773_v1, 16  ;;  %13453 = vmatpush3.bf16.msra.mxu0 %v14767_v52  ;;  %v6757_v56 = vshll.u32 %v14773_v1, 16  ;;  %v14780_v44 = vld [vmem:[#allocation12 + $0x160] sm:$0xff]  }
 0xd6e   :  { %v14774_v45 = vld [vmem:[#allocation2 + $0x10] ss:$0 sps:$4 sm:$0x33]   ;;  %v6784_v55 = vrot.slane %v14770_v33, 2  ;;  %13454 = vmatprep.subr.bf16.mxu0 %v14768_v30  ;;  %v14776_v8 = vld [vmem:[#allocation2 + $0x8] sm:$0xfe]  }
 0xd6f   :  { %v6756_v59 = vrot.slane %v6754_v49, 1  ;;  %v6762_v60 = vshrl.u32 %v14774_v45, 16  ;;  %v6765_v61 = vshll.u32 %v14774_v45, 16  ;;  %v14777_v0 = vld [vmem:[#allocation2 + $0x10] ss:$0 sps:$4 sm:$0x11]  }
 0xd70   :  { %v6785_v42 = vsel %vm345_vm7, %v6783_v54, %v6784_v55  ;;  %v6759_v7 = vrot.slane %v6757_v56, 2  ;;  %v6738_v21 = vrot.slane %v14777_v0, 1  ;;  %v6737_v15 = vrot.slane %v14776_v8, 1  ;;  %v14799_v52 = vld [vmem:[#allocation12 + $0x188] sm:$0xff]   ;;  %v14802_v1 = vld [vmem:[#allocation12 + $0x1d8] sm:$0xff]   ;;  %v14784_v54 = vld [vmem:[#allocation12 + $0x170] sm:$0xff]  }
 0xd71   :  { %14125 = vmatmul.mubr.bf16.vlgmr.msra.gmra.mrb[56].mxu1 %v6785_v42  ;;  %v6764_v19 = vrot.slane %v6762_v60, 1  ;;  %v6767_v9 = vrot.slane %v6765_v61, 2  ;;  %13455 = vmatpush3.bf16.msra.mxu0 %v14771_v5  ;;  %v14782_v33 = vld [vmem:[#allocation12 + $0x168] sm:$0xff]   ;;  %v14803_v5 = vld [vmem:[#allocation12 + $0x198] sm:$0xff]   ;;  %v7118_v55 = vmul.f32 %v15844_v10, %v15809_v41 }
 0xd72   :  { %7606 = vmatprep.mubr.bf16.mxu1 %v7179_v3  ;;  %13456 = vmatprep.subr.bf16.mxu0 %v14772_v43  ;;  %v6760_v22 = vor.u32 %v6759_v7, %v6756_v59  ;;  %v6739_v31 = vsel %vm281_vm2, %v6737_v15, %v6738_v21  ;;  %v12425_v43 = vld [vmem:[#allocation9 + $0x4] ss:$0 sm:$0xff]  ;;  %v14783_v45 = vld [vmem:[#allocation12 + $0x128] sm:$0xff]   ;;  %v7117_v59 = vmul.f32 %v15844_v10, %v15805_v53  ;;  %v14786_v61 = vld [vmem:[#allocation12 + $0x178] sm:$0xff]  }
 0xd73   :  { %v6768_v23 = vor.u32 %v6767_v9, %v6764_v19  ;;  %13481 = vmatpush3.bf16.msra.mxu1 %v14797_v58  ;;  %v7092_v49 = vmul.f32 %v12425_v43, %v15751_v48  ;;  %v7091_v56 = vmul.f32 %v12425_v43, %v15747_v35  ;;  %v14785_v58 = vld [vmem:[#allocation12 + $0x130] sm:$0xff]   ;;  %v7126_v0 = vadd.f32 %v15849_v40, %v7118_v55  ;;  %v14787_v42 = vld [vmem:[#allocation12 + $0x138] sm:$0xff]   ;;  %v12433_v7 = vld [vmem:[#allocation9 + $0x8] ss:$0 sm:$0xff] }
 0xd74   :  { %13482 = vmatprep.subr.bf16.mxu1 %v14798_v18  ;;  %v7125_v3 = vadd.f32 %v15849_v40, %v7117_v59  ;;  %v14788_v35 = vld [vmem:[#allocation12 + $0x200] sm:$0xff]   ;;  %v7094_v12 = vmul.f32 %v12425_v43, %v15759_v11  ;;  %v7188_v19 = vmul.f32 %v12433_v7, %v15701_v26  ;;  %v7093_v9 = vmul.f32 %v12425_v43, %v15755_v62  ;;  %v14795_v43 = vld [vmem:[#allocation12 + $0x238] sm:$0xff]   ;;  %v14806_v59 = vld [vmem:[#allocation12 + $0x1e8] sm:$0xff]  }
 0xd75   :  { %v6769_v30 = vsel %vm314_vm8, %v6760_v22, %v6768_v23  ;;  %13457 = vmatpush3.bf16.msra.mxu0 %v14775_v20  ;;  %v7100_v60 = vadd.f32 %v12426_v57, %v7092_v49  ;;  %v7099_v48 = vadd.f32 %v12426_v57, %v7091_v56  ;;  %v7130_v18 = vmax.f32 %v7126_v0, 0.0  ;;  %v14789_v22 = vld [vmem:[#allocation12 + $0x208] sm:$0xff]   ;;  %v12434_v23 = vld [vmem:[#allocation11 + $0x8] ss:$0 sm:$0xff]  ;;  %v14809_v0 = vld [vmem:[#allocation12 + $0x1b0] sm:$0xff]  }
 0xd76   :  { %7027 = vmatprep.mubr.bf16.mxu0 %v6769_v30  ;;  %13458 = vmatprep.subr.bf16.mxu0 %v14778_v51  ;;  %v7129_v20 = vmax.f32 %v7125_v3, 0.0  ;;  %v7187_v21 = vmul.f32 %v12433_v7, %v15697_v24  ;;  %v7102_v40 = vadd.f32 %v12426_v57, %v7094_v12  ;;  %v7196_v15 = vadd.f32 %v12434_v23, %v7188_v19  ;;  %v14790_v30 = vld [vmem:[#allocation12 + $0x210] sm:$0xff]  }
 0xd77   :  { %7028 = vmatmul.mubr.bf16.gmra.mrb[108].mxu0 %v6739_v31  ;;  %13483 = vmatpush3.bf16.msra.mxu1 %v14799_v52  ;;  %v7104_v8 = vmax.f32 %v7100_v60, 0.0  ;;  %v7103_v10 = vmax.f32 %v7099_v48, 0.0  ;;  %v7101_v27 = vadd.f32 %v12426_v57, %v7093_v9  ;;  %v14804_v57 = vld [vmem:[#allocation12 + $0x1e0] sm:$0xff]   ;;  %v14807_v60 = vld [vmem:[#allocation12 + $0x1a8] sm:$0xff]   ;;  %v14810_v48 = vld [vmem:[#allocation12 + $0x1f8] sm:$0xff]  }
 0xd78   :  { %7557 = vmatprep.mubr.bf16.mxu0 %v7131_v34  ;;  %13484 = vmatprep.subr.bf16.mxu1 %v14800_v32  ;;  %v7132_v51 = vpack.c.bf16 %v7130_v18, %v7129_v20  ;;  %v7195_v11 = vadd.f32 %v12434_v23, %v7187_v21  ;;  %v7106_v52 = vmax.f32 %v7102_v40, 0.0  ;;  %v7200_v62 = vmax.f32 %v7196_v15, 0.0  ;;  %v12429_v20 = vld [vmem:[#allocation9 + $0x6] ss:$0 sm:$0xff]  ;;  %v12430_v40 = vld [vmem:[#allocation11 + $0x6] ss:$0 sm:$0xff] }
 0xd79   :  { %13459 = vmatpush3.bf16.msra.mxu0 %v14779_v36  ;;  %v7107_v63 = vpack.c.bf16 %v7104_v8, %v7103_v10  ;;  %v7105_v32 = vmax.f32 %v7101_v27, 0.0  ;;  %v14791_v36 = vld [vmem:[#allocation12 + $0x218] sm:$0xff]  }
 0xd7a   :  { %13460 = vmatprep.subr.bf16.mxu0 %v14780_v44  ;;  %v7199_v31 = vmax.f32 %v7195_v11, 0.0 }
 0xd7b   :  { %13485 = vmatpush3.bf16.msra.mxu1 %v14801_v38  ;;  %v7108_v34 = vpack.c.bf16 %v7106_v52, %v7105_v32  ;;  %v14792_v38 = vld [vmem:[#allocation12 + $0x220] sm:$0xff]  }
 0xd7c   :  { %13486 = vmatprep.subr.bf16.mxu1 %v14802_v1  ;;  %v7203_v44 = vpack.c.bf16 %v7200_v62, %v7199_v31  ;;  %v14793_v1 = vld [vmem:[#allocation12 + $0x228] sm:$0xff]  }
 0xd7d   :  { %13461 = vmatpush3.bf16.msra.mxu0 %v14781_v39  ;;  %v7190_v39 = vmul.f32 %v12433_v7, %v15709_v47 }
 0xd7e   :  { %13462 = vmatprep.subr.bf16.mxu0 %v14782_v33  ;;  %v14794_v33 = vld [vmem:[#allocation12 + $0x230] sm:$0xff]  }
 0xd7f   :  { %13487 = vmatpush3.bf16.msra.mxu1 %v14803_v5  ;;  %v7189_v5 = vmul.f32 %v12433_v7, %v15705_v13 }
 0xd80   :  { %13488 = vmatprep.subr.bf16.mxu1 %v14804_v57 }
 0xd81   :  { %13463 = vmatpush3.bf16.msra.mxu0 %v14783_v45  ;;  %v7198_v45 = vadd.f32 %v12434_v23, %v7190_v39  ;;  %v7197_v49 = vadd.f32 %v12434_v23, %v7189_v5 }
 0xd82   :  { %13464 = vmatprep.subr.bf16.mxu0 %v14784_v54 }
 0xd83   :  { %v7202_v54 = vmax.f32 %v7198_v45, 0.0  ;;  %v7201_v55 = vmax.f32 %v7197_v49, 0.0 }
 0xd85   :  { %13465 = vmatpush3.bf16.msra.mxu0 %v14785_v58  ;;  %v7204_v56 = vpack.c.bf16 %v7202_v54, %v7201_v55  ;;  %v14805_v58 = vld [vmem:[#allocation12 + $0x1a0] sm:$0xff]  }
 0xd86   :  { %13466 = vmatprep.subr.bf16.mxu0 %v14786_v61  ;;  %13489 = vmatpush3.bf16.msra.mxu1 %v14805_v58  ;;  %v14808_v61 = vld [vmem:[#allocation12 + $0x1f0] sm:$0xff]  }
 0xd87   :  { %13490 = vmatprep.subr.bf16.mxu1 %v14806_v59 }
 0xd89   :  { %13467 = vmatpush3.bf16.msra.mxu0 %v14787_v42  ;;  %v14811_v42 = vld [vmem:[#allocation12 + $0x1b8] sm:$0xff]  }
 0xd8a   :  { %14128 = vmatprep.subr.bf16.mxu0 %v14788_v35  ;;  %13491 = vmatpush3.bf16.msra.mxu1 %v14807_v60 }
 0xd8b   :  { %13492 = vmatprep.subr.bf16.mxu1 %v14808_v61 }
 0xd8c   :  { %7558 = vmatmul.mubr.bf16.vlgmr.msra.gmra.mrb[112].mxu0 %v7107_v63 }
 0xd8d   :  { %7565 = vmatprep.mubr.bf16.mxu0 %v7132_v51  ;;  %14129 = vmatpush3.bf16.msra.mxu0 %v14788_v35 }
 0xd8e   :  { %14130 = vmatprep.subr.bf16.mxu0 %v14789_v22  ;;  %13493 = vmatpush3.bf16.msra.mxu1 %v14809_v0 }
 0xd8f   :  { %13494 = vmatprep.subr.bf16.mxu1 %v14810_v48 }
 0xd91   :  { %14131 = vmatpush3.bf16.msra.mxu0 %v14789_v22 }
 0xd92   :  { %14132 = vmatprep.subr.bf16.mxu0 %v14790_v30  ;;  %13495 = vmatpush3.bf16.msra.mxu1 %v14811_v42 }
 0xd94   :  { %7566 = vmatmul.mubr.bf16.gmra.mrb[116].mxu0 %v7108_v34 }
 0xd95   :  { %14133 = vmatpush3.bf16.msra.mxu0 %v14790_v30  ;;  %14144 = vmatprep.mubr.bf16.mxu0 %v7203_v44 }
 0xd96   :  { %14134 = vmatprep.subr.bf16.mxu0 %v14791_v36 }
 0xd99   :  { %14135 = vmatpush3.bf16.msra.mxu0 %v14791_v36 }
 0xd9a   :  { %14136 = vmatprep.subr.bf16.mxu0 %v14792_v38 }
 0xd9d   :  { %14137 = vmatpush3.bf16.msra.mxu0 %v14792_v38 }
 0xd9e   :  { %14138 = vmatprep.subr.bf16.mxu0 %v14793_v1 }
 0xda1   :  { %14139 = vmatpush3.bf16.msra.mxu0 %v14793_v1 }
 0xda2   :  { %14140 = vmatprep.subr.bf16.mxu0 %v14794_v33 }
 0xda5   :  { %14141 = vmatpush3.bf16.msra.mxu0 %v14794_v33 }
 0xda6   :  { %14142 = vmatprep.subr.bf16.mxu0 %v14795_v43 }
 0xda9   :  { %14143 = vmatpush3.bf16.msra.mxu0 %v14795_v43 }
 0xdac   :  { %14145 = vmatmul.mubr.bf16.vlgmr.msra.gmra.mrb[120].mxu0 %v7204_v56 }
 0xe3f   :  { %v13430_v3 = vpop.f32.mrb[104].mxu0 }
 0xe40   :  { %v13431_v7 = vpop.f32.mrb[105].mxu0 }
 0xe41   :  { %v13432_v8 = vadd.f32 %v13431_v7, %v13430_v3  ;;  %v13433_v35 = vpop.f32.mrb[106].mxu0 }
 0xe42   :  { %v13434_v12 = vpop.f32.mrb[107].mxu0 }
 0xe43   :  { %v13435_v18 = vadd.f32 %v13434_v12, %v13433_v35  ;;  %v7022_v10 = vadd.f32 %v13432_v8, %v15797_v4 }
 0xe44   :  { %v14126_v19 = vpop.f32.mrb[56].mxu1 }
 0xe45   :  { %v7070_v9 = vpop.f32.mrb[57].mxu1  ;;  %v7025_v22 = vadd.f32 %v13435_v18, %v15801_v29  ;;  %v14812_v18 = vld [vmem:[#allocation8 + $0xa00] sm:$0xff]  }
 0xe46   :  { %v7071_v21 = vadd.f32 %v7070_v9, %v7022_v10  ;;  %v14127_v63 = vpop.f32.mrb[58].mxu1  ;;  %13518 = vmatprep.subr.bf16.mxu1 %v14812_v18  ;;  %v14814_v10 = vld [vmem:[#allocation8 + $0xa08] sm:$0xff]  }
 0xe47   :  { %v7073_v23 = vpop.f32.mrb[59].mxu1  ;;  %v14815_v9 = vld [vmem:[#allocation8 + $0x9c8] sm:$0xff]  }
 0xe48   :  { %v7139_v51 = vmul.f32 %v12429_v20, %v7071_v21  ;;  %v7074_v15 = vadd.f32 %v7073_v23, %v7025_v22  ;;  %v14817_v21 = vld [vmem:[#allocation8 + $0xa10] sm:$0xff]   ;;  %v14819_v22 = vld [vmem:[#allocation8 + $0xa48] sm:$0xff]   ;;  %v14821_v23 = vld [vmem:[#allocation8 + $0x9d8] sm:$0xff]  }
 0xe4a   :  { %v7147_v27 = vadd.f32 %v12430_v40, %v7139_v51  ;;  %v7140_v11 = vmul.f32 %v12429_v20, %v7074_v15  ;;  %v13436_v52 = vpop.f32.mrb[108].mxu0  ;;  %v14822_v51 = vld [vmem:[#allocation8 + $0xa50] sm:$0xff]   ;;  %v14823_v15 = vld [vmem:[#allocation8 + $0xa20] sm:$0xff]  }
 0xe4b   :  { %v13437_v30 = vpop.f32.mrb[109].mxu0 }
 0xe4c   :  { %v7148_v62 = vadd.f32 %v12430_v40, %v7140_v11  ;;  %v13438_v32 = vadd.f32 %v13437_v30, %v13436_v52  ;;  %v13439_v31 = vpop.f32.mrb[110].mxu0  ;;  %v7151_v36 = vmax.f32 %v7147_v27, 0.0  ;;  %v14824_v27 = vld [vmem:[#allocation8 + $0x9e0] sm:$0xff]   ;;  %v14825_v11 = vld [vmem:[#allocation8 + $0xa58] sm:$0xff]   ;;  %v14826_v52 = vld [vmem:[#allocation8 + $0xa28] sm:$0xff]  }
 0xe4d   :  { %v13440_v34 = vpop.f32.mrb[111].mxu0  ;;  %v14827_v30 = vld [vmem:[#allocation8 + $0x9e8] sm:$0xff]  }
 0xe4e   :  { %v7152_v4 = vmax.f32 %v7148_v62, 0.0  ;;  %v7030_v44 = vadd.f32 %v13438_v32, %v15805_v53  ;;  %v13441_v38 = vadd.f32 %v13440_v34, %v13439_v31  ;;  %v14828_v62 = vld [vmem:[#allocation8 + $0xa60] sm:$0xff]   ;;  %v14829_v32 = vld [vmem:[#allocation8 + $0xa30] sm:$0xff]   ;;  %v14831_v34 = vld [vmem:[#allocation8 + $0xa68] sm:$0xff]  }
 0xe4f   :  { %v14830_v31 = vld [vmem:[#allocation8 + $0x9f0] sm:$0xff]  }
 0xe50   :  { %v7155_v1 = vpack.c.bf16 %v7152_v4, %v7151_v36  ;;  %v7079_v39 = vadd.f32 %v14126_v19, %v7030_v44  ;;  %v7033_v29 = vadd.f32 %v13441_v38, %v15809_v41  ;;  %v14813_v19 = vld [vmem:[#allocation8 + $0x9c0] sm:$0xff]   ;;  %v14834_v36 = vld [vmem:[#allocation8 + $0xa38] sm:$0xff]   ;;  %v14836_v44 = vld [vmem:[#allocation8 + $0xa70] sm:$0xff]  }
 0xe51   :  { %v14835_v4 = vld [vmem:[#allocation8 + $0x9f8] sm:$0xff]  }
 0xe52   :  { %v7141_v33 = vmul.f32 %v12429_v20, %v7079_v39  ;;  %v7082_v5 = vadd.f32 %v14127_v63, %v7033_v29  ;;  %7607 = vmatmul.mubr.bf16.vlgmr.msra.gmra.mrb[60].mxu1 %v7155_v1  ;;  %v14818_v63 = vld [vmem:[#allocation8 + $0x9d0] sm:$0xff]   ;;  %v14840_v38 = vld [vmem:[#allocation8 + $0xa78] sm:$0xff]  }
 0xe53   :  { %7614 = vmatprep.mubr.bf16.mxu1 %v15533_v25  ;;  %13519 = vmatpush3.bf16.msra.mxu1 %v14813_v19 }
 0xe54   :  { %v7142_v43 = vmul.f32 %v12429_v20, %v7082_v5  ;;  %v7149_v45 = vadd.f32 %v12430_v40, %v7141_v33  ;;  %13520 = vmatprep.subr.bf16.mxu1 %v14814_v10  ;;  %v14816_v20 = vld [vmem:[#allocation8 + $0xa40] sm:$0xff]  }
 0xe55   :  { %14148 = vmatprep.subr.bf16.mxu0 %v14816_v20 }
 0xe56   :  { %v7150_v49 = vadd.f32 %v12430_v40, %v7142_v43  ;;  %v7153_v54 = vmax.f32 %v7149_v45, 0.0  ;;  %14149 = vmatpush3.bf16.msra.mxu0 %v14816_v20  ;;  %v14820_v40 = vld [vmem:[#allocation8 + $0xa18] sm:$0xff]  }
 0xe57   :  { %13521 = vmatpush3.bf16.msra.mxu1 %v14815_v9  ;;  %14150 = vmatprep.subr.bf16.mxu0 %v14819_v22 }
 0xe58   :  { %v7154_v55 = vmax.f32 %v7150_v49, 0.0  ;;  %13522 = vmatprep.subr.bf16.mxu1 %v14817_v21  ;;  %v12475_v49 = vld [vmem:[#allocation4 + $0xd] ss:$0 sm:$0xff] }
 0xe5a   :  { %v7156_v56 = vpack.c.bf16 %v7154_v55, %v7153_v54  ;;  %14151 = vmatpush3.bf16.msra.mxu0 %v14819_v22 }
 0xe5b   :  { %13523 = vmatpush3.bf16.msra.mxu1 %v14818_v63  ;;  %14152 = vmatprep.subr.bf16.mxu0 %v14822_v51 }
 0xe5c   :  { %7615 = vmatmul.mubr.bf16.gmra.mrb[64].mxu1 %v7156_v56  ;;  %13524 = vmatprep.subr.bf16.mxu1 %v14820_v40  ;;  %v12476_v56 = vld [vmem:[#allocation6 + $0xd] ss:$0 sm:$0xff] }
 0xe5e   :  { %14153 = vmatpush3.bf16.msra.mxu0 %v14822_v51 }
 0xe5f   :  { %v13468_v57 = vpop.f32.mrb[112].mxu0  ;;  %13525 = vmatpush3.bf16.msra.mxu1 %v14821_v23  ;;  %14154 = vmatprep.subr.bf16.mxu0 %v14825_v11 }
 0xe60   :  { %v13469_v58 = vpop.f32.mrb[113].mxu0  ;;  %13526 = vmatprep.subr.bf16.mxu1 %v14823_v15 }
 0xe61   :  { %v15877_v53 = vadd.f32 %v13469_v58, %v13468_v57  ;;  %v13471_v59 = vpop.f32.mrb[114].mxu0 }
 0xe62   :  { %v13472_v60 = vpop.f32.mrb[115].mxu0  ;;  %14155 = vmatpush3.bf16.msra.mxu0 %v14825_v11 }
 0xe63   :  { %v15879_v61 = vadd.f32 %v13472_v60, %v13471_v59  ;;  %13527 = vmatpush3.bf16.msra.mxu1 %v14824_v27  ;;  %14156 = vmatprep.subr.bf16.mxu0 %v14828_v62 }
 0xe64   :  { %13528 = vmatprep.subr.bf16.mxu1 %v14826_v52 }
 0xe66   :  { %14157 = vmatpush3.bf16.msra.mxu0 %v14828_v62  ;;  %v7721_v62 = vld [vmem:[#allocation2] sm:$0xf] }
 0xe67   :  { %v13474_v41 = vpop.f32.mrb[116].mxu0  ;;  %13529 = vmatpush3.bf16.msra.mxu1 %v14827_v30  ;;  %14158 = vmatprep.subr.bf16.mxu0 %v14831_v34 }
 0xe68   :  { %v13475_v0 = vpop.f32.mrb[117].mxu0  ;;  %13530 = vmatprep.subr.bf16.mxu1 %v14829_v32 }
 0xe69   :  { %v15881_v48 = vadd.f32 %v13475_v0, %v13474_v41  ;;  %v13477_v25 = vpop.f32.mrb[118].mxu0 }
 0xe6a   :  { %v13478_v42 = vpop.f32.mrb[119].mxu0  ;;  %14159 = vmatpush3.bf16.msra.mxu0 %v14831_v34 }
 0xe6b   :  { %v15883_v3 = vadd.f32 %v13478_v42, %v13477_v25  ;;  %13531 = vmatpush3.bf16.msra.mxu1 %v14830_v31  ;;  %14160 = vmatprep.subr.bf16.mxu0 %v14836_v44 }
 0xe6c   :  { %13532 = vmatprep.subr.bf16.mxu1 %v14834_v36  ;;  %v7725_v36 = vld [vmem:[#allocation2 + $0x8] sm:$0x1] }
 0xe6e   :  { %14161 = vmatpush3.bf16.msra.mxu0 %v14836_v44 }
 0xe6f   :  { %13533 = vmatpush3.bf16.msra.mxu1 %v14835_v4  ;;  %14162 = vmatprep.subr.bf16.mxu0 %v14840_v38 }
 0xe72   :  { %14163 = vmatpush3.bf16.msra.mxu0 %v14840_v38 }
 0xe7f   :  { %v15885_v7 = vpop.f32.mrb[120].mxu0 }
 0xe80   :  { %v15887_v8 = vpop.f32.mrb[121].mxu0 }
 0xe81   :  { %v15889_v35 = vpop.f32.mrb[122].mxu0 }
 0xe82   :  { %v15891_v12 = vpop.f32.mrb[123].mxu0 }
 0xf25   :  { %v13496_v1 = vpop.f32.mrb[60].mxu1 }
 0xf26   :  { %v13497_v39 = vpop.f32.mrb[61].mxu1 }
 0xf27   :  { %v13498_v29 = vadd.f32 %v13497_v39, %v13496_v1  ;;  %v13499_v33 = vpop.f32.mrb[62].mxu1 }
 0xf28   :  { %v13500_v5 = vpop.f32.mrb[63].mxu1 }
 0xf29   :  { %v7609_v43 = vadd.f32 %v13498_v29, %v15877_v53  ;;  %v13501_v45 = vadd.f32 %v13500_v5, %v13499_v33 }
 0xf2b   :  { %v15895_v54 = vadd.f32 %v15887_v8, %v7609_v43  ;;  %v7612_v55 = vadd.f32 %v13501_v45, %v15879_v61 }
 0xf2d   :  { %v7678_v57 = vmul.f32 %v12475_v49, %v15895_v54  ;;  %v15900_v58 = vadd.f32 %v15891_v12, %v7612_v55 }
 0xf2f   :  { %v7686_v59 = vadd.f32 %v12476_v56, %v7678_v57  ;;  %v7679_v60 = vmul.f32 %v12475_v49, %v15900_v58  ;;  %v13502_v41 = vpop.f32.mrb[64].mxu1  ;;  %v7755_v57 = vld [vmem:[#allocation2 + $0x8] sm:$0xe] }
 0xf30   :  { %v13503_v0 = vpop.f32.mrb[65].mxu1 }
 0xf31   :  { %v7690_v25 = vmax.f32 %v7686_v59, 0.0  ;;  %v7687_v53 = vadd.f32 %v12476_v56, %v7679_v60  ;;  %v13504_v42 = vadd.f32 %v13503_v0, %v13502_v41  ;;  %v13505_v18 = vpop.f32.mrb[66].mxu1 }
 0xf32   :  { %v13506_v19 = vpop.f32.mrb[67].mxu1 }
 0xf33   :  { %v12874_v8 = vpack.c.bf16 %v7690_v25, %v7690_v25  ;;  %v7691_v10 = vmax.f32 %v7687_v53, 0.0  ;;  %v7617_v61 = vadd.f32 %v13504_v42, %v15881_v48  ;;  %v13507_v9 = vadd.f32 %v13506_v19, %v13505_v18 }
 0xf35   :  { %v7702_v20 = vshrl.u32 %v12874_v8, 16  ;;  %v12875_v21 = vpack.c.bf16 %v7691_v10, %v7691_v10  ;;  %v15905_v12 = vadd.f32 %v15885_v7, %v7617_v61  ;;  %v7620_v63 = vadd.f32 %v13507_v9, %v15883_v3 }
 0xf36   :  { %v7705_v40 = vshll.u32 %v12874_v8, 16 }
 0xf37   :  { %v7704_v22 = vrot.slane %v7702_v20, 7  ;;  %v7710_v23 = vshrl.u32 %v12875_v21, 16  ;;  %v7680_v51 = vmul.f32 %v12475_v49, %v15905_v12  ;;  %v15910_v15 = vadd.f32 %v15889_v35, %v7620_v63  ;;  %v7759_v20 = vld [vmem:[#allocation2 + $0x10] sm:$0x3] }
 0xf38   :  { %v7713_v52 = vshll.u32 %v12875_v21, 16 }
 0xf39   :  { %v7707_v27 = vor.u32 %v7705_v40, %v7704_v22  ;;  %v7712_v11 = vrot.slane %v7710_v23, 7  ;;  %v7688_v48 = vadd.f32 %v12476_v56, %v7680_v51  ;;  %v7708_v30 = vrot.slane %v7704_v22, 4 }
 0xf3a   :  { %v7681_v32 = vmul.f32 %v12475_v49, %v15910_v15 }
 0xf3b   :  { %v7722_v7 = vsel %vm15464_vm3, %v7707_v27, %v7721_v62  ;;  %v7715_v3 = vor.u32 %v7713_v52, %v7712_v11  ;;  %v7717_v31 = vrot.slane %v7712_v11, 4  ;;  %v7692_v34 = vmax.f32 %v7688_v48, 0.0 }
 0xf3c   :  { %7723 = vst [vmem:[#allocation2] sm:$0xf] %v7722_v7  ;;  %v7689_v4 = vadd.f32 %v12476_v56, %v7681_v32 }
 0xf3d   :  { %v7716_v35 = vsel %vm15458_vm15, %v7708_v30, %v7715_v3  ;;  %v7726_v44 = vsel %vm15417_vm6, %v7717_v31, %v7725_v36  ;;  %v12876_v38 = vpack.c.bf16 %v7692_v34, %v7692_v34 }
 0xf3e   :  { %7724 = vst [vmem:[#allocation2 + $0x4] sm:$0xf] %v7716_v35  ;;  %7727 = vst [vmem:[#allocation2 + $0x8] sm:$0x1] %v7726_v44  ;;  %v7693_v1 = vmax.f32 %v7689_v4, 0.0 }
 0xf3f   :  { %v7734_v39 = vshrl.u32 %v12876_v38, 16  ;;  %v7737_v29 = vshll.u32 %v12876_v38, 16 }
 0xf40   :  { %v12877_v33 = vpack.c.bf16 %v7693_v1, %v7693_v1 }
 0xf41   :  { %v7736_v5 = vrot.slane %v7734_v39, 6  ;;  %v7739_v43 = vrot.slane %v7737_v29, 7 }
 0xf42   :  { %v7743_v45 = vshrl.u32 %v12877_v33, 16  ;;  %v7746_v49 = vshll.u32 %v12877_v33, 16 }
 0xf43   :  { %v7740_v55 = vor.u32 %v7739_v43, %v7736_v5 }
 0xf44   :  { %v7745_v56 = vrot.slane %v7743_v45, 6  ;;  %v7748_v59 = vrot.slane %v7746_v49, 7 }
 0xf45   :  { %v7741_v60 = vrot.slane %v7740_v55, 4  ;;  %v7756_v41 = vsel %vm15470_vm0, %v7740_v55, %v7755_v57  ;;  %v14837_v0 = vld [vmem:[#allocation2] sm:$0xff]   ;;  %v14833_v42 = vld [vmem:[#allocation2 + $0x8] ss:$0 sps:$4 sm:$0x11]  }
 0xf46   :  { %7757 = vst [vmem:[#allocation2 + $0x8] sm:$0xe] %v7756_v41  ;;  %v7749_v25 = vor.u32 %v7748_v59, %v7745_v56  ;;  %v14832_v53 = vld [vmem:[#allocation2] sm:$0xfe]   ;;  %v7785_v18 = vshll.u32 %v14837_v0, 16  ;;  %v7808_v61 = vrot.slane %v14833_v42, 1 }
 0xf47   :  { %v7807_v10 = vrot.slane %v14832_v53, 1  ;;  %v14838_v9 = vld [vmem:[#allocation2 + $0x8] ss:$0 sps:$4 sm:$0x11]   ;;  %v7783_v21 = vshrl.u32 %v14837_v0, 16  ;;  %v14839_v52 = vld [vmem:[#allocation2] sm:$0xff]  }
 0xf48   :  { %v7750_v19 = vsel %vm15476_vm1, %v7741_v60, %v7749_v25  ;;  %v7751_v8 = vrot.slane %v7749_v25, 4  ;;  %v7787_v63 = vrot.slane %v7785_v18, 1  ;;  %v7790_v23 = vshll.u32 %v14838_v9, 16  ;;  %v14847_v56 = vld [vmem:[#allocation8 + $0xac0] sm:$0xff]   ;;  %v14849_v60 = vld [vmem:[#allocation8 + $0xac8] sm:$0xff]   ;;  %v14852_v25 = vld [vmem:[#allocation8 + $0xad0] sm:$0xff]  }
 0xf49   :  { %7758 = vst [vmem:[#allocation2 + $0xc] sm:$0xf] %v7750_v19  ;;  %v7809_v40 = vsel %vm281_vm2, %v7807_v10, %v7808_v61  ;;  %13556 = vmatprep.subr.bf16.mxu1 %v14847_v56  ;;  %v14848_v59 = vld [vmem:[#allocation8 + $0xa80] sm:$0xff]   ;;  %v14851_v0 = vld [vmem:[#allocation8 + $0xa88] sm:$0xff]   ;;  %v14854_v42 = vld [vmem:[#allocation8 + $0xa90] sm:$0xff]  }
 0xf4a   :  { %v7760_v22 = vsel %vm15490_vm4, %v7751_v8, %v7759_v20  ;;  %14164 = vmatprep.mubr.bf16.mxu0 %v7809_v40  ;;  %v7788_v51 = vor.u32 %v7787_v63, %v7783_v21  ;;  %v7792_v27 = vrot.slane %v7790_v23, 1  ;;  %v14850_v41 = vld [vmem:[#allocation8 + $0xb00] sm:$0xff]   ;;  %v14853_v53 = vld [vmem:[#allocation8 + $0xb08] sm:$0xff]   ;;  %v14855_v18 = vld [vmem:[#allocation8 + $0xad8] sm:$0xff]  }
 0xf4b   :  { %7761 = vst [vmem:[#allocation2 + $0x10] sm:$0x3] %v7760_v22  ;;  %14168 = vmatprep.subr.bf16.mxu0 %v14850_v41  ;;  %v14856_v19 = vld [vmem:[#allocation8 + $0xb10] sm:$0xff]   ;;  %v14857_v8 = vld [vmem:[#allocation8 + $0xa98] sm:$0xff]   ;;  %v14858_v10 = vld [vmem:[#allocation8 + $0xae0] sm:$0xff]  }
 0xf4c   :  { %v7793_v11 = vsel %vm255_vm5, %v7788_v51, %v7792_v27  ;;  %v14859_v61 = vld [vmem:[#allocation8 + $0xb18] sm:$0xff]   ;;  %v14860_v9 = vld [vmem:[#allocation8 + $0xaa0] sm:$0xff]   ;;  %v14861_v20 = vld [vmem:[#allocation8 + $0xae8] sm:$0xff]  }
 0xf4d   :  { %8105 = vmatprep.mubr.bf16.mxu1 %v7793_v11  ;;  %v14862_v21 = vld [vmem:[#allocation8 + $0xb20] sm:$0xff]   ;;  %v14863_v63 = vld [vmem:[#allocation8 + $0xaa8] sm:$0xff]   ;;  %v14864_v22 = vld [vmem:[#allocation8 + $0xaf0] sm:$0xff]  }
 0xf4e   :  { %8106 = vmatmul.mubr.bf16.vlgmr.msra.gmra.mrb[68].mxu1 %v14839_v52  ;;  %v14865_v40 = vld [vmem:[#allocation8 + $0xb28] sm:$0xff]   ;;  %v14866_v23 = vld [vmem:[#allocation8 + $0xab0] sm:$0xff]   ;;  %v14869_v51 = vld [vmem:[#allocation8 + $0xaf8] sm:$0xff]  }
 0xf4f   :  { %13557 = vmatpush3.bf16.msra.mxu1 %v14848_v59  ;;  %v14870_v27 = vld [vmem:[#allocation8 + $0xb30] sm:$0xff]   ;;  %v14871_v11 = vld [vmem:[#allocation8 + $0xab8] sm:$0xff]  }
 0xf50   :  { %v14841_v48 = vld [vmem:[#allocation2 + $0x8] sm:$0xfc]   ;;  %13558 = vmatprep.subr.bf16.mxu1 %v14849_v60  ;;  %v14875_v52 = vld [vmem:[#allocation8 + $0xb38] sm:$0xff]  }
 0xf51   :  { %v14843_v30 = vld [vmem:[#allocation2 + $0x8] sm:$0xfe]   ;;  %v7869_v3 = vrot.slane %v14841_v48, 2 }
 0xf52   :  { %v14842_v62 = vld [vmem:[#allocation2 + $0x10] ss:$0 sps:$4 sm:$0x33]   ;;  %v7840_v7 = vshrl.u32 %v14843_v30, 16  ;;  %v7843_v34 = vshll.u32 %v14843_v30, 16 }
 0xf53   :  { %v14844_v32 = vld [vmem:[#allocation2 + $0x10] ss:$0 sps:$4 sm:$0x33]   ;;  %v7870_v31 = vrot.slane %v14842_v62, 2  ;;  %v14845_v39 = vld [vmem:[#allocation2 + $0x8] sm:$0xfe]   ;;  %13559 = vmatpush3.bf16.msra.mxu1 %v14851_v0 }
 0xf54   :  { %v7842_v36 = vrot.slane %v7840_v7, 1  ;;  %v7848_v4 = vshrl.u32 %v14844_v32, 16  ;;  %v7851_v35 = vshll.u32 %v14844_v32, 16  ;;  %v14846_v44 = vld [vmem:[#allocation2 + $0x10] ss:$0 sps:$4 sm:$0x11]   ;;  %13560 = vmatprep.subr.bf16.mxu1 %v14852_v25 }
 0xf55   :  { %v7871_v38 = vsel %vm345_vm7, %v7869_v3, %v7870_v31  ;;  %v7845_v1 = vrot.slane %v7843_v34, 2  ;;  %v7824_v5 = vrot.slane %v14846_v44, 1  ;;  %v7823_v49 = vrot.slane %v14845_v39, 1  ;;  %v12517_v44 = vld [vmem:[#allocation6 + $0xe] ss:$0 sm:$0xff] }
 0xf56   :  { %14165 = vmatmul.mubr.bf16.vlgmr.msra.gmra.mrb[124].mxu0 %v7871_v38  ;;  %v7850_v29 = vrot.slane %v7848_v4, 1  ;;  %v7853_v33 = vrot.slane %v7851_v35, 2 }
 0xf57   :  { %v7846_v43 = vor.u32 %v7845_v1, %v7842_v36  ;;  %v7825_v57 = vsel %vm281_vm2, %v7823_v49, %v7824_v5  ;;  %14169 = vmatpush3.bf16.msra.mxu0 %v14850_v41  ;;  %13561 = vmatpush3.bf16.msra.mxu1 %v14854_v42  ;;  %v12516_v36 = vld [vmem:[#allocation4 + $0xe] ss:$0 sm:$0xff] }
 0xf58   :  { %v7854_v45 = vor.u32 %v7853_v33, %v7850_v29  ;;  %14170 = vmatprep.subr.bf16.mxu0 %v14853_v53  ;;  %13562 = vmatprep.subr.bf16.mxu1 %v14855_v18 }
 0xf5a   :  { %v7855_v55 = vsel %vm314_vm8, %v7846_v43, %v7854_v45 }
 0xf5b   :  { %8113 = vmatprep.mubr.bf16.mxu1 %v7855_v55  ;;  %14171 = vmatpush3.bf16.msra.mxu0 %v14853_v53 }
 0xf5c   :  { %8114 = vmatmul.mubr.bf16.gmra.mrb[72].mxu1 %v7825_v57  ;;  %14172 = vmatprep.subr.bf16.mxu0 %v14856_v19 }
 0xf5d   :  { %13563 = vmatpush3.bf16.msra.mxu1 %v14857_v8 }
 0xf5e   :  { %13564 = vmatprep.subr.bf16.mxu1 %v14858_v10 }
 0xf5f   :  { %14173 = vmatpush3.bf16.msra.mxu0 %v14856_v19 }
 0xf60   :  { %14174 = vmatprep.subr.bf16.mxu0 %v14859_v61 }
 0xf61   :  { %13565 = vmatpush3.bf16.msra.mxu1 %v14860_v9 }
 0xf62   :  { %13566 = vmatprep.subr.bf16.mxu1 %v14861_v20 }
 0xf63   :  { %14175 = vmatpush3.bf16.msra.mxu0 %v14859_v61 }
 0xf64   :  { %14176 = vmatprep.subr.bf16.mxu0 %v14862_v21 }
 0xf65   :  { %13567 = vmatpush3.bf16.msra.mxu1 %v14863_v63 }
 0xf66   :  { %13568 = vmatprep.subr.bf16.mxu1 %v14864_v22 }
 0xf67   :  { %14177 = vmatpush3.bf16.msra.mxu0 %v14862_v21 }
 0xf68   :  { %14178 = vmatprep.subr.bf16.mxu0 %v14865_v40 }
 0xf69   :  { %13569 = vmatpush3.bf16.msra.mxu1 %v14866_v23  ;;  %v8220_v23 = vld [vmem:[#allocation2] sm:$0xf] }
 0xf6a   :  { %13570 = vmatprep.subr.bf16.mxu1 %v14869_v51 }
 0xf6b   :  { %14179 = vmatpush3.bf16.msra.mxu0 %v14865_v40 }
 0xf6c   :  { %14180 = vmatprep.subr.bf16.mxu0 %v14870_v27 }
 0xf6d   :  { %13571 = vmatpush3.bf16.msra.mxu1 %v14871_v11 }
 0xf6f   :  { %14181 = vmatpush3.bf16.msra.mxu0 %v14870_v27 }
 0xf70   :  { %14182 = vmatprep.subr.bf16.mxu0 %v14875_v52 }
 0xf73   :  { %14183 = vmatpush3.bf16.msra.mxu0 %v14875_v52 }
0x1021   :  { %v13534_v48 = vpop.f32.mrb[68].mxu1 }
0x1022   :  { %v13535_v30 = vpop.f32.mrb[69].mxu1 }
0x1023   :  { %v13536_v62 = vadd.f32 %v13535_v30, %v13534_v48  ;;  %v13537_v32 = vpop.f32.mrb[70].mxu1  ;;  %v8224_v30 = vld [vmem:[#allocation2 + $0x8] sm:$0x1] }
0x1024   :  { %v13538_v7 = vpop.f32.mrb[71].mxu1 }
0x1025   :  { %v13539_v3 = vadd.f32 %v13538_v7, %v13537_v32 }
0x1029   :  { %v14166_v31 = vpop.f32.mrb[124].mxu0 }
0x102a   :  { %v8156_v34 = vpop.f32.mrb[125].mxu0 }
0x102b   :  { %v8157_v4 = vadd.f32 %v13536_v62, %v8156_v34  ;;  %v14167_v35 = vpop.f32.mrb[126].mxu0 }
0x102c   :  { %v8159_v38 = vpop.f32.mrb[127].mxu0 }
0x102d   :  { %v8177_v1 = vmul.f32 %v12516_v36, %v8157_v4  ;;  %v8160_v39 = vadd.f32 %v13539_v3, %v8159_v38 }
0x102f   :  { %v8185_v29 = vadd.f32 %v12517_v44, %v8177_v1  ;;  %v8178_v33 = vmul.f32 %v12516_v36, %v8160_v39  ;;  %v13540_v5 = vpop.f32.mrb[72].mxu1  ;;  %v8254_v1 = vld [vmem:[#allocation2 + $0x8] sm:$0xe] }
0x1030   :  { %v13541_v43 = vpop.f32.mrb[73].mxu1 }
0x1031   :  { %v8189_v45 = vmax.f32 %v8185_v29, 0.0  ;;  %v8186_v49 = vadd.f32 %v12517_v44, %v8178_v33  ;;  %v13542_v55 = vadd.f32 %v13541_v43, %v13540_v5  ;;  %v13543_v57 = vpop.f32.mrb[74].mxu1 }
0x1032   :  { %v13544_v56 = vpop.f32.mrb[75].mxu1 }
0x1033   :  { %v12878_v59 = vpack.c.bf16 %v8189_v45, %v8189_v45  ;;  %v8190_v60 = vmax.f32 %v8186_v49, 0.0  ;;  %v8165_v41 = vadd.f32 %v14166_v31, %v13542_v55  ;;  %v13545_v0 = vadd.f32 %v13544_v56, %v13543_v57  ;;  %v8258_v45 = vld [vmem:[#allocation2 + $0x10] sm:$0x3] }
0x1035   :  { %v8201_v25 = vshrl.u32 %v12878_v59, 16  ;;  %v12879_v53 = vpack.c.bf16 %v8190_v60, %v8190_v60  ;;  %v8179_v42 = vmul.f32 %v12516_v36, %v8165_v41  ;;  %v8168_v18 = vadd.f32 %v14167_v35, %v13545_v0 }
0x1036   :  { %v8204_v8 = vshll.u32 %v12878_v59, 16 }
0x1037   :  { %v8203_v19 = vrot.slane %v8201_v25, 7  ;;  %v8209_v10 = vshrl.u32 %v12879_v53, 16  ;;  %v8187_v61 = vadd.f32 %v12517_v44, %v8179_v42  ;;  %v8180_v9 = vmul.f32 %v12516_v36, %v8168_v18 }
0x1038   :  { %v8212_v63 = vshll.u32 %v12879_v53, 16 }
0x1039   :  { %v8206_v20 = vor.u32 %v8204_v8, %v8203_v19  ;;  %v8211_v21 = vrot.slane %v8209_v10, 7  ;;  %v8191_v22 = vmax.f32 %v8187_v61, 0.0  ;;  %v8207_v40 = vrot.slane %v8203_v19, 4 }
0x103a   :  { %v8188_v51 = vadd.f32 %v12517_v44, %v8180_v9 }
0x103b   :  { %v8221_v27 = vsel %vm15464_vm3, %v8206_v20, %v8220_v23  ;;  %v8214_v11 = vor.u32 %v8212_v63, %v8211_v21  ;;  %v8216_v52 = vrot.slane %v8211_v21, 4  ;;  %v12880_v48 = vpack.c.bf16 %v8191_v22, %v8191_v22 }
0x103c   :  { %8222 = vst [vmem:[#allocation2] sm:$0xf] %v8221_v27  ;;  %v8192_v62 = vmax.f32 %v8188_v51, 0.0 }
0x103d   :  { %v8215_v32 = vsel %vm15458_vm15, %v8207_v40, %v8214_v11  ;;  %v8225_v7 = vsel %vm15417_vm6, %v8216_v52, %v8224_v30  ;;  %v8233_v3 = vshrl.u32 %v12880_v48, 16  ;;  %v8236_v31 = vshll.u32 %v12880_v48, 16 }
0x103e   :  { %8223 = vst [vmem:[#allocation2 + $0x4] sm:$0xf] %v8215_v32  ;;  %8226 = vst [vmem:[#allocation2 + $0x8] sm:$0x1] %v8225_v7  ;;  %v12881_v34 = vpack.c.bf16 %v8192_v62, %v8192_v62 }
0x103f   :  { %v8235_v36 = vrot.slane %v8233_v3, 6  ;;  %v8238_v4 = vrot.slane %v8236_v31, 7 }
0x1040   :  { %v8242_v35 = vshrl.u32 %v12881_v34, 16  ;;  %v8245_v44 = vshll.u32 %v12881_v34, 16 }
0x1041   :  { %v8239_v38 = vor.u32 %v8238_v4, %v8235_v36 }
0x1042   :  { %v8244_v39 = vrot.slane %v8242_v35, 6  ;;  %v8247_v29 = vrot.slane %v8245_v44, 7 }
0x1043   :  { %v8240_v33 = vrot.slane %v8239_v38, 4  ;;  %v8255_v5 = vsel %vm15470_vm0, %v8239_v38, %v8254_v1 }
0x1044   :  { %8256 = vst [vmem:[#allocation2 + $0x8] sm:$0xe] %v8255_v5  ;;  %v8248_v43 = vor.u32 %v8247_v29, %v8244_v39  ;;  %v14882_v39 = vld [vmem:[#allocation8 + $0xb80] sm:$0xff]   ;;  %v14885_v5 = vld [vmem:[#allocation8 + $0xb48] sm:$0xff]  }
0x1045   :  { %v14867_v49 = vld [vmem:[#allocation2] sm:$0xfe]   ;;  %v14868_v56 = vld [vmem:[#allocation2 + $0x8] ss:$0 sps:$4 sm:$0x11]   ;;  %13594 = vmatprep.subr.bf16.mxu1 %v14882_v39 }
0x1046   :  { %v8249_v55 = vsel %vm15476_vm1, %v8240_v33, %v8248_v43  ;;  %v8250_v57 = vrot.slane %v8248_v43, 4  ;;  %v8306_v59 = vrot.slane %v14867_v49, 1  ;;  %v14872_v60 = vld [vmem:[#allocation2] sm:$0xff]   ;;  %v8307_v0 = vrot.slane %v14868_v56, 1  ;;  %v14884_v33 = vld [vmem:[#allocation8 + $0xb88] sm:$0xff]   ;;  %v14888_v49 = vld [vmem:[#allocation8 + $0xb50] sm:$0xff]  }
0x1047   :  { %8257 = vst [vmem:[#allocation2 + $0xc] sm:$0xf] %v8249_v55  ;;  %v14873_v25 = vld [vmem:[#allocation2 + $0x8] ss:$0 sps:$4 sm:$0x11]   ;;  %v8284_v53 = vshll.u32 %v14872_v60, 16 }
0x1048   :  { %v8259_v41 = vsel %vm15490_vm4, %v8250_v57, %v8258_v45  ;;  %v8308_v42 = vsel %vm281_vm2, %v8306_v59, %v8307_v0  ;;  %v8289_v18 = vshll.u32 %v14873_v25, 16  ;;  %v8282_v19 = vshrl.u32 %v14872_v60, 16  ;;  %v14874_v21 = vld [vmem:[#allocation2] sm:$0xff]   ;;  %v14887_v45 = vld [vmem:[#allocation8 + $0xb90] sm:$0xff]   ;;  %v14889_v55 = vld [vmem:[#allocation8 + $0xbc8] sm:$0xff]  }
0x1049   :  { %8260 = vst [vmem:[#allocation2 + $0x10] sm:$0x3] %v8259_v41  ;;  %14184 = vmatprep.mubr.bf16.mxu0 %v8308_v42  ;;  %v8286_v8 = vrot.slane %v8284_v53, 1  ;;  %v14883_v29 = vld [vmem:[#allocation8 + $0xb40] sm:$0xff]   ;;  %v14890_v57 = vld [vmem:[#allocation8 + $0xb98] sm:$0xff]   ;;  %v14892_v59 = vld [vmem:[#allocation8 + $0xbd0] sm:$0xff]  }
0x104a   :  { %v8291_v61 = vrot.slane %v8289_v18, 1  ;;  %v14886_v43 = vld [vmem:[#allocation8 + $0xbc0] sm:$0xff]   ;;  %v14891_v56 = vld [vmem:[#allocation8 + $0xb58] sm:$0xff]   ;;  %v14896_v25 = vld [vmem:[#allocation8 + $0xba8] sm:$0xff]  }
0x104b   :  { %v8287_v10 = vor.u32 %v8286_v8, %v8282_v19  ;;  %14188 = vmatprep.subr.bf16.mxu0 %v14886_v43  ;;  %v14893_v60 = vld [vmem:[#allocation8 + $0xba0] sm:$0xff]   ;;  %v14895_v0 = vld [vmem:[#allocation8 + $0xbd8] sm:$0xff]   ;;  %v14897_v53 = vld [vmem:[#allocation8 + $0xb68] sm:$0xff]  }
0x104c   :  { %v14894_v41 = vld [vmem:[#allocation8 + $0xb60] sm:$0xff]   ;;  %v14899_v18 = vld [vmem:[#allocation8 + $0xbb0] sm:$0xff]   ;;  %v14901_v8 = vld [vmem:[#allocation8 + $0xbe8] sm:$0xff]  }
0x104d   :  { %v8292_v20 = vsel %vm255_vm5, %v8287_v10, %v8291_v61  ;;  %v14898_v42 = vld [vmem:[#allocation8 + $0xbe0] sm:$0xff]   ;;  %v14900_v19 = vld [vmem:[#allocation8 + $0xb70] sm:$0xff]   ;;  %v14904_v10 = vld [vmem:[#allocation8 + $0xbb8] sm:$0xff]  }
0x104e   :  { %v14876_v9 = vld [vmem:[#allocation2 + $0x8] sm:$0xfc]   ;;  %8604 = vmatprep.mubr.bf16.mxu1 %v8292_v20  ;;  %v14905_v61 = vld [vmem:[#allocation8 + $0xb78] sm:$0xff]  }
0x104f   :  { %v14878_v63 = vld [vmem:[#allocation2 + $0x8] sm:$0xfe]   ;;  %8605 = vmatmul.mubr.bf16.vlgmr.msra.gmra.mrb[76].mxu1 %v14874_v21  ;;  %v8368_v51 = vrot.slane %v14876_v9, 2  ;;  %v14906_v9 = vld [vmem:[#allocation8 + $0xbf0] sm:$0xff]   ;;  %v14910_v20 = vld [vmem:[#allocation8 + $0xbf8] sm:$0xff]  }
0x1050   :  { %v14877_v22 = vld [vmem:[#allocation2 + $0x10] ss:$0 sps:$4 sm:$0x33]   ;;  %v8339_v23 = vshrl.u32 %v14878_v63, 16  ;;  %v8342_v11 = vshll.u32 %v14878_v63, 16  ;;  %13595 = vmatpush3.bf16.msra.mxu1 %v14883_v29 }
0x1051   :  { %v14879_v40 = vld [vmem:[#allocation2 + $0x10] ss:$0 sps:$4 sm:$0x33]   ;;  %v8369_v27 = vrot.slane %v14877_v22, 2  ;;  %v14880_v3 = vld [vmem:[#allocation2 + $0x8] sm:$0xfe]   ;;  %13596 = vmatprep.subr.bf16.mxu1 %v14884_v33 }
0x1052   :  { %v8341_v52 = vrot.slane %v8339_v23, 1  ;;  %v8347_v48 = vshrl.u32 %v14879_v40, 16  ;;  %v8350_v30 = vshll.u32 %v14879_v40, 16  ;;  %v14881_v62 = vld [vmem:[#allocation2 + $0x10] ss:$0 sps:$4 sm:$0x11]  }
0x1053   :  { %v8370_v32 = vsel %vm345_vm7, %v8368_v51, %v8369_v27  ;;  %v8344_v7 = vrot.slane %v8342_v11, 2  ;;  %v8323_v36 = vrot.slane %v14881_v62, 1  ;;  %v8322_v44 = vrot.slane %v14880_v3, 1 }
0x1054   :  { %14185 = vmatmul.mubr.bf16.vlgmr.msra.gmra.mrb[128].mxu0 %v8370_v32  ;;  %v8349_v31 = vrot.slane %v8347_v48, 1  ;;  %v8352_v34 = vrot.slane %v8350_v30, 2  ;;  %13597 = vmatpush3.bf16.msra.mxu1 %v14885_v5  ;;  %v12557_v48 = vld [vmem:[#allocation4 + $0xf] ss:$0 sm:$0xff] }
0x1055   :  { %v8345_v4 = vor.u32 %v8344_v7, %v8341_v52  ;;  %v8324_v1 = vsel %vm281_vm2, %v8322_v44, %v8323_v36  ;;  %14189 = vmatpush3.bf16.msra.mxu0 %v14886_v43  ;;  %13598 = vmatprep.subr.bf16.mxu1 %v14887_v45  ;;  %v12558_v7 = vld [vmem:[#allocation6 + $0xf] ss:$0 sm:$0xff] }
0x1056   :  { %v8353_v35 = vor.u32 %v8352_v34, %v8349_v31  ;;  %14190 = vmatprep.subr.bf16.mxu0 %v14889_v55 }
0x1058   :  { %v8354_v38 = vsel %vm314_vm8, %v8345_v4, %v8353_v35  ;;  %13599 = vmatpush3.bf16.msra.mxu1 %v14888_v49 }
0x1059   :  { %8612 = vmatprep.mubr.bf16.mxu1 %v8354_v38  ;;  %14191 = vmatpush3.bf16.msra.mxu0 %v14889_v55 }
0x105a   :  { %8613 = vmatmul.mubr.bf16.gmra.mrb[80].mxu1 %v8324_v1  ;;  %13600 = vmatprep.subr.bf16.mxu1 %v14890_v57 }
0x105b   :  { %14192 = vmatprep.subr.bf16.mxu0 %v14892_v59 }
0x105c   :  { %13601 = vmatpush3.bf16.msra.mxu1 %v14891_v56 }
0x105d   :  { %14193 = vmatpush3.bf16.msra.mxu0 %v14892_v59  ;;  %13602 = vmatprep.subr.bf16.mxu1 %v14893_v60 }
0x105e   :  { %14194 = vmatprep.subr.bf16.mxu0 %v14895_v0 }
0x1060   :  { %13603 = vmatpush3.bf16.msra.mxu1 %v14894_v41 }
0x1061   :  { %14195 = vmatpush3.bf16.msra.mxu0 %v14895_v0  ;;  %13604 = vmatprep.subr.bf16.mxu1 %v14896_v25 }
0x1062   :  { %14196 = vmatprep.subr.bf16.mxu0 %v14898_v42 }
0x1064   :  { %13605 = vmatpush3.bf16.msra.mxu1 %v14897_v53 }
0x1065   :  { %14197 = vmatpush3.bf16.msra.mxu0 %v14898_v42  ;;  %13606 = vmatprep.subr.bf16.mxu1 %v14899_v18 }
0x1066   :  { %14198 = vmatprep.subr.bf16.mxu0 %v14901_v8 }
0x1068   :  { %13607 = vmatpush3.bf16.msra.mxu1 %v14900_v19 }
0x1069   :  { %13608 = vmatprep.subr.bf16.mxu1 %v14904_v10  ;;  %14199 = vmatpush3.bf16.msra.mxu0 %v14901_v8  ;;  %v8719_v8 = vld [vmem:[#allocation2] sm:$0xf] }
0x106a   :  { %14200 = vmatprep.subr.bf16.mxu0 %v14906_v9 }
0x106c   :  { %13609 = vmatpush3.bf16.msra.mxu1 %v14905_v61 }
0x106d   :  { %14201 = vmatpush3.bf16.msra.mxu0 %v14906_v9 }
0x106e   :  { %14202 = vmatprep.subr.bf16.mxu0 %v14910_v20 }
0x1071   :  { %14203 = vmatpush3.bf16.msra.mxu0 %v14910_v20 }
0x1122   :  { %v13572_v21 = vpop.f32.mrb[76].mxu1 }
0x1123   :  { %v13573_v63 = vpop.f32.mrb[77].mxu1 }
0x1124   :  { %v13574_v22 = vadd.f32 %v13573_v63, %v13572_v21  ;;  %v13575_v40 = vpop.f32.mrb[78].mxu1 }
0x1125   :  { %v13576_v23 = vpop.f32.mrb[79].mxu1 }
0x1126   :  { %v13577_v51 = vadd.f32 %v13576_v23, %v13575_v40  ;;  %v8607_v11 = vadd.f32 %v13574_v22, %v15895_v54  ;;  %v8723_v22 = vld [vmem:[#allocation2 + $0x8] sm:$0x1] }
0x1127   :  { %v14186_v27 = vpop.f32.mrb[128].mxu0 }
0x1128   :  { %v8655_v52 = vpop.f32.mrb[129].mxu0  ;;  %v8610_v32 = vadd.f32 %v13577_v51, %v15900_v58 }
0x1129   :  { %v15948_v30 = vadd.f32 %v8655_v52, %v8607_v11  ;;  %v14187_v62 = vpop.f32.mrb[130].mxu0 }
0x112a   :  { %v8658_v3 = vpop.f32.mrb[131].mxu0 }
0x112b   :  { %v8676_v31 = vmul.f32 %v12557_v48, %v15948_v30  ;;  %v15952_v34 = vadd.f32 %v8658_v3, %v8610_v32 }
0x112d   :  { %v8684_v36 = vadd.f32 %v12558_v7, %v8676_v31  ;;  %v8677_v4 = vmul.f32 %v12557_v48, %v15952_v34  ;;  %v13578_v35 = vpop.f32.mrb[80].mxu1 }
0x112e   :  { %v13579_v44 = vpop.f32.mrb[81].mxu1 }
0x112f   :  { %v8688_v38 = vmax.f32 %v8684_v36, 0.0  ;;  %v8685_v1 = vadd.f32 %v12558_v7, %v8677_v4  ;;  %v13581_v39 = vpop.f32.mrb[82].mxu1  ;;  %v13580_v29 = vadd.f32 %v13579_v44, %v13578_v35  ;;  %v8753_v44 = vld [vmem:[#allocation2 + $0x8] sm:$0xe] }
0x1130   :  { %v13582_v33 = vpop.f32.mrb[83].mxu1 }
0x1131   :  { %v12882_v5 = vpack.c.bf16 %v8688_v38, %v8688_v38  ;;  %v8689_v43 = vmax.f32 %v8685_v1, 0.0  ;;  %v13583_v45 = vadd.f32 %v13582_v33, %v13581_v39  ;;  %v8615_v49 = vadd.f32 %v13580_v29, %v15905_v12 }
0x1133   :  { %v8700_v55 = vshrl.u32 %v12882_v5, 16  ;;  %v12883_v57 = vpack.c.bf16 %v8689_v43, %v8689_v43  ;;  %v15956_v56 = vadd.f32 %v14186_v27, %v8615_v49  ;;  %v8618_v59 = vadd.f32 %v13583_v45, %v15910_v15 }
0x1134   :  { %v8703_v41 = vshll.u32 %v12882_v5, 16 }
0x1135   :  { %v8702_v60 = vrot.slane %v8700_v55, 7  ;;  %v8708_v0 = vshrl.u32 %v12883_v57, 16  ;;  %v8678_v25 = vmul.f32 %v12557_v48, %v15956_v56  ;;  %v15960_v53 = vadd.f32 %v14187_v62, %v8618_v59 }
0x1136   :  { %v8711_v19 = vshll.u32 %v12883_v57, 16 }
0x1137   :  { %v8705_v42 = vor.u32 %v8703_v41, %v8702_v60  ;;  %v8710_v18 = vrot.slane %v8708_v0, 7  ;;  %v8686_v10 = vadd.f32 %v12558_v7, %v8678_v25  ;;  %v8679_v61 = vmul.f32 %v12557_v48, %v15960_v53 }
0x1138   :  { %v8706_v9 = vrot.slane %v8702_v60, 4  ;;  %v8757_v60 = vld [vmem:[#allocation2 + $0x10] sm:$0x3] }
0x1139   :  { %v8720_v20 = vsel %vm15464_vm3, %v8705_v42, %v8719_v8  ;;  %v8713_v21 = vor.u32 %v8711_v19, %v8710_v18  ;;  %v8715_v63 = vrot.slane %v8710_v18, 4  ;;  %v8690_v40 = vmax.f32 %v8686_v10, 0.0 }
0x113a   :  { %8721 = vst [vmem:[#allocation2] sm:$0xf] %v8720_v20  ;;  %v8687_v23 = vadd.f32 %v12558_v7, %v8679_v61 }
0x113b   :  { %v8714_v51 = vsel %vm15458_vm15, %v8706_v9, %v8713_v21  ;;  %v8724_v27 = vsel %vm15417_vm6, %v8715_v63, %v8723_v22  ;;  %v12884_v11 = vpack.c.bf16 %v8690_v40, %v8690_v40 }
0x113c   :  { %8722 = vst [vmem:[#allocation2 + $0x4] sm:$0xf] %v8714_v51  ;;  %8725 = vst [vmem:[#allocation2 + $0x8] sm:$0x1] %v8724_v27  ;;  %v8691_v52 = vmax.f32 %v8687_v23, 0.0 }
0x113d   :  { %v8732_v48 = vshrl.u32 %v12884_v11, 16  ;;  %v8735_v62 = vshll.u32 %v12884_v11, 16 }
0x113e   :  { %v12885_v32 = vpack.c.bf16 %v8691_v52, %v8691_v52 }
0x113f   :  { %v8734_v3 = vrot.slane %v8732_v48, 6  ;;  %v8737_v31 = vrot.slane %v8735_v62, 7 }
0x1140   :  { %v8741_v36 = vshrl.u32 %v12885_v32, 16  ;;  %v8744_v4 = vshll.u32 %v12885_v32, 16 }
0x1141   :  { %v8738_v35 = vor.u32 %v8737_v31, %v8734_v3 }
0x1142   :  { %v8743_v7 = vrot.slane %v8741_v36, 6  ;;  %v8746_v38 = vrot.slane %v8744_v4, 7 }
0x1143   :  { %v14902_v1 = vld [vmem:[#allocation2] sm:$0xfe]   ;;  %v8739_v39 = vrot.slane %v8738_v35, 4  ;;  %v8754_v29 = vsel %vm15470_vm0, %v8738_v35, %v8753_v44  ;;  %v14903_v5 = vld [vmem:[#allocation2 + $0x8] ss:$0 sps:$4 sm:$0x11]  }
0x1144   :  { %v8747_v33 = vor.u32 %v8746_v38, %v8743_v7  ;;  %8755 = vst [vmem:[#allocation2 + $0x8] sm:$0xe] %v8754_v29  ;;  %v8805_v43 = vrot.slane %v14902_v1, 1  ;;  %v14907_v45 = vld [vmem:[#allocation2] sm:$0xff]   ;;  %v8806_v57 = vrot.slane %v14903_v5, 1  ;;  %v14919_v5 = vld [vmem:[#allocation8 + $0xc48] sm:$0xff]  }
0x1145   :  { %v14908_v59 = vld [vmem:[#allocation2 + $0x8] ss:$0 sps:$4 sm:$0x11]   ;;  %v8783_v41 = vshll.u32 %v14907_v45, 16  ;;  %v8781_v18 = vshrl.u32 %v14907_v45, 16  ;;  %v14909_v9 = vld [vmem:[#allocation2] sm:$0xff]  }
0x1146   :  { %v8748_v49 = vsel %vm15476_vm1, %v8739_v39, %v8747_v33  ;;  %v8749_v55 = vrot.slane %v8747_v33, 4  ;;  %v8807_v25 = vsel %vm281_vm2, %v8805_v43, %v8806_v57  ;;  %v8788_v42 = vshll.u32 %v14908_v59, 16  ;;  %v14917_v29 = vld [vmem:[#allocation8 + $0xc40] sm:$0xff]   ;;  %v14921_v45 = vld [vmem:[#allocation8 + $0xc08] sm:$0xff]   ;;  %v14924_v57 = vld [vmem:[#allocation8 + $0xc10] sm:$0xff]  }
0x1147   :  { %8756 = vst [vmem:[#allocation2 + $0xc] sm:$0xf] %v8748_v49  ;;  %14204 = vmatprep.mubr.bf16.mxu0 %v8807_v25  ;;  %v8785_v19 = vrot.slane %v8783_v41, 1  ;;  %13632 = vmatprep.subr.bf16.mxu1 %v14917_v29  ;;  %v14918_v33 = vld [vmem:[#allocation8 + $0xc00] sm:$0xff]   ;;  %v14922_v49 = vld [vmem:[#allocation8 + $0xc50] sm:$0xff]   ;;  %v14925_v59 = vld [vmem:[#allocation8 + $0xc58] sm:$0xff]  }
0x1148   :  { %v8758_v0 = vsel %vm15490_vm4, %v8749_v55, %v8757_v60  ;;  %v8790_v10 = vrot.slane %v8788_v42, 1  ;;  %v14920_v43 = vld [vmem:[#allocation8 + $0xc80] sm:$0xff]   ;;  %v14923_v55 = vld [vmem:[#allocation8 + $0xc88] sm:$0xff]   ;;  %v14926_v60 = vld [vmem:[#allocation8 + $0xc90] sm:$0xff]  }
0x1149   :  { %8759 = vst [vmem:[#allocation2 + $0x10] sm:$0x3] %v8758_v0  ;;  %v8786_v8 = vor.u32 %v8785_v19, %v8781_v18  ;;  %14208 = vmatprep.subr.bf16.mxu0 %v14920_v43  ;;  %v14927_v41 = vld [vmem:[#allocation8 + $0xc18] sm:$0xff]   ;;  %v14928_v0 = vld [vmem:[#allocation8 + $0xc60] sm:$0xff]   ;;  %v14931_v18 = vld [vmem:[#allocation8 + $0xc68] sm:$0xff]  }
0x114a   :  { %v14929_v25 = vld [vmem:[#allocation8 + $0xc98] sm:$0xff]   ;;  %v14930_v42 = vld [vmem:[#allocation8 + $0xc20] sm:$0xff]  }
0x114b   :  { %v8791_v61 = vsel %vm255_vm5, %v8786_v8, %v8790_v10  ;;  %v14932_v19 = vld [vmem:[#allocation8 + $0xca0] sm:$0xff]   ;;  %v14933_v8 = vld [vmem:[#allocation8 + $0xc28] sm:$0xff]   ;;  %v14934_v10 = vld [vmem:[#allocation8 + $0xc70] sm:$0xff]  }
0x114c   :  { %9103 = vmatprep.mubr.bf16.mxu1 %v8791_v61  ;;  %v14935_v61 = vld [vmem:[#allocation8 + $0xca8] sm:$0xff]  }
0x114d   :  { %9104 = vmatmul.mubr.bf16.vlgmr.msra.gmra.mrb[84].mxu1 %v14909_v9  ;;  %v14936_v9 = vld [vmem:[#allocation8 + $0xc30] sm:$0xff]  }
0x114e   :  { %v14911_v20 = vld [vmem:[#allocation2 + $0x8] sm:$0xfc]   ;;  %13633 = vmatpush3.bf16.msra.mxu1 %v14918_v33 }
0x114f   :  { %v14913_v21 = vld [vmem:[#allocation2 + $0x8] sm:$0xfe]   ;;  %v8867_v23 = vrot.slane %v14911_v20, 2  ;;  %13634 = vmatprep.subr.bf16.mxu1 %v14919_v5  ;;  %v14939_v20 = vld [vmem:[#allocation8 + $0xc78] sm:$0xff]  }
0x1150   :  { %v14912_v63 = vld [vmem:[#allocation2 + $0x10] ss:$0 sps:$4 sm:$0x33]   ;;  %v8838_v40 = vshrl.u32 %v14913_v21, 16  ;;  %v8841_v27 = vshll.u32 %v14913_v21, 16  ;;  %v14940_v21 = vld [vmem:[#allocation8 + $0xcb0] sm:$0xff]  }
0x1151   :  { %v14914_v22 = vld [vmem:[#allocation2 + $0x10] ss:$0 sps:$4 sm:$0x33]   ;;  %v8868_v51 = vrot.slane %v14912_v63, 2  ;;  %v14915_v31 = vld [vmem:[#allocation2 + $0x8] sm:$0xfe]  }
0x1152   :  { %v8840_v11 = vrot.slane %v8838_v40, 1  ;;  %v8846_v52 = vshrl.u32 %v14914_v22, 16  ;;  %v8849_v48 = vshll.u32 %v14914_v22, 16  ;;  %v14916_v62 = vld [vmem:[#allocation2 + $0x10] ss:$0 sps:$4 sm:$0x11]   ;;  %13635 = vmatpush3.bf16.msra.mxu1 %v14921_v45 }
0x1153   :  { %v8869_v32 = vsel %vm345_vm7, %v8867_v23, %v8868_v51  ;;  %v8843_v3 = vrot.slane %v8841_v27, 2  ;;  %v8822_v35 = vrot.slane %v14916_v62, 1  ;;  %v8821_v38 = vrot.slane %v14915_v31, 1  ;;  %13636 = vmatprep.subr.bf16.mxu1 %v14922_v49  ;;  %v14941_v63 = vld [vmem:[#allocation8 + $0xc38] sm:$0xff]  }
0x1154   :  { %14205 = vmatmul.mubr.bf16.vlgmr.msra.gmra.mrb[132].mxu0 %v8869_v32  ;;  %v8848_v36 = vrot.slane %v8846_v52, 1  ;;  %v8851_v4 = vrot.slane %v8849_v48, 2  ;;  %v14945_v22 = vld [vmem:[#allocation8 + $0xcb8] sm:$0xff]   ;;  %v12598_v32 = vld [vmem:[#allocation4 + $0x10] ss:$0 sm:$0xff] }
0x1155   :  { %v8844_v44 = vor.u32 %v8843_v3, %v8840_v11  ;;  %v8823_v39 = vsel %vm281_vm2, %v8821_v38, %v8822_v35  ;;  %14209 = vmatpush3.bf16.msra.mxu0 %v14920_v43 }
0x1156   :  { %v8852_v7 = vor.u32 %v8851_v4, %v8848_v36  ;;  %14210 = vmatprep.subr.bf16.mxu0 %v14923_v55  ;;  %13637 = vmatpush3.bf16.msra.mxu1 %v14924_v57  ;;  %v12599_v36 = vld [vmem:[#allocation6 + $0x10] ss:$0 sm:$0xff] }
0x1157   :  { %13638 = vmatprep.subr.bf16.mxu1 %v14925_v59 }
0x1158   :  { %v8853_v1 = vsel %vm314_vm8, %v8844_v44, %v8852_v7 }
0x1159   :  { %9111 = vmatprep.mubr.bf16.mxu1 %v8853_v1  ;;  %14211 = vmatpush3.bf16.msra.mxu0 %v14923_v55 }
0x115a   :  { %9112 = vmatmul.mubr.bf16.gmra.mrb[88].mxu1 %v8823_v39  ;;  %14212 = vmatprep.subr.bf16.mxu0 %v14926_v60 }
0x115b   :  { %13639 = vmatpush3.bf16.msra.mxu1 %v14927_v41 }
0x115c   :  { %13640 = vmatprep.subr.bf16.mxu1 %v14928_v0 }
0x115d   :  { %14213 = vmatpush3.bf16.msra.mxu0 %v14926_v60 }
0x115e   :  { %14214 = vmatprep.subr.bf16.mxu0 %v14929_v25 }
0x115f   :  { %13641 = vmatpush3.bf16.msra.mxu1 %v14930_v42 }
0x1160   :  { %13642 = vmatprep.subr.bf16.mxu1 %v14931_v18 }
0x1161   :  { %14215 = vmatpush3.bf16.msra.mxu0 %v14929_v25 }
0x1162   :  { %14216 = vmatprep.subr.bf16.mxu0 %v14932_v19 }
0x1163   :  { %13643 = vmatpush3.bf16.msra.mxu1 %v14933_v8 }
0x1164   :  { %13644 = vmatprep.subr.bf16.mxu1 %v14934_v10 }
0x1165   :  { %14217 = vmatpush3.bf16.msra.mxu0 %v14932_v19 }
0x1166   :  { %14218 = vmatprep.subr.bf16.mxu0 %v14935_v61 }
0x1167   :  { %13645 = vmatpush3.bf16.msra.mxu1 %v14936_v9 }
0x1168   :  { %13646 = vmatprep.subr.bf16.mxu1 %v14939_v20 }
0x1169   :  { %14219 = vmatpush3.bf16.msra.mxu0 %v14935_v61 }
0x116a   :  { %14220 = vmatprep.subr.bf16.mxu0 %v14940_v21 }
0x116b   :  { %13647 = vmatpush3.bf16.msra.mxu1 %v14941_v63 }
0x116d   :  { %14221 = vmatpush3.bf16.msra.mxu0 %v14940_v21 }
0x116e   :  { %14222 = vmatprep.subr.bf16.mxu0 %v14945_v22 }
0x1171   :  { %14223 = vmatpush3.bf16.msra.mxu0 %v14945_v22  ;;  %v9218_v22 = vld [vmem:[#allocation2] sm:$0xf] }
0x1220   :  { %v13610_v40 = vpop.f32.mrb[84].mxu1 }
0x1221   :  { %v13611_v23 = vpop.f32.mrb[85].mxu1 }
0x1222   :  { %v13612_v51 = vadd.f32 %v13611_v23, %v13610_v40  ;;  %v13613_v27 = vpop.f32.mrb[86].mxu1 }
0x1223   :  { %v13614_v11 = vpop.f32.mrb[87].mxu1 }
0x1224   :  { %v13615_v52 = vadd.f32 %v13614_v11, %v13613_v27 }
0x1227   :  { %v14206_v48 = vpop.f32.mrb[132].mxu0 }
0x1228   :  { %v9154_v62 = vpop.f32.mrb[133].mxu0 }
0x1229   :  { %v9155_v3 = vadd.f32 %v13612_v51, %v9154_v62  ;;  %v14207_v31 = vpop.f32.mrb[134].mxu0 }
0x122a   :  { %v9157_v4 = vpop.f32.mrb[135].mxu0 }
0x122b   :  { %v9175_v35 = vmul.f32 %v12598_v32, %v9155_v3  ;;  %v9158_v44 = vadd.f32 %v13615_v52, %v9157_v4  ;;  %v9222_v52 = vld [vmem:[#allocation2 + $0x8] sm:$0x1] }
0x122d   :  { %v9183_v7 = vadd.f32 %v12599_v36, %v9175_v35  ;;  %v9176_v38 = vmul.f32 %v12598_v32, %v9158_v44  ;;  %v13616_v1 = vpop.f32.mrb[88].mxu1 }
0x122e   :  { %v13617_v39 = vpop.f32.mrb[89].mxu1 }
0x122f   :  { %v9187_v29 = vmax.f32 %v9183_v7, 0.0  ;;  %v9184_v33 = vadd.f32 %v12599_v36, %v9176_v38  ;;  %v13618_v5 = vadd.f32 %v13617_v39, %v13616_v1  ;;  %v13619_v43 = vpop.f32.mrb[90].mxu1  ;;  %v9252_v1 = vld [vmem:[#allocation2 + $0x8] sm:$0xe] }
0x1230   :  { %v13620_v45 = vpop.f32.mrb[91].mxu1 }
0x1231   :  { %v12886_v49 = vpack.c.bf16 %v9187_v29, %v9187_v29  ;;  %v9188_v55 = vmax.f32 %v9184_v33, 0.0  ;;  %v9163_v57 = vadd.f32 %v14206_v48, %v13618_v5  ;;  %v13621_v59 = vadd.f32 %v13620_v45, %v13619_v43  ;;  %v9256_v45 = vld [vmem:[#allocation2 + $0x10] sm:$0x3] }
0x1233   :  { %v9199_v60 = vshrl.u32 %v12886_v49, 16  ;;  %v12887_v41 = vpack.c.bf16 %v9188_v55, %v9188_v55  ;;  %v9177_v0 = vmul.f32 %v12598_v32, %v9163_v57  ;;  %v9166_v25 = vadd.f32 %v14207_v31, %v13621_v59 }
0x1234   :  { %v9202_v18 = vshll.u32 %v12886_v49, 16 }
0x1235   :  { %v9201_v42 = vrot.slane %v9199_v60, 7  ;;  %v9207_v19 = vshrl.u32 %v12887_v41, 16  ;;  %v9185_v8 = vadd.f32 %v12599_v36, %v9177_v0  ;;  %v9178_v10 = vmul.f32 %v12598_v32, %v9166_v25 }
0x1236   :  { %v9210_v20 = vshll.u32 %v12887_v41, 16 }
0x1237   :  { %v9204_v61 = vor.u32 %v9202_v18, %v9201_v42  ;;  %v9209_v9 = vrot.slane %v9207_v19, 7  ;;  %v9189_v21 = vmax.f32 %v9185_v8, 0.0  ;;  %v9205_v63 = vrot.slane %v9201_v42, 4 }
0x1238   :  { %v9186_v40 = vadd.f32 %v12599_v36, %v9178_v10 }
0x1239   :  { %v9219_v23 = vsel %vm15464_vm3, %v9204_v61, %v9218_v22  ;;  %v9212_v51 = vor.u32 %v9210_v20, %v9209_v9  ;;  %v9214_v27 = vrot.slane %v9209_v9, 4  ;;  %v12888_v11 = vpack.c.bf16 %v9189_v21, %v9189_v21 }
0x123a   :  { %9220 = vst [vmem:[#allocation2] sm:$0xf] %v9219_v23  ;;  %v9190_v48 = vmax.f32 %v9186_v40, 0.0 }
0x123b   :  { %v9213_v62 = vsel %vm15458_vm15, %v9205_v63, %v9212_v51  ;;  %v9223_v32 = vsel %vm15417_vm6, %v9214_v27, %v9222_v52  ;;  %v9231_v3 = vshrl.u32 %v12888_v11, 16  ;;  %v9234_v31 = vshll.u32 %v12888_v11, 16 }
0x123c   :  { %9221 = vst [vmem:[#allocation2 + $0x4] sm:$0xf] %v9213_v62  ;;  %9224 = vst [vmem:[#allocation2 + $0x8] sm:$0x1] %v9223_v32  ;;  %v12889_v36 = vpack.c.bf16 %v9190_v48, %v9190_v48 }
0x123d   :  { %v9233_v4 = vrot.slane %v9231_v3, 6  ;;  %v9236_v35 = vrot.slane %v9234_v31, 7 }
0x123e   :  { %v9240_v44 = vshrl.u32 %v12889_v36, 16  ;;  %v9243_v7 = vshll.u32 %v12889_v36, 16 }
0x123f   :  { %v9237_v38 = vor.u32 %v9236_v35, %v9233_v4 }
0x1240   :  { %v9242_v39 = vrot.slane %v9240_v44, 6  ;;  %v9245_v29 = vrot.slane %v9243_v7, 7 }
0x1241   :  { %v9238_v33 = vrot.slane %v9237_v38, 4  ;;  %v9253_v5 = vsel %vm15470_vm0, %v9237_v38, %v9252_v1 }
0x1242   :  { %9254 = vst [vmem:[#allocation2 + $0x8] sm:$0xe] %v9253_v5  ;;  %v9246_v43 = vor.u32 %v9245_v29, %v9242_v39 }
0x1243   :  { %v14937_v49 = vld [vmem:[#allocation2] sm:$0xfe]   ;;  %v14938_v59 = vld [vmem:[#allocation2 + $0x8] ss:$0 sps:$4 sm:$0x11]  }
0x1244   :  { %v9247_v55 = vsel %vm15476_vm1, %v9238_v33, %v9246_v43  ;;  %v9248_v57 = vrot.slane %v9246_v43, 4  ;;  %v9304_v60 = vrot.slane %v14937_v49, 1  ;;  %v14942_v41 = vld [vmem:[#allocation2] sm:$0xff]   ;;  %v9305_v25 = vrot.slane %v14938_v59, 1  ;;  %v14954_v49 = vld [vmem:[#allocation8 + $0xd08] sm:$0xff]   ;;  %v14957_v59 = vld [vmem:[#allocation8 + $0xd10] sm:$0xff]  }
0x1245   :  { %9255 = vst [vmem:[#allocation2 + $0xc] sm:$0xf] %v9247_v55  ;;  %v14943_v42 = vld [vmem:[#allocation2 + $0x8] ss:$0 sps:$4 sm:$0x11]   ;;  %v9282_v18 = vshll.u32 %v14942_v41, 16 }
0x1246   :  { %v9257_v0 = vsel %vm15490_vm4, %v9248_v57, %v9256_v45  ;;  %v9306_v19 = vsel %vm281_vm2, %v9304_v60, %v9305_v25  ;;  %v9287_v8 = vshll.u32 %v14943_v42, 16  ;;  %v9280_v10 = vshrl.u32 %v14942_v41, 16  ;;  %v14944_v22 = vld [vmem:[#allocation2] sm:$0xff]   ;;  %v14955_v55 = vld [vmem:[#allocation8 + $0xcc8] sm:$0xff]   ;;  %v14958_v60 = vld [vmem:[#allocation8 + $0xcd0] sm:$0xff]  }
0x1247   :  { %9258 = vst [vmem:[#allocation2 + $0x10] sm:$0x3] %v9257_v0  ;;  %14224 = vmatprep.mubr.bf16.mxu0 %v9306_v19  ;;  %v9284_v61 = vrot.slane %v9282_v18, 1  ;;  %v14952_v43 = vld [vmem:[#allocation8 + $0xd00] sm:$0xff]   ;;  %v14959_v41 = vld [vmem:[#allocation8 + $0xd48] sm:$0xff]   ;;  %v14960_v0 = vld [vmem:[#allocation8 + $0xd18] sm:$0xff]  }
0x1248   :  { %v9289_v20 = vrot.slane %v9287_v8, 1  ;;  %13670 = vmatprep.subr.bf16.mxu1 %v14952_v43  ;;  %v14953_v45 = vld [vmem:[#allocation8 + $0xcc0] sm:$0xff]   ;;  %v14961_v25 = vld [vmem:[#allocation8 + $0xcd8] sm:$0xff]   ;;  %v14962_v42 = vld [vmem:[#allocation8 + $0xd50] sm:$0xff]  }
0x1249   :  { %v9285_v9 = vor.u32 %v9284_v61, %v9280_v10  ;;  %v14956_v57 = vld [vmem:[#allocation8 + $0xd40] sm:$0xff]   ;;  %v14965_v8 = vld [vmem:[#allocation8 + $0xd58] sm:$0xff]   ;;  %v14966_v10 = vld [vmem:[#allocation8 + $0xd28] sm:$0xff]  }
0x124a   :  { %14228 = vmatprep.subr.bf16.mxu0 %v14956_v57  ;;  %v14963_v18 = vld [vmem:[#allocation8 + $0xd20] sm:$0xff]   ;;  %v14967_v61 = vld [vmem:[#allocation8 + $0xce8] sm:$0xff]  }
0x124b   :  { %v9290_v63 = vsel %vm255_vm5, %v9285_v9, %v9289_v20  ;;  %v14964_v19 = vld [vmem:[#allocation8 + $0xce0] sm:$0xff]   ;;  %v14969_v20 = vld [vmem:[#allocation8 + $0xd30] sm:$0xff]  }
0x124c   :  { %v14946_v21 = vld [vmem:[#allocation2 + $0x8] sm:$0xfc]   ;;  %9602 = vmatprep.mubr.bf16.mxu1 %v9290_v63 }
0x124d   :  { %v14948_v40 = vld [vmem:[#allocation2 + $0x8] sm:$0xfe]   ;;  %9603 = vmatmul.mubr.bf16.vlgmr.msra.gmra.mrb[92].mxu1 %v14944_v22  ;;  %v9366_v11 = vrot.slane %v14946_v21, 2  ;;  %v14970_v21 = vld [vmem:[#allocation8 + $0xcf0] sm:$0xff]   ;;  %v14974_v22 = vld [vmem:[#allocation8 + $0xd38] sm:$0xff]  }
0x124e   :  { %v14947_v23 = vld [vmem:[#allocation2 + $0x10] ss:$0 sps:$4 sm:$0x33]   ;;  %v9337_v27 = vshrl.u32 %v14948_v40, 16  ;;  %v9340_v48 = vshll.u32 %v14948_v40, 16  ;;  %13671 = vmatpush3.bf16.msra.mxu1 %v14953_v45  ;;  %v14968_v9 = vld [vmem:[#allocation8 + $0xd60] sm:$0xff]  }
0x124f   :  { %v14949_v51 = vld [vmem:[#allocation2 + $0x10] ss:$0 sps:$4 sm:$0x33]   ;;  %v9367_v52 = vrot.slane %v14947_v23, 2  ;;  %v14950_v35 = vld [vmem:[#allocation2 + $0x8] sm:$0xfe]   ;;  %13672 = vmatprep.subr.bf16.mxu1 %v14954_v49 }
0x1250   :  { %v9339_v62 = vrot.slane %v9337_v27, 1  ;;  %v9345_v32 = vshrl.u32 %v14949_v51, 16  ;;  %v9348_v3 = vshll.u32 %v14949_v51, 16  ;;  %v14951_v31 = vld [vmem:[#allocation2 + $0x10] ss:$0 sps:$4 sm:$0x11]  }
0x1251   :  { %v9368_v36 = vsel %vm345_vm7, %v9366_v11, %v9367_v52  ;;  %v9342_v4 = vrot.slane %v9340_v48, 2  ;;  %v9321_v38 = vrot.slane %v14951_v31, 1  ;;  %v9320_v29 = vrot.slane %v14950_v35, 1  ;;  %v14971_v63 = vld [vmem:[#allocation8 + $0xd68] sm:$0xff]   ;;  %v14975_v40 = vld [vmem:[#allocation8 + $0xcf8] sm:$0xff]   ;;  %v14976_v23 = vld [vmem:[#allocation8 + $0xd70] sm:$0xff]  }
0x1252   :  { %14225 = vmatmul.mubr.bf16.vlgmr.msra.gmra.mrb[136].mxu0 %v9368_v36  ;;  %v9347_v44 = vrot.slane %v9345_v32, 1  ;;  %v9350_v7 = vrot.slane %v9348_v3, 2  ;;  %13673 = vmatpush3.bf16.msra.mxu1 %v14955_v55  ;;  %v14980_v51 = vld [vmem:[#allocation8 + $0xd78] sm:$0xff]  }
0x1253   :  { %v9343_v1 = vor.u32 %v9342_v4, %v9339_v62  ;;  %v9322_v5 = vsel %vm281_vm2, %v9320_v29, %v9321_v38  ;;  %14229 = vmatpush3.bf16.msra.mxu0 %v14956_v57  ;;  %13674 = vmatprep.subr.bf16.mxu1 %v14957_v59  ;;  %v12639_v4 = vld [vmem:[#allocation4 + $0x11] ss:$0 sm:$0xff]  ;;  %v12640_v38 = vld [vmem:[#allocation6 + $0x11] ss:$0 sm:$0xff] }
0x1254   :  { %v9351_v39 = vor.u32 %v9350_v7, %v9347_v44  ;;  %14230 = vmatprep.subr.bf16.mxu0 %v14959_v41 }
0x1256   :  { %v9352_v33 = vsel %vm314_vm8, %v9343_v1, %v9351_v39  ;;  %13675 = vmatpush3.bf16.msra.mxu1 %v14958_v60 }
0x1257   :  { %9610 = vmatprep.mubr.bf16.mxu1 %v9352_v33  ;;  %14231 = vmatpush3.bf16.msra.mxu0 %v14959_v41 }
0x1258   :  { %9611 = vmatmul.mubr.bf16.gmra.mrb[96].mxu1 %v9322_v5  ;;  %13676 = vmatprep.subr.bf16.mxu1 %v14960_v0 }
0x1259   :  { %14232 = vmatprep.subr.bf16.mxu0 %v14962_v42 }
0x125a   :  { %13677 = vmatpush3.bf16.msra.mxu1 %v14961_v25 }
0x125b   :  { %14233 = vmatpush3.bf16.msra.mxu0 %v14962_v42  ;;  %13678 = vmatprep.subr.bf16.mxu1 %v14963_v18 }
0x125c   :  { %14234 = vmatprep.subr.bf16.mxu0 %v14965_v8 }
0x125e   :  { %13679 = vmatpush3.bf16.msra.mxu1 %v14964_v19 }
0x125f   :  { %14235 = vmatpush3.bf16.msra.mxu0 %v14965_v8  ;;  %13680 = vmatprep.subr.bf16.mxu1 %v14966_v10 }
0x1260   :  { %14236 = vmatprep.subr.bf16.mxu0 %v14968_v9 }
0x1262   :  { %13681 = vmatpush3.bf16.msra.mxu1 %v14967_v61 }
0x1263   :  { %14237 = vmatpush3.bf16.msra.mxu0 %v14968_v9  ;;  %13682 = vmatprep.subr.bf16.mxu1 %v14969_v20 }
0x1264   :  { %14238 = vmatprep.subr.bf16.mxu0 %v14971_v63 }
0x1266   :  { %13683 = vmatpush3.bf16.msra.mxu1 %v14970_v21 }
0x1267   :  { %13684 = vmatprep.subr.bf16.mxu1 %v14974_v22  ;;  %14239 = vmatpush3.bf16.msra.mxu0 %v14971_v63 }
0x1268   :  { %14240 = vmatprep.subr.bf16.mxu0 %v14976_v23 }
0x126a   :  { %13685 = vmatpush3.bf16.msra.mxu1 %v14975_v40 }
0x126b   :  { %14241 = vmatpush3.bf16.msra.mxu0 %v14976_v23 }
0x126c   :  { %14242 = vmatprep.subr.bf16.mxu0 %v14980_v51 }
0x126f   :  { %14243 = vmatpush3.bf16.msra.mxu0 %v14980_v51 }
0x1320   :  { %v13648_v27 = vpop.f32.mrb[92].mxu1 }
0x1321   :  { %v13649_v11 = vpop.f32.mrb[93].mxu1 }
0x1322   :  { %v13650_v52 = vadd.f32 %v13649_v11, %v13648_v27  ;;  %v13651_v48 = vpop.f32.mrb[94].mxu1  ;;  %v9717_v11 = vld [vmem:[#allocation2] sm:$0xf] }
0x1323   :  { %v13652_v62 = vpop.f32.mrb[95].mxu1 }
0x1324   :  { %v13653_v32 = vadd.f32 %v13652_v62, %v13651_v48  ;;  %v9605_v31 = vadd.f32 %v13650_v52, %v15948_v30 }
0x1325   :  { %v14226_v3 = vpop.f32.mrb[136].mxu0 }
0x1326   :  { %v9653_v36 = vpop.f32.mrb[137].mxu0  ;;  %v9608_v7 = vadd.f32 %v13653_v32, %v15952_v34 }
0x1327   :  { %v15998_v35 = vadd.f32 %v9653_v36, %v9605_v31  ;;  %v14227_v44 = vpop.f32.mrb[138].mxu0  ;;  %v9721_v31 = vld [vmem:[#allocation2 + $0x8] sm:$0x1] }
0x1328   :  { %v9656_v1 = vpop.f32.mrb[139].mxu0 }
0x1329   :  { %v9674_v39 = vmul.f32 %v12639_v4, %v15998_v35  ;;  %v16002_v29 = vadd.f32 %v9656_v1, %v9608_v7 }
0x132b   :  { %v9682_v33 = vadd.f32 %v12640_v38, %v9674_v39  ;;  %v9675_v5 = vmul.f32 %v12639_v4, %v16002_v29  ;;  %v13654_v43 = vpop.f32.mrb[96].mxu1 }
0x132c   :  { %v13655_v45 = vpop.f32.mrb[97].mxu1 }
0x132d   :  { %v9686_v49 = vmax.f32 %v9682_v33, 0.0  ;;  %v9683_v55 = vadd.f32 %v12640_v38, %v9675_v5  ;;  %v13656_v57 = vadd.f32 %v13655_v45, %v13654_v43  ;;  %v13657_v59 = vpop.f32.mrb[98].mxu1 }
0x132e   :  { %v13658_v60 = vpop.f32.mrb[99].mxu1 }
0x132f   :  { %v12890_v41 = vpack.c.bf16 %v9686_v49, %v9686_v49  ;;  %v9687_v0 = vmax.f32 %v9683_v55, 0.0  ;;  %v9613_v25 = vadd.f32 %v13656_v57, %v15956_v56  ;;  %v13659_v42 = vadd.f32 %v13658_v60, %v13657_v59  ;;  %v9751_v59 = vld [vmem:[#allocation2 + $0x8] sm:$0xe] }
0x1331   :  { %v9698_v18 = vshrl.u32 %v12890_v41, 16  ;;  %v12891_v19 = vpack.c.bf16 %v9687_v0, %v9687_v0  ;;  %v16006_v8 = vadd.f32 %v14226_v3, %v9613_v25  ;;  %v9616_v10 = vadd.f32 %v13659_v42, %v15960_v53 }
0x1332   :  { %v9701_v9 = vshll.u32 %v12890_v41, 16 }
0x1333   :  { %v9700_v61 = vrot.slane %v9698_v18, 7  ;;  %v9706_v20 = vshrl.u32 %v12891_v19, 16  ;;  %v9676_v21 = vmul.f32 %v12639_v4, %v16006_v8  ;;  %v16010_v63 = vadd.f32 %v14227_v44, %v9616_v10 }
0x1334   :  { %v9709_v23 = vshll.u32 %v12891_v19, 16 }
0x1335   :  { %v9703_v22 = vor.u32 %v9701_v9, %v9700_v61  ;;  %v9708_v40 = vrot.slane %v9706_v20, 7  ;;  %v9684_v51 = vadd.f32 %v12640_v38, %v9676_v21  ;;  %v9704_v27 = vrot.slane %v9700_v61, 4 }
0x1336   :  { %v9677_v52 = vmul.f32 %v12639_v4, %v16010_v63 }
0x1337   :  { %v9718_v48 = vsel %vm15464_vm3, %v9703_v22, %v9717_v11  ;;  %v9711_v62 = vor.u32 %v9709_v23, %v9708_v40  ;;  %v9713_v32 = vrot.slane %v9708_v40, 4  ;;  %v9688_v3 = vmax.f32 %v9684_v51, 0.0  ;;  %v9755_v40 = vld [vmem:[#allocation2 + $0x10] sm:$0x3] }
0x1338   :  { %9719 = vst [vmem:[#allocation2] sm:$0xf] %v9718_v48  ;;  %v9685_v36 = vadd.f32 %v12640_v38, %v9677_v52 }
0x1339   :  { %v9712_v44 = vsel %vm15458_vm15, %v9704_v27, %v9711_v62  ;;  %v9722_v7 = vsel %vm15417_vm6, %v9713_v32, %v9721_v31  ;;  %v12892_v1 = vpack.c.bf16 %v9688_v3, %v9688_v3 }
0x133a   :  { %9720 = vst [vmem:[#allocation2 + $0x4] sm:$0xf] %v9712_v44  ;;  %9723 = vst [vmem:[#allocation2 + $0x8] sm:$0x1] %v9722_v7  ;;  %v9689_v39 = vmax.f32 %v9685_v36, 0.0 }
0x133b   :  { %v9730_v4 = vshrl.u32 %v12892_v1, 16  ;;  %v9733_v33 = vshll.u32 %v12892_v1, 16 }
0x133c   :  { %v12893_v5 = vpack.c.bf16 %v9689_v39, %v9689_v39 }
0x133d   :  { %v9732_v43 = vrot.slane %v9730_v4, 6  ;;  %v9735_v45 = vrot.slane %v9733_v33, 7 }
0x133e   :  { %v9739_v49 = vshrl.u32 %v12893_v5, 16  ;;  %v9742_v55 = vshll.u32 %v12893_v5, 16 }
0x133f   :  { %v9736_v57 = vor.u32 %v9735_v45, %v9732_v43 }
0x1340   :  { %v9741_v38 = vrot.slane %v9739_v49, 6  ;;  %v9744_v60 = vrot.slane %v9742_v55, 7 }
0x1341   :  { %v9737_v41 = vrot.slane %v9736_v57, 4  ;;  %v9752_v0 = vsel %vm15470_vm0, %v9736_v57, %v9751_v59  ;;  %v14977_v25 = vld [vmem:[#allocation2] sm:$0xff]   ;;  %v14973_v19 = vld [vmem:[#allocation2 + $0x8] ss:$0 sps:$4 sm:$0x11]  }
0x1342   :  { %9753 = vst [vmem:[#allocation2 + $0x8] sm:$0xe] %v9752_v0  ;;  %v9745_v42 = vor.u32 %v9744_v60, %v9741_v38  ;;  %v14972_v18 = vld [vmem:[#allocation2] sm:$0xfe]   ;;  %v9781_v10 = vshll.u32 %v14977_v25, 16  ;;  %v9804_v21 = vrot.slane %v14973_v19, 1 }
0x1343   :  { %v9803_v20 = vrot.slane %v14972_v18, 1  ;;  %v14978_v22 = vld [vmem:[#allocation2 + $0x8] ss:$0 sps:$4 sm:$0x11]   ;;  %v9779_v23 = vshrl.u32 %v14977_v25, 16  ;;  %v14979_v3 = vld [vmem:[#allocation2] sm:$0xff]  }
0x1344   :  { %v9746_v61 = vsel %vm15476_vm1, %v9737_v41, %v9745_v42  ;;  %v9747_v9 = vrot.slane %v9745_v42, 4  ;;  %v9783_v51 = vrot.slane %v9781_v10, 1  ;;  %v9786_v52 = vshll.u32 %v14978_v22, 16  ;;  %v14987_v10 = vld [vmem:[#allocation8 + $0xdc0] sm:$0xff]   ;;  %v14992_v22 = vld [vmem:[#allocation8 + $0xdd0] sm:$0xff]  }
0x1345   :  { %9754 = vst [vmem:[#allocation2 + $0xc] sm:$0xf] %v9746_v61  ;;  %v9805_v11 = vsel %vm281_vm2, %v9803_v20, %v9804_v21  ;;  %v14988_v61 = vld [vmem:[#allocation8 + $0xd80] sm:$0xff]   ;;  %13708 = vmatprep.subr.bf16.mxu1 %v14987_v10  ;;  %v14990_v20 = vld [vmem:[#allocation8 + $0xd88] sm:$0xff]  }
0x1346   :  { %v9756_v27 = vsel %vm15490_vm4, %v9747_v9, %v9755_v40  ;;  %14244 = vmatprep.mubr.bf16.mxu0 %v9805_v11  ;;  %v9784_v48 = vor.u32 %v9783_v51, %v9779_v23  ;;  %v9788_v62 = vrot.slane %v9786_v52, 1  ;;  %v14989_v9 = vld [vmem:[#allocation8 + $0xdc8] sm:$0xff]   ;;  %v14991_v21 = vld [vmem:[#allocation8 + $0xe00] sm:$0xff]   ;;  %v14993_v40 = vld [vmem:[#allocation8 + $0xd90] sm:$0xff]  }
0x1347   :  { %9757 = vst [vmem:[#allocation2 + $0x10] sm:$0x3] %v9756_v27  ;;  %14248 = vmatprep.subr.bf16.mxu0 %v14991_v21  ;;  %v14994_v23 = vld [vmem:[#allocation8 + $0xe08] sm:$0xff]   ;;  %v14995_v51 = vld [vmem:[#allocation8 + $0xdd8] sm:$0xff]   ;;  %v14997_v11 = vld [vmem:[#allocation8 + $0xe10] sm:$0xff]  }
0x1348   :  { %v9789_v32 = vsel %vm255_vm5, %v9784_v48, %v9788_v62  ;;  %v14996_v27 = vld [vmem:[#allocation8 + $0xd98] sm:$0xff]   ;;  %v14998_v52 = vld [vmem:[#allocation8 + $0xde0] sm:$0xff]  }
0x1349   :  { %10101 = vmatprep.mubr.bf16.mxu1 %v9789_v32  ;;  %v14999_v48 = vld [vmem:[#allocation8 + $0xda0] sm:$0xff]   ;;  %v15000_v62 = vld [vmem:[#allocation8 + $0xe18] sm:$0xff]   ;;  %v15001_v32 = vld [vmem:[#allocation8 + $0xde8] sm:$0xff]  }
0x134a   :  { %10102 = vmatmul.mubr.bf16.vlgmr.msra.gmra.mrb[100].mxu1 %v14979_v3  ;;  %v15002_v3 = vld [vmem:[#allocation8 + $0xda8] sm:$0xff]  }
0x134b   :  { %13709 = vmatpush3.bf16.msra.mxu1 %v14988_v61 }
0x134c   :  { %v14981_v31 = vld [vmem:[#allocation2 + $0x8] sm:$0xfc]   ;;  %13710 = vmatprep.subr.bf16.mxu1 %v14989_v9 }
0x134d   :  { %v14983_v36 = vld [vmem:[#allocation2 + $0x8] sm:$0xfe]   ;;  %v9865_v39 = vrot.slane %v14981_v31, 2 }
0x134e   :  { %v14982_v44 = vld [vmem:[#allocation2 + $0x10] ss:$0 sps:$4 sm:$0x33]   ;;  %v9836_v1 = vshrl.u32 %v14983_v36, 16  ;;  %v9839_v33 = vshll.u32 %v14983_v36, 16  ;;  %v15003_v31 = vld [vmem:[#allocation8 + $0xe20] sm:$0xff]  }
0x134f   :  { %v14984_v7 = vld [vmem:[#allocation2 + $0x10] ss:$0 sps:$4 sm:$0x33]   ;;  %v9866_v4 = vrot.slane %v14982_v44, 2  ;;  %v14985_v59 = vld [vmem:[#allocation2 + $0x8] sm:$0xfe]   ;;  %13711 = vmatpush3.bf16.msra.mxu1 %v14990_v20 }
0x1350   :  { %v9838_v5 = vrot.slane %v9836_v1, 1  ;;  %v9844_v43 = vshrl.u32 %v14984_v7, 16  ;;  %v9847_v45 = vshll.u32 %v14984_v7, 16  ;;  %v14986_v49 = vld [vmem:[#allocation2 + $0x10] ss:$0 sps:$4 sm:$0x11]   ;;  %13712 = vmatprep.subr.bf16.mxu1 %v14992_v22 }
0x1351   :  { %v9867_v55 = vsel %vm345_vm7, %v9865_v39, %v9866_v4  ;;  %v9841_v57 = vrot.slane %v9839_v33, 2  ;;  %v9820_v41 = vrot.slane %v14986_v49, 1  ;;  %v9819_v42 = vrot.slane %v14985_v59, 1  ;;  %v15004_v36 = vld [vmem:[#allocation8 + $0xdf0] sm:$0xff]   ;;  %v15006_v7 = vld [vmem:[#allocation8 + $0xe28] sm:$0xff]   ;;  %v15007_v1 = vld [vmem:[#allocation8 + $0xdf8] sm:$0xff]  }
0x1352   :  { %14245 = vmatmul.mubr.bf16.vlgmr.msra.gmra.mrb[140].mxu0 %v9867_v55  ;;  %v9846_v38 = vrot.slane %v9844_v43, 1  ;;  %v9849_v60 = vrot.slane %v9847_v45, 2  ;;  %v15005_v44 = vld [vmem:[#allocation8 + $0xdb0] sm:$0xff]   ;;  %v15010_v39 = vld [vmem:[#allocation8 + $0xdb8] sm:$0xff]   ;;  %v15014_v33 = vld [vmem:[#allocation12 + $0x280] sm:$0xff]  }
0x1353   :  { %v9842_v0 = vor.u32 %v9841_v57, %v9838_v5  ;;  %v9821_v19 = vsel %vm281_vm2, %v9819_v42, %v9820_v41  ;;  %14249 = vmatpush3.bf16.msra.mxu0 %v14991_v21  ;;  %13713 = vmatpush3.bf16.msra.mxu1 %v14993_v40  ;;  %v15011_v4 = vld [vmem:[#allocation8 + $0xe30] sm:$0xff]   ;;  %v15016_v5 = vld [vmem:[#allocation8 + $0xe38] sm:$0xff]   ;;  %v15054_v43 = vld [vmem:[#allocation12 + $0x300] sm:$0xff]  }
0x1354   :  { %v9850_v25 = vor.u32 %v9849_v60, %v9846_v38  ;;  %14250 = vmatprep.subr.bf16.mxu0 %v14994_v23  ;;  %13714 = vmatprep.subr.bf16.mxu1 %v14995_v51 }
0x1356   :  { %v9851_v18 = vsel %vm314_vm8, %v9842_v0, %v9850_v25  ;;  %v12680_v0 = vld [vmem:[#allocation4 + $0x12] ss:$0 sm:$0xff] }
0x1357   :  { %10109 = vmatprep.mubr.bf16.mxu1 %v9851_v18  ;;  %14251 = vmatpush3.bf16.msra.mxu0 %v14994_v23  ;;  %v12681_v18 = vld [vmem:[#allocation6 + $0x12] ss:$0 sm:$0xff] }
0x1358   :  { %10110 = vmatmul.mubr.bf16.gmra.mrb[104].mxu1 %v9821_v19  ;;  %14252 = vmatprep.subr.bf16.mxu0 %v14997_v11 }
0x1359   :  { %13715 = vmatpush3.bf16.msra.mxu1 %v14996_v27 }
0x135a   :  { %13716 = vmatprep.subr.bf16.mxu1 %v14998_v52 }
0x135b   :  { %14253 = vmatpush3.bf16.msra.mxu0 %v14997_v11 }
0x135c   :  { %14254 = vmatprep.subr.bf16.mxu0 %v15000_v62 }
0x135d   :  { %13717 = vmatpush3.bf16.msra.mxu1 %v14999_v48 }
0x135e   :  { %13718 = vmatprep.subr.bf16.mxu1 %v15001_v32 }
0x135f   :  { %14255 = vmatpush3.bf16.msra.mxu0 %v15000_v62 }
0x1360   :  { %14256 = vmatprep.subr.bf16.mxu0 %v15003_v31 }
0x1361   :  { %13719 = vmatpush3.bf16.msra.mxu1 %v15002_v3 }
0x1362   :  { %13720 = vmatprep.subr.bf16.mxu1 %v15004_v36 }
0x1363   :  { %14257 = vmatpush3.bf16.msra.mxu0 %v15003_v31 }
0x1364   :  { %14258 = vmatprep.subr.bf16.mxu0 %v15006_v7 }
0x1365   :  { %13721 = vmatpush3.bf16.msra.mxu1 %v15005_v44 }
0x1366   :  { %13722 = vmatprep.subr.bf16.mxu1 %v15007_v1 }
0x1367   :  { %14259 = vmatpush3.bf16.msra.mxu0 %v15006_v7 }
0x1368   :  { %14260 = vmatprep.subr.bf16.mxu0 %v15011_v4 }
0x1369   :  { %13723 = vmatpush3.bf16.msra.mxu1 %v15010_v39 }
0x136a   :  { %13746 = vmatprep.subr.bf16.mxu1 %v15014_v33 }
0x136b   :  { %14261 = vmatpush3.bf16.msra.mxu0 %v15011_v4 }
0x136c   :  { %14262 = vmatprep.subr.bf16.mxu0 %v15016_v5 }
0x136f   :  { %14263 = vmatpush3.bf16.msra.mxu0 %v15016_v5 }
0x1370   :  { %13774 = vmatprep.subr.bf16.mxu0 %v15054_v43 }
0x141d   :  { %v13686_v45 = vpop.f32.mrb[100].mxu1 }
0x141e   :  { %v13687_v49 = vpop.f32.mrb[101].mxu1 }
0x141f   :  { %v13688_v55 = vadd.f32 %v13687_v49, %v13686_v45  ;;  %v13689_v57 = vpop.f32.mrb[102].mxu1 }
0x1420   :  { %v13690_v59 = vpop.f32.mrb[103].mxu1 }
0x1421   :  { %v13691_v38 = vadd.f32 %v13690_v59, %v13689_v57  ;;  %v10216_v57 = vld [vmem:[#allocation2] sm:$0xf] }
0x1425   :  { %v14246_v60 = vpop.f32.mrb[140].mxu0 }
0x1426   :  { %v10152_v41 = vpop.f32.mrb[141].mxu0 }
0x1427   :  { %v10153_v25 = vadd.f32 %v13688_v55, %v10152_v41  ;;  %v14247_v42 = vpop.f32.mrb[142].mxu0 }
0x1428   :  { %v10155_v19 = vpop.f32.mrb[143].mxu0 }
0x1429   :  { %v10173_v10 = vmul.f32 %v12680_v0, %v10153_v25  ;;  %v10156_v61 = vadd.f32 %v13691_v38, %v10155_v19 }
0x142b   :  { %v10181_v9 = vadd.f32 %v12681_v18, %v10173_v10  ;;  %v10174_v20 = vmul.f32 %v12680_v0, %v10156_v61  ;;  %v13692_v21 = vpop.f32.mrb[104].mxu1 }
0x142c   :  { %v13693_v22 = vpop.f32.mrb[105].mxu1 }
0x142d   :  { %v10185_v40 = vmax.f32 %v10181_v9, 0.0  ;;  %v10182_v23 = vadd.f32 %v12681_v18, %v10174_v20  ;;  %v13694_v51 = vadd.f32 %v13693_v22, %v13692_v21  ;;  %v13695_v27 = vpop.f32.mrb[106].mxu1 }
0x142e   :  { %v13696_v11 = vpop.f32.mrb[107].mxu1 }
0x142f   :  { %v12894_v52 = vpack.c.bf16 %v10185_v40, %v10185_v40  ;;  %v10186_v48 = vmax.f32 %v10182_v23, 0.0  ;;  %v10161_v62 = vadd.f32 %v14246_v60, %v13694_v51  ;;  %v13697_v32 = vadd.f32 %v13696_v11, %v13695_v27  ;;  %v10250_v51 = vld [vmem:[#allocation2 + $0x8] sm:$0xe] }
0x1431   :  { %v10197_v3 = vshrl.u32 %v12894_v52, 16  ;;  %v12895_v31 = vpack.c.bf16 %v10186_v48, %v10186_v48  ;;  %v10175_v36 = vmul.f32 %v12680_v0, %v10161_v62  ;;  %v10164_v44 = vadd.f32 %v14247_v42, %v13697_v32  ;;  %v10220_v42 = vld [vmem:[#allocation2 + $0x8] sm:$0x1]  ;;  %v10254_v32 = vld [vmem:[#allocation2 + $0x10] sm:$0x3] }
0x1432   :  { %v10200_v1 = vshll.u32 %v12894_v52, 16 }
0x1433   :  { %v10199_v7 = vrot.slane %v10197_v3, 7  ;;  %v10205_v39 = vshrl.u32 %v12895_v31, 16  ;;  %v10183_v4 = vadd.f32 %v12681_v18, %v10175_v36  ;;  %v10176_v33 = vmul.f32 %v12680_v0, %v10164_v44 }
0x1434   :  { %v10208_v45 = vshll.u32 %v12895_v31, 16  ;;  %v15109_v31 = vld [vmem:[#allocation9 + $0xc] ss:$0 sm:$0xff] }
0x1435   :  { %v10202_v5 = vor.u32 %v10200_v1, %v10199_v7  ;;  %v10207_v43 = vrot.slane %v10205_v39, 7  ;;  %v10187_v49 = vmax.f32 %v10183_v4, 0.0  ;;  %v10203_v55 = vrot.slane %v10199_v7, 4 }
0x1436   :  { %v10184_v59 = vadd.f32 %v12681_v18, %v10176_v33  ;;  %v10744_v36 = vmul.f32 %v15109_v31, %v15503_v46  ;;  %v10745_v33 = vmul.f32 %v15109_v31, %v15506_v50 }
0x1437   :  { %v10217_v38 = vsel %vm15464_vm3, %v10202_v5, %v10216_v57  ;;  %v10210_v60 = vor.u32 %v10208_v45, %v10207_v43  ;;  %v10212_v41 = vrot.slane %v10207_v43, 4  ;;  %v12896_v25 = vpack.c.bf16 %v10187_v49, %v10187_v49 }
0x1438   :  { %10218 = vst [vmem:[#allocation2] sm:$0xf] %v10217_v38  ;;  %v10188_v19 = vmax.f32 %v10184_v59, 0.0 }
0x1439   :  { %v10211_v10 = vsel %vm15458_vm15, %v10203_v55, %v10210_v60  ;;  %v10221_v0 = vsel %vm15417_vm6, %v10212_v41, %v10220_v42  ;;  %v10229_v61 = vshrl.u32 %v12896_v25, 16  ;;  %v10232_v9 = vshll.u32 %v12896_v25, 16  ;;  %v15110_v55 = vld [vmem:[#allocation11 + $0xc] ss:$0 sm:$0xff]  ;;  %v16045_v25 = vld [vmem:[#allocation9 + $0xa] ss:$0 sm:$0xff] }
0x143a   :  { %10219 = vst [vmem:[#allocation2 + $0x4] sm:$0xf] %v10211_v10  ;;  %10222 = vst [vmem:[#allocation2 + $0x8] sm:$0x1] %v10221_v0  ;;  %v12897_v18 = vpack.c.bf16 %v10188_v19, %v10188_v19  ;;  %v10752_v57 = vadd.f32 %v15110_v55, %v10744_v36  ;;  %v10753_v41 = vadd.f32 %v15110_v55, %v10745_v33  ;;  %v15017_v19 = vld [vmem:[#allocation12 + $0x240] sm:$0xff]   ;;  %v15018_v10 = vld [vmem:[#allocation12 + $0x288] sm:$0xff]  }
0x143b   :  { %v10231_v20 = vrot.slane %v10229_v61, 6  ;;  %v10234_v21 = vrot.slane %v10232_v9, 7  ;;  %v10697_v61 = vmul.f32 %v16045_v25, %v16002_v29  ;;  %v15055_v36 = vld [vmem:[#allocation12 + $0x2c0] sm:$0xff]  }
0x143c   :  { %v10238_v22 = vshrl.u32 %v12897_v18, 16  ;;  %v10241_v40 = vshll.u32 %v12897_v18, 16  ;;  %v10756_v0 = vmax.f32 %v10752_v57, 0.0 }
0x143d   :  { %v10235_v23 = vor.u32 %v10234_v21, %v10231_v20  ;;  %v10757_v21 = vmax.f32 %v10753_v41, 0.0 }
0x143e   :  { %v10240_v27 = vrot.slane %v10238_v22, 6  ;;  %v10243_v11 = vrot.slane %v10241_v40, 7  ;;  %v16050_v40 = vld [vmem:[#allocation11 + $0xa] ss:$0 sm:$0xff] }
0x143f   :  { %v10236_v52 = vrot.slane %v10235_v23, 4  ;;  %v10251_v48 = vsel %vm15470_vm0, %v10235_v23, %v10250_v51  ;;  %v10696_v23 = vmul.f32 %v16045_v25, %v15998_v35  ;;  %v10705_v31 = vadd.f32 %v16050_v40, %v10697_v61  ;;  %v15058_v61 = vld [vmem:[#allocation12 + $0x310] sm:$0xff]  }
0x1440   :  { %10252 = vst [vmem:[#allocation2 + $0x8] sm:$0xe] %v10251_v48  ;;  %v10244_v62 = vor.u32 %v10243_v11, %v10240_v27  ;;  %v15021_v27 = vld [vmem:[#allocation12 + $0x248] sm:$0xff]   ;;  %v15022_v11 = vld [vmem:[#allocation12 + $0x290] sm:$0xff]   ;;  %v10760_v33 = vpack.c.bf16 %v10757_v21, %v10756_v0  ;;  %v15030_v21 = vld [vmem:[#allocation12 + $0x2a0] sm:$0xff]  }
0x1441   :  { %v15008_v3 = vld [vmem:[#allocation2] sm:$0xfe]   ;;  %v15009_v1 = vld [vmem:[#allocation2 + $0x8] ss:$0 sps:$4 sm:$0x11]  }
0x1442   :  { %v10245_v44 = vsel %vm15476_vm1, %v10236_v52, %v10244_v62  ;;  %v10246_v7 = vrot.slane %v10244_v62, 4  ;;  %v10302_v39 = vrot.slane %v15008_v3, 1  ;;  %v15012_v4 = vld [vmem:[#allocation2] sm:$0xff]   ;;  %v10303_v43 = vrot.slane %v15009_v1, 1 }
0x1443   :  { %10253 = vst [vmem:[#allocation2 + $0xc] sm:$0xf] %v10245_v44  ;;  %v15013_v45 = vld [vmem:[#allocation2 + $0x8] ss:$0 sps:$4 sm:$0x11]   ;;  %v10280_v49 = vshll.u32 %v15012_v4, 16 }
0x1444   :  { %v10255_v5 = vsel %vm15490_vm4, %v10246_v7, %v10254_v32  ;;  %v10304_v46 = vsel %vm281_vm2, %v10302_v39, %v10303_v43  ;;  %v10285_v59 = vshll.u32 %v15013_v45, 16  ;;  %v10278_v38 = vshrl.u32 %v15012_v4, 16  ;;  %v15015_v20 = vld [vmem:[#allocation2] sm:$0xff]  }
0x1445   :  { %10256 = vst [vmem:[#allocation2 + $0x10] sm:$0x3] %v10255_v5  ;;  %14264 = vmatprep.mubr.bf16.mxu0 %v10304_v46  ;;  %v10282_v60 = vrot.slane %v10280_v49, 1  ;;  %v10704_v45 = vadd.f32 %v16050_v40, %v10696_v23  ;;  %v15056_v49 = vld [vmem:[#allocation12 + $0x308] sm:$0xff]   ;;  %v15025_v46 = vld [vmem:[#allocation12 + $0x250] sm:$0xff]   ;;  %v15060_v23 = vld [vmem:[#allocation12 + $0x318] sm:$0xff]  }
0x1446   :  { %v10287_v50 = vrot.slane %v10285_v59, 1 }
0x1447   :  { %v10283_v42 = vor.u32 %v10282_v60, %v10278_v38  ;;  %v10709_v38 = vmax.f32 %v10705_v31, 0.0 }
0x1449   :  { %v10288_v18 = vsel %vm255_vm5, %v10283_v42, %v10287_v50  ;;  %v15028_v42 = vld [vmem:[#allocation12 + $0x298] sm:$0xff]  }
0x144a   :  { %v15019_v9 = vld [vmem:[#allocation2 + $0x8] sm:$0xfc]   ;;  %10600 = vmatprep.mubr.bf16.mxu1 %v10288_v18 }
0x144b   :  { %v15023_v22 = vld [vmem:[#allocation2 + $0x8] sm:$0xfe]   ;;  %10601 = vmatmul.mubr.bf16.vlgmr.msra.gmra.mrb[108].mxu1 %v15015_v20  ;;  %v10364_v62 = vrot.slane %v15019_v9, 2  ;;  %v15029_v20 = vld [vmem:[#allocation12 + $0x258] sm:$0xff]  }
0x144c   :  { %v15020_v51 = vld [vmem:[#allocation2 + $0x10] ss:$0 sps:$4 sm:$0x33]   ;;  %v10335_v48 = vshrl.u32 %v15023_v22, 16  ;;  %13747 = vmatpush3.bf16.msra.mxu1 %v15017_v19  ;;  %v10338_v3 = vshll.u32 %v15023_v22, 16  ;;  %v10708_v19 = vmax.f32 %v10704_v45, 0.0 }
0x144d   :  { %v15024_v52 = vld [vmem:[#allocation2 + $0x10] ss:$0 sps:$4 sm:$0x33]   ;;  %v10365_v32 = vrot.slane %v15020_v51, 2  ;;  %13748 = vmatprep.subr.bf16.mxu1 %v15018_v10  ;;  %v15026_v43 = vld [vmem:[#allocation2 + $0x8] sm:$0xfe]  }
0x144e   :  { %v10337_v44 = vrot.slane %v10335_v48, 1  ;;  %v10343_v7 = vshrl.u32 %v15024_v52, 16  ;;  %v10346_v1 = vshll.u32 %v15024_v52, 16  ;;  %v15027_v39 = vld [vmem:[#allocation2 + $0x10] ss:$0 sps:$4 sm:$0x11]   ;;  %v10712_v18 = vpack.c.bf16 %v10709_v38, %v10708_v19 }
0x144f   :  { %v10366_v4 = vsel %vm345_vm7, %v10364_v62, %v10365_v32  ;;  %v10340_v5 = vrot.slane %v10338_v3, 2  ;;  %v10319_v59 = vrot.slane %v15027_v39, 1  ;;  %v10318_v50 = vrot.slane %v15026_v43, 1  ;;  %v15057_v10 = vld [vmem:[#allocation12 + $0x2c8] sm:$0xff]   ;;  %v15059_v22 = vld [vmem:[#allocation12 + $0x2d0] sm:$0xff]   ;;  %v15031_v51 = vld [vmem:[#allocation12 + $0x260] sm:$0xff]  }
0x1450   :  { %14265 = vmatmul.mubr.bf16.vlgmr.msra.gmra.mrb[144].mxu0 %v10366_v4  ;;  %v10345_v55 = vrot.slane %v10343_v7, 1  ;;  %v10348_v57 = vrot.slane %v10346_v1, 2  ;;  %13749 = vmatpush3.bf16.msra.mxu1 %v15021_v27  ;;  %v15032_v27 = vld [vmem:[#allocation12 + $0x2a8] sm:$0xff]   ;;  %v15034_v32 = vld [vmem:[#allocation12 + $0x2b0] sm:$0xff]   ;;  %v10699_v3 = vmul.f32 %v16045_v25, %v16010_v63  ;;  %v10698_v7 = vmul.f32 %v16045_v25, %v16006_v8  ;;  %v15036_v39 = vld [vmem:[#allocation12 + $0x2b8] sm:$0xff]  }
0x1451   :  { %11275 = vmatprep.mubr.bf16.mxu0 %v10760_v33  ;;  %13750 = vmatprep.subr.bf16.mxu1 %v15022_v11  ;;  %v10341_v60 = vor.u32 %v10340_v5, %v10337_v44  ;;  %v10320_v9 = vsel %vm281_vm2, %v10318_v50, %v10319_v59  ;;  %v15061_v11 = vld [vmem:[#allocation12 + $0x2d8] sm:$0xff]   ;;  %v12721_v52 = vld [vmem:[#allocation9 + $0x9] ss:$0 sm:$0xff]  ;;  %v15035_v44 = vld [vmem:[#allocation12 + $0x270] sm:$0xff]  }
0x1452   :  { %v10349_v41 = vor.u32 %v10348_v57, %v10345_v55  ;;  %13775 = vmatpush3.bf16.msra.mxu0 %v15055_v36  ;;  %v15033_v48 = vld [vmem:[#allocation12 + $0x268] sm:$0xff]   ;;  %v10673_v62 = vmul.f32 %v12721_v52, %v15952_v34  ;;  %v10672_v31 = vmul.f32 %v12721_v52, %v15948_v30  ;;  %v12722_v36 = vld [vmem:[#allocation11 + $0x9] ss:$0 sm:$0xff]  ;;  %v10707_v4 = vadd.f32 %v16050_v40, %v10699_v3  ;;  %v15038_v45 = vld [vmem:[#allocation12 + $0x380] sm:$0xff]  }
0x1453   :  { %13776 = vmatprep.subr.bf16.mxu0 %v15056_v49  ;;  %v15037_v33 = vld [vmem:[#allocation12 + $0x278] sm:$0xff]   ;;  %v10706_v5 = vadd.f32 %v16050_v40, %v10698_v7  ;;  %v10675_v30 = vmul.f32 %v12721_v52, %v15960_v53  ;;  %v12731_v49 = vld [vmem:[#allocation9 + $0xe] ss:$0 sm:$0xff]  ;;  %v15039_v38 = vld [vmem:[#allocation12 + $0x340] sm:$0xff]  }
0x1454   :  { %v10350_v0 = vsel %vm314_vm8, %v10341_v60, %v10349_v41  ;;  %13751 = vmatpush3.bf16.msra.mxu1 %v15025_v46  ;;  %v10681_v1 = vadd.f32 %v12722_v36, %v10673_v62  ;;  %v10680_v34 = vadd.f32 %v12722_v36, %v10672_v31  ;;  %v10711_v55 = vmax.f32 %v10707_v4, 0.0  ;;  %v15040_v40 = vld [vmem:[#allocation12 + $0x388] sm:$0xff]   ;;  %v12732_v50 = vld [vmem:[#allocation11 + $0xe] ss:$0 sm:$0xff]  ;;  %v15050_v3 = vld [vmem:[#allocation12 + $0x3b0] sm:$0xff]  }
0x1455   :  { %10608 = vmatprep.mubr.bf16.mxu1 %v10350_v0  ;;  %13752 = vmatprep.subr.bf16.mxu1 %v15028_v42  ;;  %v10793_v57 = vmul.f32 %v12731_v49, %v15900_v58  ;;  %v10674_v46 = vmul.f32 %v12721_v52, %v15956_v56  ;;  %v10710_v59 = vmax.f32 %v10706_v5, 0.0  ;;  %v10792_v60 = vmul.f32 %v12731_v49, %v15895_v54  ;;  %v15041_v58 = vld [vmem:[#allocation12 + $0x348] sm:$0xff]   ;;  %v15043_v54 = vld [vmem:[#allocation12 + $0x350] sm:$0xff]   ;;  %v15052_v4 = vld [vmem:[#allocation12 + $0x3b8] sm:$0xff]  }
0x1456   :  { %10609 = vmatmul.mubr.bf16.gmra.mrb[112].mxu1 %v10320_v9  ;;  %13777 = vmatpush3.bf16.msra.mxu0 %v15057_v10  ;;  %v10685_v43 = vmax.f32 %v10681_v1, 0.0  ;;  %v10684_v25 = vmax.f32 %v10680_v34, 0.0  ;;  %v10683_v42 = vadd.f32 %v12722_v36, %v10675_v30  ;;  %v15048_v52 = vld [vmem:[#allocation12 + $0x3a8] sm:$0xff]   ;;  %v10795_v31 = vmul.f32 %v12731_v49, %v15910_v15  ;;  %v15051_v7 = vld [vmem:[#allocation12 + $0x370] sm:$0xff]   ;;  %v15053_v5 = vld [vmem:[#allocation12 + $0x378] sm:$0xff]  }
0x1457   :  { %11226 = vmatprep.mubr.bf16.mxu1 %v10712_v18  ;;  %13778 = vmatprep.subr.bf16.mxu0 %v15058_v61  ;;  %v10713_v19 = vpack.c.bf16 %v10711_v55, %v10710_v59  ;;  %v10801_v10 = vadd.f32 %v12732_v50, %v10793_v57  ;;  %v10682_v53 = vadd.f32 %v12722_v36, %v10674_v46  ;;  %v15042_v61 = vld [vmem:[#allocation12 + $0x390] sm:$0xff]   ;;  %v15049_v62 = vld [vmem:[#allocation12 + $0x368] sm:$0xff]  }
0x1458   :  { %13753 = vmatpush3.bf16.msra.mxu1 %v15029_v20  ;;  %v10688_v41 = vpack.c.bf16 %v10685_v43, %v10684_v25  ;;  %v10800_v0 = vadd.f32 %v12732_v50, %v10792_v60  ;;  %v10687_v56 = vmax.f32 %v10683_v42, 0.0  ;;  %v10794_v1 = vmul.f32 %v12731_v49, %v15905_v12  ;;  %v15062_v60 = vld [vmem:[#allocation12 + $0x320] sm:$0xff]   ;;  %v15067_v42 = vld [vmem:[#allocation12 + $0x2f0] sm:$0xff]  }
0x1459   :  { %13754 = vmatprep.subr.bf16.mxu1 %v15030_v21  ;;  %v10805_v9 = vmax.f32 %v10801_v10, 0.0  ;;  %v10686_v18 = vmax.f32 %v10682_v53, 0.0  ;;  %v10803_v34 = vadd.f32 %v12732_v50, %v10795_v31 }
0x145a   :  { %13779 = vmatpush3.bf16.msra.mxu0 %v15059_v22  ;;  %v10804_v20 = vmax.f32 %v10800_v0, 0.0  ;;  %v15044_v22 = vld [vmem:[#allocation12 + $0x398] sm:$0xff]   ;;  %v10802_v43 = vadd.f32 %v12732_v50, %v10794_v1 }
0x145b   :  { %13780 = vmatprep.subr.bf16.mxu0 %v15060_v23  ;;  %v10689_v21 = vpack.c.bf16 %v10687_v56, %v10686_v18  ;;  %v10807_v15 = vmax.f32 %v10803_v34, 0.0  ;;  %v15068_v50 = vld [vmem:[#allocation12 + $0x338] sm:$0xff]  }
0x145c   :  { %13755 = vmatpush3.bf16.msra.mxu1 %v15031_v51  ;;  %v10808_v23 = vpack.c.bf16 %v10805_v9, %v10804_v20  ;;  %v15045_v51 = vld [vmem:[#allocation12 + $0x358] sm:$0xff]   ;;  %v10806_v55 = vmax.f32 %v10802_v43, 0.0  ;;  %v12725_v20 = vld [vmem:[#allocation9 + $0xb] ss:$0 sm:$0xff] }
0x145d   :  { %13756 = vmatprep.subr.bf16.mxu1 %v15032_v27  ;;  %v15046_v27 = vld [vmem:[#allocation12 + $0x3a0] sm:$0xff]  }
0x145e   :  { %13781 = vmatpush3.bf16.msra.mxu0 %v15061_v11  ;;  %v15047_v11 = vld [vmem:[#allocation12 + $0x360] sm:$0xff]   ;;  %v10809_v49 = vpack.c.bf16 %v10807_v15, %v10806_v55 }
0x145f   :  { %13782 = vmatprep.subr.bf16.mxu0 %v15062_v60 }
0x1460   :  { %13757 = vmatpush3.bf16.msra.mxu1 %v15033_v48  ;;  %v12729_v48 = vld [vmem:[#allocation9 + $0xd] ss:$0 sm:$0xff] }
0x1461   :  { %13758 = vmatprep.subr.bf16.mxu1 %v15034_v32  ;;  %v10769_v32 = vmul.f32 %v12729_v48, %v15701_v26  ;;  %v10768_v36 = vmul.f32 %v12729_v48, %v15697_v24  ;;  %v10770_v24 = vmul.f32 %v12729_v48, %v15705_v13  ;;  %v15066_v13 = vld [vmem:[#allocation12 + $0x330] sm:$0xff]  }
0x1464   :  { %13759 = vmatpush3.bf16.msra.mxu1 %v15035_v44  ;;  %v12730_v44 = vld [vmem:[#allocation11 + $0xd] ss:$0 sm:$0xff] }
0x1465   :  { %13760 = vmatprep.subr.bf16.mxu1 %v15036_v39  ;;  %v10777_v39 = vadd.f32 %v12730_v44, %v10769_v32  ;;  %v10778_v25 = vadd.f32 %v12730_v44, %v10770_v24 }
0x1467   :  { %v10781_v26 = vmax.f32 %v10777_v39, 0.0  ;;  %v10782_v59 = vmax.f32 %v10778_v25, 0.0 }
0x1468   :  { %13761 = vmatpush3.bf16.msra.mxu1 %v15037_v33  ;;  %v10776_v33 = vadd.f32 %v12730_v44, %v10768_v36 }
0x1469   :  { %13802 = vmatprep.subr.bf16.mxu1 %v15038_v45  ;;  %v10771_v45 = vmul.f32 %v12729_v48, %v15709_v47  ;;  %v15064_v47 = vld [vmem:[#allocation12 + $0x328] sm:$0xff]  }
0x146a   :  { %v10780_v30 = vmax.f32 %v10776_v33, 0.0 }
0x146b   :  { %11227 = vmatmul.mubr.bf16.vlgmr.msra.gmra.mrb[116].mxu1 %v10688_v41  ;;  %v10779_v12 = vadd.f32 %v12730_v44, %v10771_v45  ;;  %v15063_v41 = vld [vmem:[#allocation12 + $0x2e0] sm:$0xff]  }
0x146c   :  { %11234 = vmatprep.mubr.bf16.mxu1 %v10713_v19  ;;  %13803 = vmatpush3.bf16.msra.mxu1 %v15039_v38  ;;  %v10784_v57 = vpack.c.bf16 %v10781_v26, %v10780_v30  ;;  %v15069_v19 = vld [vmem:[#allocation12 + $0x2f8] sm:$0xff]  }
0x146d   :  { %13804 = vmatprep.subr.bf16.mxu1 %v15040_v40  ;;  %v10783_v46 = vmax.f32 %v10779_v12, 0.0  ;;  %13783 = vmatpush3.bf16.msra.mxu0 %v15063_v41  ;;  %v15065_v40 = vld [vmem:[#allocation12 + $0x2e8] sm:$0xff]  }
0x146e   :  { %13784 = vmatprep.subr.bf16.mxu0 %v15064_v47 }
0x146f   :  { %v10785_v38 = vpack.c.bf16 %v10783_v46, %v10782_v59 }
0x1470   :  { %13805 = vmatpush3.bf16.msra.mxu1 %v15041_v58 }
0x1471   :  { %13806 = vmatprep.subr.bf16.mxu1 %v15042_v61  ;;  %13785 = vmatpush3.bf16.msra.mxu0 %v15065_v40 }
0x1472   :  { %13786 = vmatprep.subr.bf16.mxu0 %v15066_v13 }
0x1473   :  { %11235 = vmatmul.mubr.bf16.gmra.mrb[120].mxu1 %v10689_v21 }
0x1474   :  { %13807 = vmatpush3.bf16.msra.mxu1 %v15043_v54  ;;  %11324 = vmatprep.mubr.bf16.mxu1 %v10808_v23 }
0x1475   :  { %13808 = vmatprep.subr.bf16.mxu1 %v15044_v22  ;;  %13787 = vmatpush3.bf16.msra.mxu0 %v15067_v42 }
0x1476   :  { %13788 = vmatprep.subr.bf16.mxu0 %v15068_v50 }
0x1478   :  { %13809 = vmatpush3.bf16.msra.mxu1 %v15045_v51  ;;  %v12726_v51 = vld [vmem:[#allocation11 + $0xb] ss:$0 sm:$0xff] }
0x1479   :  { %13810 = vmatprep.subr.bf16.mxu1 %v15046_v27  ;;  %13789 = vmatpush3.bf16.msra.mxu0 %v15069_v19 }
0x147c   :  { %13811 = vmatpush3.bf16.msra.mxu1 %v15047_v11 }
0x147d   :  { %13812 = vmatprep.subr.bf16.mxu1 %v15048_v52 }
0x1480   :  { %13813 = vmatpush3.bf16.msra.mxu1 %v15049_v62 }
0x1481   :  { %13814 = vmatprep.subr.bf16.mxu1 %v15050_v3 }
0x1484   :  { %13815 = vmatpush3.bf16.msra.mxu1 %v15051_v7 }
0x1485   :  { %13816 = vmatprep.subr.bf16.mxu1 %v15052_v4 }
0x1488   :  { %13817 = vmatpush3.bf16.msra.mxu1 %v15053_v5 }
0x148b   :  { %11325 = vmatmul.mubr.bf16.vlgmr.msra.gmra.mrb[124].mxu1 %v10784_v57 }
0x148c   :  { %11332 = vmatprep.mubr.bf16.mxu1 %v10809_v49 }
0x1493   :  { %11333 = vmatmul.mubr.bf16.gmra.mrb[128].mxu1 %v10785_v38 }
0x151e   :  { %v13724_v10 = vpop.f32.mrb[108].mxu1 }
0x151f   :  { %v13725_v53 = vpop.f32.mrb[109].mxu1 }
0x1520   :  { %v13726_v58 = vadd.f32 %v13725_v53, %v13724_v10  ;;  %v13727_v0 = vpop.f32.mrb[110].mxu1 }
0x1521   :  { %v13728_v56 = vpop.f32.mrb[111].mxu1 }
0x1522   :  { %v13729_v61 = vadd.f32 %v13728_v56, %v13727_v0  ;;  %v10603_v18 = vadd.f32 %v13726_v58, %v15998_v35 }
0x1523   :  { %v14266_v9 = vpop.f32.mrb[144].mxu0 }
0x1524   :  { %v10651_v54 = vpop.f32.mrb[145].mxu0  ;;  %v10606_v23 = vadd.f32 %v13729_v61, %v16002_v29 }
0x1525   :  { %v10652_v21 = vadd.f32 %v10651_v54, %v10603_v18  ;;  %v14267_v22 = vpop.f32.mrb[146].mxu0  ;;  %v15071_v18 = vld [vmem:[#allocation8 + $0xe40] sm:$0xff]   ;;  %v15072_v54 = vld [vmem:[#allocation8 + $0xe88] sm:$0xff]  }
0x1526   :  { %v10654_v27 = vpop.f32.mrb[147].mxu0 }
0x1527   :  { %v10720_v11 = vmul.f32 %v12725_v20, %v10652_v21  ;;  %v10655_v52 = vadd.f32 %v10654_v27, %v10606_v23  ;;  %v15073_v21 = vld [vmem:[#allocation8 + $0xe48] sm:$0xff]   ;;  %v15075_v23 = vld [vmem:[#allocation8 + $0xe90] sm:$0xff]  }
0x1528   :  { %v15076_v27 = vld [vmem:[#allocation8 + $0xe50] sm:$0xff]  }
0x1529   :  { %v10728_v48 = vadd.f32 %v12726_v51, %v10720_v11  ;;  %v10721_v62 = vmul.f32 %v12725_v20, %v10655_v52  ;;  %v13730_v32 = vpop.f32.mrb[112].mxu1  ;;  %v15078_v11 = vld [vmem:[#allocation8 + $0xe98] sm:$0xff]  }
0x152a   :  { %v13731_v3 = vpop.f32.mrb[113].mxu1  ;;  %v15083_v52 = vld [vmem:[#allocation8 + $0xed8] sm:$0xff]  }
0x152b   :  { %v10729_v31 = vadd.f32 %v12726_v51, %v10721_v62  ;;  %v13732_v36 = vadd.f32 %v13731_v3, %v13730_v32  ;;  %v13733_v44 = vpop.f32.mrb[114].mxu1  ;;  %v10732_v1 = vmax.f32 %v10728_v48, 0.0  ;;  %v15079_v48 = vld [vmem:[#allocation8 + $0xe58] sm:$0xff]   ;;  %v15081_v62 = vld [vmem:[#allocation8 + $0xea0] sm:$0xff]  }
0x152c   :  { %v13734_v7 = vpop.f32.mrb[115].mxu1  ;;  %v15086_v32 = vld [vmem:[#allocation8 + $0xee0] sm:$0xff]  }
0x152d   :  { %v10733_v35 = vmax.f32 %v10729_v31, 0.0  ;;  %v10611_v39 = vadd.f32 %v13732_v36, %v16006_v8  ;;  %v13735_v4 = vadd.f32 %v13734_v7, %v13733_v44  ;;  %v15082_v3 = vld [vmem:[#allocation8 + $0xe60] sm:$0xff]   ;;  %v15084_v31 = vld [vmem:[#allocation8 + $0xea8] sm:$0xff]   ;;  %v15087_v7 = vld [vmem:[#allocation8 + $0xeb0] sm:$0xff]  }
0x152e   :  { %v15089_v36 = vld [vmem:[#allocation8 + $0xee8] sm:$0xff]  }
0x152f   :  { %v10736_v34 = vpack.c.bf16 %v10733_v35, %v10732_v1  ;;  %v10660_v33 = vadd.f32 %v14266_v9, %v10611_v39  ;;  %v10614_v29 = vadd.f32 %v13735_v4, %v16010_v63  ;;  %v15070_v9 = vld [vmem:[#allocation8 + $0xe80] sm:$0xff]   ;;  %v15085_v44 = vld [vmem:[#allocation8 + $0xe68] sm:$0xff]   ;;  %v15094_v1 = vld [vmem:[#allocation8 + $0xef0] sm:$0xff]  }
0x1530   :  { %13830 = vmatprep.subr.bf16.mxu0 %v15070_v9  ;;  %v15088_v35 = vld [vmem:[#allocation8 + $0xe70] sm:$0xff]   ;;  %v15092_v39 = vld [vmem:[#allocation8 + $0xeb8] sm:$0xff]  }
0x1531   :  { %v10722_v5 = vmul.f32 %v12725_v20, %v10660_v33  ;;  %v10663_v43 = vadd.f32 %v14267_v22, %v10614_v29  ;;  %11276 = vmatmul.mubr.bf16.vlgmr.msra.gmra.mrb[148].mxu0 %v10736_v34  ;;  %v15077_v22 = vld [vmem:[#allocation8 + $0xec8] sm:$0xff]   ;;  %v15098_v4 = vld [vmem:[#allocation8 + $0xef8] sm:$0xff]  }
0x1532   :  { %11283 = vmatprep.mubr.bf16.mxu0 %v15542_v37  ;;  %13831 = vmatpush3.bf16.msra.mxu0 %v15071_v18  ;;  %v15093_v34 = vld [vmem:[#allocation8 + $0xe78] sm:$0xff]  }
0x1533   :  { %v10723_v26 = vmul.f32 %v12725_v20, %v10663_v43  ;;  %v10730_v45 = vadd.f32 %v12726_v51, %v10722_v5  ;;  %v15074_v20 = vld [vmem:[#allocation8 + $0xec0] sm:$0xff]   ;;  %13832 = vmatprep.subr.bf16.mxu0 %v15072_v54 }
0x1534   :  { %14268 = vmatprep.subr.bf16.mxu1 %v15074_v20 }
0x1535   :  { %v10731_v15 = vadd.f32 %v12726_v51, %v10723_v26  ;;  %v10734_v30 = vmax.f32 %v10730_v45, 0.0  ;;  %14269 = vmatpush3.bf16.msra.mxu1 %v15074_v20  ;;  %v15080_v51 = vld [vmem:[#allocation8 + $0xed0] sm:$0xff]  }
0x1536   :  { %14270 = vmatprep.subr.bf16.mxu1 %v15077_v22  ;;  %13833 = vmatpush3.bf16.msra.mxu0 %v15073_v21 }
0x1537   :  { %v10735_v24 = vmax.f32 %v10731_v15, 0.0  ;;  %13834 = vmatprep.subr.bf16.mxu0 %v15075_v23 }
0x1539   :  { %v10737_v55 = vpack.c.bf16 %v10735_v24, %v10734_v30  ;;  %14271 = vmatpush3.bf16.msra.mxu1 %v15077_v22  ;;  %v12781_v30 = vld [vmem:[#allocation4 + $0x13] ss:$0 sm:$0xff] }
0x153a   :  { %14272 = vmatprep.subr.bf16.mxu1 %v15080_v51  ;;  %13835 = vmatpush3.bf16.msra.mxu0 %v15076_v27 }
0x153b   :  { %11284 = vmatmul.mubr.bf16.gmra.mrb[152].mxu0 %v10737_v55  ;;  %13836 = vmatprep.subr.bf16.mxu0 %v15078_v11 }
0x153d   :  { %14273 = vmatpush3.bf16.msra.mxu1 %v15080_v51 }
0x153e   :  { %v13762_v57 = vpop.f32.mrb[116].mxu1  ;;  %14274 = vmatprep.subr.bf16.mxu1 %v15083_v52  ;;  %13837 = vmatpush3.bf16.msra.mxu0 %v15079_v48 }
0x153f   :  { %v13763_v12 = vpop.f32.mrb[117].mxu1  ;;  %13838 = vmatprep.subr.bf16.mxu0 %v15081_v62 }
0x1540   :  { %v16082_v8 = vadd.f32 %v13763_v12, %v13762_v57  ;;  %v13765_v49 = vpop.f32.mrb[118].mxu1  ;;  %v12782_v57 = vld [vmem:[#allocation6 + $0x13] ss:$0 sm:$0xff] }
0x1541   :  { %v13766_v25 = vpop.f32.mrb[119].mxu1  ;;  %14275 = vmatpush3.bf16.msra.mxu1 %v15083_v52  ;;  %v11390_v52 = vld [vmem:[#allocation2] sm:$0xf] }
0x1542   :  { %v16084_v46 = vadd.f32 %v13766_v25, %v13765_v49  ;;  %14276 = vmatprep.subr.bf16.mxu1 %v15086_v32  ;;  %13839 = vmatpush3.bf16.msra.mxu0 %v15082_v3 }
0x1543   :  { %13840 = vmatprep.subr.bf16.mxu0 %v15084_v31 }
0x1545   :  { %14277 = vmatpush3.bf16.msra.mxu1 %v15086_v32 }
0x1546   :  { %v13768_v63 = vpop.f32.mrb[120].mxu1  ;;  %14278 = vmatprep.subr.bf16.mxu1 %v15089_v36  ;;  %13841 = vmatpush3.bf16.msra.mxu0 %v15085_v44 }
0x1547   :  { %v13769_v59 = vpop.f32.mrb[121].mxu1  ;;  %13842 = vmatprep.subr.bf16.mxu0 %v15087_v7 }
0x1548   :  { %v16086_v38 = vadd.f32 %v13769_v59, %v13768_v63  ;;  %v13771_v37 = vpop.f32.mrb[122].mxu1 }
0x1549   :  { %v13772_v60 = vpop.f32.mrb[123].mxu1  ;;  %14279 = vmatpush3.bf16.msra.mxu1 %v15089_v36 }
0x154a   :  { %v16088_v41 = vadd.f32 %v13772_v60, %v13771_v37  ;;  %14280 = vmatprep.subr.bf16.mxu1 %v15094_v1  ;;  %13843 = vmatpush3.bf16.msra.mxu0 %v15088_v35 }
0x154b   :  { %13844 = vmatprep.subr.bf16.mxu0 %v15092_v39 }
0x154d   :  { %14281 = vmatpush3.bf16.msra.mxu1 %v15094_v1 }
0x154e   :  { %14282 = vmatprep.subr.bf16.mxu1 %v15098_v4  ;;  %13845 = vmatpush3.bf16.msra.mxu0 %v15093_v34 }
0x1551   :  { %14283 = vmatpush3.bf16.msra.mxu1 %v15098_v4 }
0x155e   :  { %v13818_v47 = vpop.f32.mrb[124].mxu1 }
0x155f   :  { %v13819_v40 = vpop.f32.mrb[125].mxu1 }
0x1560   :  { %v16090_v13 = vadd.f32 %v13819_v40, %v13818_v47  ;;  %v13821_v42 = vpop.f32.mrb[126].mxu1 }
0x1561   :  { %v13822_v50 = vpop.f32.mrb[127].mxu1 }
0x1562   :  { %v16092_v19 = vadd.f32 %v13822_v50, %v13821_v42 }
0x1566   :  { %v13824_v10 = vpop.f32.mrb[128].mxu1 }
0x1567   :  { %v13825_v53 = vpop.f32.mrb[129].mxu1 }
0x1568   :  { %v16094_v58 = vadd.f32 %v13825_v53, %v13824_v10  ;;  %v13827_v0 = vpop.f32.mrb[130].mxu1 }
0x1569   :  { %v13828_v56 = vpop.f32.mrb[131].mxu1 }
0x156a   :  { %v16096_v61 = vadd.f32 %v13828_v56, %v13827_v0 }
0x1604   :  { %v13790_v33 = vpop.f32.mrb[148].mxu0 }
0x1605   :  { %v13791_v29 = vpop.f32.mrb[149].mxu0 }
0x1606   :  { %v13792_v5 = vadd.f32 %v13791_v29, %v13790_v33  ;;  %v13793_v43 = vpop.f32.mrb[150].mxu0  ;;  %v11424_v29 = vld [vmem:[#allocation2 + $0x8] sm:$0xe] }
0x1607   :  { %v13794_v26 = vpop.f32.mrb[151].mxu0 }
0x1608   :  { %v11278_v45 = vadd.f32 %v13792_v5, %v16082_v8  ;;  %v13795_v15 = vadd.f32 %v13794_v26, %v13793_v43 }
0x160a   :  { %v11327_v24 = vadd.f32 %v16090_v13, %v11278_v45  ;;  %v11281_v55 = vadd.f32 %v13795_v15, %v16084_v46 }
0x160c   :  { %v11347_v12 = vmul.f32 %v12781_v30, %v11327_v24  ;;  %v11330_v49 = vadd.f32 %v16092_v19, %v11281_v55 }
0x160e   :  { %v11355_v25 = vadd.f32 %v12782_v57, %v11347_v12  ;;  %v11348_v63 = vmul.f32 %v12781_v30, %v11330_v49  ;;  %v13796_v59 = vpop.f32.mrb[152].mxu0 }
0x160f   :  { %v13797_v37 = vpop.f32.mrb[153].mxu0 }
0x1610   :  { %v11359_v60 = vmax.f32 %v11355_v25, 0.0  ;;  %v11356_v47 = vadd.f32 %v12782_v57, %v11348_v63  ;;  %v13798_v40 = vadd.f32 %v13797_v37, %v13796_v59  ;;  %v13799_v42 = vpop.f32.mrb[154].mxu0  ;;  %v11428_v63 = vld [vmem:[#allocation2 + $0x10] sm:$0x3] }
0x1611   :  { %v13800_v50 = vpop.f32.mrb[155].mxu0 }
0x1612   :  { %v12898_v8 = vpack.c.bf16 %v11359_v60, %v11359_v60  ;;  %v11360_v10 = vmax.f32 %v11356_v47, 0.0  ;;  %v11286_v53 = vadd.f32 %v13798_v40, %v16086_v38  ;;  %v13801_v13 = vadd.f32 %v13800_v50, %v13799_v42 }
0x1614   :  { %v11371_v0 = vshrl.u32 %v12898_v8, 16  ;;  %v12899_v46 = vpack.c.bf16 %v11360_v10, %v11360_v10  ;;  %v11335_v56 = vadd.f32 %v16094_v58, %v11286_v53  ;;  %v11289_v19 = vadd.f32 %v13801_v13, %v16088_v41  ;;  %v11394_v41 = vld [vmem:[#allocation2 + $0x8] sm:$0x1] }
0x1615   :  { %v11374_v18 = vshll.u32 %v12898_v8, 16 }
0x1616   :  { %v11373_v9 = vrot.slane %v11371_v0, 7  ;;  %v11379_v54 = vshrl.u32 %v12899_v46, 16  ;;  %v11349_v20 = vmul.f32 %v12781_v30, %v11335_v56  ;;  %v11338_v21 = vadd.f32 %v16096_v61, %v11289_v19 }
0x1617   :  { %v11382_v51 = vshll.u32 %v12899_v46, 16 }
0x1618   :  { %v11376_v22 = vor.u32 %v11374_v18, %v11373_v9  ;;  %v11381_v23 = vrot.slane %v11379_v54, 7  ;;  %v11357_v27 = vadd.f32 %v12782_v57, %v11349_v20  ;;  %v11377_v11 = vrot.slane %v11373_v9, 4 }
0x1619   :  { %v11350_v38 = vmul.f32 %v12781_v30, %v11338_v21 }
0x161a   :  { %v11391_v48 = vsel %vm15464_vm3, %v11376_v22, %v11390_v52  ;;  %v11384_v62 = vor.u32 %v11382_v51, %v11381_v23  ;;  %v11386_v58 = vrot.slane %v11381_v23, 4  ;;  %v11361_v32 = vmax.f32 %v11357_v27, 0.0 }
0x161b   :  { %11392 = vst [vmem:[#allocation2] sm:$0xf] %v11391_v48  ;;  %v11358_v3 = vadd.f32 %v12782_v57, %v11350_v38 }
0x161c   :  { %v11385_v31 = vsel %vm15458_vm15, %v11377_v11, %v11384_v62  ;;  %v11395_v61 = vsel %vm15417_vm6, %v11386_v58, %v11394_v41  ;;  %v12900_v36 = vpack.c.bf16 %v11361_v32, %v11361_v32 }
0x161d   :  { %11393 = vst [vmem:[#allocation2 + $0x4] sm:$0xf] %v11385_v31  ;;  %11396 = vst [vmem:[#allocation2 + $0x8] sm:$0x1] %v11395_v61  ;;  %v11362_v44 = vmax.f32 %v11358_v3, 0.0 }
0x161e   :  { %v11403_v7 = vshrl.u32 %v12900_v36, 16  ;;  %v11406_v1 = vshll.u32 %v12900_v36, 16 }
0x161f   :  { %v12901_v6 = vpack.c.bf16 %v11362_v44, %v11362_v44  ;;  %v15111_v44 = vld [vmem:[%s16147_s0] sm:$0xff] }
0x1620   :  { %v11405_v35 = vrot.slane %v11403_v7, 6  ;;  %v11408_v39 = vrot.slane %v11406_v1, 7 }
0x1621   :  { %v11412_v4 = vshrl.u32 %v12901_v6, 16  ;;  %v11415_v34 = vshll.u32 %v12901_v6, 16 }
0x1622   :  { %v11409_v33 = vor.u32 %v11408_v39, %v11405_v35  ;;  %v15112_v39 = vld [vmem:[%s16147_s0 + $0x8] sm:$0xff] }
0x1623   :  { %v11414_v5 = vrot.slane %v11412_v4, 6  ;;  %v11417_v43 = vrot.slane %v11415_v34, 7 }
0x1624   :  { %v11410_v2 = vrot.slane %v11409_v33, 4  ;;  %v11425_v14 = vsel %vm15470_vm0, %v11409_v33, %v11424_v29  ;;  %v15095_v26 = vld [vmem:[#allocation2] sm:$0xff]   ;;  %v15091_v30 = vld [vmem:[#allocation2 + $0x8] ss:$0 sps:$4 sm:$0x11]  }
0x1625   :  { %11426 = vst [vmem:[#allocation2 + $0x8] sm:$0xe] %v11425_v14  ;;  %v11418_v45 = vor.u32 %v11417_v43, %v11414_v5  ;;  %v15090_v15 = vld [vmem:[#allocation2] sm:$0xfe]   ;;  %v11454_v24 = vshll.u32 %v15095_v26, 16  ;;  %v11477_v49 = vrot.slane %v15091_v30, 1 }
0x1626   :  { %v11476_v12 = vrot.slane %v15090_v15, 1  ;;  %v15096_v25 = vld [vmem:[#allocation2 + $0x8] ss:$0 sps:$4 sm:$0x11]   ;;  %v11452_v59 = vshrl.u32 %v15095_v26, 16  ;;  %v15097_v50 = vld [vmem:[#allocation2] sm:$0xff]  }
0x1627   :  { %v11419_v55 = vsel %vm15476_vm1, %v11410_v2, %v11418_v45  ;;  %v11420_v57 = vrot.slane %v11418_v45, 4  ;;  %v11456_v37 = vrot.slane %v11454_v24, 1  ;;  %v11459_v47 = vshll.u32 %v15096_v25, 16  ;;  %v15113_v26 = vld [vmem:[%s16147_s0 + $0x10] sm:$0xff]  ;;  %v15114_v24 = vld [vmem:[%s16147_s0 + $0x18] sm:$0xff] }
0x1628   :  { %11427 = vst [vmem:[#allocation2 + $0xc] sm:$0xf] %v11419_v55  ;;  %v11478_v60 = vsel %vm281_vm2, %v11476_v12, %v11477_v49 }
0x1629   :  { %v11429_v16 = vsel %vm15490_vm4, %v11420_v57, %v11428_v63  ;;  %14284 = vmatprep.mubr.bf16.mxu1 %v11478_v60  ;;  %v11457_v40 = vor.u32 %v11456_v37, %v11452_v59  ;;  %v11461_v42 = vrot.slane %v11459_v47, 1 }
0x162a   :  { %11430 = vst [vmem:[#allocation2 + $0x10] sm:$0x3] %v11429_v16 }
0x162b   :  { %v11462_v17 = vsel %vm255_vm5, %v11457_v40, %v11461_v42 }
0x162c   :  { %11774 = vmatprep.mubr.bf16.mxu0 %v11462_v17 }
0x162d   :  { %11775 = vmatmul.mubr.bf16.vlgmr.msra.gmra.mrb[156].mxu0 %v15097_v50 }
0x162f   :  { %v15099_v8 = vld [vmem:[#allocation2 + $0x8] sm:$0xfc]  }
0x1630   :  { %v15101_v10 = vld [vmem:[#allocation2 + $0x8] sm:$0xfe]   ;;  %v11538_v46 = vrot.slane %v15099_v8, 2 }
0x1631   :  { %v15100_v53 = vld [vmem:[#allocation2 + $0x10] ss:$0 sps:$4 sm:$0x33]   ;;  %v11509_v0 = vshrl.u32 %v15101_v10, 16  ;;  %v11512_v56 = vshll.u32 %v15101_v10, 16 }
0x1632   :  { %v15102_v13 = vld [vmem:[#allocation2 + $0x10] ss:$0 sps:$4 sm:$0x33]   ;;  %v11539_v28 = vrot.slane %v15100_v53, 2  ;;  %v15103_v22 = vld [vmem:[#allocation2 + $0x8] sm:$0xfe]  }
0x1633   :  { %v11511_v19 = vrot.slane %v11509_v0, 1  ;;  %v11517_v9 = vshrl.u32 %v15102_v13, 16  ;;  %v11520_v18 = vshll.u32 %v15102_v13, 16  ;;  %v15104_v54 = vld [vmem:[#allocation2 + $0x10] ss:$0 sps:$4 sm:$0x11]  }
0x1634   :  { %v11540_v20 = vsel %vm345_vm7, %v11538_v46, %v11539_v28  ;;  %v11514_v21 = vrot.slane %v11512_v56, 2  ;;  %v11493_v27 = vrot.slane %v15104_v54, 1  ;;  %v11492_v38 = vrot.slane %v15103_v22, 1 }
0x1635   :  { %14285 = vmatmul.mubr.bf16.vlgmr.msra.gmra.mrb[132].mxu1 %v11540_v20  ;;  %v11519_v23 = vrot.slane %v11517_v9, 1  ;;  %v11522_v51 = vrot.slane %v11520_v18, 2 }
0x1636   :  { %v11515_v11 = vor.u32 %v11514_v21, %v11511_v19  ;;  %v11494_v62 = vsel %vm281_vm2, %v11492_v38, %v11493_v27 }
0x1637   :  { %v11523_v52 = vor.u32 %v11522_v51, %v11519_v23 }
0x1639   :  { %v11524_v48 = vsel %vm314_vm8, %v11515_v11, %v11523_v52 }
0x163a   :  { %11782 = vmatprep.mubr.bf16.mxu0 %v11524_v48 }
0x163b   :  { %11783 = vmatmul.mubr.bf16.gmra.mrb[160].mxu0 %v11494_v62 }
0x1700   :  { %v13846_v58 = vpop.f32.mrb[156].mxu0 }
0x1701   :  { %v13847_v32 = vpop.f32.mrb[157].mxu0 }
0x1702   :  { %v13848_v41 = vadd.f32 %v13847_v32, %v13846_v58  ;;  %v13849_v3 = vpop.f32.mrb[158].mxu0 }
0x1703   :  { %v13850_v31 = vpop.f32.mrb[159].mxu0 }
0x1704   :  { %v13851_v61 = vadd.f32 %v13850_v31, %v13849_v3  ;;  %v11777_v7 = vadd.f32 %v15111_v44, %v13848_v41 }
0x1706   :  { %v11780_v4 = vadd.f32 %v15112_v39, %v13851_v61 }
0x1708   :  { %v14286_v36 = vpop.f32.mrb[132].mxu1 }
0x1709   :  { %v11825_v1 = vpop.f32.mrb[133].mxu1 }
0x170a   :  { %v11826_v6 = vadd.f32 %v11825_v1, %v11777_v7  ;;  %v14287_v35 = vpop.f32.mrb[134].mxu1 }
0x170b   :  { %v11828_v34 = vpop.f32.mrb[135].mxu1 }
0x170c   :  { %11840 = vst [vmem:[%s16154_s7] sm:$0xff] %v11826_v6  ;;  %v11829_v33 = vadd.f32 %v11828_v34, %v11780_v4 }
0x170e   :  { %11841 = vst [vmem:[%s16154_s7 + $0x8] sm:$0xff] %v11829_v33  ;;  %v13852_v29 = vpop.f32.mrb[160].mxu0 }
0x170f   :  { %v13853_v5 = vpop.f32.mrb[161].mxu0 }
0x1710   :  { %v13854_v43 = vadd.f32 %v13853_v5, %v13852_v29  ;;  %v13855_v2 = vpop.f32.mrb[162].mxu0 }
0x1711   :  { %v13856_v14 = vpop.f32.mrb[163].mxu0 }
0x1712   :  { %v11785_v45 = vadd.f32 %v15113_v26, %v13854_v43  ;;  %v13857_v15 = vadd.f32 %v13856_v14, %v13855_v2 }
0x1714   :  { %v11834_v30 = vadd.f32 %v14286_v36, %v11785_v45  ;;  %v11788_v55 = vadd.f32 %v15114_v24, %v13857_v15 }
0x1716   :  { %11842 = vst [vmem:[%s16154_s7 + $0x10] sm:$0xff] %v11834_v30  ;;  %v11837_v57 = vadd.f32 %v14287_v35, %v11788_v55 }
0x1718   :  { %11843 = vst [vmem:[%s16154_s7 + $0x18] sm:$0xff] %v11837_v57 }
0x1719   :  { %11848 = vsyncpa [#allocation5], 1 }
0x171a   :  { %11849 = vsyncpa [#allocation7], 1 }
0x171b   :  { %11850 = vsyncpa [#allocation10], 1 }
0x171c   :  { %11851 = vsyncpa [#allocation13], 1 }

</bundles_post_ra>
